<compile_context>
chip_gen: v7x
topology: tpu7x:2x2x1
jax: 0.10.0
libtpu: 0.0.40
codegen_flags: <defaults>
</compile_context>

<pallas_src>
import functools

import numpy as np
import jax
import jax.numpy as jnp
from jax.experimental import pallas as pl
from jax.experimental.pallas import tpu as pltpu

NEG_SLOPE = 0.02


def _lrelu(x):
    return jnp.where(x > 0, x, NEG_SLOPE * x)


def _conv_out(h, k, s, p):
    return (h + 2 * p - k) // s + 1


def _round16(n):
    return ((n + 15) // 16) * 16


# ------------------------------ fused kernel ------------------------------ #
def _discx_kernel(p1_ref, w1_ref, w2_ref, w345_ref, b_ref,
                  s2_ref, s3_ref, s45_ref,
                  o_ref,
                  cb2_ref, br2_ref, cb3_ref, br3_ref, cb45_ref, br45_ref,
                  *, n_batch):
    # ---- layer 1: valid 3x3 (im2col patches built once in the wrapper) ----
    a = jnp.dot(p1_ref[...], w1_ref[...], preferred_element_type=jnp.float32)
    a = _lrelu(a + b_ref[0:1, :w1_ref.shape[1]])           # (M1, N*zd1/2) f32

    def conv(a_f32, w_bd, s, cb_ref, br_ref, bias, apply_lrelu):
        """3x3 conv as 2 MXU matmuls; stride/zero-pad live in the 0/1 S matrix."""
        m_in = a_f32.shape[0]
        cout = br_ref.shape[1] // n_batch                   # per-image Cout
        mp = br_ref.shape[0] // 9                           # 16-aligned row block
        # (1) channel mixing: ONE matmul covering all 9 taps and both images.
        cb_ref[...] = jnp.dot(a_f32.astype(jnp.bfloat16), w_bd,
                              preferred_element_type=jnp.float32
                              ).astype(jnp.bfloat16)        # (m_in, N*9*Cout)
        # (2) relayout to tap-major rows / batch-minor lanes (aligned copies).
        if mp != m_in:                                      # keep pad rows finite
            br_ref[...] = jnp.zeros(br_ref.shape, br_ref.dtype)
        for n in range(n_batch):
            base = n * 9 * cout
            for tap in range(9):                            # unrolled at trace time
                br_ref[tap * mp:tap * mp + m_in, n * cout:(n + 1) * cout] = (
                    cb_ref[:, base + tap * cout:base + (tap + 1) * cout])
        # (3) spatial gather (stride + zero padding) as ONE matmul.
        out = jnp.dot(s, br_ref[...], preferred_element_type=jnp.float32) + bias
        return _lrelu(out) if apply_lrelu else out

    # TODO(synk): Dropout2d(0.2) after layers 2/3 is train-time only; this
    # kernel implements eval-mode (identity) semantics.
    a = conv(a, w2_ref[...], s2_ref[...], cb2_ref, br2_ref, b_ref[1:2, :], True)
    a = conv(a, w345_ref[0], s3_ref[...], cb3_ref, br3_ref, b_ref[2:3, :], True)
    a = conv(a, w345_ref[1], s45_ref[...], cb45_ref, br45_ref, b_ref[3:4, :], True)
    a = conv(a, w345_ref[2], s45_ref[...], cb45_ref, br45_ref, b_ref[4:5, :], False)
    o_ref[...] = a.astype(o_ref.dtype)                      # (M3, N*zd1) lane-dense


# --------------------------- SpectralNorm (glue) --------------------------- #
def l2normalize(v, eps=1e-12):
    return v / (jnp.linalg.norm(v) + eps)


def spectral_normalize(w, u):
    """One power iteration, mirroring SpectralNorm._update_u_v.  NOTE: like a
    single PyTorch forward, `u` is not written back here, so only single-call
    (eval) equivalence is claimed; repeated calls would drift from PyTorch's
    in-place-updated `u`."""
    h = w.shape[0]
    wm = w.reshape(h, -1)
    v_new = l2normalize(wm.T @ u)
    u_new = l2normalize(wm @ v_new)
    sigma = u_new @ (wm @ v_new)
    return w / sigma


# ------------------------- static conv-as-matmul prep ---------------------- #
@functools.lru_cache(maxsize=None)
def _gather_cat(H, W, Ho, Wo, stride, pad, m_in_pad):
    """0/1 gather: S[y*Wo+x, tap*m_in_pad + iy*W+ix] = 1 where
    (iy, ix) = (y*stride+dy-pad, x*stride+dx-pad) is the input pixel feeding
    output (y, x) through tap (dy, dx); out-of-bounds taps / pad cols stay 0."""
    s = np.zeros((Ho * Wo, 9 * m_in_pad), np.float32)
    for dy in range(3):
        for dx in range(3):
            tap = dy * 3 + dx
            for y in range(Ho):
                iy = y * stride + dy - pad
                if iy < 0 or iy >= H:
                    continue
                for x in range(Wo):
                    ix = x * stride + dx - pad
                    if 0 <= ix < W:
                        s[y * Wo + x, tap * m_in_pad + iy * W + ix] = 1.0
    return jnp.asarray(s, dtype=jnp.bfloat16)


def _w_all(w):
    """(Cout, Cin, 3, 3) -> (Cin, 9*Cout), column index (dy*3+dx)*Cout + cout."""
    cout, cin = w.shape[0], w.shape[1]
    return jnp.transpose(w, (1, 2, 3, 0)).reshape(cin, 9 * cout)


# ------------------------------- forward pass ------------------------------ #
@jax.jit
def discriminator_x(x, params):
    """x: (N, ch, H, W) NCHW f32 -> (N, zd1, Ho, Wo) NCHW f32 (eval mode)."""
    N, cin, H, W = x.shape
    zd1 = params["c2"]["w"].shape[0]
    c1out = zd1 // 2
    lane = N * zd1

    # spectral-normalize all five weights up front (single XLA block)
    wn = {k: spectral_normalize(p["w"], p["u"]) for k, p in params.items()}

    # layer geometry
    H1, W1 = _conv_out(H, 3, 1, 0), _conv_out(W, 3, 1, 0)
    H2, W2 = _conv_out(H1, 3, 2, 1), _conv_out(W1, 3, 2, 1)
    H3, W3 = _conv_out(H2, 3, 2, 1), _conv_out(W2, 3, 2, 1)   # layers 4/5 keep H3,W3
    M1, M2, M3 = H1 * W1, H2 * W2, H3 * W3
    M1p, M2p, M3p = _round16(M1), _round16(M2), _round16(M3)

    # layer-1 im2col (tiny), batch folded onto the lane axis:
    #   p1[y*W1+x, n*(cin*9) + c*9 + dy*3+dx] = x[n, c, y+dy, x+dx]
    cols = [x[:, :, dy:dy + H1, dx:dx + W1] for dy in range(3) for dx in range(3)]
    p1 = jnp.stack(cols, axis=2)                              # (N, cin, 9, H1, W1)
    p1 = p1.transpose(3, 4, 0, 1, 2).reshape(M1, N * cin * 9).astype(jnp.bfloat16)

    # per-image weights -> block-diagonal over batch (batch lives on lanes)
    eye_n = jnp.eye(N, dtype=jnp.float32)
    w1_bd = jnp.kron(eye_n, wn["c1"].reshape(c1out, cin * 9).T).astype(jnp.bfloat16)
    w2_bd = jnp.kron(eye_n, _w_all(wn["c2"])).astype(jnp.bfloat16)
    w345_bd = jnp.stack([jnp.kron(eye_n, _w_all(wn[k])).astype(jnp.bfloat16)
                         for k in ("c3", "c4", "c5")])        # (3, N*zd1, N*9*zd1)

    def tile_bias(b):
        bt = jnp.tile(b.astype(jnp.float32), N)
        return jnp.pad(bt, (0, lane - bt.shape[0]))
    biases = jnp.stack([tile_bias(params[k]["b"])
                        for k in ("c1", "c2", "c3", "c4", "c5")])   # (5, N*zd1)

    # static 0/1 spatial-gather matrices (stride + zero padding), per image
    s2 = _gather_cat(H1, W1, H2, W2, 2, 1, M1p)               # (M2, 9*M1p)
    s3 = _gather_cat(H2, W2, H3, W3, 2, 1, M2p)               # (M3, 9*M2p)
    s45 = _gather_cat(H3, W3, H3, W3, 1, 1, M3p)              # (M3, 9*M3p)

    out = pl.pallas_call(
        functools.partial(_discx_kernel, n_batch=N),
        out_shape=jax.ShapeDtypeStruct((M3, lane), jnp.float32),
        scratch_shapes=[
            pltpu.VMEM((M1, N * 9 * zd1), jnp.bfloat16),      # cb2: channel-matmul out
            pltpu.VMEM((9 * M1p, lane), jnp.bfloat16),        # br2: tap-major relayout
            pltpu.VMEM((M2, N * 9 * zd1), jnp.bfloat16),      # cb3
            pltpu.VMEM((9 * M2p, lane), jnp.bfloat16),        # br3
            pltpu.VMEM((M3, N * 9 * zd1), jnp.bfloat16),      # cb45 (layers 4 & 5)
            pltpu.VMEM((9 * M3p, lane), jnp.bfloat16),        # br45 (layers 4 & 5)
        ],
    )(p1, w1_bd, w2_bd, w345_bd, biases, s2, s3, s45)

    # rows are y*W3+x, lanes are n*zd1+c  ->  NCHW
    return out.reshape(H3, W3, N, zd1).transpose(2, 3, 0, 1)


# ------------------------- pure-JAX reference (check) ---------------------- #
def _conv_ref(x, w, b, stride, pad):
    out = jax.lax.conv_general_dilated(
        x, w, window_strides=(stride, stride),
        padding=((pad, pad), (pad, pad)),
        dimension_numbers=("NCHW", "OIHW", "NCHW"))
    return out + b.reshape(1, -1, 1, 1)


@jax.jit
def discriminator_x_ref(x, params):
    def layer(h, p, s, pad, lrelu):
        w = spectral_normalize(p["w"], p["u"])
        h = _conv_ref(h, w, p["b"], s, pad)
        return _lrelu(h) if lrelu else h
    h = layer(x, params["c1"], 1, 0, True)
    h = layer(h, params["c2"], 2, 1, True)
    h = layer(h, params["c3"], 2, 1, True)
    h = layer(h, params["c4"], 1, 1, True)
    h = layer(h, params["c5"], 1, 1, False)
    return h


# ------------------------------- parameters -------------------------------- #
def init_conv(key, cout, cin, k=3):
    kw_, kb, ku, kv = jax.random.split(key, 4)
    fan_in = cin * k * k
    bound = 1.0 / np.sqrt(fan_in)
    w = jax.random.uniform(kw_, (cout, cin, k, k), minval=-bound, maxval=bound,
                           dtype=jnp.float32)
    b = jax.random.uniform(kb, (cout,), minval=-bound, maxval=bound,
                           dtype=jnp.float32)
    u = l2normalize(jax.random.normal(ku, (cout,), dtype=jnp.float32))
    v = l2normalize(jax.random.normal(kv, (cin * k * k,), dtype=jnp.float32))
    return dict(w=w, b=b, u=u, v=v)


def init_params(key, ch=1, zd1=64):
    ks = jax.random.split(key, 5)
    return dict(
        c1=init_conv(ks[0], zd1 // 2, ch),
        c2=init_conv(ks[1], zd1, zd1 // 2),
        c3=init_conv(ks[2], zd1, zd1),
        c4=init_conv(ks[3], zd1, zd1),
        c5=init_conv(ks[4], zd1, zd1),
    )


if __name__ == "__main__":
    key = jax.random.PRNGKey(0)
    kx, kp = jax.random.split(key)
    # batch=2, ch=1 (module default), spatial 16x16
    x = jax.random.normal(kx, (2, 1, 16, 16), dtype=jnp.float32)
    params = init_params(kp, ch=1, zd1=64)

    out = jax.block_until_ready(discriminator_x(x, params))
    assert out.shape == (2, 64, 4, 4), out.shape

    # Tolerance documented: MXU operands are bf16 (~0.4% per-element rounding)
    # with f32 accumulation, compounded over 5 layers -> well under 5e-2.
    ref = jax.block_until_ready(discriminator_x_ref(x, params))
    err = float(jnp.max(jnp.abs(out - ref)) / (jnp.max(jnp.abs(ref)) + 1e-6))
    assert err < 5e-2, f"mismatch vs reference: rel-max err {err}"

    print("KERNEL_OK")
</pallas_src>

<mosaic_0001>
module attributes {stable_mosaic.version = 11 : i64} {
  func.func @_discx_kernel(%arg0: memref<196x18xbf16, #tpu.memory_space<vmem>>, %arg1: memref<18x64xbf16, #tpu.memory_space<vmem>>, %arg2: memref<64x1152xbf16, #tpu.memory_space<vmem>>, %arg3: memref<3x128x1152xbf16, #tpu.memory_space<vmem>>, %arg4: memref<5x128xf32, #tpu.memory_space<vmem>>, %arg5: memref<49x1872xbf16, #tpu.memory_space<vmem>>, %arg6: memref<16x576xbf16, #tpu.memory_space<vmem>>, %arg7: memref<16x144xbf16, #tpu.memory_space<vmem>>, %arg8: memref<16x128xf32, #tpu.memory_space<vmem>>, %arg9: memref<196x1152xbf16, #tpu.memory_space<vmem>>, %arg10: memref<1872x128xbf16, #tpu.memory_space<vmem>>, %arg11: memref<49x1152xbf16, #tpu.memory_space<vmem>>, %arg12: memref<576x128xbf16, #tpu.memory_space<vmem>>, %arg13: memref<16x1152xbf16, #tpu.memory_space<vmem>>, %arg14: memref<144x128xbf16, #tpu.memory_space<vmem>>) attributes {dimension_semantics = [], scalar_prefetch = 0 : i64, scratch_operands = 6 : i64, tpu.core_type = #tpu.core_type<tc>} {
    %c0 = arith.constant 0 : index
    %c0_0 = arith.constant 0 : index
    %0 = vector.load %arg0[%c0, %c0_0] : memref<196x18xbf16, #tpu.memory_space<vmem>>, vector<196x18xbf16>
    %c0_1 = arith.constant 0 : index
    %c0_2 = arith.constant 0 : index
    %1 = vector.load %arg1[%c0_1, %c0_2] : memref<18x64xbf16, #tpu.memory_space<vmem>>, vector<18x64xbf16>
    %cst = arith.constant dense<0.000000e+00> : vector<196x64xf32>
    %2 = tpu.matmul %0, %1, %cst {dimension_numbers = #tpu.dot_dimension_numbers<[1], [0], [0], [1], [0, 0, 1, 1], [], []>} : vector<196x18xbf16>, vector<18x64xbf16>, vector<196x64xf32> -> vector<196x64xf32>
    %c0_3 = arith.constant 0 : index
    %c0_4 = arith.constant 0 : index
    %3 = vector.load %arg4[%c0_3, %c0_4] : memref<5x128xf32, #tpu.memory_space<vmem>>, vector<1x64xf32>
    %4 = vector.broadcast %3 : vector<1x64xf32> to vector<196x64xf32>
    %5 = arith.addf %2, %4 : vector<196x64xf32>
    %cst_5 = arith.constant 0.000000e+00 : f32
    %6 = vector.broadcast %cst_5 : f32 to vector<196x64xf32>
    %7 = arith.cmpf ogt, %5, %6 : vector<196x64xf32>
    %cst_6 = arith.constant 2.000000e-02 : f32
    %8 = vector.broadcast %cst_6 : f32 to vector<196x64xf32>
    %9 = arith.mulf %8, %5 : vector<196x64xf32>
    %10 = arith.select %7, %5, %9 : vector<196x64xi1>, vector<196x64xf32>
    %c0_7 = arith.constant 0 : index
    %c0_8 = arith.constant 0 : index
    %11 = vector.load %arg2[%c0_7, %c0_8] : memref<64x1152xbf16, #tpu.memory_space<vmem>>, vector<64x1152xbf16>
    %c0_9 = arith.constant 0 : index
    %c0_10 = arith.constant 0 : index
    %12 = vector.load %arg5[%c0_9, %c0_10] : memref<49x1872xbf16, #tpu.memory_space<vmem>>, vector<49x1872xbf16>
    %c1 = arith.constant 1 : index
    %c0_11 = arith.constant 0 : index
    %13 = vector.load %arg4[%c1, %c0_11] : memref<5x128xf32, #tpu.memory_space<vmem>>, vector<1x128xf32>
    %14 = arith.truncf %10 : vector<196x64xf32> to vector<196x64xbf16>
    %cst_12 = arith.constant dense<0.000000e+00> : vector<196x1152xf32>
    %15 = tpu.matmul %14, %11, %cst_12 {dimension_numbers = #tpu.dot_dimension_numbers<[1], [0], [0], [1], [0, 0, 1, 1], [], []>} : vector<196x64xbf16>, vector<64x1152xbf16>, vector<196x1152xf32> -> vector<196x1152xf32>
    %16 = arith.truncf %15 : vector<196x1152xf32> to vector<196x1152xbf16>
    %c0_13 = arith.constant 0 : index
    %c0_14 = arith.constant 0 : index
    %17 = vector.load %arg9[%c0_13, %c0_14] : memref<196x1152xbf16, #tpu.memory_space<vmem>>, vector<196x1152xbf16>
    tpu.vector_store %arg9[%c0_13, %c0_14], %16 {strides = array<i32>} : memref<196x1152xbf16, #tpu.memory_space<vmem>>, vector<196x1152xbf16>,
    %cst_15 = arith.constant 0.000000e+00 : bf16
    %18 = vector.broadcast %cst_15 : bf16 to vector<1872x128xbf16>
    %c0_16 = arith.constant 0 : index
    %c0_17 = arith.constant 0 : index
    %19 = vector.load %arg10[%c0_16, %c0_17] : memref<1872x128xbf16, #tpu.memory_space<vmem>>, vector<1872x128xbf16>
    tpu.vector_store %arg10[%c0_16, %c0_17], %18 {strides = array<i32>} : memref<1872x128xbf16, #tpu.memory_space<vmem>>, vector<1872x128xbf16>,
    %c0_18 = arith.constant 0 : index
    %c0_19 = arith.constant 0 : index
    %20 = vector.load %arg9[%c0_18, %c0_19] : memref<196x1152xbf16, #tpu.memory_space<vmem>>, vector<196x64xbf16>
    %c0_20 = arith.constant 0 : index
    %c0_21 = arith.constant 0 : index
    %21 = vector.load %arg10[%c0_20, %c0_21] : memref<1872x128xbf16, #tpu.memory_space<vmem>>, vector<196x64xbf16>
    tpu.vector_store %arg10[%c0_20, %c0_21], %20 {strides = array<i32>} : memref<1872x128xbf16, #tpu.memory_space<vmem>>, vector<196x64xbf16>,
    %c0_22 = arith.constant 0 : index
    %c64 = arith.constant 64 : index
    %22 = vector.load %arg9[%c0_22, %c64] : memref<196x1152xbf16, #tpu.memory_space<vmem>>, vector<196x64xbf16>
    %c208 = arith.constant 208 : index
    %c0_23 = arith.constant 0 : index
    %23 = vector.load %arg10[%c208, %c0_23] : memref<1872x128xbf16, #tpu.memory_space<vmem>>, vector<196x64xbf16>
    tpu.vector_store %arg10[%c208, %c0_23], %22 {strides = array<i32>} : memref<1872x128xbf16, #tpu.memory_space<vmem>>, vector<196x64xbf16>,
    %c0_24 = arith.constant 0 : index
    %c128 = arith.constant 128 : index
    %24 = vector.load %arg9[%c0_24, %c128] : memref<196x1152xbf16, #tpu.memory_space<vmem>>, vector<196x64xbf16>
    %c416 = arith.constant 416 : index
    %c0_25 = arith.constant 0 : index
    %25 = vector.load %arg10[%c416, %c0_25] : memref<1872x128xbf16, #tpu.memory_space<vmem>>, vector<196x64xbf16>
    tpu.vector_store %arg10[%c416, %c0_25], %24 {strides = array<i32>} : memref<1872x128xbf16, #tpu.memory_space<vmem>>, vector<196x64xbf16>,
    %c0_26 = arith.constant 0 : index
    %c192 = arith.constant 192 : index
    %26 = vector.load %arg9[%c0_26, %c192] : memref<196x1152xbf16, #tpu.memory_space<vmem>>, vector<196x64xbf16>
    %c624 = arith.constant 624 : index
    %c0_27 = arith.constant 0 : index
    %27 = vector.load %arg10[%c624, %c0_27] : memref<1872x128xbf16, #tpu.memory_space<vmem>>, vector<196x64xbf16>
    tpu.vector_store %arg10[%c624, %c0_27], %26 {strides = array<i32>} : memref<1872x128xbf16, #tpu.memory_space<vmem>>, vector<196x64xbf16>,
    %c0_28 = arith.constant 0 : index
    %c256 = arith.constant 256 : index
    %28 = vector.load %arg9[%c0_28, %c256] : memref<196x1152xbf16, #tpu.memory_space<vmem>>, vector<196x64xbf16>
    %c832 = arith.constant 832 : index
    %c0_29 = arith.constant 0 : index
    %29 = vector.load %arg10[%c832, %c0_29] : memref<1872x128xbf16, #tpu.memory_space<vmem>>, vector<196x64xbf16>
    tpu.vector_store %arg10[%c832, %c0_29], %28 {strides = array<i32>} : memref<1872x128xbf16, #tpu.memory_space<vmem>>, vector<196x64xbf16>,
    %c0_30 = arith.constant 0 : index
    %c320 = arith.constant 320 : index
    %30 = vector.load %arg9[%c0_30, %c320] : memref<196x1152xbf16, #tpu.memory_space<vmem>>, vector<196x64xbf16>
    %c1040 = arith.constant 1040 : index
    %c0_31 = arith.constant 0 : index
    %31 = vector.load %arg10[%c1040, %c0_31] : memref<1872x128xbf16, #tpu.memory_space<vmem>>, vector<196x64xbf16>
    tpu.vector_store %arg10[%c1040, %c0_31], %30 {strides = array<i32>} : memref<1872x128xbf16, #tpu.memory_space<vmem>>, vector<196x64xbf16>,
    %c0_32 = arith.constant 0 : index
    %c384 = arith.constant 384 : index
    %32 = vector.load %arg9[%c0_32, %c384] : memref<196x1152xbf16, #tpu.memory_space<vmem>>, vector<196x64xbf16>
    %c1248 = arith.constant 1248 : index
    %c0_33 = arith.constant 0 : index
    %33 = vector.load %arg10[%c1248, %c0_33] : memref<1872x128xbf16, #tpu.memory_space<vmem>>, vector<196x64xbf16>
    tpu.vector_store %arg10[%c1248, %c0_33], %32 {strides = array<i32>} : memref<1872x128xbf16, #tpu.memory_space<vmem>>, vector<196x64xbf16>,
    %c0_34 = arith.constant 0 : index
    %c448 = arith.constant 448 : index
    %34 = vector.load %arg9[%c0_34, %c448] : memref<196x1152xbf16, #tpu.memory_space<vmem>>, vector<196x64xbf16>
    %c1456 = arith.constant 1456 : index
    %c0_35 = arith.constant 0 : index
    %35 = vector.load %arg10[%c1456, %c0_35] : memref<1872x128xbf16, #tpu.memory_space<vmem>>, vector<196x64xbf16>
    tpu.vector_store %arg10[%c1456, %c0_35], %34 {strides = array<i32>} : memref<1872x128xbf16, #tpu.memory_space<vmem>>, vector<196x64xbf16>,
    %c0_36 = arith.constant 0 : index
    %c512 = arith.constant 512 : index
    %36 = vector.load %arg9[%c0_36, %c512] : memref<196x1152xbf16, #tpu.memory_space<vmem>>, vector<196x64xbf16>
    %c1664 = arith.constant 1664 : index
    %c0_37 = arith.constant 0 : index
    %37 = vector.load %arg10[%c1664, %c0_37] : memref<1872x128xbf16, #tpu.memory_space<vmem>>, vector<196x64xbf16>
    tpu.vector_store %arg10[%c1664, %c0_37], %36 {strides = array<i32>} : memref<1872x128xbf16, #tpu.memory_space<vmem>>, vector<196x64xbf16>,
    %c0_38 = arith.constant 0 : index
    %c576 = arith.constant 576 : index
    %38 = vector.load %arg9[%c0_38, %c576] : memref<196x1152xbf16, #tpu.memory_space<vmem>>, vector<196x64xbf16>
    %c0_39 = arith.constant 0 : index
    %c64_40 = arith.constant 64 : index
    %39 = vector.load %arg10[%c0_39, %c64_40] : memref<1872x128xbf16, #tpu.memory_space<vmem>>, vector<196x64xbf16>
    tpu.vector_store %arg10[%c0_39, %c64_40], %38 {strides = array<i32>} : memref<1872x128xbf16, #tpu.memory_space<vmem>>, vector<196x64xbf16>,
    %c0_41 = arith.constant 0 : index
    %c640 = arith.constant 640 : index
    %40 = vector.load %arg9[%c0_41, %c640] : memref<196x1152xbf16, #tpu.memory_space<vmem>>, vector<196x64xbf16>
    %c208_42 = arith.constant 208 : index
    %c64_43 = arith.constant 64 : index
    %41 = vector.load %arg10[%c208_42, %c64_43] : memref<1872x128xbf16, #tpu.memory_space<vmem>>, vector<196x64xbf16>
    tpu.vector_store %arg10[%c208_42, %c64_43], %40 {strides = array<i32>} : memref<1872x128xbf16, #tpu.memory_space<vmem>>, vector<196x64xbf16>,
    %c0_44 = arith.constant 0 : index
    %c704 = arith.constant 704 : index
    %42 = vector.load %arg9[%c0_44, %c704] : memref<196x1152xbf16, #tpu.memory_space<vmem>>, vector<196x64xbf16>
    %c416_45 = arith.constant 416 : index
    %c64_46 = arith.constant 64 : index
    %43 = vector.load %arg10[%c416_45, %c64_46] : memref<1872x128xbf16, #tpu.memory_space<vmem>>, vector<196x64xbf16>
    tpu.vector_store %arg10[%c416_45, %c64_46], %42 {strides = array<i32>} : memref<1872x128xbf16, #tpu.memory_space<vmem>>, vector<196x64xbf16>,
    %c0_47 = arith.constant 0 : index
    %c768 = arith.constant 768 : index
    %44 = vector.load %arg9[%c0_47, %c768] : memref<196x1152xbf16, #tpu.memory_space<vmem>>, vector<196x64xbf16>
    %c624_48 = arith.constant 624 : index
    %c64_49 = arith.constant 64 : index
    %45 = vector.load %arg10[%c624_48, %c64_49] : memref<1872x128xbf16, #tpu.memory_space<vmem>>, vector<196x64xbf16>
    tpu.vector_store %arg10[%c624_48, %c64_49], %44 {strides = array<i32>} : memref<1872x128xbf16, #tpu.memory_space<vmem>>, vector<196x64xbf16>,
    %c0_50 = arith.constant 0 : index
    %c832_51 = arith.constant 832 : index
    %46 = vector.load %arg9[%c0_50, %c832_51] : memref<196x1152xbf16, #tpu.memory_space<vmem>>, vector<196x64xbf16>
    %c832_52 = arith.constant 832 : index
    %c64_53 = arith.constant 64 : index
    %47 = vector.load %arg10[%c832_52, %c64_53] : memref<1872x128xbf16, #tpu.memory_space<vmem>>, vector<196x64xbf16>
    tpu.vector_store %arg10[%c832_52, %c64_53], %46 {strides = array<i32>} : memref<1872x128xbf16, #tpu.memory_space<vmem>>, vector<196x64xbf16>,
    %c0_54 = arith.constant 0 : index
    %c896 = arith.constant 896 : index
    %48 = vector.load %arg9[%c0_54, %c896] : memref<196x1152xbf16, #tpu.memory_space<vmem>>, vector<196x64xbf16>
    %c1040_55 = arith.constant 1040 : index
    %c64_56 = arith.constant 64 : index
    %49 = vector.load %arg10[%c1040_55, %c64_56] : memref<1872x128xbf16, #tpu.memory_space<vmem>>, vector<196x64xbf16>
    tpu.vector_store %arg10[%c1040_55, %c64_56], %48 {strides = array<i32>} : memref<1872x128xbf16, #tpu.memory_space<vmem>>, vector<196x64xbf16>,
    %c0_57 = arith.constant 0 : index
    %c960 = arith.constant 960 : index
    %50 = vector.load %arg9[%c0_57, %c960] : memref<196x1152xbf16, #tpu.memory_space<vmem>>, vector<196x64xbf16>
    %c1248_58 = arith.constant 1248 : index
    %c64_59 = arith.constant 64 : index
    %51 = vector.load %arg10[%c1248_58, %c64_59] : memref<1872x128xbf16, #tpu.memory_space<vmem>>, vector<196x64xbf16>
    tpu.vector_store %arg10[%c1248_58, %c64_59], %50 {strides = array<i32>} : memref<1872x128xbf16, #tpu.memory_space<vmem>>, vector<196x64xbf16>,
    %c0_60 = arith.constant 0 : index
    %c1024 = arith.constant 1024 : index
    %52 = vector.load %arg9[%c0_60, %c1024] : memref<196x1152xbf16, #tpu.memory_space<vmem>>, vector<196x64xbf16>
    %c1456_61 = arith.constant 1456 : index
    %c64_62 = arith.constant 64 : index
    %53 = vector.load %arg10[%c1456_61, %c64_62] : memref<1872x128xbf16, #tpu.memory_space<vmem>>, vector<196x64xbf16>
    tpu.vector_store %arg10[%c1456_61, %c64_62], %52 {strides = array<i32>} : memref<1872x128xbf16, #tpu.memory_space<vmem>>, vector<196x64xbf16>,
    %c0_63 = arith.constant 0 : index
    %c1088 = arith.constant 1088 : index
    %54 = vector.load %arg9[%c0_63, %c1088] : memref<196x1152xbf16, #tpu.memory_space<vmem>>, vector<196x64xbf16>
    %c1664_64 = arith.constant 1664 : index
    %c64_65 = arith.constant 64 : index
    %55 = vector.load %arg10[%c1664_64, %c64_65] : memref<1872x128xbf16, #tpu.memory_space<vmem>>, vector<196x64xbf16>
    tpu.vector_store %arg10[%c1664_64, %c64_65], %54 {strides = array<i32>} : memref<1872x128xbf16, #tpu.memory_space<vmem>>, vector<196x64xbf16>,
    %c0_66 = arith.constant 0 : index
    %c0_67 = arith.constant 0 : index
    %56 = vector.load %arg10[%c0_66, %c0_67] : memref<1872x128xbf16, #tpu.memory_space<vmem>>, vector<1872x128xbf16>
    %cst_68 = arith.constant dense<0.000000e+00> : vector<49x128xf32>
    %57 = tpu.matmul %12, %56, %cst_68 {dimension_numbers = #tpu.dot_dimension_numbers<[1], [0], [0], [1], [0, 0, 1, 1], [], []>} : vector<49x1872xbf16>, vector<1872x128xbf16>, vector<49x128xf32> -> vector<49x128xf32>
    %58 = vector.broadcast %13 : vector<1x128xf32> to vector<49x128xf32>
    %59 = arith.addf %57, %58 : vector<49x128xf32>
    %cst_69 = arith.constant 0.000000e+00 : f32
    %60 = vector.broadcast %cst_69 : f32 to vector<49x128xf32>
    %61 = arith.cmpf ogt, %59, %60 : vector<49x128xf32>
    %cst_70 = arith.constant 2.000000e-02 : f32
    %62 = vector.broadcast %cst_70 : f32 to vector<49x128xf32>
    %63 = arith.mulf %62, %59 : vector<49x128xf32>
    %64 = arith.select %61, %59, %63 : vector<49x128xi1>, vector<49x128xf32>
    %c0_71 = arith.constant 0 : index
    %c0_72 = arith.constant 0 : index
    %c0_73 = arith.constant 0 : index
    %65 = vector.load %arg3[%c0_71, %c0_72, %c0_73] : memref<3x128x1152xbf16, #tpu.memory_space<vmem>>, vector<1x128x1152xbf16>
    %66 = vector.shape_cast %65 : vector<1x128x1152xbf16> to vector<128x1152xbf16>
    %c0_74 = arith.constant 0 : index
    %c0_75 = arith.constant 0 : index
    %67 = vector.load %arg6[%c0_74, %c0_75] : memref<16x576xbf16, #tpu.memory_space<vmem>>, vector<16x576xbf16>
    %c2 = arith.constant 2 : index
    %c0_76 = arith.constant 0 : index
    %68 = vector.load %arg4[%c2, %c0_76] : memref<5x128xf32, #tpu.memory_space<vmem>>, vector<1x128xf32>
    %69 = arith.truncf %64 : vector<49x128xf32> to vector<49x128xbf16>
    %cst_77 = arith.constant dense<0.000000e+00> : vector<49x1152xf32>
    %70 = tpu.matmul %69, %66, %cst_77 {dimension_numbers = #tpu.dot_dimension_numbers<[1], [0], [0], [1], [0, 0, 1, 1], [], []>} : vector<49x128xbf16>, vector<128x1152xbf16>, vector<49x1152xf32> -> vector<49x1152xf32>
    %71 = arith.truncf %70 : vector<49x1152xf32> to vector<49x1152xbf16>
    %c0_78 = arith.constant 0 : index
    %c0_79 = arith.constant 0 : index
    %72 = vector.load %arg11[%c0_78, %c0_79] : memref<49x1152xbf16, #tpu.memory_space<vmem>>, vector<49x1152xbf16>
    tpu.vector_store %arg11[%c0_78, %c0_79], %71 {strides = array<i32>} : memref<49x1152xbf16, #tpu.memory_space<vmem>>, vector<49x1152xbf16>,
    %cst_80 = arith.constant 0.000000e+00 : bf16
    %73 = vector.broadcast %cst_80 : bf16 to vector<576x128xbf16>
    %c0_81 = arith.constant 0 : index
    %c0_82 = arith.constant 0 : index
    %74 = vector.load %arg12[%c0_81, %c0_82] : memref<576x128xbf16, #tpu.memory_space<vmem>>, vector<576x128xbf16>
    tpu.vector_store %arg12[%c0_81, %c0_82], %73 {strides = array<i32>} : memref<576x128xbf16, #tpu.memory_space<vmem>>, vector<576x128xbf16>,
    %c0_83 = arith.constant 0 : index
    %c0_84 = arith.constant 0 : index
    %75 = vector.load %arg11[%c0_83, %c0_84] : memref<49x1152xbf16, #tpu.memory_space<vmem>>, vector<49x64xbf16>
    %c0_85 = arith.constant 0 : index
    %c0_86 = arith.constant 0 : index
    %76 = vector.load %arg12[%c0_85, %c0_86] : memref<576x128xbf16, #tpu.memory_space<vmem>>, vector<49x64xbf16>
    tpu.vector_store %arg12[%c0_85, %c0_86], %75 {strides = array<i32>} : memref<576x128xbf16, #tpu.memory_space<vmem>>, vector<49x64xbf16>,
    %c0_87 = arith.constant 0 : index
    %c64_88 = arith.constant 64 : index
    %77 = vector.load %arg11[%c0_87, %c64_88] : memref<49x1152xbf16, #tpu.memory_space<vmem>>, vector<49x64xbf16>
    %c64_89 = arith.constant 64 : index
    %c0_90 = arith.constant 0 : index
    %78 = vector.load %arg12[%c64_89, %c0_90] : memref<576x128xbf16, #tpu.memory_space<vmem>>, vector<49x64xbf16>
    tpu.vector_store %arg12[%c64_89, %c0_90], %77 {strides = array<i32>} : memref<576x128xbf16, #tpu.memory_space<vmem>>, vector<49x64xbf16>,
    %c0_91 = arith.constant 0 : index
    %c128_92 = arith.constant 128 : index
    %79 = vector.load %arg11[%c0_91, %c128_92] : memref<49x1152xbf16, #tpu.memory_space<vmem>>, vector<49x64xbf16>
    %c128_93 = arith.constant 128 : index
    %c0_94 = arith.constant 0 : index
    %80 = vector.load %arg12[%c128_93, %c0_94] : memref<576x128xbf16, #tpu.memory_space<vmem>>, vector<49x64xbf16>
    tpu.vector_store %arg12[%c128_93, %c0_94], %79 {strides = array<i32>} : memref<576x128xbf16, #tpu.memory_space<vmem>>, vector<49x64xbf16>,
    %c0_95 = arith.constant 0 : index
    %c192_96 = arith.constant 192 : index
    %81 = vector.load %arg11[%c0_95, %c192_96] : memref<49x1152xbf16, #tpu.memory_space<vmem>>, vector<49x64xbf16>
    %c192_97 = arith.constant 192 : index
    %c0_98 = arith.constant 0 : index
    %82 = vector.load %arg12[%c192_97, %c0_98] : memref<576x128xbf16, #tpu.memory_space<vmem>>, vector<49x64xbf16>
    tpu.vector_store %arg12[%c192_97, %c0_98], %81 {strides = array<i32>} : memref<576x128xbf16, #tpu.memory_space<vmem>>, vector<49x64xbf16>,
    %c0_99 = arith.constant 0 : index
    %c256_100 = arith.constant 256 : index
    %83 = vector.load %arg11[%c0_99, %c256_100] : memref<49x1152xbf16, #tpu.memory_space<vmem>>, vector<49x64xbf16>
    %c256_101 = arith.constant 256 : index
    %c0_102 = arith.constant 0 : index
    %84 = vector.load %arg12[%c256_101, %c0_102] : memref<576x128xbf16, #tpu.memory_space<vmem>>, vector<49x64xbf16>
    tpu.vector_store %arg12[%c256_101, %c0_102], %83 {strides = array<i32>} : memref<576x128xbf16, #tpu.memory_space<vmem>>, vector<49x64xbf16>,
    %c0_103 = arith.constant 0 : index
    %c320_104 = arith.constant 320 : index
    %85 = vector.load %arg11[%c0_103, %c320_104] : memref<49x1152xbf16, #tpu.memory_space<vmem>>, vector<49x64xbf16>
    %c320_105 = arith.constant 320 : index
    %c0_106 = arith.constant 0 : index
    %86 = vector.load %arg12[%c320_105, %c0_106] : memref<576x128xbf16, #tpu.memory_space<vmem>>, vector<49x64xbf16>
    tpu.vector_store %arg12[%c320_105, %c0_106], %85 {strides = array<i32>} : memref<576x128xbf16, #tpu.memory_space<vmem>>, vector<49x64xbf16>,
    %c0_107 = arith.constant 0 : index
    %c384_108 = arith.constant 384 : index
    %87 = vector.load %arg11[%c0_107, %c384_108] : memref<49x1152xbf16, #tpu.memory_space<vmem>>, vector<49x64xbf16>
    %c384_109 = arith.constant 384 : index
    %c0_110 = arith.constant 0 : index
    %88 = vector.load %arg12[%c384_109, %c0_110] : memref<576x128xbf16, #tpu.memory_space<vmem>>, vector<49x64xbf16>
    tpu.vector_store %arg12[%c384_109, %c0_110], %87 {strides = array<i32>} : memref<576x128xbf16, #tpu.memory_space<vmem>>, vector<49x64xbf16>,
    %c0_111 = arith.constant 0 : index
    %c448_112 = arith.constant 448 : index
    %89 = vector.load %arg11[%c0_111, %c448_112] : memref<49x1152xbf16, #tpu.memory_space<vmem>>, vector<49x64xbf16>
    %c448_113 = arith.constant 448 : index
    %c0_114 = arith.constant 0 : index
    %90 = vector.load %arg12[%c448_113, %c0_114] : memref<576x128xbf16, #tpu.memory_space<vmem>>, vector<49x64xbf16>
    tpu.vector_store %arg12[%c448_113, %c0_114], %89 {strides = array<i32>} : memref<576x128xbf16, #tpu.memory_space<vmem>>, vector<49x64xbf16>,
    %c0_115 = arith.constant 0 : index
    %c512_116 = arith.constant 512 : index
    %91 = vector.load %arg11[%c0_115, %c512_116] : memref<49x1152xbf16, #tpu.memory_space<vmem>>, vector<49x64xbf16>
    %c512_117 = arith.constant 512 : index
    %c0_118 = arith.constant 0 : index
    %92 = vector.load %arg12[%c512_117, %c0_118] : memref<576x128xbf16, #tpu.memory_space<vmem>>, vector<49x64xbf16>
    tpu.vector_store %arg12[%c512_117, %c0_118], %91 {strides = array<i32>} : memref<576x128xbf16, #tpu.memory_space<vmem>>, vector<49x64xbf16>,
    %c0_119 = arith.constant 0 : index
    %c576_120 = arith.constant 576 : index
    %93 = vector.load %arg11[%c0_119, %c576_120] : memref<49x1152xbf16, #tpu.memory_space<vmem>>, vector<49x64xbf16>
    %c0_121 = arith.constant 0 : index
    %c64_122 = arith.constant 64 : index
    %94 = vector.load %arg12[%c0_121, %c64_122] : memref<576x128xbf16, #tpu.memory_space<vmem>>, vector<49x64xbf16>
    tpu.vector_store %arg12[%c0_121, %c64_122], %93 {strides = array<i32>} : memref<576x128xbf16, #tpu.memory_space<vmem>>, vector<49x64xbf16>,
    %c0_123 = arith.constant 0 : index
    %c640_124 = arith.constant 640 : index
    %95 = vector.load %arg11[%c0_123, %c640_124] : memref<49x1152xbf16, #tpu.memory_space<vmem>>, vector<49x64xbf16>
    %c64_125 = arith.constant 64 : index
    %c64_126 = arith.constant 64 : index
    %96 = vector.load %arg12[%c64_125, %c64_126] : memref<576x128xbf16, #tpu.memory_space<vmem>>, vector<49x64xbf16>
    tpu.vector_store %arg12[%c64_125, %c64_126], %95 {strides = array<i32>} : memref<576x128xbf16, #tpu.memory_space<vmem>>, vector<49x64xbf16>,
    %c0_127 = arith.constant 0 : index
    %c704_128 = arith.constant 704 : index
    %97 = vector.load %arg11[%c0_127, %c704_128] : memref<49x1152xbf16, #tpu.memory_space<vmem>>, vector<49x64xbf16>
    %c128_129 = arith.constant 128 : index
    %c64_130 = arith.constant 64 : index
    %98 = vector.load %arg12[%c128_129, %c64_130] : memref<576x128xbf16, #tpu.memory_space<vmem>>, vector<49x64xbf16>
    tpu.vector_store %arg12[%c128_129, %c64_130], %97 {strides = array<i32>} : memref<576x128xbf16, #tpu.memory_space<vmem>>, vector<49x64xbf16>,
    %c0_131 = arith.constant 0 : index
    %c768_132 = arith.constant 768 : index
    %99 = vector.load %arg11[%c0_131, %c768_132] : memref<49x1152xbf16, #tpu.memory_space<vmem>>, vector<49x64xbf16>
    %c192_133 = arith.constant 192 : index
    %c64_134 = arith.constant 64 : index
    %100 = vector.load %arg12[%c192_133, %c64_134] : memref<576x128xbf16, #tpu.memory_space<vmem>>, vector<49x64xbf16>
    tpu.vector_store %arg12[%c192_133, %c64_134], %99 {strides = array<i32>} : memref<576x128xbf16, #tpu.memory_space<vmem>>, vector<49x64xbf16>,
    %c0_135 = arith.constant 0 : index
    %c832_136 = arith.constant 832 : index
    %101 = vector.load %arg11[%c0_135, %c832_136] : memref<49x1152xbf16, #tpu.memory_space<vmem>>, vector<49x64xbf16>
    %c256_137 = arith.constant 256 : index
    %c64_138 = arith.constant 64 : index
    %102 = vector.load %arg12[%c256_137, %c64_138] : memref<576x128xbf16, #tpu.memory_space<vmem>>, vector<49x64xbf16>
    tpu.vector_store %arg12[%c256_137, %c64_138], %101 {strides = array<i32>} : memref<576x128xbf16, #tpu.memory_space<vmem>>, vector<49x64xbf16>,
    %c0_139 = arith.constant 0 : index
    %c896_140 = arith.constant 896 : index
    %103 = vector.load %arg11[%c0_139, %c896_140] : memref<49x1152xbf16, #tpu.memory_space<vmem>>, vector<49x64xbf16>
    %c320_141 = arith.constant 320 : index
    %c64_142 = arith.constant 64 : index
    %104 = vector.load %arg12[%c320_141, %c64_142] : memref<576x128xbf16, #tpu.memory_space<vmem>>, vector<49x64xbf16>
    tpu.vector_store %arg12[%c320_141, %c64_142], %103 {strides = array<i32>} : memref<576x128xbf16, #tpu.memory_space<vmem>>, vector<49x64xbf16>,
    %c0_143 = arith.constant 0 : index
    %c960_144 = arith.constant 960 : index
    %105 = vector.load %arg11[%c0_143, %c960_144] : memref<49x1152xbf16, #tpu.memory_space<vmem>>, vector<49x64xbf16>
    %c384_145 = arith.constant 384 : index
    %c64_146 = arith.constant 64 : index
    %106 = vector.load %arg12[%c384_145, %c64_146] : memref<576x128xbf16, #tpu.memory_space<vmem>>, vector<49x64xbf16>
    tpu.vector_store %arg12[%c384_145, %c64_146], %105 {strides = array<i32>} : memref<576x128xbf16, #tpu.memory_space<vmem>>, vector<49x64xbf16>,
    %c0_147 = arith.constant 0 : index
    %c1024_148 = arith.constant 1024 : index
    %107 = vector.load %arg11[%c0_147, %c1024_148] : memref<49x1152xbf16, #tpu.memory_space<vmem>>, vector<49x64xbf16>
    %c448_149 = arith.constant 448 : index
    %c64_150 = arith.constant 64 : index
    %108 = vector.load %arg12[%c448_149, %c64_150] : memref<576x128xbf16, #tpu.memory_space<vmem>>, vector<49x64xbf16>
    tpu.vector_store %arg12[%c448_149, %c64_150], %107 {strides = array<i32>} : memref<576x128xbf16, #tpu.memory_space<vmem>>, vector<49x64xbf16>,
    %c0_151 = arith.constant 0 : index
    %c1088_152 = arith.constant 1088 : index
    %109 = vector.load %arg11[%c0_151, %c1088_152] : memref<49x1152xbf16, #tpu.memory_space<vmem>>, vector<49x64xbf16>
    %c512_153 = arith.constant 512 : index
    %c64_154 = arith.constant 64 : index
    %110 = vector.load %arg12[%c512_153, %c64_154] : memref<576x128xbf16, #tpu.memory_space<vmem>>, vector<49x64xbf16>
    tpu.vector_store %arg12[%c512_153, %c64_154], %109 {strides = array<i32>} : memref<576x128xbf16, #tpu.memory_space<vmem>>, vector<49x64xbf16>,
    %c0_155 = arith.constant 0 : index
    %c0_156 = arith.constant 0 : index
    %111 = vector.load %arg12[%c0_155, %c0_156] : memref<576x128xbf16, #tpu.memory_space<vmem>>, vector<576x128xbf16>
    %cst_157 = arith.constant dense<0.000000e+00> : vector<16x128xf32>
    %112 = tpu.matmul %67, %111, %cst_157 {dimension_numbers = #tpu.dot_dimension_numbers<[1], [0], [0], [1], [0, 0, 1, 1], [], []>} : vector<16x576xbf16>, vector<576x128xbf16>, vector<16x128xf32> -> vector<16x128xf32>
    %113 = vector.broadcast %68 : vector<1x128xf32> to vector<16x128xf32>
    %114 = arith.addf %112, %113 : vector<16x128xf32>
    %cst_158 = arith.constant 0.000000e+00 : f32
    %115 = vector.broadcast %cst_158 : f32 to vector<16x128xf32>
    %116 = arith.cmpf ogt, %114, %115 : vector<16x128xf32>
    %cst_159 = arith.constant 2.000000e-02 : f32
    %117 = vector.broadcast %cst_159 : f32 to vector<16x128xf32>
    %118 = arith.mulf %117, %114 : vector<16x128xf32>
    %119 = arith.select %116, %114, %118 : vector<16x128xi1>, vector<16x128xf32>
    %c1_160 = arith.constant 1 : index
    %c0_161 = arith.constant 0 : index
    %c0_162 = arith.constant 0 : index
    %120 = vector.load %arg3[%c1_160, %c0_161, %c0_162] : memref<3x128x1152xbf16, #tpu.memory_space<vmem>>, vector<1x128x1152xbf16>
    %121 = vector.shape_cast %120 : vector<1x128x1152xbf16> to vector<128x1152xbf16>
    %c0_163 = arith.constant 0 : index
    %c0_164 = arith.constant 0 : index
    %122 = vector.load %arg7[%c0_163, %c0_164] : memref<16x144xbf16, #tpu.memory_space<vmem>>, vector<16x144xbf16>
    %c3 = arith.constant 3 : index
    %c0_165 = arith.constant 0 : index
    %123 = vector.load %arg4[%c3, %c0_165] : memref<5x128xf32, #tpu.memory_space<vmem>>, vector<1x128xf32>
    %124 = arith.truncf %119 : vector<16x128xf32> to vector<16x128xbf16>
    %cst_166 = arith.constant dense<0.000000e+00> : vector<16x1152xf32>
    %125 = tpu.matmul %124, %121, %cst_166 {dimension_numbers = #tpu.dot_dimension_numbers<[1], [0], [0], [1], [0, 0, 1, 1], [], []>} : vector<16x128xbf16>, vector<128x1152xbf16>, vector<16x1152xf32> -> vector<16x1152xf32>
    %126 = arith.truncf %125 : vector<16x1152xf32> to vector<16x1152xbf16>
    %c0_167 = arith.constant 0 : index
    %c0_168 = arith.constant 0 : index
    %127 = vector.load %arg13[%c0_167, %c0_168] : memref<16x1152xbf16, #tpu.memory_space<vmem>>, vector<16x1152xbf16>
    tpu.vector_store %arg13[%c0_167, %c0_168], %126 {strides = array<i32>} : memref<16x1152xbf16, #tpu.memory_space<vmem>>, vector<16x1152xbf16>,
    %c0_169 = arith.constant 0 : index
    %c0_170 = arith.constant 0 : index
    %128 = vector.load %arg13[%c0_169, %c0_170] : memref<16x1152xbf16, #tpu.memory_space<vmem>>, vector<16x64xbf16>
    %c0_171 = arith.constant 0 : index
    %c0_172 = arith.constant 0 : index
    %129 = vector.load %arg14[%c0_171, %c0_172] : memref<144x128xbf16, #tpu.memory_space<vmem>>, vector<16x64xbf16>
    tpu.vector_store %arg14[%c0_171, %c0_172], %128 {strides = array<i32>} : memref<144x128xbf16, #tpu.memory_space<vmem>>, vector<16x64xbf16>,
    %c0_173 = arith.constant 0 : index
    %c64_174 = arith.constant 64 : index
    %130 = vector.load %arg13[%c0_173, %c64_174] : memref<16x1152xbf16, #tpu.memory_space<vmem>>, vector<16x64xbf16>
    %c16 = arith.constant 16 : index
    %c0_175 = arith.constant 0 : index
    %131 = vector.load %arg14[%c16, %c0_175] : memref<144x128xbf16, #tpu.memory_space<vmem>>, vector<16x64xbf16>
    tpu.vector_store %arg14[%c16, %c0_175], %130 {strides = array<i32>} : memref<144x128xbf16, #tpu.memory_space<vmem>>, vector<16x64xbf16>,
    %c0_176 = arith.constant 0 : index
    %c128_177 = arith.constant 128 : index
    %132 = vector.load %arg13[%c0_176, %c128_177] : memref<16x1152xbf16, #tpu.memory_space<vmem>>, vector<16x64xbf16>
    %c32 = arith.constant 32 : index
    %c0_178 = arith.constant 0 : index
    %133 = vector.load %arg14[%c32, %c0_178] : memref<144x128xbf16, #tpu.memory_space<vmem>>, vector<16x64xbf16>
    tpu.vector_store %arg14[%c32, %c0_178], %132 {strides = array<i32>} : memref<144x128xbf16, #tpu.memory_space<vmem>>, vector<16x64xbf16>,
    %c0_179 = arith.constant 0 : index
    %c192_180 = arith.constant 192 : index
    %134 = vector.load %arg13[%c0_179, %c192_180] : memref<16x1152xbf16, #tpu.memory_space<vmem>>, vector<16x64xbf16>
    %c48 = arith.constant 48 : index
    %c0_181 = arith.constant 0 : index
    %135 = vector.load %arg14[%c48, %c0_181] : memref<144x128xbf16, #tpu.memory_space<vmem>>, vector<16x64xbf16>
    tpu.vector_store %arg14[%c48, %c0_181], %134 {strides = array<i32>} : memref<144x128xbf16, #tpu.memory_space<vmem>>, vector<16x64xbf16>,
    %c0_182 = arith.constant 0 : index
    %c256_183 = arith.constant 256 : index
    %136 = vector.load %arg13[%c0_182, %c256_183] : memref<16x1152xbf16, #tpu.memory_space<vmem>>, vector<16x64xbf16>
    %c64_184 = arith.constant 64 : index
    %c0_185 = arith.constant 0 : index
    %137 = vector.load %arg14[%c64_184, %c0_185] : memref<144x128xbf16, #tpu.memory_space<vmem>>, vector<16x64xbf16>
    tpu.vector_store %arg14[%c64_184, %c0_185], %136 {strides = array<i32>} : memref<144x128xbf16, #tpu.memory_space<vmem>>, vector<16x64xbf16>,
    %c0_186 = arith.constant 0 : index
    %c320_187 = arith.constant 320 : index
    %138 = vector.load %arg13[%c0_186, %c320_187] : memref<16x1152xbf16, #tpu.memory_space<vmem>>, vector<16x64xbf16>
    %c80 = arith.constant 80 : index
    %c0_188 = arith.constant 0 : index
    %139 = vector.load %arg14[%c80, %c0_188] : memref<144x128xbf16, #tpu.memory_space<vmem>>, vector<16x64xbf16>
    tpu.vector_store %arg14[%c80, %c0_188], %138 {strides = array<i32>} : memref<144x128xbf16, #tpu.memory_space<vmem>>, vector<16x64xbf16>,
    %c0_189 = arith.constant 0 : index
    %c384_190 = arith.constant 384 : index
    %140 = vector.load %arg13[%c0_189, %c384_190] : memref<16x1152xbf16, #tpu.memory_space<vmem>>, vector<16x64xbf16>
    %c96 = arith.constant 96 : index
    %c0_191 = arith.constant 0 : index
    %141 = vector.load %arg14[%c96, %c0_191] : memref<144x128xbf16, #tpu.memory_space<vmem>>, vector<16x64xbf16>
    tpu.vector_store %arg14[%c96, %c0_191], %140 {strides = array<i32>} : memref<144x128xbf16, #tpu.memory_space<vmem>>, vector<16x64xbf16>,
    %c0_192 = arith.constant 0 : index
    %c448_193 = arith.constant 448 : index
    %142 = vector.load %arg13[%c0_192, %c448_193] : memref<16x1152xbf16, #tpu.memory_space<vmem>>, vector<16x64xbf16>
    %c112 = arith.constant 112 : index
    %c0_194 = arith.constant 0 : index
    %143 = vector.load %arg14[%c112, %c0_194] : memref<144x128xbf16, #tpu.memory_space<vmem>>, vector<16x64xbf16>
    tpu.vector_store %arg14[%c112, %c0_194], %142 {strides = array<i32>} : memref<144x128xbf16, #tpu.memory_space<vmem>>, vector<16x64xbf16>,
    %c0_195 = arith.constant 0 : index
    %c512_196 = arith.constant 512 : index
    %144 = vector.load %arg13[%c0_195, %c512_196] : memref<16x1152xbf16, #tpu.memory_space<vmem>>, vector<16x64xbf16>
    %c128_197 = arith.constant 128 : index
    %c0_198 = arith.constant 0 : index
    %145 = vector.load %arg14[%c128_197, %c0_198] : memref<144x128xbf16, #tpu.memory_space<vmem>>, vector<16x64xbf16>
    tpu.vector_store %arg14[%c128_197, %c0_198], %144 {strides = array<i32>} : memref<144x128xbf16, #tpu.memory_space<vmem>>, vector<16x64xbf16>,
    %c0_199 = arith.constant 0 : index
    %c576_200 = arith.constant 576 : index
    %146 = vector.load %arg13[%c0_199, %c576_200] : memref<16x1152xbf16, #tpu.memory_space<vmem>>, vector<16x64xbf16>
    %c0_201 = arith.constant 0 : index
    %c64_202 = arith.constant 64 : index
    %147 = vector.load %arg14[%c0_201, %c64_202] : memref<144x128xbf16, #tpu.memory_space<vmem>>, vector<16x64xbf16>
    tpu.vector_store %arg14[%c0_201, %c64_202], %146 {strides = array<i32>} : memref<144x128xbf16, #tpu.memory_space<vmem>>, vector<16x64xbf16>,
    %c0_203 = arith.constant 0 : index
    %c640_204 = arith.constant 640 : index
    %148 = vector.load %arg13[%c0_203, %c640_204] : memref<16x1152xbf16, #tpu.memory_space<vmem>>, vector<16x64xbf16>
    %c16_205 = arith.constant 16 : index
    %c64_206 = arith.constant 64 : index
    %149 = vector.load %arg14[%c16_205, %c64_206] : memref<144x128xbf16, #tpu.memory_space<vmem>>, vector<16x64xbf16>
    tpu.vector_store %arg14[%c16_205, %c64_206], %148 {strides = array<i32>} : memref<144x128xbf16, #tpu.memory_space<vmem>>, vector<16x64xbf16>,
    %c0_207 = arith.constant 0 : index
    %c704_208 = arith.constant 704 : index
    %150 = vector.load %arg13[%c0_207, %c704_208] : memref<16x1152xbf16, #tpu.memory_space<vmem>>, vector<16x64xbf16>
    %c32_209 = arith.constant 32 : index
    %c64_210 = arith.constant 64 : index
    %151 = vector.load %arg14[%c32_209, %c64_210] : memref<144x128xbf16, #tpu.memory_space<vmem>>, vector<16x64xbf16>
    tpu.vector_store %arg14[%c32_209, %c64_210], %150 {strides = array<i32>} : memref<144x128xbf16, #tpu.memory_space<vmem>>, vector<16x64xbf16>,
    %c0_211 = arith.constant 0 : index
    %c768_212 = arith.constant 768 : index
    %152 = vector.load %arg13[%c0_211, %c768_212] : memref<16x1152xbf16, #tpu.memory_space<vmem>>, vector<16x64xbf16>
    %c48_213 = arith.constant 48 : index
    %c64_214 = arith.constant 64 : index
    %153 = vector.load %arg14[%c48_213, %c64_214] : memref<144x128xbf16, #tpu.memory_space<vmem>>, vector<16x64xbf16>
    tpu.vector_store %arg14[%c48_213, %c64_214], %152 {strides = array<i32>} : memref<144x128xbf16, #tpu.memory_space<vmem>>, vector<16x64xbf16>,
    %c0_215 = arith.constant 0 : index
    %c832_216 = arith.constant 832 : index
    %154 = vector.load %arg13[%c0_215, %c832_216] : memref<16x1152xbf16, #tpu.memory_space<vmem>>, vector<16x64xbf16>
    %c64_217 = arith.constant 64 : index
    %c64_218 = arith.constant 64 : index
    %155 = vector.load %arg14[%c64_217, %c64_218] : memref<144x128xbf16, #tpu.memory_space<vmem>>, vector<16x64xbf16>
    tpu.vector_store %arg14[%c64_217, %c64_218], %154 {strides = array<i32>} : memref<144x128xbf16, #tpu.memory_space<vmem>>, vector<16x64xbf16>,
    %c0_219 = arith.constant 0 : index
    %c896_220 = arith.constant 896 : index
    %156 = vector.load %arg13[%c0_219, %c896_220] : memref<16x1152xbf16, #tpu.memory_space<vmem>>, vector<16x64xbf16>
    %c80_221 = arith.constant 80 : index
    %c64_222 = arith.constant 64 : index
    %157 = vector.load %arg14[%c80_221, %c64_222] : memref<144x128xbf16, #tpu.memory_space<vmem>>, vector<16x64xbf16>
    tpu.vector_store %arg14[%c80_221, %c64_222], %156 {strides = array<i32>} : memref<144x128xbf16, #tpu.memory_space<vmem>>, vector<16x64xbf16>,
    %c0_223 = arith.constant 0 : index
    %c960_224 = arith.constant 960 : index
    %158 = vector.load %arg13[%c0_223, %c960_224] : memref<16x1152xbf16, #tpu.memory_space<vmem>>, vector<16x64xbf16>
    %c96_225 = arith.constant 96 : index
    %c64_226 = arith.constant 64 : index
    %159 = vector.load %arg14[%c96_225, %c64_226] : memref<144x128xbf16, #tpu.memory_space<vmem>>, vector<16x64xbf16>
    tpu.vector_store %arg14[%c96_225, %c64_226], %158 {strides = array<i32>} : memref<144x128xbf16, #tpu.memory_space<vmem>>, vector<16x64xbf16>,
    %c0_227 = arith.constant 0 : index
    %c1024_228 = arith.constant 1024 : index
    %160 = vector.load %arg13[%c0_227, %c1024_228] : memref<16x1152xbf16, #tpu.memory_space<vmem>>, vector<16x64xbf16>
    %c112_229 = arith.constant 112 : index
    %c64_230 = arith.constant 64 : index
    %161 = vector.load %arg14[%c112_229, %c64_230] : memref<144x128xbf16, #tpu.memory_space<vmem>>, vector<16x64xbf16>
    tpu.vector_store %arg14[%c112_229, %c64_230], %160 {strides = array<i32>} : memref<144x128xbf16, #tpu.memory_space<vmem>>, vector<16x64xbf16>,
    %c0_231 = arith.constant 0 : index
    %c1088_232 = arith.constant 1088 : index
    %162 = vector.load %arg13[%c0_231, %c1088_232] : memref<16x1152xbf16, #tpu.memory_space<vmem>>, vector<16x64xbf16>
    %c128_233 = arith.constant 128 : index
    %c64_234 = arith.constant 64 : index
    %163 = vector.load %arg14[%c128_233, %c64_234] : memref<144x128xbf16, #tpu.memory_space<vmem>>, vector<16x64xbf16>
    tpu.vector_store %arg14[%c128_233, %c64_234], %162 {strides = array<i32>} : memref<144x128xbf16, #tpu.memory_space<vmem>>, vector<16x64xbf16>,
    %c0_235 = arith.constant 0 : index
    %c0_236 = arith.constant 0 : index
    %164 = vector.load %arg14[%c0_235, %c0_236] : memref<144x128xbf16, #tpu.memory_space<vmem>>, vector<144x128xbf16>
    %cst_237 = arith.constant dense<0.000000e+00> : vector<16x128xf32>
    %165 = tpu.matmul %122, %164, %cst_237 {dimension_numbers = #tpu.dot_dimension_numbers<[1], [0], [0], [1], [0, 0, 1, 1], [], []>} : vector<16x144xbf16>, vector<144x128xbf16>, vector<16x128xf32> -> vector<16x128xf32>
    %166 = vector.broadcast %123 : vector<1x128xf32> to vector<16x128xf32>
    %167 = arith.addf %165, %166 : vector<16x128xf32>
    %cst_238 = arith.constant 0.000000e+00 : f32
    %168 = vector.broadcast %cst_238 : f32 to vector<16x128xf32>
    %169 = arith.cmpf ogt, %167, %168 : vector<16x128xf32>
    %cst_239 = arith.constant 2.000000e-02 : f32
    %170 = vector.broadcast %cst_239 : f32 to vector<16x128xf32>
    %171 = arith.mulf %170, %167 : vector<16x128xf32>
    %172 = arith.select %169, %167, %171 : vector<16x128xi1>, vector<16x128xf32>
    %c2_240 = arith.constant 2 : index
    %c0_241 = arith.constant 0 : index
    %c0_242 = arith.constant 0 : index
    %173 = vector.load %arg3[%c2_240, %c0_241, %c0_242] : memref<3x128x1152xbf16, #tpu.memory_space<vmem>>, vector<1x128x1152xbf16>
    %174 = vector.shape_cast %173 : vector<1x128x1152xbf16> to vector<128x1152xbf16>
    %c0_243 = arith.constant 0 : index
    %c0_244 = arith.constant 0 : index
    %175 = vector.load %arg7[%c0_243, %c0_244] : memref<16x144xbf16, #tpu.memory_space<vmem>>, vector<16x144xbf16>
    %c4 = arith.constant 4 : index
    %c0_245 = arith.constant 0 : index
    %176 = vector.load %arg4[%c4, %c0_245] : memref<5x128xf32, #tpu.memory_space<vmem>>, vector<1x128xf32>
    %177 = arith.truncf %172 : vector<16x128xf32> to vector<16x128xbf16>
    %cst_246 = arith.constant dense<0.000000e+00> : vector<16x1152xf32>
    %178 = tpu.matmul %177, %174, %cst_246 {dimension_numbers = #tpu.dot_dimension_numbers<[1], [0], [0], [1], [0, 0, 1, 1], [], []>} : vector<16x128xbf16>, vector<128x1152xbf16>, vector<16x1152xf32> -> vector<16x1152xf32>
    %179 = arith.truncf %178 : vector<16x1152xf32> to vector<16x1152xbf16>
    %c0_247 = arith.constant 0 : index
    %c0_248 = arith.constant 0 : index
    %180 = vector.load %arg13[%c0_247, %c0_248] : memref<16x1152xbf16, #tpu.memory_space<vmem>>, vector<16x1152xbf16>
    tpu.vector_store %arg13[%c0_247, %c0_248], %179 {strides = array<i32>} : memref<16x1152xbf16, #tpu.memory_space<vmem>>, vector<16x1152xbf16>,
    %c0_249 = arith.constant 0 : index
    %c0_250 = arith.constant 0 : index
    %181 = vector.load %arg13[%c0_249, %c0_250] : memref<16x1152xbf16, #tpu.memory_space<vmem>>, vector<16x64xbf16>
    %c0_251 = arith.constant 0 : index
    %c0_252 = arith.constant 0 : index
    %182 = vector.load %arg14[%c0_251, %c0_252] : memref<144x128xbf16, #tpu.memory_space<vmem>>, vector<16x64xbf16>
    tpu.vector_store %arg14[%c0_251, %c0_252], %181 {strides = array<i32>} : memref<144x128xbf16, #tpu.memory_space<vmem>>, vector<16x64xbf16>,
    %c0_253 = arith.constant 0 : index
    %c64_254 = arith.constant 64 : index
    %183 = vector.load %arg13[%c0_253, %c64_254] : memref<16x1152xbf16, #tpu.memory_space<vmem>>, vector<16x64xbf16>
    %c16_255 = arith.constant 16 : index
    %c0_256 = arith.constant 0 : index
    %184 = vector.load %arg14[%c16_255, %c0_256] : memref<144x128xbf16, #tpu.memory_space<vmem>>, vector<16x64xbf16>
    tpu.vector_store %arg14[%c16_255, %c0_256], %183 {strides = array<i32>} : memref<144x128xbf16, #tpu.memory_space<vmem>>, vector<16x64xbf16>,
    %c0_257 = arith.constant 0 : index
    %c128_258 = arith.constant 128 : index
    %185 = vector.load %arg13[%c0_257, %c128_258] : memref<16x1152xbf16, #tpu.memory_space<vmem>>, vector<16x64xbf16>
    %c32_259 = arith.constant 32 : index
    %c0_260 = arith.constant 0 : index
    %186 = vector.load %arg14[%c32_259, %c0_260] : memref<144x128xbf16, #tpu.memory_space<vmem>>, vector<16x64xbf16>
    tpu.vector_store %arg14[%c32_259, %c0_260], %185 {strides = array<i32>} : memref<144x128xbf16, #tpu.memory_space<vmem>>, vector<16x64xbf16>,
    %c0_261 = arith.constant 0 : index
    %c192_262 = arith.constant 192 : index
    %187 = vector.load %arg13[%c0_261, %c192_262] : memref<16x1152xbf16, #tpu.memory_space<vmem>>, vector<16x64xbf16>
    %c48_263 = arith.constant 48 : index
    %c0_264 = arith.constant 0 : index
    %188 = vector.load %arg14[%c48_263, %c0_264] : memref<144x128xbf16, #tpu.memory_space<vmem>>, vector<16x64xbf16>
    tpu.vector_store %arg14[%c48_263, %c0_264], %187 {strides = array<i32>} : memref<144x128xbf16, #tpu.memory_space<vmem>>, vector<16x64xbf16>,
    %c0_265 = arith.constant 0 : index
    %c256_266 = arith.constant 256 : index
    %189 = vector.load %arg13[%c0_265, %c256_266] : memref<16x1152xbf16, #tpu.memory_space<vmem>>, vector<16x64xbf16>
    %c64_267 = arith.constant 64 : index
    %c0_268 = arith.constant 0 : index
    %190 = vector.load %arg14[%c64_267, %c0_268] : memref<144x128xbf16, #tpu.memory_space<vmem>>, vector<16x64xbf16>
    tpu.vector_store %arg14[%c64_267, %c0_268], %189 {strides = array<i32>} : memref<144x128xbf16, #tpu.memory_space<vmem>>, vector<16x64xbf16>,
    %c0_269 = arith.constant 0 : index
    %c320_270 = arith.constant 320 : index
    %191 = vector.load %arg13[%c0_269, %c320_270] : memref<16x1152xbf16, #tpu.memory_space<vmem>>, vector<16x64xbf16>
    %c80_271 = arith.constant 80 : index
    %c0_272 = arith.constant 0 : index
    %192 = vector.load %arg14[%c80_271, %c0_272] : memref<144x128xbf16, #tpu.memory_space<vmem>>, vector<16x64xbf16>
    tpu.vector_store %arg14[%c80_271, %c0_272], %191 {strides = array<i32>} : memref<144x128xbf16, #tpu.memory_space<vmem>>, vector<16x64xbf16>,
    %c0_273 = arith.constant 0 : index
    %c384_274 = arith.constant 384 : index
    %193 = vector.load %arg13[%c0_273, %c384_274] : memref<16x1152xbf16, #tpu.memory_space<vmem>>, vector<16x64xbf16>
    %c96_275 = arith.constant 96 : index
    %c0_276 = arith.constant 0 : index
    %194 = vector.load %arg14[%c96_275, %c0_276] : memref<144x128xbf16, #tpu.memory_space<vmem>>, vector<16x64xbf16>
    tpu.vector_store %arg14[%c96_275, %c0_276], %193 {strides = array<i32>} : memref<144x128xbf16, #tpu.memory_space<vmem>>, vector<16x64xbf16>,
    %c0_277 = arith.constant 0 : index
    %c448_278 = arith.constant 448 : index
    %195 = vector.load %arg13[%c0_277, %c448_278] : memref<16x1152xbf16, #tpu.memory_space<vmem>>, vector<16x64xbf16>
    %c112_279 = arith.constant 112 : index
    %c0_280 = arith.constant 0 : index
    %196 = vector.load %arg14[%c112_279, %c0_280] : memref<144x128xbf16, #tpu.memory_space<vmem>>, vector<16x64xbf16>
    tpu.vector_store %arg14[%c112_279, %c0_280], %195 {strides = array<i32>} : memref<144x128xbf16, #tpu.memory_space<vmem>>, vector<16x64xbf16>,
    %c0_281 = arith.constant 0 : index
    %c512_282 = arith.constant 512 : index
    %197 = vector.load %arg13[%c0_281, %c512_282] : memref<16x1152xbf16, #tpu.memory_space<vmem>>, vector<16x64xbf16>
    %c128_283 = arith.constant 128 : index
    %c0_284 = arith.constant 0 : index
    %198 = vector.load %arg14[%c128_283, %c0_284] : memref<144x128xbf16, #tpu.memory_space<vmem>>, vector<16x64xbf16>
    tpu.vector_store %arg14[%c128_283, %c0_284], %197 {strides = array<i32>} : memref<144x128xbf16, #tpu.memory_space<vmem>>, vector<16x64xbf16>,
    %c0_285 = arith.constant 0 : index
    %c576_286 = arith.constant 576 : index
    %199 = vector.load %arg13[%c0_285, %c576_286] : memref<16x1152xbf16, #tpu.memory_space<vmem>>, vector<16x64xbf16>
    %c0_287 = arith.constant 0 : index
    %c64_288 = arith.constant 64 : index
    %200 = vector.load %arg14[%c0_287, %c64_288] : memref<144x128xbf16, #tpu.memory_space<vmem>>, vector<16x64xbf16>
    tpu.vector_store %arg14[%c0_287, %c64_288], %199 {strides = array<i32>} : memref<144x128xbf16, #tpu.memory_space<vmem>>, vector<16x64xbf16>,
    %c0_289 = arith.constant 0 : index
    %c640_290 = arith.constant 640 : index
    %201 = vector.load %arg13[%c0_289, %c640_290] : memref<16x1152xbf16, #tpu.memory_space<vmem>>, vector<16x64xbf16>
    %c16_291 = arith.constant 16 : index
    %c64_292 = arith.constant 64 : index
    %202 = vector.load %arg14[%c16_291, %c64_292] : memref<144x128xbf16, #tpu.memory_space<vmem>>, vector<16x64xbf16>
    tpu.vector_store %arg14[%c16_291, %c64_292], %201 {strides = array<i32>} : memref<144x128xbf16, #tpu.memory_space<vmem>>, vector<16x64xbf16>,
    %c0_293 = arith.constant 0 : index
    %c704_294 = arith.constant 704 : index
    %203 = vector.load %arg13[%c0_293, %c704_294] : memref<16x1152xbf16, #tpu.memory_space<vmem>>, vector<16x64xbf16>
    %c32_295 = arith.constant 32 : index
    %c64_296 = arith.constant 64 : index
    %204 = vector.load %arg14[%c32_295, %c64_296] : memref<144x128xbf16, #tpu.memory_space<vmem>>, vector<16x64xbf16>
    tpu.vector_store %arg14[%c32_295, %c64_296], %203 {strides = array<i32>} : memref<144x128xbf16, #tpu.memory_space<vmem>>, vector<16x64xbf16>,
    %c0_297 = arith.constant 0 : index
    %c768_298 = arith.constant 768 : index
    %205 = vector.load %arg13[%c0_297, %c768_298] : memref<16x1152xbf16, #tpu.memory_space<vmem>>, vector<16x64xbf16>
    %c48_299 = arith.constant 48 : index
    %c64_300 = arith.constant 64 : index
    %206 = vector.load %arg14[%c48_299, %c64_300] : memref<144x128xbf16, #tpu.memory_space<vmem>>, vector<16x64xbf16>
    tpu.vector_store %arg14[%c48_299, %c64_300], %205 {strides = array<i32>} : memref<144x128xbf16, #tpu.memory_space<vmem>>, vector<16x64xbf16>,
    %c0_301 = arith.constant 0 : index
    %c832_302 = arith.constant 832 : index
    %207 = vector.load %arg13[%c0_301, %c832_302] : memref<16x1152xbf16, #tpu.memory_space<vmem>>, vector<16x64xbf16>
    %c64_303 = arith.constant 64 : index
    %c64_304 = arith.constant 64 : index
    %208 = vector.load %arg14[%c64_303, %c64_304] : memref<144x128xbf16, #tpu.memory_space<vmem>>, vector<16x64xbf16>
    tpu.vector_store %arg14[%c64_303, %c64_304], %207 {strides = array<i32>} : memref<144x128xbf16, #tpu.memory_space<vmem>>, vector<16x64xbf16>,
    %c0_305 = arith.constant 0 : index
    %c896_306 = arith.constant 896 : index
    %209 = vector.load %arg13[%c0_305, %c896_306] : memref<16x1152xbf16, #tpu.memory_space<vmem>>, vector<16x64xbf16>
    %c80_307 = arith.constant 80 : index
    %c64_308 = arith.constant 64 : index
    %210 = vector.load %arg14[%c80_307, %c64_308] : memref<144x128xbf16, #tpu.memory_space<vmem>>, vector<16x64xbf16>
    tpu.vector_store %arg14[%c80_307, %c64_308], %209 {strides = array<i32>} : memref<144x128xbf16, #tpu.memory_space<vmem>>, vector<16x64xbf16>,
    %c0_309 = arith.constant 0 : index
    %c960_310 = arith.constant 960 : index
    %211 = vector.load %arg13[%c0_309, %c960_310] : memref<16x1152xbf16, #tpu.memory_space<vmem>>, vector<16x64xbf16>
    %c96_311 = arith.constant 96 : index
    %c64_312 = arith.constant 64 : index
    %212 = vector.load %arg14[%c96_311, %c64_312] : memref<144x128xbf16, #tpu.memory_space<vmem>>, vector<16x64xbf16>
    tpu.vector_store %arg14[%c96_311, %c64_312], %211 {strides = array<i32>} : memref<144x128xbf16, #tpu.memory_space<vmem>>, vector<16x64xbf16>,
    %c0_313 = arith.constant 0 : index
    %c1024_314 = arith.constant 1024 : index
    %213 = vector.load %arg13[%c0_313, %c1024_314] : memref<16x1152xbf16, #tpu.memory_space<vmem>>, vector<16x64xbf16>
    %c112_315 = arith.constant 112 : index
    %c64_316 = arith.constant 64 : index
    %214 = vector.load %arg14[%c112_315, %c64_316] : memref<144x128xbf16, #tpu.memory_space<vmem>>, vector<16x64xbf16>
    tpu.vector_store %arg14[%c112_315, %c64_316], %213 {strides = array<i32>} : memref<144x128xbf16, #tpu.memory_space<vmem>>, vector<16x64xbf16>,
    %c0_317 = arith.constant 0 : index
    %c1088_318 = arith.constant 1088 : index
    %215 = vector.load %arg13[%c0_317, %c1088_318] : memref<16x1152xbf16, #tpu.memory_space<vmem>>, vector<16x64xbf16>
    %c128_319 = arith.constant 128 : index
    %c64_320 = arith.constant 64 : index
    %216 = vector.load %arg14[%c128_319, %c64_320] : memref<144x128xbf16, #tpu.memory_space<vmem>>, vector<16x64xbf16>
    tpu.vector_store %arg14[%c128_319, %c64_320], %215 {strides = array<i32>} : memref<144x128xbf16, #tpu.memory_space<vmem>>, vector<16x64xbf16>,
    %c0_321 = arith.constant 0 : index
    %c0_322 = arith.constant 0 : index
    %217 = vector.load %arg14[%c0_321, %c0_322] : memref<144x128xbf16, #tpu.memory_space<vmem>>, vector<144x128xbf16>
    %cst_323 = arith.constant dense<0.000000e+00> : vector<16x128xf32>
    %218 = tpu.matmul %175, %217, %cst_323 {dimension_numbers = #tpu.dot_dimension_numbers<[1], [0], [0], [1], [0, 0, 1, 1], [], []>} : vector<16x144xbf16>, vector<144x128xbf16>, vector<16x128xf32> -> vector<16x128xf32>
    %219 = vector.broadcast %176 : vector<1x128xf32> to vector<16x128xf32>
    %220 = arith.addf %218, %219 : vector<16x128xf32>
    %c0_324 = arith.constant 0 : index
    %c0_325 = arith.constant 0 : index
    %221 = vector.load %arg8[%c0_324, %c0_325] : memref<16x128xf32, #tpu.memory_space<vmem>>, vector<16x128xf32>
    tpu.vector_store %arg8[%c0_324, %c0_325], %220 {strides = array<i32>} : memref<16x128xf32, #tpu.memory_space<vmem>>, vector<16x128xf32>,
    return
  }
}

</mosaic_0001>

<bundles_post_ra>
// kernel: mul.27
= control target key start
LH: loop header
LB: loop body
LE: loop exit
PB: predicated region body
PF: predicated region fallthrough
CT: control target
= control target key end

     0   :  { %s1345_s13 = smov 3  ;;  %vm482_vm0 = vcmask 523264   ;;  %s1350_s16 = smov 3  ;;  %vm840_vm1 = vcmask 1047556   ;;  %vm844_vm2 = vcmask 1048064   ;;  %s1998_s0 = inlined_call_operand.vmem [shape: f32[32,3,3,64], index: 0, kind: input, shape index: {}]   ;;  %s1999_s1 = inlined_call_operand.vmem [shape: f32[32,576], index: 1, kind: output, shape index: {}]  }
   0x1   :  { %v1179_v0 = vld [vmem:[%s1998_s0 + $0x54] sm:$0xf]  ;;  %v1180_v1 = vld [vmem:[%s1998_s0 + $0x50] sm:$0xf]  ;;  %v1182_v2 = vld [vmem:[%s1998_s0 + $0x48] sm:$0xf] }
   0x2   :  { %378 = vst [vmem:[#allocation0 + $0xa8] sm:$0xf] %v1179_v0  ;;  %383 = vst [vmem:[#allocation0 + $0xa0] sm:$0xf] %v1180_v1  ;;  %v1183_v3 = vld [vmem:[%s1998_s0 + $0x44] sm:$0xf] }
   0x3   :  { %393 = vst [vmem:[#allocation0 + $0x90] sm:$0xf] %v1182_v2  ;;  %v1185_v4 = vld [vmem:[%s1998_s0 + $0x3c] sm:$0xf]  ;;  %v1186_v5 = vld [vmem:[%s1998_s0 + $0x38] sm:$0xf] }
   0x4   :  { %398 = vst [vmem:[#allocation0 + $0x88] sm:$0xf] %v1183_v3  ;;  %408 = vst [vmem:[#allocation0 + $0x78] sm:$0xf] %v1185_v4  ;;  %v1188_v6 = vld [vmem:[%s1998_s0 + $0x30] sm:$0xf] }
   0x5   :  { %413 = vst [vmem:[#allocation0 + $0x70] sm:$0xf] %v1186_v5  ;;  %v1189_v7 = vld [vmem:[%s1998_s0 + $0x2c] sm:$0xf]  ;;  %v1191_v8 = vld [vmem:[%s1998_s0 + $0x24] sm:$0xf] }
   0x6   :  { %423 = vst [vmem:[#allocation0 + $0x60] sm:$0xf] %v1188_v6  ;;  %428 = vst [vmem:[#allocation0 + $0x58] sm:$0xf] %v1189_v7  ;;  %v1192_v9 = vld [vmem:[%s1998_s0 + $0x20] sm:$0xf] }
   0x7   :  { %438 = vst [vmem:[#allocation0 + $0x48] sm:$0xf] %v1191_v8  ;;  %v1193_v10 = vld [vmem:[%s1998_s0 + $0x1c] sm:$0xf]  ;;  %v1194_v11 = vld [vmem:[%s1998_s0 + $0x18] sm:$0xf] }
   0x8   :  { %443 = vst [vmem:[#allocation0 + $0x40] sm:$0xf] %v1192_v9  ;;  %448 = vst [vmem:[#allocation0 + $0x38] sm:$0xf] %v1193_v10  ;;  %v1195_v12 = vld [vmem:[%s1998_s0 + $0x14] sm:$0xf] }
   0x9   :  { %453 = vst [vmem:[#allocation0 + $0x30] sm:$0xf] %v1194_v11  ;;  %v1196_v13 = vld [vmem:[%s1998_s0 + $0x10] sm:$0xf]  ;;  %v1197_v14 = vld [vmem:[%s1998_s0 + $0xc] sm:$0xf] }
   0xa   :  { %458 = vst [vmem:[#allocation0 + $0x28] sm:$0xf] %v1195_v12  ;;  %463 = vst [vmem:[#allocation0 + $0x20] sm:$0xf] %v1196_v13  ;;  %v1198_v15 = vld [vmem:[%s1998_s0 + $0x8] sm:$0xf] }
   0xb   :  { %468 = vst [vmem:[#allocation0 + $0x18] sm:$0xf] %v1197_v14  ;;  %v1199_v16 = vld [vmem:[%s1998_s0 + $0x4] sm:$0xf]  ;;  %v478_v17 = vld [vmem:[%s1998_s0] sm:$0xf] }
   0xc   :  { %473 = vst [vmem:[#allocation0 + $0x10] sm:$0xf] %v1198_v15  ;;  %477 = vst [vmem:[#allocation0 + $0x8] sm:$0xf] %v1199_v16  ;;  %v1176_v18 = vld [vmem:[%s1998_s0 + $0x60] sm:$0xf] }
   0xd   :  { %479 = vst [vmem:[#allocation0] sm:$0xf] %v478_v17  ;;  %363 = vst [vmem:[#allocation0 + $0xc0] sm:$0xf] %v1176_v18  ;;  %v1177_v19 = vld [vmem:[%s1998_s0 + $0x5c] sm:$0xf] }
   0xe   :  { %v1130_v20 = vld [vmem:[%s1998_s0 + $0x118] sm:$0xf]  ;;  %s513_s21 = smov 3  ;;  %s524_s22 = smov 3  ;;  %368 = vst [vmem:[#allocation0 + $0xb8] sm:$0xf] %v1177_v19 }
   0xf   :  { %133 = vst [vmem:[#allocation0 + $0x230] sm:$0xf] %v1130_v20  ;;  %v1131_v21 = vld [vmem:[%s1998_s0 + $0x114] sm:$0xf]  ;;  %v1132_v22 = vld [vmem:[%s1998_s0 + $0x110] sm:$0xf] }
  0x10   :  { %s502_s27 = smov 3  ;;  %s535_s28 = smov 3  ;;  %138 = vst [vmem:[#allocation0 + $0x228] sm:$0xf] %v1131_v21  ;;  %143 = vst [vmem:[#allocation0 + $0x220] sm:$0xf] %v1132_v22 }
  0x11   :  { %v1133_v23 = vld [vmem:[%s1998_s0 + $0x10c] sm:$0xf]  ;;  %v1134_v24 = vld [vmem:[%s1998_s0 + $0x108] sm:$0xf]  ;;  %s491_s4 = smov 3  ;;  %s546_s5 = smov 3 }
  0x12   :  { %v525_v25 = vld [vmem:[#allocation0 + $0x5a] ss:$6 sm:%s524_s22]   ;;  %148 = vst [vmem:[#allocation0 + $0x218] sm:$0xf] %v1133_v23  ;;  %153 = vst [vmem:[#allocation0 + $0x210] sm:$0xf] %v1134_v24 }
  0x13   :  { %v536_v26 = vld [vmem:[#allocation0 + $0x72] ss:$6 sm:%s535_s28]   ;;  %v514_v27 = vld [vmem:[#allocation0 + $0x42] ss:$6 sm:%s513_s21]   ;;  %s557_s10 = smov 3  ;;  %s1280_s29 = smov 64  }
  0x14   :  { %1207 = vst.msk [vmem:[%s1999_s1 + $0x23] ss:$-31 sm:$0x3] %vm482_vm0, %v525_v25   ;;  %1209 = vst.msk [vmem:[%s1999_s1 + $0x24] ss:$-31 sm:$0x3] %vm482_vm0, %v536_v26  }
  0x15   :  { %v839_v28 = vld [vmem:[#allocation0 + $0x1] ss:$24 sm:$0xf0]   ;;  %v503_v30 = vld [vmem:[#allocation0 + $0x2a] ss:$6 sm:%s502_s27]   ;;  %s1468_s7 = smov 3 }
  0x16   :  { %v497_v29 = vld [vmem:[#allocation0 + $0x1a] ss:$7 sm:$0x7]   ;;  %1205 = vst.msk [vmem:[%s1999_s1 + $0x22] ss:$-31 sm:$0x3] %vm482_vm0, %v514_v27  }
  0x17   :  { %v481_v31 = vld [vmem:[#allocation0] ss:$2 sm:%s1345_s13]   ;;  %1202 = vst.msk [vmem:[%s1999_s1 + $0x9] ss:$8 sm:$0x7] %vm482_vm0, %v497_v29   ;;  %s1499_s26 = smov 3 }
  0x18   :  { %v486_v32 = vld [vmem:[#allocation0 + $0x9] ss:$7 sm:%s1350_s16]   ;;  %1203 = vst.msk [vmem:[%s1999_s1 + $0x21] ss:$-31 sm:$0x3] %vm482_vm0, %v503_v30   ;;  %s1508_s3 = smov 3 }
  0x19   :  { %v492_v33 = vld [vmem:[#allocation0 + $0x12] ss:$6 sm:%s491_s4]   ;;  %483 = vst.msk [vmem:[%s1999_s1] ss:$8 sm:$0x3] %vm482_vm0, %v481_v31   ;;  %s1517_s9 = smov 3 }
  0x1a   :  { %1200 = vst.msk [vmem:[%s1999_s1 + $0x10] ss:$8 sm:$0x3] %vm482_vm0, %v486_v32   ;;  %1201 = vst.msk [vmem:[%s1999_s1 + $0x20] ss:$-31 sm:$0x3] %vm482_vm0, %v492_v33  }
  0x1b   :  { %v837_v34 = vld [vmem:[#allocation0 + $0x1] ss:$24 sm:$0xf]   ;;  %v547_v35 = vld [vmem:[#allocation0 + $0x8a] ss:$6 sm:%s546_s5]   ;;  %s1531_s16 = smov 3 }
  0x1c   :  { %v841_v36 = vsel %vm840_vm1, %v839_v28, %v837_v34  ;;  %1211 = vst.msk [vmem:[%s1999_s1 + $0x25] ss:$-31 sm:$0x3] %vm482_vm0, %v547_v35   ;;  %v558_v37 = vld [vmem:[#allocation0 + $0xa2] ss:$6 sm:%s557_s10]   ;;  %s1541_s21 = smov 3 }
  0x1d   :  { %v1135_v38 = vld [vmem:[%s1998_s0 + $0x104] sm:$0xf]  ;;  %v1136_v39 = vld [vmem:[%s1998_s0 + $0x100] sm:$0xf]  ;;  %842 = vrot.lane.b32.xlu0 %v841_v36, %s1280_s29  ;;  %v1137_v40 = vld [vmem:[%s1998_s0 + $0xfc] sm:$0xf] }
  0x1e   :  { %1213 = vst.msk [vmem:[%s1999_s1 + $0x26] ss:$-31 sm:$0x3] %vm482_vm0, %v558_v37   ;;  %158 = vst [vmem:[#allocation0 + $0x208] sm:$0xf] %v1135_v38  ;;  %s1550_s27 = smov 3 }
  0x1f   :  { %163 = vst [vmem:[#allocation0 + $0x200] sm:$0xf] %v1136_v39  ;;  %v1138_v41 = vld [vmem:[%s1998_s0 + $0xf8] sm:$0xf]  ;;  %v1139_v42 = vld [vmem:[%s1998_s0 + $0xf4] sm:$0xf] }
  0x20   :  { %168 = vst [vmem:[#allocation0 + $0x1f8] sm:$0xf] %v1137_v40  ;;  %173 = vst [vmem:[#allocation0 + $0x1f0] sm:$0xf] %v1138_v41  ;;  %v1140_v43 = vld [vmem:[%s1998_s0 + $0xf0] sm:$0xf] }
  0x21   :  { %178 = vst [vmem:[#allocation0 + $0x1e8] sm:$0xf] %v1139_v42  ;;  %v1141_v44 = vld [vmem:[%s1998_s0 + $0xec] sm:$0xf]  ;;  %v1142_v45 = vld [vmem:[%s1998_s0 + $0xe8] sm:$0xf] }
  0x22   :  { %183 = vst [vmem:[#allocation0 + $0x1e0] sm:$0xf] %v1140_v43  ;;  %188 = vst [vmem:[#allocation0 + $0x1d8] sm:$0xf] %v1141_v44  ;;  %v1143_v46 = vld [vmem:[%s1998_s0 + $0xe4] sm:$0xf] }
  0x23   :  { %193 = vst [vmem:[#allocation0 + $0x1d0] sm:$0xf] %v1142_v45  ;;  %v1144_v47 = vld [vmem:[%s1998_s0 + $0xe0] sm:$0xf]  ;;  %v1145_v48 = vld [vmem:[%s1998_s0 + $0xdc] sm:$0xf] }
  0x24   :  { %198 = vst [vmem:[#allocation0 + $0x1c8] sm:$0xf] %v1143_v46  ;;  %203 = vst [vmem:[#allocation0 + $0x1c0] sm:$0xf] %v1144_v47  ;;  %v1146_v49 = vld [vmem:[%s1998_s0 + $0xd8] sm:$0xf] }
  0x25   :  { %208 = vst [vmem:[#allocation0 + $0x1b8] sm:$0xf] %v1145_v48  ;;  %v1147_v50 = vld [vmem:[%s1998_s0 + $0xd4] sm:$0xf]  ;;  %v1148_v51 = vld [vmem:[%s1998_s0 + $0xd0] sm:$0xf] }
  0x26   :  { %213 = vst [vmem:[#allocation0 + $0x1b0] sm:$0xf] %v1146_v49  ;;  %218 = vst [vmem:[#allocation0 + $0x1a8] sm:$0xf] %v1147_v50  ;;  %v1149_v52 = vld [vmem:[%s1998_s0 + $0xcc] sm:$0xf] }
  0x27   :  { %223 = vst [vmem:[#allocation0 + $0x1a0] sm:$0xf] %v1148_v51  ;;  %v1150_v53 = vld [vmem:[%s1998_s0 + $0xc8] sm:$0xf]  ;;  %v1151_v54 = vld [vmem:[%s1998_s0 + $0xc4] sm:$0xf] }
  0x28   :  { %228 = vst [vmem:[#allocation0 + $0x198] sm:$0xf] %v1149_v52  ;;  %233 = vst [vmem:[#allocation0 + $0x190] sm:$0xf] %v1150_v53  ;;  %v1152_v55 = vld [vmem:[%s1998_s0 + $0xc0] sm:$0xf] }
  0x29   :  { %238 = vst [vmem:[#allocation0 + $0x188] sm:$0xf] %v1151_v54  ;;  %v728_v56 = vld [vmem:[#allocation0 + $0x212] ss:$7 sm:$0x7]   ;;  %s1552_s28 = smov 3 }
  0x2a   :  { %243 = vst [vmem:[#allocation0 + $0x180] sm:$0xf] %v1152_v55  ;;  %1244 = vst.msk [vmem:[%s1999_s1 + $0x5e] ss:$8 sm:$0x7] %vm482_vm0, %v728_v56   ;;  %s1613_s22 = smov 3 }
  0x2b   :  { %v1129_v57 = vld [vmem:[%s1998_s0 + $0x11c] sm:$0xf]  ;;  %v1156_v59 = vld [vmem:[%s1998_s0 + $0xb0] sm:$0xf]  ;;  %v1159_v60 = vld [vmem:[%s1998_s0 + $0xa4] sm:$0xf] }
  0x2c   :  { %v1153_v58 = vld [vmem:[%s1998_s0 + $0xbc] sm:$0xf]  ;;  %128 = vst [vmem:[#allocation0 + $0x238] sm:$0xf] %v1129_v57  ;;  %263 = vst [vmem:[#allocation0 + $0x160] sm:$0xf] %v1156_v59 }
  0x2d   :  { %248 = vst [vmem:[#allocation0 + $0x178] sm:$0xf] %v1153_v58  ;;  %v1161_v61 = vld [vmem:[%s1998_s0 + $0x9c] sm:$0xf]  ;;  %v1162_v62 = vld [vmem:[%s1998_s0 + $0x98] sm:$0xf] }
  0x2e   :  { %v717_v63 = vld [vmem:[#allocation0 + $0x1fa] ss:$7 sm:$0x7]   ;;  %278 = vst [vmem:[#allocation0 + $0x148] sm:$0xf] %v1159_v60  ;;  %s1629_s8 = smov 3 }
  0x2f   :  { %v860_v0 = vld [vmem:[#allocation0 + $0x18a] ss:$24 sm:$0xf0]   ;;  %288 = vst [vmem:[#allocation0 + $0x138] sm:$0xf] %v1161_v61  ;;  %s1634_s12 = smov 3 }
  0x30   :  { %293 = vst [vmem:[#allocation0 + $0x130] sm:$0xf] %v1162_v62  ;;  %v706_v1 = vld [vmem:[#allocation0 + $0x1e2] ss:$7 sm:$0x7]   ;;  %s1649_s23 = smov 3 }
  0x31   :  { %1242 = vst.msk [vmem:[%s1999_s1 + $0x5d] ss:$8 sm:$0x7] %vm482_vm0, %v717_v63   ;;  %v1164_v2 = vld [vmem:[%s1998_s0 + $0x90] sm:$0xf]  ;;  %s1651_s24 = smov 3 }
  0x32   :  { %v695_v3 = vld [vmem:[#allocation0 + $0x1ca] ss:$7 sm:$0x7]   ;;  %1240 = vst.msk [vmem:[%s1999_s1 + $0x5c] ss:$8 sm:$0x7] %vm482_vm0, %v706_v1  }
  0x33   :  { %303 = vst [vmem:[#allocation0 + $0x120] sm:$0xf] %v1164_v2  ;;  %v1165_v4 = vld [vmem:[%s1998_s0 + $0x8c] sm:$0xf]  ;;  %v1168_v6 = vld [vmem:[%s1998_s0 + $0x80] sm:$0xf] }
  0x34   :  { %v684_v5 = vld [vmem:[#allocation0 + $0x1b2] ss:$7 sm:$0x7]   ;;  %1238 = vst.msk [vmem:[%s1999_s1 + $0x5b] ss:$8 sm:$0x7] %vm482_vm0, %v695_v3  }
  0x35   :  { %308 = vst [vmem:[#allocation0 + $0x118] sm:$0xf] %v1165_v4  ;;  %v673_v7 = vld [vmem:[#allocation0 + $0x19a] ss:$7 sm:$0x7]   ;;  %s1694_s19 = smov 3 }
  0x36   :  { %1236 = vst.msk [vmem:[%s1999_s1 + $0x5a] ss:$8 sm:$0x7] %vm482_vm0, %v684_v5   ;;  %v858_v8 = vld [vmem:[#allocation0 + $0x18a] ss:$24 sm:$0xf]  }
  0x37   :  { %323 = vst [vmem:[#allocation0 + $0x100] sm:$0xf] %v1168_v6  ;;  %v662_v9 = vld [vmem:[#allocation0 + $0x182] ss:$7 sm:$0x7]   ;;  %v862_v10 = vsel %vm840_vm1, %v860_v0, %v858_v8  ;;  %s1717_s10 = smov 3 }
  0x38   :  { %1234 = vst.msk [vmem:[%s1999_s1 + $0x59] ss:$8 sm:$0x7] %vm482_vm0, %v673_v7   ;;  %v1171_v11 = vld [vmem:[%s1998_s0 + $0x74] sm:$0xf]  ;;  %863 = vrot.lane.b32.xlu1 %v862_v10, %s1280_s29  ;;  %s1723_s14 = smov 3 }
  0x39   :  { %1232 = vst.msk [vmem:[%s1999_s1 + $0x58] ss:$8 sm:$0x7] %vm482_vm0, %v662_v9   ;;  %v739_v12 = vld [vmem:[#allocation0 + $0x22a] ss:$7 sm:$0x7]  }
  0x3a   :  { %338 = vst [vmem:[#allocation0 + $0xe8] sm:$0xf] %v1171_v11  ;;  %v1174_v13 = vld [vmem:[%s1998_s0 + $0x68] sm:$0xf]  ;;  %v1106_v14 = vld [vmem:[%s1998_s0 + $0x178] sm:$0xf] }
  0x3b   :  { %1246 = vst.msk [vmem:[%s1999_s1 + $0x5f] ss:$8 sm:$0x7] %vm482_vm0, %v739_v12   ;;  %353 = vst [vmem:[#allocation0 + $0xd0] sm:$0xf] %v1174_v13  ;;  %s1780_s20 = smov 3 }
  0x3c   :  { %13 = vst [vmem:[#allocation0 + $0x2f0] sm:$0xf] %v1106_v14  ;;  %v1109_v15 = vld [vmem:[%s1998_s0 + $0x16c] sm:$0xf]  ;;  %v1112_v16 = vld [vmem:[%s1998_s0 + $0x160] sm:$0xf] }
  0x3d   :  { %v1115_v17 = vld [vmem:[%s1998_s0 + $0x154] sm:$0xf]  ;;  %28 = vst [vmem:[#allocation0 + $0x2d8] sm:$0xf] %v1109_v15  ;;  %43 = vst [vmem:[#allocation0 + $0x2c0] sm:$0xf] %v1112_v16 }
  0x3e   :  { %58 = vst [vmem:[#allocation0 + $0x2a8] sm:$0xf] %v1115_v17  ;;  %v1117_v18 = vld [vmem:[%s1998_s0 + $0x14c] sm:$0xf]  ;;  %v1118_v19 = vld [vmem:[%s1998_s0 + $0x148] sm:$0xf] }
  0x3f   :  { %v1119_v20 = vld [vmem:[%s1998_s0 + $0x144] sm:$0xf]  ;;  %v849_v22 = vld [vmem:[#allocation0 + $0xd1] ss:$24 sm:$0xf0]   ;;  %s1789_s5 = smov 3 }
  0x40   :  { %v613_v21 = vld [vmem:[#allocation0 + $0x11a] ss:$6 sm:%s1468_s7]   ;;  %68 = vst [vmem:[#allocation0 + $0x298] sm:$0xf] %v1117_v18  ;;  %73 = vst [vmem:[#allocation0 + $0x290] sm:$0xf] %v1118_v19 }
  0x41   :  { %78 = vst [vmem:[#allocation0 + $0x288] sm:$0xf] %v1119_v20  ;;  %v1120_v23 = vld [vmem:[%s1998_s0 + $0x140] sm:$0xf]  ;;  %v1121_v24 = vld [vmem:[%s1998_s0 + $0x13c] sm:$0xf] }
  0x42   :  { %1223 = vst.msk [vmem:[%s1999_s1 + $0x4b] ss:$-31 sm:$0x3] %vm482_vm0, %v613_v21   ;;  %83 = vst [vmem:[#allocation0 + $0x280] sm:$0xf] %v1120_v23  ;;  %s799_s30 = smov 3 }
  0x43   :  { %88 = vst [vmem:[#allocation0 + $0x278] sm:$0xf] %v1121_v24  ;;  %v1122_v25 = vld [vmem:[%s1998_s0 + $0x138] sm:$0xf]  ;;  %v1123_v26 = vld [vmem:[%s1998_s0 + $0x134] sm:$0xf] }
  0x44   :  { %v1124_v27 = vld [vmem:[%s1998_s0 + $0x130] sm:$0xf]  ;;  %93 = vst [vmem:[#allocation0 + $0x270] sm:$0xf] %v1122_v25  ;;  %98 = vst [vmem:[#allocation0 + $0x268] sm:$0xf] %v1123_v26 }
  0x45   :  { %103 = vst [vmem:[#allocation0 + $0x260] sm:$0xf] %v1124_v27  ;;  %v1125_v28 = vld [vmem:[%s1998_s0 + $0x12c] sm:$0xf]  ;;  %v1126_v29 = vld [vmem:[%s1998_s0 + $0x128] sm:$0xf] }
  0x46   :  { %v1127_v30 = vld [vmem:[%s1998_s0 + $0x124] sm:$0xf]  ;;  %108 = vst [vmem:[#allocation0 + $0x258] sm:$0xf] %v1125_v28  ;;  %113 = vst [vmem:[#allocation0 + $0x250] sm:$0xf] %v1126_v29 }
  0x47   :  { %118 = vst [vmem:[#allocation0 + $0x248] sm:$0xf] %v1127_v30  ;;  %v1128_v31 = vld [vmem:[%s1998_s0 + $0x120] sm:$0xf]  ;;  %v1178_v32 = vld [vmem:[%s1998_s0 + $0x58] sm:$0xf] }
  0x48   :  { %v1181_v33 = vld [vmem:[%s1998_s0 + $0x4c] sm:$0xf]  ;;  %v847_v34 = vld [vmem:[#allocation0 + $0xd1] ss:$24 sm:$0xf]   ;;  %s810_s2 = smov 3 }
  0x49   :  { %123 = vst [vmem:[#allocation0 + $0x240] sm:$0xf] %v1128_v31  ;;  %373 = vst [vmem:[#allocation0 + $0xb0] sm:$0xf] %v1178_v32  ;;  %v1184_v35 = vld [vmem:[%s1998_s0 + $0x40] sm:$0xf]  ;;  %v851_v36 = vsel %vm840_vm1, %v849_v22, %v847_v34 }
  0x4a   :  { %388 = vst [vmem:[#allocation0 + $0x98] sm:$0xf] %v1181_v33  ;;  %403 = vst [vmem:[#allocation0 + $0x80] sm:$0xf] %v1184_v35  ;;  %v1187_v37 = vld [vmem:[%s1998_s0 + $0x34] sm:$0xf]  ;;  %852 = vrot.lane.b32.xlu0 %v851_v36, %s1280_s29 }
  0x4b   :  { %v1190_v38 = vld [vmem:[%s1998_s0 + $0x28] sm:$0xf]  ;;  %v1155_v39 = vld [vmem:[%s1998_s0 + $0xb4] sm:$0xf]  ;;  %418 = vst [vmem:[#allocation0 + $0x68] sm:$0xf] %v1187_v37 }
  0x4c   :  { %v871_v40 = vld [vmem:[#allocation0 + $0x248] ss:$24 sm:$0xf0]   ;;  %433 = vst [vmem:[#allocation0 + $0x50] sm:$0xf] %v1190_v38  ;;  %s821_s13 = smov 3 }
  0x4d   :  { %258 = vst [vmem:[#allocation0 + $0x168] sm:$0xf] %v1155_v39  ;;  %v1158_v41 = vld [vmem:[%s1998_s0 + $0xa8] sm:$0xf]  ;;  %v1167_v43 = vld [vmem:[%s1998_s0 + $0x84] sm:$0xf] }
  0x4e   :  { %v783_v42 = vld [vmem:[#allocation0 + $0x28a] ss:$7 sm:$0x7]   ;;  %273 = vst [vmem:[#allocation0 + $0x150] sm:$0xf] %v1158_v41 }
  0x4f   :  { %1254 = vst.msk [vmem:[%s1999_s1 + $0x83] ss:$8 sm:$0x7] %vm482_vm0, %v783_v42   ;;  %318 = vst [vmem:[#allocation0 + $0x108] sm:$0xf] %v1167_v43 }
  0x50   :  { %v1170_v44 = vld [vmem:[%s1998_s0 + $0x78] sm:$0xf]  ;;  %v1173_v45 = vld [vmem:[%s1998_s0 + $0x6c] sm:$0xf]  ;;  %v1107_v46 = vld [vmem:[%s1998_s0 + $0x174] sm:$0xf] }
  0x51   :  { %v772_v47 = vld [vmem:[#allocation0 + $0x272] ss:$7 sm:$0x7]   ;;  %333 = vst [vmem:[#allocation0 + $0xf0] sm:$0xf] %v1170_v44 }
  0x52   :  { %348 = vst [vmem:[#allocation0 + $0xd8] sm:$0xf] %v1173_v45  ;;  %18 = vst [vmem:[#allocation0 + $0x2e8] sm:$0xf] %v1107_v46  ;;  %v745_v54 = vld [vmem:[#allocation0 + $0x23a] ss:$6 sm:%s1550_s27]  }
  0x53   :  { %v761_v48 = vld [vmem:[#allocation0 + $0x25a] ss:$7 sm:$0x7]   ;;  %1252 = vst.msk [vmem:[%s1999_s1 + $0x82] ss:$8 sm:$0x7] %vm482_vm0, %v772_v47  }
  0x54   :  { %v869_v49 = vld [vmem:[#allocation0 + $0x248] ss:$24 sm:$0xf]   ;;  %1250 = vst.msk [vmem:[%s1999_s1 + $0x81] ss:$8 sm:$0x7] %vm482_vm0, %v761_v48  }
  0x55   :  { %v750_v50 = vld [vmem:[#allocation0 + $0x242] ss:$7 sm:$0x7]   ;;  %v873_v51 = vsel %vm840_vm1, %v871_v40, %v869_v49  ;;  %1247 = vst.msk [vmem:[%s1999_s1 + $0x77] sm:$0x3] %vm482_vm0, %v745_v54  }
  0x56   :  { %v902_v52 = vld [vmem:[#allocation0 + $0x191] ss:$24 sm:$0xf]   ;;  %1248 = vst.msk [vmem:[%s1999_s1 + $0x80] ss:$8 sm:$0x7] %vm482_vm0, %v750_v50   ;;  %874 = vrot.lane.b32.xlu1 %v873_v51, %s1280_s29 }
  0x57   :  { %v904_v53 = vld [vmem:[#allocation0 + $0x191] ss:$24 sm:$0xf0]   ;;  %v880_v57 = vld [vmem:[#allocation0 + $0x8] ss:$24 sm:$0xf]  }
  0x58   :  { %v1108_v55 = vld [vmem:[%s1998_s0 + $0x170] sm:$0xf]  ;;  %v1110_v56 = vld [vmem:[%s1998_s0 + $0x168] sm:$0xf]  ;;  %v1111_v62 = vld [vmem:[%s1998_s0 + $0x164] sm:$0xf]  ;;  %v906_v3 = vsel %vm840_vm1, %v904_v53, %v902_v52 }
  0x59   :  { %v882_v58 = vld [vmem:[#allocation0 + $0x8] ss:$24 sm:$0xf0]   ;;  %23 = vst [vmem:[#allocation0 + $0x2e0] sm:$0xf] %v1108_v55 }
  0x5a   :  { %33 = vst [vmem:[#allocation0 + $0x2d0] sm:$0xf] %v1110_v56  ;;  %v884_v59 = vsel %vm840_vm1, %v882_v58, %v880_v57  ;;  %v624_v60 = vld [vmem:[#allocation0 + $0x132] ss:$6 sm:%s1531_s16]   ;;  %v602_v63 = vld [vmem:[#allocation0 + $0x102] ss:$6 sm:%s1517_s9]  }
  0x5b   :  { %v635_v61 = vld [vmem:[#allocation0 + $0x14a] ss:$6 sm:%s1541_s21]   ;;  %885 = vrot.lane.b32.xlu0 %v884_v59, %s1280_s29  ;;  %1225 = vst.msk [vmem:[%s1999_s1 + $0x4c] ss:$-31 sm:$0x3] %vm482_vm0, %v624_v60   ;;  %s1730_s21 = smov 3 }
  0x5c   :  { %1227 = vst.msk [vmem:[%s1999_s1 + $0x4d] ss:$-31 sm:$0x3] %vm482_vm0, %v635_v61   ;;  %v893_v0 = vld [vmem:[#allocation0 + $0xc1] ss:$24 sm:$0xf0]  }
  0x5d   :  { %38 = vst [vmem:[#allocation0 + $0x2c8] sm:$0xf] %v1111_v62  ;;  %v580_v1 = vld [vmem:[#allocation0 + $0xd2] ss:$6 sm:%s1499_s26]   ;;  %v1157_v25 = vld [vmem:[%s1998_s0 + $0xac] sm:$0xf] }
  0x5e   :  { %v591_v2 = vld [vmem:[#allocation0 + $0xea] ss:$6 sm:%s1508_s3]   ;;  %1221 = vst.msk [vmem:[%s1999_s1 + $0x4a] ss:$-31 sm:$0x3] %vm482_vm0, %v602_v63  }
  0x5f   :  { %v1113_v4 = vld [vmem:[%s1998_s0 + $0x15c] sm:$0xf]  ;;  %1217 = vst.msk [vmem:[%s1999_s1 + $0x48] ss:$-31 sm:$0x3] %vm482_vm0, %v580_v1   ;;  %907 = vrot.lane.b32.xlu0 %v906_v3, %s1280_s29 }
  0x60   :  { %1219 = vst.msk [vmem:[%s1999_s1 + $0x49] ss:$-31 sm:$0x3] %vm482_vm0, %v591_v2   ;;  %v891_v5 = vld [vmem:[#allocation0 + $0xc1] ss:$24 sm:$0xf]  }
  0x61   :  { %48 = vst [vmem:[#allocation0 + $0x2b8] sm:$0xf] %v1113_v4  ;;  %v1114_v6 = vld [vmem:[%s1998_s0 + $0x158] sm:$0xf]  ;;  %v895_v7 = vsel %vm840_vm1, %v893_v0, %v891_v5  ;;  %v1116_v8 = vld [vmem:[%s1998_s0 + $0x150] sm:$0xf] }
  0x62   :  { %53 = vst [vmem:[#allocation0 + $0x2b0] sm:$0xf] %v1114_v6  ;;  %v913_v9 = vld [vmem:[#allocation0 + $0x24a] ss:$24 sm:$0xf]   ;;  %896 = vrot.lane.b32.xlu1 %v895_v7, %s1280_s29 }
  0x63   :  { %63 = vst [vmem:[#allocation0 + $0x2a0] sm:$0xf] %v1116_v8  ;;  %v915_v10 = vld [vmem:[#allocation0 + $0x24a] ss:$24 sm:$0xf0]  }
  0x64   :  { %v1105_v11 = vld [vmem:[%s1998_s0 + $0x17c] sm:$0xf]  ;;  %v816_v12 = vld [vmem:[#allocation0 + $0x2d2] ss:$7 sm:$0x7]   ;;  %v917_v13 = vsel %vm840_vm1, %v915_v10, %v913_v9 }
  0x65   :  { %8 = vst [vmem:[#allocation0 + $0x2f8] sm:$0xf] %v1105_v11  ;;  %v508_v14 = vld [vmem:[#allocation0 + $0x32] ss:$7 sm:$0x7]  }
  0x66   :  { %1260 = vst.msk [vmem:[%s1999_s1 + $0x86] ss:$8 sm:$0x7] %vm482_vm0, %v816_v12   ;;  %1204 = vst.msk [vmem:[%s1999_s1 + $0xa] ss:$8 sm:$0x7] %vm482_vm0, %v508_v14   ;;  %918 = vrot.lane.b32.xlu1 %v917_v13, %s1280_s29 }
  0x67   :  { %v519_v15 = vld [vmem:[#allocation0 + $0x4a] ss:$7 sm:$0x7]   ;;  %v530_v16 = vld [vmem:[#allocation0 + $0x62] ss:$7 sm:$0x7]  }
  0x68   :  { %1206 = vst.msk [vmem:[%s1999_s1 + $0xb] ss:$8 sm:$0x7] %vm482_vm0, %v519_v15   ;;  %1208 = vst.msk [vmem:[%s1999_s1 + $0xc] ss:$8 sm:$0x7] %vm482_vm0, %v530_v16  }
  0x69   :  { %v541_v17 = vld [vmem:[#allocation0 + $0x7a] ss:$7 sm:$0x7]   ;;  %v552_v18 = vld [vmem:[#allocation0 + $0x92] ss:$7 sm:$0x7]  }
  0x6a   :  { %1210 = vst.msk [vmem:[%s1999_s1 + $0xd] ss:$8 sm:$0x7] %vm482_vm0, %v541_v17   ;;  %1212 = vst.msk [vmem:[%s1999_s1 + $0xe] ss:$8 sm:$0x7] %vm482_vm0, %v552_v18  }
  0x6b   :  { %v563_v19 = vld [vmem:[#allocation0 + $0xaa] ss:$7 sm:$0x7]   ;;  %v805_v21 = vld [vmem:[#allocation0 + $0x2ba] ss:$7 sm:$0x7]  }
  0x6c   :  { %v924_v20 = vld [vmem:[#allocation0 + $0xa] ss:$24 sm:$0xf]   ;;  %1214 = vst.msk [vmem:[%s1999_s1 + $0xf] ss:$8 sm:$0x7] %vm482_vm0, %v563_v19  }
  0x6d   :  { %v926_v22 = vld [vmem:[#allocation0 + $0xa] ss:$24 sm:$0xf0]   ;;  %1258 = vst.msk [vmem:[%s1999_s1 + $0x85] ss:$8 sm:$0x7] %vm482_vm0, %v805_v21  }
  0x6e   :  { %v928_v23 = vsel %vm840_vm1, %v926_v22, %v924_v20  ;;  %v1154_v24 = vld [vmem:[%s1998_s0 + $0xb8] sm:$0xf]  ;;  %v1160_v26 = vld [vmem:[%s1998_s0 + $0xa0] sm:$0xf]  ;;  %268 = vst [vmem:[#allocation0 + $0x158] sm:$0xf] %v1157_v25 }
  0x6f   :  { %v794_v27 = vld [vmem:[#allocation0 + $0x2a2] ss:$7 sm:$0x7]   ;;  %929 = vrot.lane.b32.xlu0 %v928_v23, %s1280_s29  ;;  %253 = vst [vmem:[#allocation0 + $0x170] sm:$0xf] %v1154_v24 }
  0x70   :  { %283 = vst [vmem:[#allocation0 + $0x140] sm:$0xf] %v1160_v26  ;;  %v1163_v28 = vld [vmem:[%s1998_s0 + $0x94] sm:$0xf]  ;;  %v1166_v30 = vld [vmem:[%s1998_s0 + $0x88] sm:$0xf] }
  0x71   :  { %1256 = vst.msk [vmem:[%s1999_s1 + $0x84] ss:$8 sm:$0x7] %vm482_vm0, %v794_v27   ;;  %v827_v29 = vld [vmem:[#allocation0 + $0x2ea] ss:$7 sm:$0x7]  }
  0x72   :  { %298 = vst [vmem:[#allocation0 + $0x128] sm:$0xf] %v1163_v28  ;;  %1262 = vst.msk [vmem:[%s1999_s1 + $0x87] ss:$8 sm:$0x7] %vm482_vm0, %v827_v29  }
  0x73   :  { %313 = vst [vmem:[#allocation0 + $0x110] sm:$0xf] %v1166_v30  ;;  %v1169_v31 = vld [vmem:[%s1998_s0 + $0x7c] sm:$0xf]  ;;  %v1172_v32 = vld [vmem:[%s1998_s0 + $0x70] sm:$0xf] }
  0x74   :  { %v1175_v33 = vld [vmem:[%s1998_s0 + $0x64] sm:$0xf]  ;;  %328 = vst [vmem:[#allocation0 + $0xf8] sm:$0xf] %v1169_v31  ;;  %343 = vst [vmem:[#allocation0 + $0xe0] sm:$0xf] %v1172_v32 }
  0x75   :  { %358 = vst [vmem:[#allocation0 + $0xc8] sm:$0xf] %v1175_v33  ;;  %v646_v34 = vld [vmem:[#allocation0 + $0x162] ss:$6 sm:%s1552_s28]   ;;  %v668_v36 = vld [vmem:[#allocation0 + $0x192] ss:$6 sm:%s1629_s8]  }
  0x76   :  { %v657_v35 = vld [vmem:[#allocation0 + $0x17a] ss:$6 sm:%s1613_s22]   ;;  %1229 = vst.msk [vmem:[%s1999_s1 + $0x4e] ss:$-31 sm:$0x3] %vm482_vm0, %v646_v34  }
  0x77   :  { %1231 = vst.msk [vmem:[%s1999_s1 + $0x4f] sm:$0x3] %vm482_vm0, %v657_v35   ;;  %1233 = vst.msk [vmem:[%s1999_s1 + $0x70] ss:$-31 sm:$0x3] %vm482_vm0, %v668_v36  }
  0x78   :  { %v679_v37 = vld [vmem:[#allocation0 + $0x1aa] ss:$6 sm:%s1634_s12]   ;;  %v701_v39 = vld [vmem:[#allocation0 + $0x1da] ss:$6 sm:%s1651_s24]  }
  0x79   :  { %v690_v38 = vld [vmem:[#allocation0 + $0x1c2] ss:$6 sm:%s1649_s23]   ;;  %1235 = vst.msk [vmem:[%s1999_s1 + $0x71] ss:$-31 sm:$0x3] %vm482_vm0, %v679_v37  }
  0x7a   :  { %1237 = vst.msk [vmem:[%s1999_s1 + $0x72] ss:$-31 sm:$0x3] %vm482_vm0, %v690_v38   ;;  %1239 = vst.msk [vmem:[%s1999_s1 + $0x73] ss:$-31 sm:$0x3] %vm482_vm0, %v701_v39  }
  0x7b   :  { %v712_v40 = vld [vmem:[#allocation0 + $0x1f2] ss:$6 sm:%s1694_s19]   ;;  %v734_v42 = vld [vmem:[#allocation0 + $0x222] ss:$6 sm:%s1723_s14]   ;;  %s788_s19 = smov 3 }
  0x7c   :  { %v723_v41 = vld [vmem:[#allocation0 + $0x20a] ss:$6 sm:%s1717_s10]   ;;  %1241 = vst.msk [vmem:[%s1999_s1 + $0x74] ss:$-31 sm:$0x3] %vm482_vm0, %v712_v40  }
  0x7d   :  { %1243 = vst.msk [vmem:[%s1999_s1 + $0x75] ss:$-31 sm:$0x3] %vm482_vm0, %v723_v41   ;;  %v946_v43 = vld [vmem:[#allocation0 + $0x181] ss:$24 sm:$0xf]  }
  0x7e   :  { %v948_v44 = vld [vmem:[#allocation0 + $0x181] ss:$24 sm:$0xf0]   ;;  %1245 = vst.msk [vmem:[%s1999_s1 + $0x76] ss:$-31 sm:$0x3] %vm482_vm0, %v734_v42  }
  0x7f   :  { %v629_v45 = vld [vmem:[#allocation0 + $0x13a] ss:$7 sm:$0x7]   ;;  %v640_v46 = vld [vmem:[#allocation0 + $0x152] ss:$7 sm:$0x7]   ;;  %v950_v47 = vsel %vm840_vm1, %v948_v44, %v946_v43 }
  0x80   :  { %v618_v48 = vld [vmem:[#allocation0 + $0x122] ss:$7 sm:$0x7]   ;;  %1226 = vst.msk [vmem:[%s1999_s1 + $0x35] ss:$8 sm:$0x7] %vm482_vm0, %v629_v45   ;;  %951 = vrot.lane.b32.xlu0 %v950_v47, %s1280_s29 }
  0x81   :  { %1228 = vst.msk [vmem:[%s1999_s1 + $0x36] ss:$8 sm:$0x7] %vm482_vm0, %v640_v46   ;;  %v651_v49 = vld [vmem:[#allocation0 + $0x16a] ss:$7 sm:$0x7]  }
  0x82   :  { %v607_v50 = vld [vmem:[#allocation0 + $0x10a] ss:$7 sm:$0x7]   ;;  %1224 = vst.msk [vmem:[%s1999_s1 + $0x34] ss:$8 sm:$0x7] %vm482_vm0, %v618_v48  }
  0x83   :  { %1230 = vst.msk [vmem:[%s1999_s1 + $0x37] ss:$8 sm:$0x7] %vm482_vm0, %v651_v49   ;;  %v937_v51 = vld [vmem:[#allocation0 + $0xc8] ss:$24 sm:$0xf0]  }
  0x84   :  { %v574_v52 = vld [vmem:[#allocation0 + $0xc2] ss:$7 sm:$0x7]   ;;  %v585_v53 = vld [vmem:[#allocation0 + $0xda] ss:$7 sm:$0x7]  }
  0x85   :  { %1222 = vst.msk [vmem:[%s1999_s1 + $0x33] ss:$8 sm:$0x7] %vm482_vm0, %v607_v50   ;;  %1216 = vst.msk [vmem:[%s1999_s1 + $0x30] ss:$8 sm:$0x7] %vm482_vm0, %v574_v52  }
  0x86   :  { %1218 = vst.msk [vmem:[%s1999_s1 + $0x31] ss:$8 sm:$0x7] %vm482_vm0, %v585_v53   ;;  %v596_v54 = vld [vmem:[#allocation0 + $0xf2] ss:$7 sm:$0x7]  }
  0x87   :  { %v935_v55 = vld [vmem:[#allocation0 + $0xc8] ss:$24 sm:$0xf]   ;;  %1220 = vst.msk [vmem:[%s1999_s1 + $0x32] ss:$8 sm:$0x7] %vm482_vm0, %v596_v54  }
  0x88   :  { %v939_v56 = vsel %vm840_vm1, %v937_v51, %v935_v55  ;;  %v957_v57 = vld [vmem:[#allocation0 + $0x251] ss:$24 sm:$0xf]   ;;  %v832_v59 = vld [vmem:[#allocation0 + $0x2fa] sm:$0x1]  }
  0x89   :  { %v959_v58 = vld [vmem:[#allocation0 + $0x251] ss:$24 sm:$0xf0]   ;;  %940 = vrot.lane.b32.xlu1 %v939_v56, %s1280_s29  ;;  %v569_v60 = vld [vmem:[#allocation0 + $0xba] ss:$6 sm:%s1730_s21]  }
  0x8a   :  { %v756_v61 = vld [vmem:[#allocation0 + $0x252] ss:$6 sm:%s1780_s20]   ;;  %v961_v62 = vsel %vm840_vm1, %v959_v58, %v957_v57  ;;  %1263 = vst.msk [vmem:[%s1999_s1 + $0x9f] sm:$0x1] %vm482_vm0, %v832_v59   ;;  %1215 = vst.msk [vmem:[%s1999_s1 + $0x27] sm:$0x3] %vm482_vm0, %v569_v60  }
  0x8b   :  { %v968_v63 = vld [vmem:[#allocation0 + $0x11] ss:$24 sm:$0xf]   ;;  %1249 = vst.msk [vmem:[%s1999_s1 + $0x98] ss:$-31 sm:$0x3] %vm482_vm0, %v756_v61  }
  0x8c   :  { %v970_v0 = vld [vmem:[#allocation0 + $0x11] ss:$24 sm:$0xf0]   ;;  %v979_v2 = vld [vmem:[#allocation0 + $0xca] ss:$24 sm:$0xf]  }
  0x8d   :  { %v972_v1 = vsel %vm840_vm1, %v970_v0, %v968_v63  ;;  %v981_v3 = vld [vmem:[#allocation0 + $0xca] ss:$24 sm:$0xf0]   ;;  %v990_v4 = vld [vmem:[#allocation0 + $0x188] ss:$24 sm:$0xf]   ;;  %962 = vrot.lane.b32.xlu1 %v961_v62, %s1280_s29 }
  0x8e   :  { %973 = vrot.lane.b32.xlu0 %v972_v1, %s1280_s29  ;;  %v992_v5 = vld [vmem:[#allocation0 + $0x188] ss:$24 sm:$0xf0]   ;;  %v983_v8 = vsel %vm840_vm1, %v981_v3, %v979_v2  ;;  %v1001_v13 = vld [vmem:[#allocation0 + $0x241] ss:$24 sm:$0xf]  }
  0x8f   :  { %v994_v6 = vsel %vm840_vm1, %v992_v5, %v990_v4  ;;  %v767_v7 = vld [vmem:[#allocation0 + $0x26a] ss:$6 sm:%s1789_s5]   ;;  %s777_s5 = smov 3  ;;  %v789_v10 = vld [vmem:[#allocation0 + $0x29a] ss:$6 sm:%s788_s19]   ;;  %v843_v17 = vpop.permute.xlu0 %842  }
  0x90   :  { %1251 = vst.msk [vmem:[%s1999_s1 + $0x99] ss:$-31 sm:$0x3] %vm482_vm0, %v767_v7   ;;  %v778_v9 = vld [vmem:[#allocation0 + $0x282] ss:$6 sm:%s777_s5]  }
  0x91   :  { %1253 = vst.msk [vmem:[%s1999_s1 + $0x9a] ss:$-31 sm:$0x3] %vm482_vm0, %v778_v9   ;;  %1255 = vst.msk [vmem:[%s1999_s1 + $0x9b] ss:$-31 sm:$0x3] %vm482_vm0, %v789_v10   ;;  %984 = vrot.lane.b32.xlu1 %v983_v8, %s1280_s29 }
  0x92   :  { %v800_v11 = vld [vmem:[#allocation0 + $0x2b2] ss:$6 sm:%s799_s30]   ;;  %995 = vrot.lane.b32.xlu0 %v994_v6, %s1280_s29  ;;  %v1003_v14 = vld [vmem:[#allocation0 + $0x241] ss:$24 sm:$0xf0]   ;;  %845 = vst.msk [vmem:[%s1999_s1] sm:$0xff] %vm844_vm2, %v843_v17  }
  0x93   :  { %v811_v12 = vld [vmem:[#allocation0 + $0x2ca] ss:$6 sm:%s810_s2]   ;;  %1257 = vst.msk [vmem:[%s1999_s1 + $0x9c] ss:$-31 sm:$0x3] %vm482_vm0, %v800_v11   ;;  %v1005_v16 = vsel %vm840_vm1, %v1003_v14, %v1001_v13 }
  0x94   :  { %1259 = vst.msk [vmem:[%s1999_s1 + $0x9d] ss:$-31 sm:$0x3] %vm482_vm0, %v811_v12   ;;  %v822_v15 = vld [vmem:[#allocation0 + $0x2e2] ss:$6 sm:%s821_s13]  }
  0x95   :  { %1261 = vst.msk [vmem:[%s1999_s1 + $0x9e] ss:$-31 sm:$0x3] %vm482_vm0, %v822_v15   ;;  %1006 = vrot.lane.b32.xlu1 %v1005_v16, %s1280_s29 }
  0xaa   :  { %v864_v18 = vpop.permute.xlu1 %863  }
  0xab   :  { %1265 = vst.msk [vmem:[%s1999_s1 + $0x60] sm:$0xff] %vm844_vm2, %v864_v18  }
  0xbc   :  { %v853_v19 = vpop.permute.xlu0 %852  }
  0xbd   :  { %1264 = vst.msk [vmem:[%s1999_s1 + $0x40] sm:$0xff] %vm844_vm2, %v853_v19  }
  0xc8   :  { %v875_v20 = vpop.permute.xlu1 %874  }
  0xc9   :  { %1266 = vst.msk [vmem:[%s1999_s1 + $0x80] sm:$0xff] %vm844_vm2, %v875_v20  }
  0xcd   :  { %v886_v21 = vpop.permute.xlu0 %885  }
  0xce   :  { %1267 = vst.msk [vmem:[%s1999_s1 + $0x8] sm:$0xff] %vm844_vm2, %v886_v21  }
  0xd1   :  { %v908_v23 = vpop.permute.xlu0 %907  }
  0xd2   :  { %1269 = vst.msk [vmem:[%s1999_s1 + $0x68] sm:$0xff] %vm844_vm2, %v908_v23  }
  0xd4   :  { %v897_v22 = vpop.permute.xlu1 %896  }
  0xd5   :  { %1268 = vst.msk [vmem:[%s1999_s1 + $0x28] sm:$0xff] %vm844_vm2, %v897_v22  }
  0xd8   :  { %v919_v24 = vpop.permute.xlu1 %918  }
  0xd9   :  { %1270 = vst.msk [vmem:[%s1999_s1 + $0x88] sm:$0xff] %vm844_vm2, %v919_v24  }
  0xe1   :  { %v930_v25 = vpop.permute.xlu0 %929  }
  0xe2   :  { %1271 = vst.msk [vmem:[%s1999_s1 + $0x10] sm:$0xff] %vm844_vm2, %v930_v25  }
  0xf2   :  { %v952_v26 = vpop.permute.xlu0 %951  }
  0xf3   :  { %1273 = vst.msk [vmem:[%s1999_s1 + $0x50] sm:$0xff] %vm844_vm2, %v952_v26  }
  0xfb   :  { %v941_v27 = vpop.permute.xlu1 %940  }
  0xfc   :  { %1272 = vst.msk [vmem:[%s1999_s1 + $0x30] sm:$0xff] %vm844_vm2, %v941_v27  }
  0xff   :  { %v963_v29 = vpop.permute.xlu1 %962  }
 0x100   :  { %v974_v28 = vpop.permute.xlu0 %973   ;;  %1274 = vst.msk [vmem:[%s1999_s1 + $0x90] sm:$0xff] %vm844_vm2, %v963_v29  }
 0x101   :  { %1275 = vst.msk [vmem:[%s1999_s1 + $0x18] sm:$0xff] %vm844_vm2, %v974_v28  }
 0x103   :  { %v985_v31 = vpop.permute.xlu1 %984  }
 0x104   :  { %v996_v30 = vpop.permute.xlu0 %995   ;;  %1276 = vst.msk [vmem:[%s1999_s1 + $0x38] sm:$0xff] %vm844_vm2, %v985_v31  }
 0x105   :  { %1277 = vst.msk [vmem:[%s1999_s1 + $0x58] sm:$0xff] %vm844_vm2, %v996_v30  }
 0x107   :  { %v1007_v32 = vpop.permute.xlu1 %1006  }
 0x108   :  { %1278 = vst.msk [vmem:[%s1999_s1 + $0x78] sm:$0xff] %vm844_vm2, %v1007_v32  }

// kernel: tile.28
= control target key start
LH: loop header
LB: loop body
LE: loop exit
PB: predicated region body
PF: predicated region fallthrough
CT: control target
= control target key end

     0   :  { %s22_s0 = inlined_call_operand.vmem [shape: f32[32], index: 0, kind: input, shape index: {}]   ;;  %s23_s1 = inlined_call_operand.vmem [shape: f32[2,32], index: 1, kind: output, shape index: {}]  }
   0x1   :  { %v4_v0 = vld [vmem:[%s22_s0] ss:$0 sm:$0xff] }
   0x2   :  { %5 = vst [vmem:[%s23_s1] sm:$0x3] %v4_v0 }

// kernel: tile.29
= control target key start
LH: loop header
LB: loop body
LE: loop exit
PB: predicated region body
PF: predicated region fallthrough
CT: control target
= control target key end

     0   :  { %vm7_vm0 = vcmask 261120   ;;  %vm13_vm1 = vcmask 523520   ;;  %s39_s0 = inlined_call_operand.vmem [shape: f32[2,32], index: 0, kind: input, shape index: {}]   ;;  %s40_s1 = inlined_call_operand.vmem [shape: f32[64], index: 1, kind: output, shape index: {}]  }
   0x1   :  { %v4_v0 = vld [vmem:[%s39_s0] sm:$0x3]  ;;  %s22_s0 = smov 32  }
   0x2   :  { %5 = vst [vmem:[#allocation1] sm:$0x3] %v4_v0 }
   0x9   :  { %v10_v1 = vld [vmem:[#allocation1 + $0x1] sm:$0x1]   ;;  %v6_v2 = vld [vmem:[#allocation1] sm:$0x1]  }
   0xa   :  { %11 = vrot.lane.b32.xlu0 %v10_v1, %s22_s0  ;;  %8 = vst.msk [vmem:[#allocation0] sm:$0x1] %vm7_vm0, %v6_v2  }
  0x7c   :  { %v12_v3 = vpop.permute.xlu0 %11  }
  0x7d   :  { %14 = vst.msk [vmem:[#allocation0] sm:$0x1] %vm13_vm1, %v12_v3  }
  0x84   :  { %v18_v4 = vld [vmem:[#allocation0] sm:$0x1] }
  0x85   :  { %20 = vst [vmem:[%s40_s1] sm:$0x1] %v18_v4 }

// kernel: tile.33
= control target key start
LH: loop header
LB: loop body
LE: loop exit
PB: predicated region body
PF: predicated region fallthrough
CT: control target
= control target key end

     0   :  { %s22_s0 = inlined_call_operand.vmem [shape: f32[64], index: 0, kind: input, shape index: {}]   ;;  %s23_s1 = inlined_call_operand.vmem [shape: f32[2,64], index: 1, kind: output, shape index: {}]  }
   0x1   :  { %v4_v0 = vld [vmem:[%s22_s0] ss:$0 sm:$0xff] }
   0x2   :  { %5 = vst [vmem:[%s23_s1] sm:$0x3] %v4_v0 }

// kernel: discriminator_x.1
= control target key start
LH: loop header
LB: loop body
LE: loop exit
PB: predicated region body
PF: predicated region fallthrough
CT: control target
= control target key end

     0   :  { %v11758_v0 = vmov 0.0   ;;  %vm175_vm0 = vcmask 1040384   ;;  %vm11759_vm1 = vmmov 0   ;;  %vm135_vm2 = vcmask 146432   ;;  %s13980_s1 = inlined_call_operand.vmem [shape: bf16[18,64], index: 1, kind: input, shape index: {}]   ;;  %s13981_s0 = inlined_call_operand.vmem [shape: bf16[196,18], index: 0, kind: input, shape index: {}]   ;;  %s13982_s2 = inlined_call_operand.vmem [shape: bf16[64,1152], index: 2, kind: input, shape index: {}]   ;;  %s13983_s4 = inlined_call_operand.vmem [shape: f32[5,128], index: 4, kind: input, shape index: {}]   ;;  %s13984_s5 = inlined_call_operand.vmem [shape: bf16[49,1872], index: 5, kind: input, shape index: {}]   ;;  %s13985_s3 = inlined_call_operand.vmem [shape: bf16[3,128,1152], index: 3, kind: input, shape index: {}]   ;;  %s13986_s6 = inlined_call_operand.vmem [shape: bf16[16,576], index: 6, kind: input, shape index: {}]   ;;  %s13987_s7 = inlined_call_operand.vmem [shape: bf16[16,144], index: 7, kind: input, shape index: {}]   ;;  %s13988_s8 = inlined_call_operand.vmem [shape: f32[16,128], index: 8, kind: output, shape index: {}]  }
   0x1   :  { %10918 = vmatprep.subr.bf16.mxu0 %v11758_v0  ;;  %v11132_v1 = vld [vmem:[%s13980_s1] sm:$0xff]   ;;  %v11133_v2 = vld [vmem:[%s13980_s1 + $0x8] ss:$0 sps:$4 sm:$0x11]   ;;  %10922 = vmatprep.mubr.msk.bf16.mxu0 %vm11759_vm1, %v11758_v0  ;;  %v11149_v7 = vld [vmem:[%s13982_s2 + $0xc] ss:$36 sps:$4 sm:$0xff]  }
   0x2   :  { %10919 = vmatpush3.bf16.msra.mxu0 %v11132_v1  ;;  %v177_v3 = vsel %vm175_vm0, %v11133_v2, 0  ;;  %v11134_v4 = vld [vmem:[%s13981_s0] sm:$0xff]   ;;  %v11135_v5 = vld [vmem:[%s13981_s0 + $0x8] sm:$0xff]   ;;  %v11155_v11 = vld [vmem:[%s13982_s2 + $0x50] ss:$36 sps:$4 sm:$0xff]   ;;  %v11760_v33 = vmov 0  }
   0x3   :  { %10920 = vmatprep.subr.bf16.mxu0 %v11758_v0  ;;  %v11147_v6 = vld [vmem:[%s13982_s2 + $0x8] ss:$36 sps:$4 sm:$0xff]   ;;  %v11152_v9 = vld [vmem:[%s13982_s2] ss:$36 sps:$4 sm:$0xff]   ;;  %v11157_v12 = vld [vmem:[%s13982_s2 + $0x54] ss:$36 sps:$4 sm:$0xff]   ;;  %756 = vmatprep.mubr.bf16.mxu1 %v11760_v33 }
   0x4   :  { %v11150_v8 = vld [vmem:[%s13982_s2 + $0x4] ss:$36 sps:$4 sm:$0xff]   ;;  %v11153_v10 = vld [vmem:[%s13982_s2 + $0x4c] ss:$36 sps:$4 sm:$0xff]   ;;  %v11137_v15 = vld [vmem:[%s13981_s0 + $0x18] sm:$0xff]   ;;  %2338 = vst [vmem:[#allocation3] sm:$0xff] %v11760_v33 }
   0x5   :  { %724 = vmatprep.subr.bf16.mxu1 %v11150_v8  ;;  %v11136_v13 = vld [vmem:[%s13981_s0 + $0x10] sm:$0xff]   ;;  %v11158_v14 = vld [vmem:[%s13982_s2 + $0x48] ss:$36 sps:$4 sm:$0xff]   ;;  %v11138_v16 = vld [vmem:[%s13981_s0 + $0x20] sm:$0xff]   ;;  %2339 = vst [vmem:[#allocation3 + $0x8] sm:$0xff] %v11760_v33  ;;  %vm684_vm5 = vcmask 523264  }
   0x6   :  { %10921 = vmatpush3.bf16.msra.mxu0 %v177_v3  ;;  %725 = vmatpush1.bf16.msra.mxu1 %v11152_v9  ;;  %v11139_v17 = vld [vmem:[%s13981_s0 + $0x28] sm:$0xff]   ;;  %v11140_v18 = vld [vmem:[%s13981_s0 + $0x30] sm:$0xff]   ;;  %v11141_v19 = vld [vmem:[%s13981_s0 + $0x38] sm:$0xff]   ;;  %2340 = vst [vmem:[#allocation3 + $0x10] sm:$0xff] %v11760_v33 }
   0x7   :  { %885 = vmatprep.subr.bf16.mxu0 %v11149_v7  ;;  %726 = vmatprep.subr.bf16.mxu1 %v11153_v10  ;;  %v11142_v20 = vld [vmem:[%s13981_s0 + $0x40] sm:$0xff]   ;;  %v11143_v21 = vld [vmem:[%s13981_s0 + $0x48] sm:$0xff]   ;;  %v11144_v22 = vld [vmem:[%s13981_s0 + $0x50] sm:$0xff]   ;;  %2341 = vst [vmem:[#allocation3 + $0x18] sm:$0xff] %v11760_v33 }
   0x8   :  { %v11159_v23 = vld [vmem:[%s13982_s2 + $0x94] ss:$36 sps:$4 sm:$0xff]   ;;  %v11163_v24 = vld [vmem:[%s13982_s2 + $0x9c] ss:$36 sps:$4 sm:$0xff]   ;;  %v11169_v29 = vld [vmem:[%s13982_s2 + $0xe4] ss:$36 sps:$4 sm:$0xff]  }
   0x9   :  { %10923 = vmatmul.mubr.msk.bf16.vlgmr.msra.gmra.mrb[0].mxu0 %vm135_vm2, %v11134_v4  ;;  %v11145_v25 = vld [vmem:[%s13981_s0 + $0x58] sm:$0xff]   ;;  %v11164_v27 = vld [vmem:[%s13982_s2 + $0x90] ss:$36 sps:$4 sm:$0xff]   ;;  %v11167_v30 = vld [vmem:[%s13982_s2 + $0xe0] ss:$36 sps:$4 sm:$0xff]   ;;  %2342 = vst [vmem:[#allocation3 + $0x20] sm:$0xff] %v11760_v33 }
   0xa   :  { %10926 = vmatprep.mubr.msk.bf16.mxu0 %vm11759_vm1, %v11758_v0  ;;  %886 = vmatpush1.bf16.msra.mxu0 %v11147_v6  ;;  %v11161_v26 = vld [vmem:[%s13982_s2 + $0x98] ss:$36 sps:$4 sm:$0xff]   ;;  %v11941_v32 = vld [vmem:[%s13981_s0 + $0x60] ss:$0 sps:$4 sm:$0x33]   ;;  %2343 = vst [vmem:[#allocation3 + $0x28] sm:$0xff] %v11760_v33 }
   0xb   :  { %887 = vmatprep.subr.bf16.mxu0 %v11157_v12  ;;  %727 = vmatpush1.bf16.msra.mxu1 %v11158_v14  ;;  %v11165_v28 = vld [vmem:[%s13982_s2 + $0xdc] ss:$36 sps:$4 sm:$0xff]   ;;  %2344 = vst [vmem:[#allocation3 + $0x30] sm:$0xff] %v11760_v33  ;;  %2345 = vst [vmem:[#allocation3 + $0x38] sm:$0xff] %v11760_v33  ;;  %v11173_v34 = vld [vmem:[%s13982_s2 + $0x14] ss:$36 sps:$4 sm:$0xff]  }
   0xc   :  { %728 = vmatprep.subr.bf16.mxu1 %v11159_v23  ;;  %v11170_v31 = vld [vmem:[%s13982_s2 + $0xd8] ss:$36 sps:$4 sm:$0xff]   ;;  %2346 = vst [vmem:[#allocation3 + $0x40] sm:$0xff] %v11760_v33  ;;  %2347 = vst [vmem:[#allocation3 + $0x48] sm:$0xff] %v11760_v33  ;;  %v12109_v36 = vld [vmem:[%s13983_s4] ss:$0 sm:$0xff] }
   0xd   :  { %2348 = vst [vmem:[#allocation3 + $0x50] sm:$0xff] %v11760_v33  ;;  %2349 = vst [vmem:[#allocation3 + $0x58] sm:$0xff] %v11760_v33  ;;  %v11176_v35 = vld [vmem:[%s13982_s2 + $0x1c] ss:$36 sps:$4 sm:$0xff]   ;;  %v11171_v49 = vld [vmem:[%s13982_s2 + $0x10] ss:$36 sps:$4 sm:$0xff]  }
   0xe   :  { %888 = vmatpush1.bf16.msra.mxu0 %v11155_v11  ;;  %2350 = vst [vmem:[#allocation3 + $0x60] sm:$0xff] %v11760_v33  ;;  %2351 = vst [vmem:[#allocation3 + $0x68] sm:$0xff] %v11760_v33  ;;  %v11174_v50 = vld [vmem:[%s13982_s2 + $0x18] ss:$36 sps:$4 sm:$0xff]   ;;  %v11182_v54 = vld [vmem:[%s13982_s2 + $0x64] ss:$36 sps:$4 sm:$0xff]  }
   0xf   :  { %889 = vmatprep.subr.bf16.mxu0 %v11163_v24  ;;  %729 = vmatpush1.bf16.msra.mxu1 %v11164_v27  ;;  %2352 = vst [vmem:[#allocation3 + $0x70] sm:$0xff] %v11760_v33  ;;  %2353 = vst [vmem:[#allocation3 + $0x78] sm:$0xff] %v11760_v33  ;;  %v11179_v53 = vld [vmem:[%s13982_s2 + $0x5c] ss:$36 sps:$4 sm:$0xff]   ;;  %v11185_v61 = vld [vmem:[%s13982_s2 + $0xa4] ss:$36 sps:$4 sm:$0xff]  }
  0x10   :  { %730 = vmatprep.subr.bf16.mxu1 %v11165_v28  ;;  %2354 = vst [vmem:[#allocation3 + $0x80] sm:$0xff] %v11760_v33  ;;  %2355 = vst [vmem:[#allocation3 + $0x88] sm:$0xff] %v11760_v33  ;;  %v11177_v59 = vld [vmem:[%s13982_s2 + $0x58] ss:$36 sps:$4 sm:$0xff]   ;;  %v11180_v60 = vld [vmem:[%s13982_s2 + $0x60] ss:$36 sps:$4 sm:$0xff]  }
  0x11   :  { %10927 = vmatmul.mubr.msk.bf16.gmra.mrb[4].mxu0 %vm135_vm2, %v11135_v5  ;;  %2356 = vst [vmem:[#allocation3 + $0x90] sm:$0xff] %v11760_v33  ;;  %2357 = vst [vmem:[#allocation3 + $0x98] sm:$0xff] %v11760_v33  ;;  %v11188_v63 = vld [vmem:[%s13982_s2 + $0xac] ss:$36 sps:$4 sm:$0xff]   ;;  %v11183_v5 = vld [vmem:[%s13982_s2 + $0xa0] ss:$36 sps:$4 sm:$0xff]  }
  0x12   :  { %10930 = vmatprep.mubr.msk.bf16.mxu0 %vm11759_vm1, %v11758_v0  ;;  %890 = vmatpush1.bf16.msra.mxu0 %v11161_v26  ;;  %2358 = vst [vmem:[#allocation3 + $0xa0] sm:$0xff] %v11760_v33  ;;  %2359 = vst [vmem:[#allocation3 + $0xa8] sm:$0xff] %v11760_v33  ;;  %v11186_v6 = vld [vmem:[%s13982_s2 + $0xa8] ss:$36 sps:$4 sm:$0xff]   ;;  %v11194_v10 = vld [vmem:[%s13982_s2 + $0xf4] ss:$36 sps:$4 sm:$0xff]  }
  0x13   :  { %891 = vmatprep.subr.bf16.mxu0 %v11169_v29  ;;  %731 = vmatpush1.bf16.msra.mxu1 %v11170_v31  ;;  %2360 = vst [vmem:[#allocation3 + $0xb0] sm:$0xff] %v11760_v33  ;;  %2361 = vst [vmem:[#allocation3 + $0xb8] sm:$0xff] %v11760_v33  ;;  %v11191_v9 = vld [vmem:[%s13982_s2 + $0xec] ss:$36 sps:$4 sm:$0xff]  }
  0x14   :  { %2362 = vst [vmem:[#allocation3 + $0xc0] sm:$0xff] %v11760_v33  ;;  %2363 = vst [vmem:[#allocation3 + $0xc8] sm:$0xff] %v11760_v33  ;;  %1046 = vmatprep.subr.bf16.mxu1 %v11173_v34 }
  0x15   :  { %2364 = vst [vmem:[#allocation3 + $0xd0] sm:$0xff] %v11760_v33  ;;  %2365 = vst [vmem:[#allocation3 + $0xd8] sm:$0xff] %v11760_v33 }
  0x16   :  { %892 = vmatpush1.bf16.msra.mxu0 %v11167_v30  ;;  %2366 = vst [vmem:[#allocation3 + $0xe0] sm:$0xff] %v11760_v33  ;;  %2367 = vst [vmem:[#allocation3 + $0xe8] sm:$0xff] %v11760_v33 }
  0x17   :  { %2368 = vst [vmem:[#allocation3 + $0xf0] sm:$0xff] %v11760_v33  ;;  %2369 = vst [vmem:[#allocation3 + $0xf8] sm:$0xff] %v11760_v33  ;;  %1207 = vmatprep.subr.bf16.mxu0 %v11176_v35 }
  0x18   :  { %2370 = vst [vmem:[#allocation3 + $0x100] sm:$0xff] %v11760_v33  ;;  %2371 = vst [vmem:[#allocation3 + $0x108] sm:$0xff] %v11760_v33 }
  0x19   :  { %10931 = vmatmul.mubr.msk.bf16.gmra.mrb[8].mxu0 %vm135_vm2, %v11136_v13  ;;  %2372 = vst [vmem:[#allocation3 + $0x110] sm:$0xff] %v11760_v33  ;;  %2373 = vst [vmem:[#allocation3 + $0x118] sm:$0xff] %v11760_v33 }
  0x1a   :  { %10934 = vmatprep.mubr.msk.bf16.mxu0 %vm11759_vm1, %v11758_v0  ;;  %2374 = vst [vmem:[#allocation3 + $0x120] sm:$0xff] %v11760_v33  ;;  %2375 = vst [vmem:[#allocation3 + $0x128] sm:$0xff] %v11760_v33 }
  0x1b   :  { %2376 = vst [vmem:[#allocation3 + $0x130] sm:$0xff] %v11760_v33  ;;  %2377 = vst [vmem:[#allocation3 + $0x138] sm:$0xff] %v11760_v33 }
  0x1c   :  { %2378 = vst [vmem:[#allocation3 + $0x140] sm:$0xff] %v11760_v33  ;;  %2379 = vst [vmem:[#allocation3 + $0x148] sm:$0xff] %v11760_v33 }
  0x1d   :  { %2380 = vst [vmem:[#allocation3 + $0x150] sm:$0xff] %v11760_v33  ;;  %2381 = vst [vmem:[#allocation3 + $0x158] sm:$0xff] %v11760_v33 }
  0x1e   :  { %2382 = vst [vmem:[#allocation3 + $0x160] sm:$0xff] %v11760_v33  ;;  %2383 = vst [vmem:[#allocation3 + $0x168] sm:$0xff] %v11760_v33 }
  0x1f   :  { %2384 = vst [vmem:[#allocation3 + $0x170] sm:$0xff] %v11760_v33  ;;  %2385 = vst [vmem:[#allocation3 + $0x178] sm:$0xff] %v11760_v33 }
  0x20   :  { %2386 = vst [vmem:[#allocation3 + $0x180] sm:$0xff] %v11760_v33  ;;  %2387 = vst [vmem:[#allocation3 + $0x188] sm:$0xff] %v11760_v33 }
  0x21   :  { %10935 = vmatmul.mubr.msk.bf16.gmra.mrb[12].mxu0 %vm135_vm2, %v11137_v15  ;;  %2388 = vst [vmem:[#allocation3 + $0x190] sm:$0xff] %v11760_v33  ;;  %2389 = vst [vmem:[#allocation3 + $0x198] sm:$0xff] %v11760_v33  ;;  %v11189_v15 = vld [vmem:[%s13982_s2 + $0xe8] ss:$36 sps:$4 sm:$0xff]  }
  0x22   :  { %10938 = vmatprep.mubr.msk.bf16.mxu0 %vm11759_vm1, %v11758_v0  ;;  %2390 = vst [vmem:[#allocation3 + $0x1a0] sm:$0xff] %v11760_v33  ;;  %2391 = vst [vmem:[#allocation3 + $0x1a8] sm:$0xff] %v11760_v33 }
  0x23   :  { %2392 = vst [vmem:[#allocation3 + $0x1b0] sm:$0xff] %v11760_v33  ;;  %2393 = vst [vmem:[#allocation3 + $0x1b8] sm:$0xff] %v11760_v33 }
  0x24   :  { %2394 = vst [vmem:[#allocation3 + $0x1c0] sm:$0xff] %v11760_v33  ;;  %2395 = vst [vmem:[#allocation3 + $0x1c8] sm:$0xff] %v11760_v33 }
  0x25   :  { %2396 = vst [vmem:[#allocation3 + $0x1d0] sm:$0xff] %v11760_v33  ;;  %2397 = vst [vmem:[#allocation3 + $0x1d8] sm:$0xff] %v11760_v33 }
  0x26   :  { %2398 = vst [vmem:[#allocation3 + $0x1e0] sm:$0xff] %v11760_v33  ;;  %2399 = vst [vmem:[#allocation3 + $0x1e8] sm:$0xff] %v11760_v33 }
  0x27   :  { %2400 = vst [vmem:[#allocation3 + $0x1f0] sm:$0xff] %v11760_v33  ;;  %2401 = vst [vmem:[#allocation3 + $0x1f8] sm:$0xff] %v11760_v33 }
  0x28   :  { %2402 = vst [vmem:[#allocation3 + $0x200] sm:$0xff] %v11760_v33  ;;  %2403 = vst [vmem:[#allocation3 + $0x208] sm:$0xff] %v11760_v33 }
  0x29   :  { %10939 = vmatmul.mubr.msk.bf16.gmra.mrb[16].mxu0 %vm135_vm2, %v11138_v16  ;;  %2404 = vst [vmem:[#allocation3 + $0x210] sm:$0xff] %v11760_v33  ;;  %2405 = vst [vmem:[#allocation3 + $0x218] sm:$0xff] %v11760_v33  ;;  %v11192_v16 = vld [vmem:[%s13982_s2 + $0xf0] ss:$36 sps:$4 sm:$0xff]  }
  0x2a   :  { %10942 = vmatprep.mubr.msk.bf16.mxu0 %vm11759_vm1, %v11758_v0  ;;  %2406 = vst [vmem:[#allocation3 + $0x220] sm:$0xff] %v11760_v33  ;;  %2407 = vst [vmem:[#allocation3 + $0x228] sm:$0xff] %v11760_v33 }
  0x2b   :  { %2408 = vst [vmem:[#allocation3 + $0x230] sm:$0xff] %v11760_v33  ;;  %2409 = vst [vmem:[#allocation3 + $0x238] sm:$0xff] %v11760_v33 }
  0x2c   :  { %2410 = vst [vmem:[#allocation3 + $0x240] sm:$0xff] %v11760_v33  ;;  %2411 = vst [vmem:[#allocation3 + $0x248] sm:$0xff] %v11760_v33 }
  0x2d   :  { %2412 = vst [vmem:[#allocation3 + $0x250] sm:$0xff] %v11760_v33  ;;  %2413 = vst [vmem:[#allocation3 + $0x258] sm:$0xff] %v11760_v33 }
  0x2e   :  { %2414 = vst [vmem:[#allocation3 + $0x260] sm:$0xff] %v11760_v33  ;;  %2415 = vst [vmem:[#allocation3 + $0x268] sm:$0xff] %v11760_v33 }
  0x2f   :  { %2416 = vst [vmem:[#allocation3 + $0x270] sm:$0xff] %v11760_v33  ;;  %2417 = vst [vmem:[#allocation3 + $0x278] sm:$0xff] %v11760_v33 }
  0x30   :  { %2418 = vst [vmem:[#allocation3 + $0x280] sm:$0xff] %v11760_v33  ;;  %2419 = vst [vmem:[#allocation3 + $0x288] sm:$0xff] %v11760_v33 }
  0x31   :  { %10943 = vmatmul.mubr.msk.bf16.gmra.mrb[20].mxu0 %vm135_vm2, %v11139_v17  ;;  %2420 = vst [vmem:[#allocation3 + $0x290] sm:$0xff] %v11760_v33  ;;  %2421 = vst [vmem:[#allocation3 + $0x298] sm:$0xff] %v11760_v33 }
  0x32   :  { %10946 = vmatprep.mubr.msk.bf16.mxu0 %vm11759_vm1, %v11758_v0  ;;  %2422 = vst [vmem:[#allocation3 + $0x2a0] sm:$0xff] %v11760_v33  ;;  %2423 = vst [vmem:[#allocation3 + $0x2a8] sm:$0xff] %v11760_v33 }
  0x33   :  { %2424 = vst [vmem:[#allocation3 + $0x2b0] sm:$0xff] %v11760_v33  ;;  %2425 = vst [vmem:[#allocation3 + $0x2b8] sm:$0xff] %v11760_v33 }
  0x34   :  { %2426 = vst [vmem:[#allocation3 + $0x2c0] sm:$0xff] %v11760_v33  ;;  %2427 = vst [vmem:[#allocation3 + $0x2c8] sm:$0xff] %v11760_v33 }
  0x35   :  { %2428 = vst [vmem:[#allocation3 + $0x2d0] sm:$0xff] %v11760_v33  ;;  %2429 = vst [vmem:[#allocation3 + $0x2d8] sm:$0xff] %v11760_v33 }
  0x36   :  { %2430 = vst [vmem:[#allocation3 + $0x2e0] sm:$0xff] %v11760_v33  ;;  %2431 = vst [vmem:[#allocation3 + $0x2e8] sm:$0xff] %v11760_v33 }
  0x37   :  { %2432 = vst [vmem:[#allocation3 + $0x2f0] sm:$0xff] %v11760_v33  ;;  %2433 = vst [vmem:[#allocation3 + $0x2f8] sm:$0xff] %v11760_v33 }
  0x38   :  { %2434 = vst [vmem:[#allocation3 + $0x300] sm:$0xff] %v11760_v33  ;;  %2435 = vst [vmem:[#allocation3 + $0x308] sm:$0xff] %v11760_v33 }
  0x39   :  { %10947 = vmatmul.mubr.msk.bf16.gmra.mrb[24].mxu0 %vm135_vm2, %v11140_v18  ;;  %2436 = vst [vmem:[#allocation3 + $0x310] sm:$0xff] %v11760_v33  ;;  %2437 = vst [vmem:[#allocation3 + $0x318] sm:$0xff] %v11760_v33 }
  0x3a   :  { %10950 = vmatprep.mubr.msk.bf16.mxu0 %vm11759_vm1, %v11758_v0  ;;  %2438 = vst [vmem:[#allocation3 + $0x320] sm:$0xff] %v11760_v33  ;;  %2439 = vst [vmem:[#allocation3 + $0x328] sm:$0xff] %v11760_v33 }
  0x3b   :  { %2440 = vst [vmem:[#allocation3 + $0x330] sm:$0xff] %v11760_v33  ;;  %2441 = vst [vmem:[#allocation3 + $0x338] sm:$0xff] %v11760_v33 }
  0x3c   :  { %2442 = vst [vmem:[#allocation3 + $0x340] sm:$0xff] %v11760_v33  ;;  %2443 = vst [vmem:[#allocation3 + $0x348] sm:$0xff] %v11760_v33 }
  0x3d   :  { %2444 = vst [vmem:[#allocation3 + $0x350] sm:$0xff] %v11760_v33  ;;  %2445 = vst [vmem:[#allocation3 + $0x358] sm:$0xff] %v11760_v33 }
  0x3e   :  { %2446 = vst [vmem:[#allocation3 + $0x360] sm:$0xff] %v11760_v33  ;;  %2447 = vst [vmem:[#allocation3 + $0x368] sm:$0xff] %v11760_v33 }
  0x3f   :  { %2448 = vst [vmem:[#allocation3 + $0x370] sm:$0xff] %v11760_v33  ;;  %2449 = vst [vmem:[#allocation3 + $0x378] sm:$0xff] %v11760_v33 }
  0x40   :  { %2450 = vst [vmem:[#allocation3 + $0x380] sm:$0xff] %v11760_v33  ;;  %2451 = vst [vmem:[#allocation3 + $0x388] sm:$0xff] %v11760_v33 }
  0x41   :  { %10951 = vmatmul.mubr.msk.bf16.gmra.mrb[28].mxu0 %vm135_vm2, %v11141_v19  ;;  %2452 = vst [vmem:[#allocation3 + $0x390] sm:$0xff] %v11760_v33  ;;  %2453 = vst [vmem:[#allocation3 + $0x398] sm:$0xff] %v11760_v33 }
  0x42   :  { %10954 = vmatprep.mubr.msk.bf16.mxu0 %vm11759_vm1, %v11758_v0  ;;  %2454 = vst [vmem:[#allocation3 + $0x3a0] sm:$0xff] %v11760_v33  ;;  %6726 = vst [vmem:[#allocation5] sm:$0xff] %v11760_v33 }
  0x43   :  { %6727 = vst [vmem:[#allocation5 + $0x8] sm:$0xff] %v11760_v33  ;;  %6728 = vst [vmem:[#allocation5 + $0x10] sm:$0xff] %v11760_v33 }
  0x44   :  { %6729 = vst [vmem:[#allocation5 + $0x18] sm:$0xff] %v11760_v33  ;;  %6730 = vst [vmem:[#allocation5 + $0x20] sm:$0xff] %v11760_v33 }
  0x45   :  { %6731 = vst [vmem:[#allocation5 + $0x28] sm:$0xff] %v11760_v33  ;;  %6732 = vst [vmem:[#allocation5 + $0x30] sm:$0xff] %v11760_v33 }
  0x46   :  { %6733 = vst [vmem:[#allocation5 + $0x38] sm:$0xff] %v11760_v33  ;;  %6734 = vst [vmem:[#allocation5 + $0x40] sm:$0xff] %v11760_v33 }
  0x47   :  { %6735 = vst [vmem:[#allocation5 + $0x48] sm:$0xff] %v11760_v33  ;;  %6736 = vst [vmem:[#allocation5 + $0x50] sm:$0xff] %v11760_v33 }
  0x48   :  { %6737 = vst [vmem:[#allocation5 + $0x58] sm:$0xff] %v11760_v33  ;;  %6738 = vst [vmem:[#allocation5 + $0x60] sm:$0xff] %v11760_v33 }
  0x49   :  { %10955 = vmatmul.mubr.msk.bf16.gmra.mrb[32].mxu0 %vm135_vm2, %v11142_v20  ;;  %6739 = vst [vmem:[#allocation5 + $0x68] sm:$0xff] %v11760_v33  ;;  %6740 = vst [vmem:[#allocation5 + $0x70] sm:$0xff] %v11760_v33 }
  0x4a   :  { %10958 = vmatprep.mubr.msk.bf16.mxu0 %vm11759_vm1, %v11758_v0  ;;  %6741 = vst [vmem:[#allocation5 + $0x78] sm:$0xff] %v11760_v33  ;;  %6742 = vst [vmem:[#allocation5 + $0x80] sm:$0xff] %v11760_v33 }
  0x4b   :  { %6743 = vst [vmem:[#allocation5 + $0x88] sm:$0xff] %v11760_v33  ;;  %6744 = vst [vmem:[#allocation5 + $0x90] sm:$0xff] %v11760_v33 }
  0x4c   :  { %6745 = vst [vmem:[#allocation5 + $0x98] sm:$0xff] %v11760_v33  ;;  %6746 = vst [vmem:[#allocation5 + $0xa0] sm:$0xff] %v11760_v33 }
  0x4d   :  { %6747 = vst [vmem:[#allocation5 + $0xa8] sm:$0xff] %v11760_v33  ;;  %6748 = vst [vmem:[#allocation5 + $0xb0] sm:$0xff] %v11760_v33 }
  0x4e   :  { %6749 = vst [vmem:[#allocation5 + $0xb8] sm:$0xff] %v11760_v33  ;;  %6750 = vst [vmem:[#allocation5 + $0xc0] sm:$0xff] %v11760_v33 }
  0x4f   :  { %6751 = vst [vmem:[#allocation5 + $0xc8] sm:$0xff] %v11760_v33  ;;  %6752 = vst [vmem:[#allocation5 + $0xd0] sm:$0xff] %v11760_v33 }
  0x50   :  { %6753 = vst [vmem:[#allocation5 + $0xd8] sm:$0xff] %v11760_v33  ;;  %6754 = vst [vmem:[#allocation5 + $0xe0] sm:$0xff] %v11760_v33 }
  0x51   :  { %10959 = vmatmul.mubr.msk.bf16.gmra.mrb[36].mxu0 %vm135_vm2, %v11143_v21  ;;  %6755 = vst [vmem:[#allocation5 + $0xe8] sm:$0xff] %v11760_v33  ;;  %6756 = vst [vmem:[#allocation5 + $0xf0] sm:$0xff] %v11760_v33 }
  0x52   :  { %10962 = vmatprep.mubr.msk.bf16.mxu0 %vm11759_vm1, %v11758_v0  ;;  %6757 = vst [vmem:[#allocation5 + $0xf8] sm:$0xff] %v11760_v33  ;;  %6758 = vst [vmem:[#allocation5 + $0x100] sm:$0xff] %v11760_v33 }
  0x53   :  { %6759 = vst [vmem:[#allocation5 + $0x108] sm:$0xff] %v11760_v33  ;;  %6760 = vst [vmem:[#allocation5 + $0x110] sm:$0xff] %v11760_v33 }
  0x54   :  { %6761 = vst [vmem:[#allocation5 + $0x118] sm:$0xff] %v11760_v33 }
  0x59   :  { %10963 = vmatmul.mubr.msk.bf16.gmra.mrb[40].mxu0 %vm135_vm2, %v11144_v22 }
  0x5a   :  { %10966 = vmatprep.mubr.msk.bf16.mxu0 %vm11759_vm1, %v11758_v0 }
  0x61   :  { %10967 = vmatmul.mubr.msk.bf16.gmra.mrb[44].mxu0 %vm135_vm2, %v11145_v25 }
  0x62   :  { %10970 = vmatprep.mubr.msk.bf16.mxu0 %vm11759_vm1, %v11758_v0 }
  0x69   :  { %10971 = vmatmul.mubr.msk.bf16.gmra.mrb[48].mxu0 %vm135_vm2, %v11941_v32 }
  0x6a   :  { %917 = vmatprep.mubr.bf16.mxu0 %v11760_v33 }
  0xdc   :  { %v213_v37 = vpop.f32.mrb[0].mxu0 }
  0xdd   :  { %v214_v38 = vadd.f32 %v12109_v36, %v213_v37  ;;  %v10924_v39 = vpop.f32.mrb[1].mxu0 }
  0xde   :  { %v216_v40 = vpop.f32.mrb[2].mxu0 }
  0xdf   :  { %v340_v41 = vmul.f32 0.02, %v214_v38  ;;  %v217_v42 = vadd.f32 %v12109_v36, %v216_v40  ;;  %v10925_v43 = vpop.f32.mrb[3].mxu0  ;;  %vm315_vm3 = vcmp.gt.f32.partialorder %v214_v38, 0.0 }
  0xe1   :  { %vm316_vm4 = vcmp.gt.f32.partialorder %v217_v42, 0.0  ;;  %v341_v44 = vmul.f32 0.02, %v217_v42  ;;  %v365_v45 = vsel %vm315_vm3, %v214_v38, %v340_v41 }
  0xe3   :  { %v366_v46 = vsel %vm316_vm4, %v217_v42, %v341_v44 }
  0xe4   :  { %v12113_v47 = vpack.c.bf16 %v366_v46, %v365_v45  ;;  %v221_v48 = vpop.f32.mrb[4].mxu0 }
  0xe5   :  { %v222_v51 = vadd.f32 %v12109_v36, %v221_v48  ;;  %v10928_v52 = vpop.f32.mrb[5].mxu0 }
  0xe6   :  { %v224_v55 = vpop.f32.mrb[6].mxu0  ;;  %9371 = vmatmul.mubr.msk.bf16.vlgmr.msra.gmra.mrb[0].mxu1 %vm684_vm5, %v12113_v47  ;;  %9384 = vmatmul.mubr.msk.bf16.vlgmr.msra.gmra.mrb[52].mxu0 %vm684_vm5, %v12113_v47 }
  0xe7   :  { %v342_v56 = vmul.f32 0.02, %v222_v51  ;;  %v225_v57 = vadd.f32 %v12109_v36, %v224_v55  ;;  %v10929_v58 = vpop.f32.mrb[7].mxu0  ;;  %766 = vmatprep.mubr.bf16.mxu1 %v11760_v33  ;;  %927 = vmatprep.mubr.bf16.mxu0 %v11760_v33  ;;  %vm317_vm6 = vcmp.gt.f32.partialorder %v222_v51, 0.0 }
  0xe8   :  { %1047 = vmatpush1.bf16.msra.mxu1 %v11171_v49  ;;  %1208 = vmatpush1.bf16.msra.mxu0 %v11174_v50 }
  0xe9   :  { %vm318_vm7 = vcmp.gt.f32.partialorder %v225_v57, 0.0  ;;  %v343_v62 = vmul.f32 0.02, %v225_v57  ;;  %1048 = vmatprep.subr.bf16.mxu1 %v11179_v53  ;;  %1209 = vmatprep.subr.bf16.mxu0 %v11182_v54  ;;  %v367_v1 = vsel %vm317_vm6, %v222_v51, %v342_v56 }
  0xeb   :  { %v368_v2 = vsel %vm318_vm7, %v225_v57, %v343_v62 }
  0xec   :  { %v12147_v3 = vpack.c.bf16 %v368_v2, %v367_v1  ;;  %v229_v4 = vpop.f32.mrb[8].mxu0  ;;  %1049 = vmatpush1.bf16.msra.mxu1 %v11177_v59  ;;  %1210 = vmatpush1.bf16.msra.mxu0 %v11180_v60 }
  0xed   :  { %v230_v7 = vadd.f32 %v12109_v36, %v229_v4  ;;  %v10932_v8 = vpop.f32.mrb[9].mxu0  ;;  %1050 = vmatprep.subr.bf16.mxu1 %v11185_v61  ;;  %1211 = vmatprep.subr.bf16.mxu0 %v11188_v63 }
  0xee   :  { %v232_v11 = vpop.f32.mrb[10].mxu0  ;;  %9372 = vmatmul.mubr.msk.bf16.gmra.mrb[4].mxu1 %vm684_vm5, %v12147_v3  ;;  %9385 = vmatmul.mubr.msk.bf16.gmra.mrb[56].mxu0 %vm684_vm5, %v12147_v3 }
  0xef   :  { %v344_v12 = vmul.f32 0.02, %v230_v7  ;;  %v233_v13 = vadd.f32 %v12109_v36, %v232_v11  ;;  %v10933_v14 = vpop.f32.mrb[11].mxu0  ;;  %776 = vmatprep.mubr.bf16.mxu1 %v11760_v33  ;;  %937 = vmatprep.mubr.bf16.mxu0 %v11760_v33  ;;  %vm319_vm8 = vcmp.gt.f32.partialorder %v230_v7, 0.0 }
  0xf0   :  { %1051 = vmatpush1.bf16.msra.mxu1 %v11183_v5  ;;  %1212 = vmatpush1.bf16.msra.mxu0 %v11186_v6 }
  0xf1   :  { %vm320_vm9 = vcmp.gt.f32.partialorder %v233_v13, 0.0  ;;  %v345_v17 = vmul.f32 0.02, %v233_v13  ;;  %1052 = vmatprep.subr.bf16.mxu1 %v11191_v9  ;;  %1213 = vmatprep.subr.bf16.mxu0 %v11194_v10  ;;  %v369_v18 = vsel %vm319_vm8, %v230_v7, %v344_v12 }
  0xf3   :  { %v370_v19 = vsel %vm320_vm9, %v233_v13, %v345_v17 }
  0xf4   :  { %v12175_v20 = vpack.c.bf16 %v370_v19, %v369_v18  ;;  %v237_v21 = vpop.f32.mrb[12].mxu0  ;;  %1053 = vmatpush1.bf16.msra.mxu1 %v11189_v15  ;;  %1214 = vmatpush1.bf16.msra.mxu0 %v11192_v16 }
  0xf5   :  { %v238_v22 = vadd.f32 %v12109_v36, %v237_v21  ;;  %v10936_v23 = vpop.f32.mrb[13].mxu0  ;;  %10974 = vmatprep.subr.bf16.mxu1 %v11758_v0 }
  0xf6   :  { %v240_v24 = vpop.f32.mrb[14].mxu0  ;;  %9373 = vmatmul.mubr.msk.bf16.gmra.mrb[8].mxu1 %vm684_vm5, %v12175_v20  ;;  %9386 = vmatmul.mubr.msk.bf16.gmra.mrb[60].mxu0 %vm684_vm5, %v12175_v20 }
  0xf7   :  { %v346_v25 = vmul.f32 0.02, %v238_v22  ;;  %v241_v26 = vadd.f32 %v12109_v36, %v240_v24  ;;  %v10937_v27 = vpop.f32.mrb[15].mxu0  ;;  %786 = vmatprep.mubr.bf16.mxu1 %v11760_v33  ;;  %947 = vmatprep.mubr.bf16.mxu0 %v11760_v33  ;;  %vm321_vm10 = vcmp.gt.f32.partialorder %v238_v22, 0.0 }
  0xf9   :  { %vm322_vm11 = vcmp.gt.f32.partialorder %v241_v26, 0.0  ;;  %v347_v28 = vmul.f32 0.02, %v241_v26  ;;  %v371_v29 = vsel %vm321_vm10, %v238_v22, %v346_v25 }
  0xfb   :  { %v372_v30 = vsel %vm322_vm11, %v241_v26, %v347_v28 }
  0xfc   :  { %v12186_v31 = vpack.c.bf16 %v372_v30, %v371_v29  ;;  %v245_v32 = vpop.f32.mrb[16].mxu0 }
  0xfd   :  { %v246_v34 = vadd.f32 %v12109_v36, %v245_v32  ;;  %v10940_v35 = vpop.f32.mrb[17].mxu0 }
  0xfe   :  { %v248_v37 = vpop.f32.mrb[18].mxu0  ;;  %9374 = vmatmul.mubr.msk.bf16.gmra.mrb[12].mxu1 %vm684_vm5, %v12186_v31  ;;  %9387 = vmatmul.mubr.msk.bf16.gmra.mrb[64].mxu0 %vm684_vm5, %v12186_v31 }
  0xff   :  { %v348_v38 = vmul.f32 0.02, %v246_v34  ;;  %v249_v39 = vadd.f32 %v12109_v36, %v248_v37  ;;  %v10941_v40 = vpop.f32.mrb[19].mxu0  ;;  %796 = vmatprep.mubr.bf16.mxu1 %v11760_v33  ;;  %957 = vmatprep.mubr.bf16.mxu0 %v11760_v33  ;;  %vm323_vm12 = vcmp.gt.f32.partialorder %v246_v34, 0.0 }
 0x101   :  { %vm324_vm13 = vcmp.gt.f32.partialorder %v249_v39, 0.0  ;;  %v349_v41 = vmul.f32 0.02, %v249_v39  ;;  %v373_v42 = vsel %vm323_vm12, %v246_v34, %v348_v38 }
 0x103   :  { %v374_v43 = vsel %vm324_vm13, %v249_v39, %v349_v41 }
 0x104   :  { %v12196_v44 = vpack.c.bf16 %v374_v43, %v373_v42  ;;  %v253_v45 = vpop.f32.mrb[20].mxu0 }
 0x105   :  { %v254_v46 = vadd.f32 %v12109_v36, %v253_v45  ;;  %v10944_v48 = vpop.f32.mrb[21].mxu0 }
 0x106   :  { %v256_v49 = vpop.f32.mrb[22].mxu0  ;;  %9375 = vmatmul.mubr.msk.bf16.gmra.mrb[16].mxu1 %vm684_vm5, %v12196_v44  ;;  %9388 = vmatmul.mubr.msk.bf16.gmra.mrb[68].mxu0 %vm684_vm5, %v12196_v44 }
 0x107   :  { %v350_v50 = vmul.f32 0.02, %v254_v46  ;;  %v257_v51 = vadd.f32 %v12109_v36, %v256_v49  ;;  %v10945_v52 = vpop.f32.mrb[23].mxu0  ;;  %806 = vmatprep.mubr.bf16.mxu1 %v11760_v33  ;;  %967 = vmatprep.mubr.bf16.mxu0 %v11760_v33  ;;  %vm325_vm14 = vcmp.gt.f32.partialorder %v254_v46, 0.0 }
 0x109   :  { %vm326_vm15 = vcmp.gt.f32.partialorder %v257_v51, 0.0  ;;  %v351_v53 = vmul.f32 0.02, %v257_v51  ;;  %v375_v54 = vsel %vm325_vm14, %v254_v46, %v350_v50 }
 0x10b   :  { %v376_v55 = vsel %vm326_vm15, %v257_v51, %v351_v53 }
 0x10c   :  { %v12206_v56 = vpack.c.bf16 %v376_v55, %v375_v54  ;;  %v261_v57 = vpop.f32.mrb[24].mxu0 }
 0x10d   :  { %v262_v58 = vadd.f32 %v12109_v36, %v261_v57  ;;  %v10948_v59 = vpop.f32.mrb[25].mxu0 }
 0x10e   :  { %v264_v60 = vpop.f32.mrb[26].mxu0  ;;  %9376 = vmatmul.mubr.msk.bf16.gmra.mrb[20].mxu1 %vm684_vm5, %v12206_v56  ;;  %9389 = vmatmul.mubr.msk.bf16.gmra.mrb[72].mxu0 %vm684_vm5, %v12206_v56 }
 0x10f   :  { %v352_v61 = vmul.f32 0.02, %v262_v58  ;;  %v265_v62 = vadd.f32 %v12109_v36, %v264_v60  ;;  %v10949_v63 = vpop.f32.mrb[27].mxu0  ;;  %816 = vmatprep.mubr.bf16.mxu1 %v11760_v33  ;;  %977 = vmatprep.mubr.bf16.mxu0 %v11760_v33  ;;  %vm327_vm2 = vcmp.gt.f32.partialorder %v262_v58, 0.0 }
 0x111   :  { %vm328_vm3 = vcmp.gt.f32.partialorder %v265_v62, 0.0  ;;  %v353_v1 = vmul.f32 0.02, %v265_v62  ;;  %v377_v2 = vsel %vm327_vm2, %v262_v58, %v352_v61  ;;  %vm2568_vm2 = vcmask 517120  }
 0x113   :  { %v378_v4 = vsel %vm328_vm3, %v265_v62, %v353_v1  ;;  %vm3687_vm3 = vcmask 1048064  }
 0x114   :  { %v12216_v5 = vpack.c.bf16 %v378_v4, %v377_v2  ;;  %v269_v6 = vpop.f32.mrb[28].mxu0 }
 0x115   :  { %v270_v7 = vadd.f32 %v12109_v36, %v269_v6  ;;  %v10952_v8 = vpop.f32.mrb[29].mxu0 }
 0x116   :  { %v272_v9 = vpop.f32.mrb[30].mxu0  ;;  %9377 = vmatmul.mubr.msk.bf16.gmra.mrb[24].mxu1 %vm684_vm5, %v12216_v5  ;;  %9390 = vmatmul.mubr.msk.bf16.gmra.mrb[76].mxu0 %vm684_vm5, %v12216_v5 }
 0x117   :  { %v354_v10 = vmul.f32 0.02, %v270_v7  ;;  %v273_v11 = vadd.f32 %v12109_v36, %v272_v9  ;;  %v10953_v12 = vpop.f32.mrb[31].mxu0  ;;  %826 = vmatprep.mubr.bf16.mxu1 %v11760_v33  ;;  %987 = vmatprep.mubr.bf16.mxu0 %v11760_v33  ;;  %vm329_vm4 = vcmp.gt.f32.partialorder %v270_v7, 0.0 }
 0x119   :  { %vm330_vm6 = vcmp.gt.f32.partialorder %v273_v11, 0.0  ;;  %v355_v13 = vmul.f32 0.02, %v273_v11  ;;  %v379_v14 = vsel %vm329_vm4, %v270_v7, %v354_v10  ;;  %vm3700_vm4 = vcmask 1041920  }
 0x11b   :  { %v380_v15 = vsel %vm330_vm6, %v273_v11, %v355_v13  ;;  %vm5116_vm6 = vcmask 654336  }
 0x11c   :  { %v12226_v16 = vpack.c.bf16 %v380_v15, %v379_v14  ;;  %v277_v17 = vpop.f32.mrb[32].mxu0  ;;  %v11196_v15 = vld [vmem:[%s13982_s2 + $0x68] ss:$36 sps:$4 sm:$0xff]  }
 0x11d   :  { %v278_v18 = vadd.f32 %v12109_v36, %v277_v17  ;;  %v10956_v19 = vpop.f32.mrb[33].mxu0  ;;  %v11197_v17 = vld [vmem:[%s13982_s2 + $0xb0] ss:$36 sps:$4 sm:$0xff]  }
 0x11e   :  { %v280_v21 = vpop.f32.mrb[34].mxu0  ;;  %9378 = vmatmul.mubr.msk.bf16.gmra.mrb[28].mxu1 %vm684_vm5, %v12226_v16  ;;  %9391 = vmatmul.mubr.msk.bf16.gmra.mrb[80].mxu0 %vm684_vm5, %v12226_v16 }
 0x11f   :  { %v356_v22 = vmul.f32 0.02, %v278_v18  ;;  %v281_v23 = vadd.f32 %v12109_v36, %v280_v21  ;;  %v10957_v24 = vpop.f32.mrb[35].mxu0  ;;  %836 = vmatprep.mubr.bf16.mxu1 %v11760_v33  ;;  %997 = vmatprep.mubr.bf16.mxu0 %v11760_v33  ;;  %vm331_vm7 = vcmp.gt.f32.partialorder %v278_v18, 0.0 }
 0x121   :  { %vm332_vm8 = vcmp.gt.f32.partialorder %v281_v23, 0.0  ;;  %v357_v25 = vmul.f32 0.02, %v281_v23  ;;  %v381_v26 = vsel %vm331_vm7, %v278_v18, %v356_v22  ;;  %v11198_v18 = vld [vmem:[%s13982_s2 + $0xf8] ss:$36 sps:$4 sm:$0xff]  }
 0x123   :  { %v382_v27 = vsel %vm332_vm8, %v281_v23, %v357_v25 }
 0x124   :  { %v12236_v28 = vpack.c.bf16 %v382_v27, %v381_v26  ;;  %v285_v29 = vpop.f32.mrb[36].mxu0 }
 0x125   :  { %v286_v30 = vadd.f32 %v12109_v36, %v285_v29  ;;  %v10960_v32 = vpop.f32.mrb[37].mxu0 }
 0x126   :  { %v288_v34 = vpop.f32.mrb[38].mxu0  ;;  %9379 = vmatmul.mubr.msk.bf16.gmra.mrb[32].mxu1 %vm684_vm5, %v12236_v28  ;;  %9392 = vmatmul.mubr.msk.bf16.gmra.mrb[84].mxu0 %vm684_vm5, %v12236_v28 }
 0x127   :  { %v358_v35 = vmul.f32 0.02, %v286_v30  ;;  %v289_v37 = vadd.f32 %v12109_v36, %v288_v34  ;;  %v10961_v38 = vpop.f32.mrb[39].mxu0  ;;  %846 = vmatprep.mubr.bf16.mxu1 %v11760_v33  ;;  %1007 = vmatprep.mubr.bf16.mxu0 %v11760_v33  ;;  %vm333_vm9 = vcmp.gt.f32.partialorder %v286_v30, 0.0 }
 0x129   :  { %vm334_vm10 = vcmp.gt.f32.partialorder %v289_v37, 0.0  ;;  %v359_v39 = vmul.f32 0.02, %v289_v37  ;;  %v383_v40 = vsel %vm333_vm9, %v286_v30, %v358_v35 }
 0x12b   :  { %v384_v41 = vsel %vm334_vm10, %v289_v37, %v359_v39 }
 0x12c   :  { %v12246_v42 = vpack.c.bf16 %v384_v41, %v383_v40  ;;  %v293_v43 = vpop.f32.mrb[40].mxu0 }
 0x12d   :  { %v294_v45 = vadd.f32 %v12109_v36, %v293_v43  ;;  %v10964_v46 = vpop.f32.mrb[41].mxu0 }
 0x12e   :  { %v296_v48 = vpop.f32.mrb[42].mxu0  ;;  %9380 = vmatmul.mubr.msk.bf16.gmra.mrb[36].mxu1 %vm684_vm5, %v12246_v42  ;;  %9393 = vmatmul.mubr.msk.bf16.gmra.mrb[88].mxu0 %vm684_vm5, %v12246_v42 }
 0x12f   :  { %v360_v49 = vmul.f32 0.02, %v294_v45  ;;  %v297_v50 = vadd.f32 %v12109_v36, %v296_v48  ;;  %v10965_v51 = vpop.f32.mrb[43].mxu0  ;;  %856 = vmatprep.mubr.bf16.mxu1 %v11760_v33  ;;  %1017 = vmatprep.mubr.bf16.mxu0 %v11760_v33  ;;  %vm335_vm11 = vcmp.gt.f32.partialorder %v294_v45, 0.0 }
 0x131   :  { %vm336_vm12 = vcmp.gt.f32.partialorder %v297_v50, 0.0  ;;  %v361_v52 = vmul.f32 0.02, %v297_v50  ;;  %v385_v53 = vsel %vm335_vm11, %v294_v45, %v360_v49 }
 0x133   :  { %v386_v54 = vsel %vm336_vm12, %v297_v50, %v361_v52 }
 0x134   :  { %v12256_v55 = vpack.c.bf16 %v386_v54, %v385_v53  ;;  %v301_v57 = vpop.f32.mrb[44].mxu0 }
 0x135   :  { %v302_v58 = vadd.f32 %v12109_v36, %v301_v57  ;;  %v10968_v59 = vpop.f32.mrb[45].mxu0 }
 0x136   :  { %v304_v60 = vpop.f32.mrb[46].mxu0  ;;  %9381 = vmatmul.mubr.msk.bf16.gmra.mrb[40].mxu1 %vm684_vm5, %v12256_v55  ;;  %9394 = vmatmul.mubr.msk.bf16.gmra.mrb[92].mxu0 %vm684_vm5, %v12256_v55 }
 0x137   :  { %v362_v61 = vmul.f32 0.02, %v302_v58  ;;  %v305_v62 = vadd.f32 %v12109_v36, %v304_v60  ;;  %v10969_v63 = vpop.f32.mrb[47].mxu0  ;;  %866 = vmatprep.mubr.bf16.mxu1 %v11760_v33  ;;  %1027 = vmatprep.mubr.bf16.mxu0 %v11760_v33  ;;  %vm337_vm13 = vcmp.gt.f32.partialorder %v302_v58, 0.0 }
 0x139   :  { %vm338_vm14 = vcmp.gt.f32.partialorder %v305_v62, 0.0  ;;  %v363_v1 = vmul.f32 0.02, %v305_v62  ;;  %v387_v2 = vsel %vm337_vm13, %v302_v58, %v362_v61 }
 0x13b   :  { %v388_v4 = vsel %vm338_vm14, %v305_v62, %v363_v1  ;;  %vm6705_vm14 = vsmask.f32 256 }
 0x13c   :  { %v12266_v6 = vpack.c.bf16 %v388_v4, %v387_v2  ;;  %v309_v7 = vpop.f32.mrb[48].mxu0 }
 0x13d   :  { %v310_v8 = vadd.f32 %v12109_v36, %v309_v7  ;;  %v10972_v9 = vpop.f32.mrb[49].mxu0  ;;  %v11195_v36 = vld [vmem:[%s13982_s2 + $0x20] ss:$36 sps:$4 sm:$0xff]   ;;  %s11761_s2 = smov 64  }
 0x13e   :  { %v312_v10 = vpop.f32.mrb[50].mxu0  ;;  %9382 = vmatmul.mubr.msk.bf16.gmra.mrb[44].mxu1 %vm684_vm5, %v12266_v6  ;;  %9395 = vmatmul.mubr.msk.bf16.gmra.mrb[96].mxu0 %vm684_vm5, %v12266_v6 }
 0x13f   :  { %vm339_vm15 = vcmp.gt.f32.partialorder %v310_v8, 0.0  ;;  %v364_v11 = vmul.f32 0.02, %v310_v8  ;;  %v10973_v12 = vpop.f32.mrb[51].mxu0  ;;  %876 = vmatprep.mubr.bf16.mxu1 %v11760_v33  ;;  %1037 = vmatprep.mubr.bf16.mxu0 %v11760_v33 }
 0x141   :  { %v389_v13 = vsel %vm339_vm15, %v310_v8, %v364_v11  ;;  %vm6707_vm15 = vcmask 1044484  }
 0x142   :  { %v12275_v14 = vpack.c.bf16 %v389_v13, %v389_v13 }
 0x146   :  { %9383 = vmatmul.mubr.msk.bf16.gmra.mrb[48].mxu1 %vm684_vm5, %v12275_v14  ;;  %9396 = vmatmul.mubr.msk.bf16.gmra.mrb[100].mxu0 %vm684_vm5, %v12275_v14 }
 0x147   :  { %1078 = vmatprep.mubr.bf16.mxu1 %v11760_v33  ;;  %1239 = vmatprep.mubr.bf16.mxu0 %v11760_v33 }
 0x14e   :  { %9397 = vmatmul.mubr.msk.bf16.vlgmr.msra.gmra.mrb[52].mxu1 %vm684_vm5, %v12113_v47  ;;  %9410 = vmatmul.mubr.msk.bf16.vlgmr.msra.gmra.mrb[104].mxu0 %vm684_vm5, %v12113_v47 }
 0x14f   :  { %1088 = vmatprep.mubr.bf16.mxu1 %v11760_v33  ;;  %1249 = vmatprep.mubr.bf16.mxu0 %v11760_v33 }
 0x150   :  { %10975 = vmatpush3.bf16.msra.mxu1 %v11195_v36 }
 0x151   :  { %10976 = vmatprep.subr.bf16.mxu1 %v11758_v0 }
 0x154   :  { %10977 = vmatpush3.bf16.msra.mxu1 %v11196_v15 }
 0x155   :  { %10978 = vmatprep.subr.bf16.mxu1 %v11758_v0 }
 0x156   :  { %9398 = vmatmul.mubr.msk.bf16.gmra.mrb[56].mxu1 %vm684_vm5, %v12147_v3  ;;  %9411 = vmatmul.mubr.msk.bf16.gmra.mrb[108].mxu0 %vm684_vm5, %v12147_v3 }
 0x157   :  { %1098 = vmatprep.mubr.bf16.mxu1 %v11760_v33  ;;  %1259 = vmatprep.mubr.bf16.mxu0 %v11760_v33 }
 0x158   :  { %10979 = vmatpush3.bf16.msra.mxu1 %v11197_v17 }
 0x159   :  { %10980 = vmatprep.subr.bf16.mxu1 %v11758_v0 }
 0x15c   :  { %10981 = vmatpush3.bf16.msra.mxu1 %v11198_v18 }
 0x15e   :  { %9399 = vmatmul.mubr.msk.bf16.gmra.mrb[60].mxu1 %vm684_vm5, %v12175_v20  ;;  %9412 = vmatmul.mubr.msk.bf16.gmra.mrb[112].mxu0 %vm684_vm5, %v12175_v20 }
 0x15f   :  { %1108 = vmatprep.mubr.bf16.mxu1 %v11760_v33  ;;  %1269 = vmatprep.mubr.bf16.mxu0 %v11760_v33 }
 0x166   :  { %9400 = vmatmul.mubr.msk.bf16.gmra.mrb[64].mxu1 %vm684_vm5, %v12186_v31  ;;  %9413 = vmatmul.mubr.msk.bf16.gmra.mrb[116].mxu0 %vm684_vm5, %v12186_v31 }
 0x167   :  { %1118 = vmatprep.mubr.bf16.mxu1 %v11760_v33  ;;  %1279 = vmatprep.mubr.bf16.mxu0 %v11760_v33 }
 0x16e   :  { %9401 = vmatmul.mubr.msk.bf16.gmra.mrb[68].mxu1 %vm684_vm5, %v12196_v44  ;;  %9414 = vmatmul.mubr.msk.bf16.gmra.mrb[120].mxu0 %vm684_vm5, %v12196_v44 }
 0x16f   :  { %1128 = vmatprep.mubr.bf16.mxu1 %v11760_v33  ;;  %1289 = vmatprep.mubr.bf16.mxu0 %v11760_v33 }
 0x176   :  { %9402 = vmatmul.mubr.msk.bf16.gmra.mrb[72].mxu1 %vm684_vm5, %v12206_v56  ;;  %9415 = vmatmul.mubr.msk.bf16.gmra.mrb[124].mxu0 %vm684_vm5, %v12206_v56 }
 0x177   :  { %1138 = vmatprep.mubr.bf16.mxu1 %v11760_v33  ;;  %1299 = vmatprep.mubr.bf16.mxu0 %v11760_v33 }
 0x17e   :  { %9403 = vmatmul.mubr.msk.bf16.gmra.mrb[76].mxu1 %vm684_vm5, %v12216_v5  ;;  %9416 = vmatmul.mubr.msk.bf16.gmra.mrb[128].mxu0 %vm684_vm5, %v12216_v5 }
 0x17f   :  { %1148 = vmatprep.mubr.bf16.mxu1 %v11760_v33  ;;  %1309 = vmatprep.mubr.bf16.mxu0 %v11760_v33 }
 0x186   :  { %9404 = vmatmul.mubr.msk.bf16.gmra.mrb[80].mxu1 %vm684_vm5, %v12226_v16  ;;  %9417 = vmatmul.mubr.msk.bf16.gmra.mrb[132].mxu0 %vm684_vm5, %v12226_v16 }
 0x187   :  { %1158 = vmatprep.mubr.bf16.mxu1 %v11760_v33  ;;  %1319 = vmatprep.mubr.bf16.mxu0 %v11760_v33 }
 0x18e   :  { %9405 = vmatmul.mubr.msk.bf16.gmra.mrb[84].mxu1 %vm684_vm5, %v12236_v28  ;;  %9418 = vmatmul.mubr.msk.bf16.gmra.mrb[136].mxu0 %vm684_vm5, %v12236_v28 }
 0x18f   :  { %1168 = vmatprep.mubr.bf16.mxu1 %v11760_v33  ;;  %1329 = vmatprep.mubr.bf16.mxu0 %v11760_v33 }
 0x196   :  { %9406 = vmatmul.mubr.msk.bf16.gmra.mrb[88].mxu1 %vm684_vm5, %v12246_v42  ;;  %9419 = vmatmul.mubr.msk.bf16.gmra.mrb[140].mxu0 %vm684_vm5, %v12246_v42 }
 0x197   :  { %1178 = vmatprep.mubr.bf16.mxu1 %v11760_v33  ;;  %1339 = vmatprep.mubr.bf16.mxu0 %v11760_v33 }
 0x19e   :  { %9407 = vmatmul.mubr.msk.bf16.gmra.mrb[92].mxu1 %vm684_vm5, %v12256_v55  ;;  %9420 = vmatmul.mubr.msk.bf16.gmra.mrb[144].mxu0 %vm684_vm5, %v12256_v55 }
 0x19f   :  { %1188 = vmatprep.mubr.bf16.mxu1 %v11760_v33  ;;  %1349 = vmatprep.mubr.bf16.mxu0 %v11760_v33 }
 0x1a6   :  { %9408 = vmatmul.mubr.msk.bf16.gmra.mrb[96].mxu1 %vm684_vm5, %v12266_v6  ;;  %9421 = vmatmul.mubr.msk.bf16.gmra.mrb[148].mxu0 %vm684_vm5, %v12266_v6 }
 0x1a7   :  { %1198 = vmatprep.mubr.bf16.mxu1 %v11760_v33  ;;  %1359 = vmatprep.mubr.bf16.mxu0 %v11760_v33 }
 0x1ae   :  { %9409 = vmatmul.mubr.msk.bf16.gmra.mrb[100].mxu1 %vm684_vm5, %v12275_v14  ;;  %9422 = vmatmul.mubr.msk.bf16.gmra.mrb[152].mxu0 %vm684_vm5, %v12275_v14 }
 0x1af   :  { %10982 = vmatprep.mubr.msk.bf16.mxu1 %vm11759_vm1, %v11758_v0 }
 0x1b6   :  { %10983 = vmatmul.mubr.msk.bf16.vlgmr.msra.gmra.mrb[104].mxu1 %vm684_vm5, %v12113_v47 }
 0x1b7   :  { %10986 = vmatprep.mubr.msk.bf16.mxu1 %vm11759_vm1, %v11758_v0 }
 0x1b9   :  { %v758_v19 = vpop.f32.mrb[0].mxu1  ;;  %v919_v21 = vpop.f32.mrb[52].mxu0 }
 0x1ba   :  { %v760_v22 = vpop.f32.mrb[1].mxu1  ;;  %v921_v23 = vpop.f32.mrb[53].mxu0 }
 0x1bb   :  { %v10358_v33 = vpack.c.bf16 %v760_v22, %v758_v19  ;;  %v10359_v24 = vpack.c.bf16 %v921_v23, %v919_v21  ;;  %v762_v25 = vpop.f32.mrb[2].mxu1  ;;  %v923_v26 = vpop.f32.mrb[54].mxu0 }
 0x1bc   :  { %v764_v27 = vpop.f32.mrb[3].mxu1  ;;  %v925_v29 = vpop.f32.mrb[55].mxu0 }
 0x1bd   :  { %2213 = vst [vmem:[#allocation2] sm:$0xff] %v10358_v33  ;;  %2214 = vst [vmem:[#allocation2 + $0x8] sm:$0xff] %v10359_v24  ;;  %v10363_v30 = vpack.c.bf16 %v764_v27, %v762_v25  ;;  %v10364_v32 = vpack.c.bf16 %v925_v29, %v923_v26 }
 0x1be   :  { %10987 = vmatmul.mubr.msk.bf16.gmra.mrb[108].mxu1 %vm684_vm5, %v12147_v3 }
 0x1bf   :  { %2218 = vst [vmem:[#allocation2 + $0x24] sm:$0xff] %v10363_v30  ;;  %2219 = vst [vmem:[#allocation2 + $0x2c] sm:$0xff] %v10364_v32  ;;  %10990 = vmatprep.mubr.msk.bf16.mxu1 %vm11759_vm1, %v11758_v0 }
 0x1c1   :  { %v768_v47 = vpop.f32.mrb[4].mxu1  ;;  %v929_v34 = vpop.f32.mrb[56].mxu0 }
 0x1c2   :  { %v770_v35 = vpop.f32.mrb[5].mxu1  ;;  %v931_v37 = vpop.f32.mrb[57].mxu0 }
 0x1c3   :  { %v10368_v38 = vpack.c.bf16 %v770_v35, %v768_v47  ;;  %v10369_v39 = vpack.c.bf16 %v931_v37, %v929_v34  ;;  %v772_v40 = vpop.f32.mrb[6].mxu1  ;;  %v933_v41 = vpop.f32.mrb[58].mxu0 }
 0x1c4   :  { %v2455_v43 = vld [vmem:[#allocation2] sm:$0xf]  ;;  %v2710_v45 = vld [vmem:[#allocation2 + $0x4] sm:$0xf]  ;;  %v2964_v46 = vld [vmem:[#allocation2 + $0x8] sm:$0xf] }
 0x1c5   :  { %v3218_v48 = vld [vmem:[#allocation2 + $0xc] sm:$0xf]  ;;  %2223 = vst [vmem:[#allocation2 + $0x48] sm:$0xff] %v10368_v38  ;;  %2224 = vst [vmem:[#allocation2 + $0x50] sm:$0xff] %v10369_v39  ;;  %v774_v3 = vpop.f32.mrb[7].mxu1  ;;  %v935_v49 = vpop.f32.mrb[59].mxu0 }
 0x1c6   :  { %v2456_v50 = vld [vmem:[#allocation2 + $0x24] sm:$0xf]  ;;  %v2711_v51 = vld [vmem:[#allocation2 + $0x28] sm:$0xf]  ;;  %v2965_v52 = vld [vmem:[#allocation2 + $0x2c] sm:$0xf]  ;;  %v10373_v53 = vpack.c.bf16 %v774_v3, %v772_v40  ;;  %v10374_v54 = vpack.c.bf16 %v935_v49, %v933_v41  ;;  %10991 = vmatmul.mubr.msk.bf16.gmra.mrb[112].mxu1 %vm684_vm5, %v12175_v20 }
 0x1c7   :  { %v9561_v57 = vcombine.low %v2455_v43, %v2456_v50  ;;  %v9587_v58 = vcombine.low %v2710_v45, %v2711_v51  ;;  %v9613_v59 = vcombine.low %v2964_v46, %v2965_v52  ;;  %v3219_v60 = vld [vmem:[#allocation2 + $0x30] sm:$0xf]  ;;  %v11199_v61 = vld [vmem:[#allocation2] ss:$36 sps:$4 sm:$0xff]   ;;  %10994 = vmatprep.mubr.msk.bf16.mxu1 %vm11759_vm1, %v11758_v0 }
 0x1c8   :  { %v9639_v62 = vcombine.low %v3218_v48, %v3219_v60  ;;  %2228 = vst [vmem:[#allocation2 + $0x6c] sm:$0xff] %v10373_v53  ;;  %2229 = vst [vmem:[#allocation2 + $0x74] sm:$0xff] %v10374_v54  ;;  %2658 = vrot.lane.b32.xlu0 %v11199_v61, %s11761_s2 }
 0x1c9   :  { %2556 = vst.msk [vmem:[#allocation3] sm:$0xff] %vm684_vm5, %v9561_v57  ;;  %2811 = vst.msk [vmem:[#allocation3 + $0xd0] sm:$0xff] %vm684_vm5, %v9587_v58  ;;  %v778_v20 = vpop.f32.mrb[8].mxu1  ;;  %v939_v63 = vpop.f32.mrb[60].mxu0 }
 0x1ca   :  { %3065 = vst.msk [vmem:[#allocation3 + $0x1a0] sm:$0xff] %vm684_vm5, %v9613_v59  ;;  %3319 = vst.msk [vmem:[#allocation3 + $0x270] sm:$0xff] %vm684_vm5, %v9639_v62  ;;  %v780_v1 = vpop.f32.mrb[9].mxu1  ;;  %v941_v2 = vpop.f32.mrb[61].mxu0 }
 0x1cb   :  { %v10378_v4 = vpack.c.bf16 %v780_v1, %v778_v20  ;;  %v10379_v7 = vpack.c.bf16 %v941_v2, %v939_v63  ;;  %v782_v8 = vpop.f32.mrb[10].mxu1  ;;  %v943_v9 = vpop.f32.mrb[62].mxu0 }
 0x1cc   :  { %v2457_v10 = vld [vmem:[#allocation2 + $0x48] sm:$0xf]  ;;  %v2712_v11 = vld [vmem:[#allocation2 + $0x4c] sm:$0xf]  ;;  %v2966_v12 = vld [vmem:[#allocation2 + $0x50] sm:$0xf] }
 0x1cd   :  { %2233 = vst [vmem:[#allocation2 + $0x90] sm:$0xff] %v10378_v4  ;;  %2234 = vst [vmem:[#allocation2 + $0x98] sm:$0xff] %v10379_v7  ;;  %v784_v13 = vpop.f32.mrb[11].mxu1  ;;  %v945_v36 = vpop.f32.mrb[63].mxu0  ;;  %v3220_v15 = vld [vmem:[#allocation2 + $0x54] sm:$0xf] }
 0x1ce   :  { %v10383_v17 = vpack.c.bf16 %v784_v13, %v782_v8  ;;  %v10384_v18 = vpack.c.bf16 %v945_v36, %v943_v9  ;;  %10995 = vmatmul.mubr.msk.bf16.gmra.mrb[116].mxu1 %vm684_vm5, %v12186_v31 }
 0x1cf   :  { %v2458_v19 = vld [vmem:[#allocation2 + $0x6c] sm:$0xf]  ;;  %v2713_v21 = vld [vmem:[#allocation2 + $0x70] sm:$0xf]  ;;  %v2967_v22 = vld [vmem:[#allocation2 + $0x74] sm:$0xf]  ;;  %10998 = vmatprep.mubr.msk.bf16.mxu1 %vm11759_vm1, %v11758_v0 }
 0x1d0   :  { %v9562_v23 = vcombine.low %v2457_v10, %v2458_v19  ;;  %v9588_v33 = vcombine.low %v2712_v11, %v2713_v21  ;;  %v9614_v24 = vcombine.low %v2966_v12, %v2967_v22  ;;  %v3221_v25 = vld [vmem:[#allocation2 + $0x78] sm:$0xf]  ;;  %2238 = vst [vmem:[#allocation2 + $0xb4] sm:$0xff] %v10383_v17  ;;  %2239 = vst [vmem:[#allocation2 + $0xbc] sm:$0xff] %v10384_v18  ;;  %v11200_v26 = vld [vmem:[#allocation2 + $0x48] ss:$36 sps:$4 sm:$0xff]  }
 0x1d1   :  { %v9640_v27 = vcombine.low %v3220_v15, %v3221_v25  ;;  %v788_v29 = vpop.f32.mrb[12].mxu1  ;;  %v949_v30 = vpop.f32.mrb[64].mxu0  ;;  %2660 = vrot.lane.b32.xlu0 %v11200_v26, %s11761_s2  ;;  %v11201_v38 = vld [vmem:[#allocation2 + $0x4c] ss:$36 sps:$4 sm:$0xff]  }
 0x1d2   :  { %2557 = vst.msk [vmem:[#allocation3 + $0x8] sm:$0xff] %vm684_vm5, %v9562_v23  ;;  %2812 = vst.msk [vmem:[#allocation3 + $0xd8] sm:$0xff] %vm684_vm5, %v9588_v33  ;;  %v790_v31 = vpop.f32.mrb[13].mxu1  ;;  %v951_v32 = vpop.f32.mrb[65].mxu0 }
 0x1d3   :  { %3066 = vst.msk [vmem:[#allocation3 + $0x1a8] sm:$0xff] %vm684_vm5, %v9614_v24  ;;  %3320 = vst.msk [vmem:[#allocation3 + $0x278] sm:$0xff] %vm684_vm5, %v9640_v27  ;;  %v10388_v47 = vpack.c.bf16 %v790_v31, %v788_v29  ;;  %v10389_v34 = vpack.c.bf16 %v951_v32, %v949_v30  ;;  %v792_v35 = vpop.f32.mrb[14].mxu1  ;;  %v953_v37 = vpop.f32.mrb[66].mxu0 }
 0x1d4   :  { %v2459_v39 = vld [vmem:[#allocation2 + $0x90] sm:$0xf]  ;;  %v2714_v40 = vld [vmem:[#allocation2 + $0x94] sm:$0xf]  ;;  %v2968_v41 = vld [vmem:[#allocation2 + $0x98] sm:$0xf] }
 0x1d5   :  { %2243 = vst [vmem:[#allocation2 + $0xd8] sm:$0xff] %v10388_v47  ;;  %2244 = vst [vmem:[#allocation2 + $0xe0] sm:$0xff] %v10389_v34  ;;  %v794_v43 = vpop.f32.mrb[15].mxu1  ;;  %v955_v45 = vpop.f32.mrb[67].mxu0  ;;  %v3222_v46 = vld [vmem:[#allocation2 + $0x9c] sm:$0xf]  ;;  %2914 = vrot.lane.b32.xlu0 %v11201_v38, %s11761_s2 }
 0x1d6   :  { %v10393_v48 = vpack.c.bf16 %v794_v43, %v792_v35  ;;  %v10394_v3 = vpack.c.bf16 %v955_v45, %v953_v37  ;;  %10999 = vmatmul.mubr.msk.bf16.gmra.mrb[120].mxu1 %vm684_vm5, %v12196_v44 }
 0x1d7   :  { %v2460_v49 = vld [vmem:[#allocation2 + $0xb4] sm:$0xf]  ;;  %v2715_v50 = vld [vmem:[#allocation2 + $0xb8] sm:$0xf]  ;;  %v2969_v51 = vld [vmem:[#allocation2 + $0xbc] sm:$0xf]  ;;  %11002 = vmatprep.mubr.msk.bf16.mxu1 %vm11759_vm1, %v11758_v0 }
 0x1d8   :  { %v9563_v52 = vcombine.low %v2459_v39, %v2460_v49  ;;  %v9589_v53 = vcombine.low %v2714_v40, %v2715_v50  ;;  %v9615_v54 = vcombine.low %v2968_v41, %v2969_v51  ;;  %v3223_v57 = vld [vmem:[#allocation2 + $0xc0] sm:$0xf]  ;;  %2248 = vst [vmem:[#allocation2 + $0xfc] sm:$0xff] %v10393_v48  ;;  %2249 = vst [vmem:[#allocation2 + $0x104] sm:$0xff] %v10394_v3  ;;  %v11202_v58 = vld [vmem:[#allocation2 + $0x90] ss:$36 sps:$4 sm:$0xff]  }
 0x1d9   :  { %v9641_v59 = vcombine.low %v3222_v46, %v3223_v57  ;;  %v798_v60 = vpop.f32.mrb[16].mxu1  ;;  %v959_v61 = vpop.f32.mrb[68].mxu0  ;;  %2662 = vrot.lane.b32.xlu0 %v11202_v58, %s11761_s2  ;;  %v11203_v4 = vld [vmem:[#allocation2 + $0x94] ss:$36 sps:$4 sm:$0xff]  }
 0x1da   :  { %2558 = vst.msk [vmem:[#allocation3 + $0x10] sm:$0xff] %vm684_vm5, %v9563_v52  ;;  %2813 = vst.msk [vmem:[#allocation3 + $0xe0] sm:$0xff] %vm684_vm5, %v9589_v53  ;;  %v800_v44 = vpop.f32.mrb[17].mxu1  ;;  %v961_v62 = vpop.f32.mrb[69].mxu0 }
 0x1db   :  { %3067 = vst.msk [vmem:[#allocation3 + $0x1b0] sm:$0xff] %vm684_vm5, %v9615_v54  ;;  %3321 = vst.msk [vmem:[#allocation3 + $0x280] sm:$0xff] %vm684_vm5, %v9641_v59  ;;  %v10398_v20 = vpack.c.bf16 %v800_v44, %v798_v60  ;;  %v10399_v63 = vpack.c.bf16 %v961_v62, %v959_v61  ;;  %v802_v1 = vpop.f32.mrb[18].mxu1  ;;  %v963_v2 = vpop.f32.mrb[70].mxu0 }
 0x1dc   :  { %v2461_v7 = vld [vmem:[#allocation2 + $0xd8] sm:$0xf]  ;;  %v2716_v8 = vld [vmem:[#allocation2 + $0xdc] sm:$0xf]  ;;  %v2970_v9 = vld [vmem:[#allocation2 + $0xe0] sm:$0xf] }
 0x1dd   :  { %2253 = vst [vmem:[#allocation2 + $0x120] sm:$0xff] %v10398_v20  ;;  %2254 = vst [vmem:[#allocation2 + $0x128] sm:$0xff] %v10399_v63  ;;  %v804_v10 = vpop.f32.mrb[19].mxu1  ;;  %v965_v11 = vpop.f32.mrb[71].mxu0  ;;  %v3224_v12 = vld [vmem:[#allocation2 + $0xe4] sm:$0xf]  ;;  %2916 = vrot.lane.b32.xlu0 %v11203_v4, %s11761_s2 }
 0x1de   :  { %v10403_v13 = vpack.c.bf16 %v804_v10, %v802_v1  ;;  %v10404_v36 = vpack.c.bf16 %v965_v11, %v963_v2  ;;  %11003 = vmatmul.mubr.msk.bf16.gmra.mrb[124].mxu1 %vm684_vm5, %v12206_v56 }
 0x1df   :  { %v2462_v15 = vld [vmem:[#allocation2 + $0xfc] sm:$0xf]  ;;  %v2717_v17 = vld [vmem:[#allocation2 + $0x100] sm:$0xf]  ;;  %v2971_v18 = vld [vmem:[#allocation2 + $0x104] sm:$0xf]  ;;  %11006 = vmatprep.mubr.msk.bf16.mxu1 %vm11759_vm1, %v11758_v0 }
 0x1e0   :  { %v9564_v19 = vcombine.low %v2461_v7, %v2462_v15  ;;  %v9590_v21 = vcombine.low %v2716_v8, %v2717_v17  ;;  %v9616_v22 = vcombine.low %v2970_v9, %v2971_v18  ;;  %v3225_v23 = vld [vmem:[#allocation2 + $0x108] sm:$0xf]  ;;  %2258 = vst [vmem:[#allocation2 + $0x144] sm:$0xff] %v10403_v13  ;;  %2259 = vst [vmem:[#allocation2 + $0x14c] sm:$0xff] %v10404_v36  ;;  %v11204_v33 = vld [vmem:[#allocation2 + $0xd8] ss:$36 sps:$4 sm:$0xff]  }
 0x1e1   :  { %v9642_v24 = vcombine.low %v3224_v12, %v3225_v23  ;;  %v808_v25 = vpop.f32.mrb[20].mxu1  ;;  %v969_v26 = vpop.f32.mrb[72].mxu0  ;;  %2664 = vrot.lane.b32.xlu0 %v11204_v33, %s11761_s2  ;;  %v11205_v47 = vld [vmem:[#allocation2 + $0xdc] ss:$36 sps:$4 sm:$0xff]  }
 0x1e2   :  { %2559 = vst.msk [vmem:[#allocation3 + $0x18] sm:$0xff] %vm684_vm5, %v9564_v19  ;;  %2814 = vst.msk [vmem:[#allocation3 + $0xe8] sm:$0xff] %vm684_vm5, %v9590_v21  ;;  %v810_v56 = vpop.f32.mrb[21].mxu1  ;;  %v971_v27 = vpop.f32.mrb[73].mxu0 }
 0x1e3   :  { %3068 = vst.msk [vmem:[#allocation3 + $0x1b8] sm:$0xff] %vm684_vm5, %v9616_v22  ;;  %3322 = vst.msk [vmem:[#allocation3 + $0x288] sm:$0xff] %vm684_vm5, %v9642_v24  ;;  %v10408_v29 = vpack.c.bf16 %v810_v56, %v808_v25  ;;  %v10409_v30 = vpack.c.bf16 %v971_v27, %v969_v26  ;;  %v812_v31 = vpop.f32.mrb[22].mxu1  ;;  %v973_v32 = vpop.f32.mrb[74].mxu0 }
 0x1e4   :  { %v2463_v34 = vld [vmem:[#allocation2 + $0x120] sm:$0xf]  ;;  %v2718_v35 = vld [vmem:[#allocation2 + $0x124] sm:$0xf]  ;;  %v2972_v37 = vld [vmem:[#allocation2 + $0x128] sm:$0xf] }
 0x1e5   :  { %2263 = vst [vmem:[#allocation2 + $0x168] sm:$0xff] %v10408_v29  ;;  %2264 = vst [vmem:[#allocation2 + $0x170] sm:$0xff] %v10409_v30  ;;  %v814_v38 = vpop.f32.mrb[23].mxu1  ;;  %v975_v39 = vpop.f32.mrb[75].mxu0  ;;  %v3226_v40 = vld [vmem:[#allocation2 + $0x12c] sm:$0xf]  ;;  %2918 = vrot.lane.b32.xlu0 %v11205_v47, %s11761_s2 }
 0x1e6   :  { %v10413_v41 = vpack.c.bf16 %v814_v38, %v812_v31  ;;  %v10414_v43 = vpack.c.bf16 %v975_v39, %v973_v32  ;;  %11007 = vmatmul.mubr.msk.bf16.gmra.mrb[128].mxu1 %vm684_vm5, %v12216_v5 }
 0x1e7   :  { %v2464_v45 = vld [vmem:[#allocation2 + $0x144] sm:$0xf]  ;;  %v2719_v46 = vld [vmem:[#allocation2 + $0x148] sm:$0xf]  ;;  %v2973_v48 = vld [vmem:[#allocation2 + $0x14c] sm:$0xf]  ;;  %11010 = vmatprep.mubr.msk.bf16.mxu1 %vm11759_vm1, %v11758_v0 }
 0x1e8   :  { %v9565_v3 = vcombine.low %v2463_v34, %v2464_v45  ;;  %v9591_v49 = vcombine.low %v2718_v35, %v2719_v46  ;;  %v9617_v50 = vcombine.low %v2972_v37, %v2973_v48  ;;  %v3227_v51 = vld [vmem:[#allocation2 + $0x150] sm:$0xf]  ;;  %2268 = vst [vmem:[#allocation2 + $0x18c] sm:$0xff] %v10413_v41  ;;  %2269 = vst [vmem:[#allocation2 + $0x194] sm:$0xff] %v10414_v43  ;;  %v11206_v52 = vld [vmem:[#allocation2 + $0x124] ss:$36 sps:$4 sm:$0xff]  }
 0x1e9   :  { %v9643_v53 = vcombine.low %v3226_v40, %v3227_v51  ;;  %v11207_v54 = vld [vmem:[#allocation2 + $0x120] ss:$36 sps:$4 sm:$0xff]   ;;  %v818_v57 = vpop.f32.mrb[24].mxu1  ;;  %v979_v58 = vpop.f32.mrb[76].mxu0  ;;  %2920 = vrot.lane.b32.xlu0 %v11206_v52, %s11761_s2 }
 0x1ea   :  { %2560 = vst.msk [vmem:[#allocation3 + $0x20] sm:$0xff] %vm684_vm5, %v9565_v3  ;;  %2815 = vst.msk [vmem:[#allocation3 + $0xf0] sm:$0xff] %vm684_vm5, %v9591_v49  ;;  %v820_v5 = vpop.f32.mrb[25].mxu1  ;;  %v981_v59 = vpop.f32.mrb[77].mxu0  ;;  %2666 = vrot.lane.b32.xlu1 %v11207_v54, %s11761_s2 }
 0x1eb   :  { %3069 = vst.msk [vmem:[#allocation3 + $0x1c0] sm:$0xff] %vm684_vm5, %v9617_v50  ;;  %3323 = vst.msk [vmem:[#allocation3 + $0x290] sm:$0xff] %vm684_vm5, %v9643_v53  ;;  %v10418_v60 = vpack.c.bf16 %v820_v5, %v818_v57  ;;  %v10419_v61 = vpack.c.bf16 %v981_v59, %v979_v58  ;;  %v822_v44 = vpop.f32.mrb[26].mxu1  ;;  %v983_v62 = vpop.f32.mrb[78].mxu0 }
 0x1ec   :  { %v2465_v20 = vld [vmem:[#allocation2 + $0x168] sm:$0xf]  ;;  %v2720_v63 = vld [vmem:[#allocation2 + $0x16c] sm:$0xf]  ;;  %v2974_v1 = vld [vmem:[#allocation2 + $0x170] sm:$0xf] }
 0x1ed   :  { %2273 = vst [vmem:[#allocation2 + $0x1b0] sm:$0xff] %v10418_v60  ;;  %2274 = vst [vmem:[#allocation2 + $0x1b8] sm:$0xff] %v10419_v61  ;;  %v824_v2 = vpop.f32.mrb[27].mxu1  ;;  %v985_v4 = vpop.f32.mrb[79].mxu0  ;;  %v3228_v7 = vld [vmem:[#allocation2 + $0x174] sm:$0xf] }
 0x1ee   :  { %v10423_v8 = vpack.c.bf16 %v824_v2, %v822_v44  ;;  %v10424_v9 = vpack.c.bf16 %v985_v4, %v983_v62  ;;  %11011 = vmatmul.mubr.msk.bf16.gmra.mrb[132].mxu1 %vm684_vm5, %v12226_v16 }
 0x1ef   :  { %v2466_v10 = vld [vmem:[#allocation2 + $0x18c] sm:$0xf]  ;;  %v2721_v11 = vld [vmem:[#allocation2 + $0x190] sm:$0xf]  ;;  %v2975_v12 = vld [vmem:[#allocation2 + $0x194] sm:$0xf]  ;;  %11014 = vmatprep.mubr.msk.bf16.mxu1 %vm11759_vm1, %v11758_v0 }
 0x1f0   :  { %v9566_v13 = vcombine.low %v2465_v20, %v2466_v10  ;;  %v9592_v36 = vcombine.low %v2720_v63, %v2721_v11  ;;  %v9618_v15 = vcombine.low %v2974_v1, %v2975_v12  ;;  %v3229_v17 = vld [vmem:[#allocation2 + $0x198] sm:$0xf]  ;;  %2278 = vst [vmem:[#allocation2 + $0x1d4] sm:$0xff] %v10423_v8  ;;  %2279 = vst [vmem:[#allocation2 + $0x1dc] sm:$0xff] %v10424_v9  ;;  %v11208_v18 = vld [vmem:[#allocation2 + $0x168] ss:$36 sps:$4 sm:$0xff]  }
 0x1f1   :  { %v9644_v19 = vcombine.low %v3228_v7, %v3229_v17  ;;  %v828_v21 = vpop.f32.mrb[28].mxu1  ;;  %v989_v22 = vpop.f32.mrb[80].mxu0  ;;  %2668 = vrot.lane.b32.xlu0 %v11208_v18, %s11761_s2  ;;  %v11209_v56 = vld [vmem:[#allocation2 + $0x16c] ss:$36 sps:$4 sm:$0xff]  }
 0x1f2   :  { %2561 = vst.msk [vmem:[#allocation3 + $0x28] sm:$0xff] %vm684_vm5, %v9566_v13  ;;  %2816 = vst.msk [vmem:[#allocation3 + $0xf8] sm:$0xff] %vm684_vm5, %v9592_v36  ;;  %v830_v16 = vpop.f32.mrb[29].mxu1  ;;  %v991_v23 = vpop.f32.mrb[81].mxu0 }
 0x1f3   :  { %3070 = vst.msk [vmem:[#allocation3 + $0x1c8] sm:$0xff] %vm684_vm5, %v9618_v15  ;;  %3324 = vst.msk [vmem:[#allocation3 + $0x298] sm:$0xff] %vm684_vm5, %v9644_v19  ;;  %v10428_v33 = vpack.c.bf16 %v830_v16, %v828_v21  ;;  %v10429_v24 = vpack.c.bf16 %v991_v23, %v989_v22  ;;  %v832_v25 = vpop.f32.mrb[30].mxu1  ;;  %v993_v26 = vpop.f32.mrb[82].mxu0 }
 0x1f4   :  { %v2467_v27 = vld [vmem:[#allocation2 + $0x1b0] sm:$0xf]  ;;  %v2722_v29 = vld [vmem:[#allocation2 + $0x1b4] sm:$0xf]  ;;  %v2976_v30 = vld [vmem:[#allocation2 + $0x1b8] sm:$0xf] }
 0x1f5   :  { %2283 = vst [vmem:[#allocation2 + $0x1f8] sm:$0xff] %v10428_v33  ;;  %2284 = vst [vmem:[#allocation2 + $0x200] sm:$0xff] %v10429_v24  ;;  %v834_v31 = vpop.f32.mrb[31].mxu1  ;;  %v995_v32 = vpop.f32.mrb[83].mxu0  ;;  %v3230_v47 = vld [vmem:[#allocation2 + $0x1bc] sm:$0xf]  ;;  %2922 = vrot.lane.b32.xlu0 %v11209_v56, %s11761_s2 }
 0x1f6   :  { %v10433_v34 = vpack.c.bf16 %v834_v31, %v832_v25  ;;  %v10434_v35 = vpack.c.bf16 %v995_v32, %v993_v26  ;;  %11015 = vmatmul.mubr.msk.bf16.gmra.mrb[136].mxu1 %vm684_vm5, %v12236_v28 }
 0x1f7   :  { %v2468_v37 = vld [vmem:[#allocation2 + $0x1d4] sm:$0xf]  ;;  %v2723_v38 = vld [vmem:[#allocation2 + $0x1d8] sm:$0xf]  ;;  %v2977_v39 = vld [vmem:[#allocation2 + $0x1dc] sm:$0xf]  ;;  %11018 = vmatprep.mubr.msk.bf16.mxu1 %vm11759_vm1, %v11758_v0 }
 0x1f8   :  { %v9567_v40 = vcombine.low %v2467_v27, %v2468_v37  ;;  %v9593_v41 = vcombine.low %v2722_v29, %v2723_v38  ;;  %v9619_v43 = vcombine.low %v2976_v30, %v2977_v39  ;;  %v3231_v45 = vld [vmem:[#allocation2 + $0x1e0] sm:$0xf]  ;;  %2288 = vst [vmem:[#allocation2 + $0x21c] sm:$0xff] %v10433_v34  ;;  %2289 = vst [vmem:[#allocation2 + $0x224] sm:$0xff] %v10434_v35  ;;  %v11210_v46 = vld [vmem:[#allocation2 + $0x1b0] ss:$36 sps:$4 sm:$0xff]  }
 0x1f9   :  { %v9645_v48 = vcombine.low %v3230_v47, %v3231_v45  ;;  %v838_v3 = vpop.f32.mrb[32].mxu1  ;;  %v999_v49 = vpop.f32.mrb[84].mxu0  ;;  %2670 = vrot.lane.b32.xlu0 %v11210_v46, %s11761_s2  ;;  %v11211_v57 = vld [vmem:[#allocation2 + $0x1b4] ss:$36 sps:$4 sm:$0xff]  }
 0x1fa   :  { %2562 = vst.msk [vmem:[#allocation3 + $0x30] sm:$0xff] %vm684_vm5, %v9567_v40  ;;  %2817 = vst.msk [vmem:[#allocation3 + $0x100] sm:$0xff] %vm684_vm5, %v9593_v41  ;;  %v840_v28 = vpop.f32.mrb[33].mxu1  ;;  %v1001_v50 = vpop.f32.mrb[85].mxu0 }
 0x1fb   :  { %3071 = vst.msk [vmem:[#allocation3 + $0x1d0] sm:$0xff] %vm684_vm5, %v9619_v43  ;;  %3325 = vst.msk [vmem:[#allocation3 + $0x2a0] sm:$0xff] %vm684_vm5, %v9645_v48  ;;  %v10438_v51 = vpack.c.bf16 %v840_v28, %v838_v3  ;;  %v10439_v52 = vpack.c.bf16 %v1001_v50, %v999_v49  ;;  %v842_v53 = vpop.f32.mrb[34].mxu1  ;;  %v1003_v54 = vpop.f32.mrb[86].mxu0 }
 0x1fc   :  { %v2469_v58 = vld [vmem:[#allocation2 + $0x1f8] sm:$0xf]  ;;  %v2724_v5 = vld [vmem:[#allocation2 + $0x1fc] sm:$0xf]  ;;  %v2978_v59 = vld [vmem:[#allocation2 + $0x200] sm:$0xf] }
 0x1fd   :  { %2293 = vst [vmem:[#allocation2 + $0x240] sm:$0xff] %v10438_v51  ;;  %2294 = vst [vmem:[#allocation2 + $0x248] sm:$0xff] %v10439_v52  ;;  %v844_v60 = vpop.f32.mrb[35].mxu1  ;;  %v1005_v61 = vpop.f32.mrb[87].mxu0  ;;  %v3232_v44 = vld [vmem:[#allocation2 + $0x204] sm:$0xf]  ;;  %2924 = vrot.lane.b32.xlu0 %v11211_v57, %s11761_s2 }
 0x1fe   :  { %v10443_v62 = vpack.c.bf16 %v844_v60, %v842_v53  ;;  %v10444_v20 = vpack.c.bf16 %v1005_v61, %v1003_v54  ;;  %11019 = vmatmul.mubr.msk.bf16.gmra.mrb[140].mxu1 %vm684_vm5, %v12246_v42 }
 0x1ff   :  { %v2470_v63 = vld [vmem:[#allocation2 + $0x21c] sm:$0xf]  ;;  %v2725_v1 = vld [vmem:[#allocation2 + $0x220] sm:$0xf]  ;;  %v2979_v2 = vld [vmem:[#allocation2 + $0x224] sm:$0xf]  ;;  %11022 = vmatprep.mubr.msk.bf16.mxu1 %vm11759_vm1, %v11758_v0 }
 0x200   :  { %v9568_v4 = vcombine.low %v2469_v58, %v2470_v63  ;;  %v9594_v7 = vcombine.low %v2724_v5, %v2725_v1  ;;  %v9620_v8 = vcombine.low %v2978_v59, %v2979_v2  ;;  %v3233_v9 = vld [vmem:[#allocation2 + $0x228] sm:$0xf]  ;;  %2298 = vst [vmem:[#allocation2 + $0x264] sm:$0xff] %v10443_v62  ;;  %2299 = vst [vmem:[#allocation2 + $0x26c] sm:$0xff] %v10444_v20  ;;  %v11212_v10 = vld [vmem:[#allocation2 + $0x1f8] ss:$36 sps:$4 sm:$0xff]  }
 0x201   :  { %v9646_v11 = vcombine.low %v3232_v44, %v3233_v9  ;;  %v848_v12 = vpop.f32.mrb[36].mxu1  ;;  %v1009_v13 = vpop.f32.mrb[88].mxu0  ;;  %2672 = vrot.lane.b32.xlu1 %v11212_v10, %s11761_s2 }
 0x202   :  { %2563 = vst.msk [vmem:[#allocation3 + $0x38] sm:$0xff] %vm684_vm5, %v9568_v4  ;;  %2818 = vst.msk [vmem:[#allocation3 + $0x108] sm:$0xff] %vm684_vm5, %v9594_v7  ;;  %v850_v42 = vpop.f32.mrb[37].mxu1  ;;  %v1011_v36 = vpop.f32.mrb[89].mxu0 }
 0x203   :  { %3072 = vst.msk [vmem:[#allocation3 + $0x1d8] sm:$0xff] %vm684_vm5, %v9620_v8  ;;  %3326 = vst.msk [vmem:[#allocation3 + $0x2a8] sm:$0xff] %vm684_vm5, %v9646_v11  ;;  %v10448_v15 = vpack.c.bf16 %v850_v42, %v848_v12  ;;  %v10449_v17 = vpack.c.bf16 %v1011_v36, %v1009_v13  ;;  %v852_v18 = vpop.f32.mrb[38].mxu1  ;;  %v1013_v19 = vpop.f32.mrb[90].mxu0 }
 0x204   :  { %v2471_v21 = vld [vmem:[#allocation2 + $0x240] sm:$0xf]  ;;  %v2726_v22 = vld [vmem:[#allocation2 + $0x244] sm:$0xf]  ;;  %v2980_v16 = vld [vmem:[#allocation2 + $0x248] sm:$0xf] }
 0x205   :  { %2303 = vst [vmem:[#allocation2 + $0x288] sm:$0xff] %v10448_v15  ;;  %2304 = vst [vmem:[#allocation2 + $0x290] sm:$0xff] %v10449_v17  ;;  %v854_v23 = vpop.f32.mrb[39].mxu1  ;;  %v1015_v33 = vpop.f32.mrb[91].mxu0  ;;  %v3234_v24 = vld [vmem:[#allocation2 + $0x24c] sm:$0xf] }
 0x206   :  { %v10453_v25 = vpack.c.bf16 %v854_v23, %v852_v18  ;;  %v10454_v26 = vpack.c.bf16 %v1015_v33, %v1013_v19  ;;  %11023 = vmatmul.mubr.msk.bf16.gmra.mrb[144].mxu1 %vm684_vm5, %v12256_v55 }
 0x207   :  { %v2472_v56 = vld [vmem:[#allocation2 + $0x264] sm:$0xf]  ;;  %v2727_v27 = vld [vmem:[#allocation2 + $0x268] sm:$0xf]  ;;  %v2981_v29 = vld [vmem:[#allocation2 + $0x26c] sm:$0xf]  ;;  %11026 = vmatprep.mubr.msk.bf16.mxu1 %vm11759_vm1, %v11758_v0 }
 0x208   :  { %v9569_v30 = vcombine.low %v2471_v21, %v2472_v56  ;;  %v9595_v31 = vcombine.low %v2726_v22, %v2727_v27  ;;  %v9621_v32 = vcombine.low %v2980_v16, %v2981_v29  ;;  %v3235_v47 = vld [vmem:[#allocation2 + $0x270] sm:$0xf]  ;;  %2308 = vst [vmem:[#allocation2 + $0x2ac] sm:$0xff] %v10453_v25  ;;  %2309 = vst [vmem:[#allocation2 + $0x2b4] sm:$0xff] %v10454_v26  ;;  %v11213_v34 = vld [vmem:[#allocation2 + $0x240] ss:$36 sps:$4 sm:$0xff]  }
 0x209   :  { %v9647_v35 = vcombine.low %v3234_v24, %v3235_v47  ;;  %v858_v37 = vpop.f32.mrb[40].mxu1  ;;  %v1019_v38 = vpop.f32.mrb[92].mxu0  ;;  %2674 = vrot.lane.b32.xlu1 %v11213_v34, %s11761_s2 }
 0x20a   :  { %2564 = vst.msk [vmem:[#allocation3 + $0x40] sm:$0xff] %vm684_vm5, %v9569_v30  ;;  %2819 = vst.msk [vmem:[#allocation3 + $0x110] sm:$0xff] %vm684_vm5, %v9595_v31  ;;  %v860_v55 = vpop.f32.mrb[41].mxu1  ;;  %v1021_v39 = vpop.f32.mrb[93].mxu0 }
 0x20b   :  { %3073 = vst.msk [vmem:[#allocation3 + $0x1e0] sm:$0xff] %vm684_vm5, %v9621_v32  ;;  %3327 = vst.msk [vmem:[#allocation3 + $0x2b0] sm:$0xff] %vm684_vm5, %v9647_v35  ;;  %v10458_v40 = vpack.c.bf16 %v860_v55, %v858_v37  ;;  %v10459_v41 = vpack.c.bf16 %v1021_v39, %v1019_v38  ;;  %v862_v43 = vpop.f32.mrb[42].mxu1  ;;  %v1023_v45 = vpop.f32.mrb[94].mxu0 }
 0x20c   :  { %v2473_v46 = vld [vmem:[#allocation2 + $0x288] sm:$0xf]  ;;  %v2728_v48 = vld [vmem:[#allocation2 + $0x28c] sm:$0xf]  ;;  %v2982_v3 = vld [vmem:[#allocation2 + $0x290] sm:$0xf] }
 0x20d   :  { %2313 = vst [vmem:[#allocation2 + $0x2d0] sm:$0xff] %v10458_v40  ;;  %2314 = vst [vmem:[#allocation2 + $0x2d8] sm:$0xff] %v10459_v41  ;;  %v864_v49 = vpop.f32.mrb[43].mxu1  ;;  %v1025_v28 = vpop.f32.mrb[95].mxu0  ;;  %v3236_v50 = vld [vmem:[#allocation2 + $0x294] sm:$0xf] }
 0x20e   :  { %v10463_v51 = vpack.c.bf16 %v864_v49, %v862_v43  ;;  %v10464_v52 = vpack.c.bf16 %v1025_v28, %v1023_v45  ;;  %11027 = vmatmul.mubr.msk.bf16.gmra.mrb[148].mxu1 %vm684_vm5, %v12266_v6 }
 0x20f   :  { %v2474_v53 = vld [vmem:[#allocation2 + $0x2ac] sm:$0xf]  ;;  %v2729_v54 = vld [vmem:[#allocation2 + $0x2b0] sm:$0xf]  ;;  %v2983_v57 = vld [vmem:[#allocation2 + $0x2b4] sm:$0xf]  ;;  %11030 = vmatprep.mubr.msk.bf16.mxu1 %vm11759_vm1, %v11758_v0 }
 0x210   :  { %v9570_v58 = vcombine.low %v2473_v46, %v2474_v53  ;;  %v9596_v5 = vcombine.low %v2728_v48, %v2729_v54  ;;  %v9622_v59 = vcombine.low %v2982_v3, %v2983_v57  ;;  %v3237_v60 = vld [vmem:[#allocation2 + $0x2b8] sm:$0xf]  ;;  %2318 = vst [vmem:[#allocation2 + $0x2f4] sm:$0xff] %v10463_v51  ;;  %2319 = vst [vmem:[#allocation2 + $0x2fc] sm:$0xff] %v10464_v52  ;;  %v11214_v61 = vld [vmem:[#allocation2 + $0x288] ss:$36 sps:$4 sm:$0xff]  }
 0x211   :  { %v9648_v44 = vcombine.low %v3236_v50, %v3237_v60  ;;  %v868_v62 = vpop.f32.mrb[44].mxu1  ;;  %v1029_v20 = vpop.f32.mrb[96].mxu0  ;;  %2676 = vrot.lane.b32.xlu1 %v11214_v61, %s11761_s2  ;;  %v11215_v8 = vld [vmem:[#allocation2 + $0x28c] ss:$36 sps:$4 sm:$0xff]  }
 0x212   :  { %2565 = vst.msk [vmem:[#allocation3 + $0x48] sm:$0xff] %vm684_vm5, %v9570_v58  ;;  %2820 = vst.msk [vmem:[#allocation3 + $0x118] sm:$0xff] %vm684_vm5, %v9596_v5  ;;  %v870_v6 = vpop.f32.mrb[45].mxu1  ;;  %v1031_v63 = vpop.f32.mrb[97].mxu0 }
 0x213   :  { %3074 = vst.msk [vmem:[#allocation3 + $0x1e8] sm:$0xff] %vm684_vm5, %v9622_v59  ;;  %3328 = vst.msk [vmem:[#allocation3 + $0x2b8] sm:$0xff] %vm684_vm5, %v9648_v44  ;;  %v10468_v1 = vpack.c.bf16 %v870_v6, %v868_v62  ;;  %v10469_v2 = vpack.c.bf16 %v1031_v63, %v1029_v20  ;;  %v872_v4 = vpop.f32.mrb[46].mxu1  ;;  %v1033_v7 = vpop.f32.mrb[98].mxu0 }
 0x214   :  { %v2475_v9 = vld [vmem:[#allocation2 + $0x2d0] sm:$0xf]  ;;  %v2730_v10 = vld [vmem:[#allocation2 + $0x2d4] sm:$0xf]  ;;  %v2984_v11 = vld [vmem:[#allocation2 + $0x2d8] sm:$0xf] }
 0x215   :  { %2323 = vst [vmem:[#allocation2 + $0x318] sm:$0xff] %v10468_v1  ;;  %2324 = vst [vmem:[#allocation2 + $0x320] sm:$0xff] %v10469_v2  ;;  %v874_v12 = vpop.f32.mrb[47].mxu1  ;;  %v1035_v13 = vpop.f32.mrb[99].mxu0  ;;  %v3238_v42 = vld [vmem:[#allocation2 + $0x2dc] sm:$0xf]  ;;  %2930 = vrot.lane.b32.xlu1 %v11215_v8, %s11761_s2 }
 0x216   :  { %v10473_v36 = vpack.c.bf16 %v874_v12, %v872_v4  ;;  %v10474_v15 = vpack.c.bf16 %v1035_v13, %v1033_v7  ;;  %11031 = vmatmul.mubr.msk.bf16.gmra.mrb[152].mxu1 %vm684_vm5, %v12275_v14 }
 0x217   :  { %v2476_v17 = vld [vmem:[#allocation2 + $0x2f4] sm:$0xf]  ;;  %v2731_v18 = vld [vmem:[#allocation2 + $0x2f8] sm:$0xf]  ;;  %v2985_v19 = vld [vmem:[#allocation2 + $0x2fc] sm:$0xf] }
 0x218   :  { %v9571_v21 = vcombine.low %v2475_v9, %v2476_v17  ;;  %v9597_v22 = vcombine.low %v2730_v10, %v2731_v18  ;;  %v9623_v16 = vcombine.low %v2984_v11, %v2985_v19  ;;  %v3239_v23 = vld [vmem:[#allocation2 + $0x300] sm:$0xf]  ;;  %2328 = vst [vmem:[#allocation2 + $0x33c] sm:$0xff] %v10473_v36  ;;  %2329 = vst [vmem:[#allocation2 + $0x344] sm:$0xff] %v10474_v15  ;;  %v11216_v33 = vld [vmem:[#allocation2 + $0x2d0] ss:$36 sps:$4 sm:$0xff]  }
 0x219   :  { %v9649_v24 = vcombine.low %v3238_v42, %v3239_v23  ;;  %v878_v25 = vpop.f32.mrb[48].mxu1  ;;  %v1039_v26 = vpop.f32.mrb[100].mxu0  ;;  %2678 = vrot.lane.b32.xlu1 %v11216_v33, %s11761_s2  ;;  %v11221_v32 = vld [vmem:[#allocation2 + $0x2d4] ss:$36 sps:$4 sm:$0xff]  }
 0x21a   :  { %2566 = vst.msk [vmem:[#allocation3 + $0x50] sm:$0xff] %vm684_vm5, %v9571_v21  ;;  %2821 = vst.msk [vmem:[#allocation3 + $0x120] sm:$0xff] %vm684_vm5, %v9597_v22  ;;  %v880_v14 = vpop.f32.mrb[49].mxu1  ;;  %v1041_v56 = vpop.f32.mrb[101].mxu0 }
 0x21b   :  { %3075 = vst.msk [vmem:[#allocation3 + $0x1f0] sm:$0xff] %vm684_vm5, %v9623_v16  ;;  %3329 = vst.msk [vmem:[#allocation3 + $0x2c0] sm:$0xff] %vm684_vm5, %v9649_v24  ;;  %v10478_v27 = vpack.c.bf16 %v880_v14, %v878_v25  ;;  %v10479_v29 = vpack.c.bf16 %v1041_v56, %v1039_v26  ;;  %v882_v30 = vpop.f32.mrb[50].mxu1  ;;  %v1043_v31 = vpop.f32.mrb[102].mxu0 }
 0x21c   :  { %v2477_v47 = vld [vmem:[#allocation2 + $0x318] sm:$0xf]  ;;  %v2732_v34 = vld [vmem:[#allocation2 + $0x31c] sm:$0xf]  ;;  %v2986_v35 = vld [vmem:[#allocation2 + $0x320] sm:$0xf] }
 0x21d   :  { %2333 = vst [vmem:[#allocation2 + $0x360] sm:$0x33] %v10478_v27  ;;  %2334 = vst [vmem:[#allocation2 + $0x368] sm:$0x33] %v10479_v29  ;;  %v883_v37 = vpop.f32.mrb[51].mxu1  ;;  %v1044_v38 = vpop.f32.mrb[103].mxu0  ;;  %2932 = vrot.lane.b32.xlu1 %v11221_v32, %s11761_s2 }
 0x21e   :  { %v3240_v55 = vld [vmem:[#allocation2 + $0x324] sm:$0xf] }
 0x21f   :  { %v2478_v39 = vld [vmem:[#allocation2 + $0x33c] sm:$0xf]  ;;  %v2733_v40 = vld [vmem:[#allocation2 + $0x340] sm:$0xf]  ;;  %v2987_v41 = vld [vmem:[#allocation2 + $0x344] sm:$0xf] }
 0x220   :  { %v9572_v43 = vcombine.low %v2477_v47, %v2478_v39  ;;  %v9598_v45 = vcombine.low %v2732_v34, %v2733_v40  ;;  %v9624_v46 = vcombine.low %v2986_v35, %v2987_v41  ;;  %v3241_v48 = vld [vmem:[#allocation2 + $0x348] sm:$0xf]  ;;  %v11222_v3 = vld [vmem:[#allocation2 + $0x31c] ss:$36 sps:$4 sm:$0xff]  }
 0x221   :  { %v9650_v49 = vcombine.low %v3240_v55, %v3241_v48  ;;  %v11223_v28 = vld [vmem:[#allocation2 + $0x318] ss:$36 sps:$4 sm:$0xff]   ;;  %v1080_v50 = vpop.f32.mrb[52].mxu1  ;;  %v1241_v51 = vpop.f32.mrb[104].mxu0  ;;  %2934 = vrot.lane.b32.xlu1 %v11222_v3, %s11761_s2 }
 0x222   :  { %2567 = vst.msk [vmem:[#allocation3 + $0x58] sm:$0xff] %vm684_vm5, %v9572_v43  ;;  %2822 = vst.msk [vmem:[#allocation3 + $0x128] sm:$0xff] %vm684_vm5, %v9598_v45  ;;  %v1082_v52 = vpop.f32.mrb[53].mxu1  ;;  %v1243_v53 = vpop.f32.mrb[105].mxu0  ;;  %2680 = vrot.lane.b32.xlu0 %v11223_v28, %s11761_s2 }
 0x223   :  { %3076 = vst.msk [vmem:[#allocation3 + $0x1f8] sm:$0xff] %vm684_vm5, %v9624_v46  ;;  %3330 = vst.msk [vmem:[#allocation3 + $0x2c8] sm:$0xff] %vm684_vm5, %v9650_v49  ;;  %v10360_v54 = vpack.c.bf16 %v1082_v52, %v1080_v50  ;;  %v10361_v57 = vpack.c.bf16 %v1243_v53, %v1241_v51  ;;  %v1084_v58 = vpop.f32.mrb[54].mxu1  ;;  %v1245_v5 = vpop.f32.mrb[106].mxu0 }
 0x224   :  { %v11217_v59 = vld [vmem:[#allocation2 + $0x360] ss:$0 sps:$4 sm:$0x33]   ;;  %v1086_v60 = vpop.f32.mrb[55].mxu1  ;;  %v1247_v62 = vpop.f32.mrb[107].mxu0 }
 0x225   :  { %v11218_v61 = vld [vmem:[#allocation2 + $0x364] ss:$0 sps:$4 sm:$0x33]   ;;  %2215 = vst [vmem:[#allocation2 + $0x10] sm:$0xff] %v10360_v54  ;;  %2216 = vst [vmem:[#allocation2 + $0x18] sm:$0xff] %v10361_v57  ;;  %v10365_v44 = vpack.c.bf16 %v1086_v60, %v1084_v58  ;;  %v10366_v6 = vpack.c.bf16 %v1247_v62, %v1245_v5 }
 0x226   :  { %v11219_v20 = vld [vmem:[#allocation2 + $0x368] ss:$0 sps:$4 sm:$0x33]   ;;  %2569 = vst.msk [vmem:[#allocation3 + $0x60] sm:$0x3] %vm2568_vm2, %v11217_v59 }
 0x227   :  { %v11220_v63 = vld [vmem:[#allocation2 + $0x36c] ss:$0 sps:$4 sm:$0x33]   ;;  %2220 = vst [vmem:[#allocation2 + $0x34] sm:$0xff] %v10365_v44  ;;  %2823 = vst.msk [vmem:[#allocation3 + $0x130] sm:$0x3] %vm2568_vm2, %v11218_v61 }
 0x228   :  { %2221 = vst [vmem:[#allocation2 + $0x3c] sm:$0xff] %v10366_v6  ;;  %v11224_v1 = vld [vmem:[#allocation2 + $0x364] ss:$0 sps:$4 sm:$0x33]   ;;  %3077 = vst.msk [vmem:[#allocation3 + $0x200] sm:$0x3] %vm2568_vm2, %v11219_v20 }
 0x229   :  { %v11225_v2 = vld [vmem:[#allocation2 + $0x360] ss:$0 sps:$4 sm:$0x33]   ;;  %v1090_v4 = vpop.f32.mrb[56].mxu1  ;;  %3331 = vst.msk [vmem:[#allocation3 + $0x2d0] sm:$0x3] %vm2568_vm2, %v11220_v63  ;;  %2936 = vrot.lane.b32.xlu1 %v11224_v1, %s11761_s2 }
 0x22a   :  { %v1251_v7 = vpop.f32.mrb[108].mxu0  ;;  %v1092_v8 = vpop.f32.mrb[57].mxu1  ;;  %2682 = vrot.lane.b32.xlu0 %v11225_v2, %s11761_s2 }
 0x22b   :  { %v10370_v9 = vpack.c.bf16 %v1092_v8, %v1090_v4  ;;  %v1253_v10 = vpop.f32.mrb[109].mxu0  ;;  %v1094_v11 = vpop.f32.mrb[58].mxu1 }
 0x22c   :  { %v3472_v12 = vld [vmem:[#allocation2 + $0x10] sm:$0xf]  ;;  %v3842_v42 = vld [vmem:[#allocation2 + $0x14] sm:$0xf]  ;;  %v10371_v36 = vpack.c.bf16 %v1253_v10, %v1251_v7  ;;  %v4096_v15 = vld [vmem:[#allocation2 + $0x18] sm:$0xf] }
 0x22d   :  { %v3586_v13 = vld [vmem:[#allocation2 + $0x10] sm:$0xf]  ;;  %v4350_v17 = vld [vmem:[#allocation2 + $0x1c] sm:$0xf]  ;;  %2225 = vst [vmem:[#allocation2 + $0x58] sm:$0xff] %v10370_v9  ;;  %v1255_v18 = vpop.f32.mrb[110].mxu0 }
 0x22e   :  { %v1096_v19 = vpop.f32.mrb[59].mxu1  ;;  %v3473_v21 = vld [vmem:[#allocation2 + $0x34] sm:$0xf]  ;;  %v3843_v16 = vld [vmem:[#allocation2 + $0x38] sm:$0xf]  ;;  %2226 = vst [vmem:[#allocation2 + $0x60] sm:$0xff] %v10371_v36 }
 0x22f   :  { %v3587_v22 = vld [vmem:[#allocation2 + $0x34] sm:$0xf]  ;;  %v10375_v23 = vpack.c.bf16 %v1096_v19, %v1094_v11  ;;  %v9665_v33 = vcombine.low %v3472_v12, %v3473_v21  ;;  %v9704_v25 = vcombine.low %v3842_v42, %v3843_v16  ;;  %v4097_v26 = vld [vmem:[#allocation2 + $0x3c] sm:$0xf]  ;;  %v4351_v14 = vld [vmem:[#allocation2 + $0x40] sm:$0xf] }
 0x230   :  { %v9678_v24 = vcombine.low %v3586_v13, %v3587_v22  ;;  %v1257_v56 = vpop.f32.mrb[111].mxu0  ;;  %v9730_v27 = vcombine.low %v4096_v15, %v4097_v26  ;;  %v9756_v29 = vcombine.low %v4350_v17, %v4351_v14  ;;  %v11226_v31 = vld [vmem:[#allocation2 + $0x14] ss:$36 sps:$4 sm:$0xff]  }
 0x231   :  { %2230 = vst [vmem:[#allocation2 + $0x7c] sm:$0xff] %v10375_v23  ;;  %v10376_v30 = vpack.c.bf16 %v1257_v56, %v1255_v18  ;;  %3573 = vst.msk [vmem:[#allocation3 + $0x340] sm:$0xff] %vm684_vm5, %v9665_v33  ;;  %v1100_v32 = vpop.f32.mrb[60].mxu1  ;;  %v1261_v47 = vpop.f32.mrb[112].mxu0  ;;  %3790 = vrot.lane.b32.xlu0 %v11226_v31, %s11761_s2 }
 0x232   :  { %3688 = vst.msk [vmem:[#allocation3] sm:$0xff] %vm3687_vm3, %v9678_v24  ;;  %3943 = vst.msk [vmem:[#allocation3 + $0xd0] sm:$0xff] %vm3687_vm3, %v9704_v25  ;;  %v1102_v34 = vpop.f32.mrb[61].mxu1  ;;  %v1263_v35 = vpop.f32.mrb[113].mxu0 }
 0x233   :  { %2231 = vst [vmem:[#allocation2 + $0x84] sm:$0xff] %v10376_v30  ;;  %4197 = vst.msk [vmem:[#allocation3 + $0x1a0] sm:$0xff] %vm3687_vm3, %v9730_v27  ;;  %v10380_v37 = vpack.c.bf16 %v1102_v34, %v1100_v32  ;;  %v10381_v38 = vpack.c.bf16 %v1263_v35, %v1261_v47  ;;  %v1104_v55 = vpop.f32.mrb[62].mxu1  ;;  %v1265_v39 = vpop.f32.mrb[114].mxu0 }
 0x234   :  { %4451 = vst.msk [vmem:[#allocation3 + $0x270] sm:$0xff] %vm3687_vm3, %v9756_v29  ;;  %v3474_v40 = vld [vmem:[#allocation2 + $0x58] sm:$0xf]  ;;  %v3844_v43 = vld [vmem:[#allocation2 + $0x5c] sm:$0xf]  ;;  %v1106_v45 = vpop.f32.mrb[63].mxu1 }
 0x235   :  { %v3588_v41 = vld [vmem:[#allocation2 + $0x58] sm:$0xf]  ;;  %2235 = vst [vmem:[#allocation2 + $0xa0] sm:$0xff] %v10380_v37  ;;  %2236 = vst [vmem:[#allocation2 + $0xa8] sm:$0xff] %v10381_v38  ;;  %v1267_v46 = vpop.f32.mrb[115].mxu0  ;;  %v10385_v48 = vpack.c.bf16 %v1106_v45, %v1104_v55 }
 0x236   :  { %v10386_v3 = vpack.c.bf16 %v1267_v46, %v1265_v39  ;;  %v4098_v49 = vld [vmem:[#allocation2 + $0x60] sm:$0xf]  ;;  %v4352_v52 = vld [vmem:[#allocation2 + $0x64] sm:$0xf] }
 0x237   :  { %2240 = vst [vmem:[#allocation2 + $0xc4] sm:$0xff] %v10385_v48 }
 0x238   :  { %v3475_v28 = vld [vmem:[#allocation2 + $0x7c] sm:$0xf]  ;;  %v3845_v51 = vld [vmem:[#allocation2 + $0x80] sm:$0xf]  ;;  %2241 = vst [vmem:[#allocation2 + $0xcc] sm:$0xff] %v10386_v3 }
 0x239   :  { %v3589_v50 = vld [vmem:[#allocation2 + $0x7c] sm:$0xf]  ;;  %v9666_v53 = vcombine.low %v3474_v40, %v3475_v28  ;;  %v9705_v57 = vcombine.low %v3844_v43, %v3845_v51  ;;  %v1110_v60 = vpop.f32.mrb[64].mxu1  ;;  %v1271_v61 = vpop.f32.mrb[116].mxu0 }
 0x23a   :  { %v9679_v54 = vcombine.low %v3588_v41, %v3589_v50  ;;  %v11227_v58 = vld [vmem:[#allocation2 + $0x5c] ss:$36 sps:$4 sm:$0xff]   ;;  %v4099_v5 = vld [vmem:[#allocation2 + $0x84] sm:$0xf]  ;;  %v4353_v59 = vld [vmem:[#allocation2 + $0x88] sm:$0xf]  ;;  %v2659_v2 = vpop.permute.xlu0 %2658 }
 0x23b   :  { %3574 = vst.msk [vmem:[#allocation3 + $0x348] sm:$0xff] %vm684_vm5, %v9666_v53  ;;  %v9731_v44 = vcombine.low %v4098_v49, %v4099_v5  ;;  %v9757_v62 = vcombine.low %v4352_v52, %v4353_v59  ;;  %3792 = vrot.lane.b32.xlu0 %v11227_v58, %s11761_s2  ;;  %v1112_v20 = vpop.f32.mrb[65].mxu1  ;;  %v1273_v6 = vpop.f32.mrb[117].mxu0  ;;  %2697 = vst.msk [vmem:[#allocation3 + $0x68] sm:$0xff] %vm684_vm5, %v2659_v2  ;;  %v11228_v7 = vld [vmem:[#allocation2 + $0x60] ss:$36 sps:$4 sm:$0xff]  }
 0x23c   :  { %3689 = vst.msk [vmem:[#allocation3 + $0x8] sm:$0xff] %vm3687_vm3, %v9679_v54  ;;  %3944 = vst.msk [vmem:[#allocation3 + $0xd8] sm:$0xff] %vm3687_vm3, %v9705_v57  ;;  %v10390_v63 = vpack.c.bf16 %v1112_v20, %v1110_v60  ;;  %v10391_v1 = vpack.c.bf16 %v1273_v6, %v1271_v61  ;;  %v1114_v4 = vpop.f32.mrb[66].mxu1  ;;  %v3476_v8 = vld [vmem:[#allocation2 + $0xa0] sm:$0xf]  ;;  %v1275_v11 = vpop.f32.mrb[118].mxu0 }
 0x23d   :  { %4198 = vst.msk [vmem:[#allocation3 + $0x1a8] sm:$0xff] %vm3687_vm3, %v9731_v44  ;;  %4452 = vst.msk [vmem:[#allocation3 + $0x278] sm:$0xff] %vm3687_vm3, %v9757_v62  ;;  %v3590_v9 = vld [vmem:[#allocation2 + $0xa0] sm:$0xf]  ;;  %v3846_v10 = vld [vmem:[#allocation2 + $0xa4] sm:$0xf] }
 0x23e   :  { %2245 = vst [vmem:[#allocation2 + $0xe8] sm:$0xff] %v10390_v63  ;;  %2246 = vst [vmem:[#allocation2 + $0xf0] sm:$0xff] %v10391_v1  ;;  %v1116_v12 = vpop.f32.mrb[67].mxu1  ;;  %v4100_v13 = vld [vmem:[#allocation2 + $0xa8] sm:$0xf]  ;;  %v1277_v15 = vpop.f32.mrb[119].mxu0 }
 0x23f   :  { %v4354_v42 = vld [vmem:[#allocation2 + $0xac] sm:$0xf]  ;;  %v10395_v36 = vpack.c.bf16 %v1116_v12, %v1114_v4  ;;  %4046 = vrot.lane.b32.xlu0 %v11228_v7, %s11761_s2  ;;  %v3477_v17 = vld [vmem:[#allocation2 + $0xc4] sm:$0xf]  ;;  %v3847_v19 = vld [vmem:[#allocation2 + $0xc8] sm:$0xf]  ;;  %v10396_v21 = vpack.c.bf16 %v1277_v15, %v1275_v11 }
 0x240   :  { %v3591_v18 = vld [vmem:[#allocation2 + $0xc4] sm:$0xf]  ;;  %v9667_v22 = vcombine.low %v3476_v8, %v3477_v17  ;;  %v9706_v23 = vcombine.low %v3846_v10, %v3847_v19  ;;  %v4101_v33 = vld [vmem:[#allocation2 + $0xcc] sm:$0xf]  ;;  %v4355_v24 = vld [vmem:[#allocation2 + $0xd0] sm:$0xf] }
 0x241   :  { %v9680_v16 = vcombine.low %v3590_v9, %v3591_v18  ;;  %2250 = vst [vmem:[#allocation2 + $0x10c] sm:$0xff] %v10395_v36  ;;  %v9732_v25 = vcombine.low %v4100_v13, %v4101_v33  ;;  %v9758_v26 = vcombine.low %v4354_v42, %v4355_v24  ;;  %2251 = vst [vmem:[#allocation2 + $0x114] sm:$0xff] %v10396_v21  ;;  %v1120_v14 = vpop.f32.mrb[68].mxu1  ;;  %v11229_v56 = vld [vmem:[#allocation2 + $0xa4] ss:$36 sps:$4 sm:$0xff]   ;;  %v1281_v27 = vpop.f32.mrb[120].mxu0 }
 0x242   :  { %3575 = vst.msk [vmem:[#allocation3 + $0x350] sm:$0xff] %vm684_vm5, %v9667_v22  ;;  %v1122_v29 = vpop.f32.mrb[69].mxu1  ;;  %v1283_v30 = vpop.f32.mrb[121].mxu0  ;;  %v11230_v37 = vld [vmem:[#allocation2 + $0xa8] ss:$36 sps:$4 sm:$0xff]  }
 0x243   :  { %3690 = vst.msk [vmem:[#allocation3 + $0x10] sm:$0xff] %vm3687_vm3, %v9680_v16  ;;  %3945 = vst.msk [vmem:[#allocation3 + $0xe0] sm:$0xff] %vm3687_vm3, %v9706_v23  ;;  %3794 = vrot.lane.b32.xlu0 %v11229_v56, %s11761_s2  ;;  %v10400_v31 = vpack.c.bf16 %v1122_v29, %v1120_v14  ;;  %v10401_v32 = vpack.c.bf16 %v1283_v30, %v1281_v27  ;;  %v1124_v47 = vpop.f32.mrb[70].mxu1  ;;  %v1285_v34 = vpop.f32.mrb[122].mxu0  ;;  %v11279_v15 = vld [vmem:[%s13984_s5 + $0x4] ss:$60 sps:$4 sm:$0xff]  }
 0x244   :  { %4199 = vst.msk [vmem:[#allocation3 + $0x1b0] sm:$0xff] %vm3687_vm3, %v9732_v25  ;;  %4453 = vst.msk [vmem:[#allocation3 + $0x280] sm:$0xff] %vm3687_vm3, %v9758_v26  ;;  %v2661_v35 = vpop.permute.xlu0 %2660  ;;  %v1126_v40 = vpop.f32.mrb[71].mxu1  ;;  %5161 = vmatprep.mubr.bf16.mxu0 %v11279_v15 }
 0x245   :  { %v3478_v38 = vld [vmem:[#allocation2 + $0xe8] sm:$0xf]  ;;  %v3848_v39 = vld [vmem:[#allocation2 + $0xec] sm:$0xf]  ;;  %2255 = vst [vmem:[#allocation2 + $0x130] sm:$0xff] %v10400_v31  ;;  %2256 = vst [vmem:[#allocation2 + $0x138] sm:$0xff] %v10401_v32  ;;  %v10405_v46 = vpack.c.bf16 %v1126_v40, %v1124_v47 }
 0x246   :  { %v3592_v55 = vld [vmem:[#allocation2 + $0xe8] sm:$0xf]  ;;  %2698 = vst.msk [vmem:[#allocation3 + $0x70] sm:$0xff] %vm684_vm5, %v2661_v35  ;;  %v1287_v41 = vpop.f32.mrb[123].mxu0  ;;  %v4102_v43 = vld [vmem:[#allocation2 + $0xf0] sm:$0xf] }
 0x247   :  { %v4356_v45 = vld [vmem:[#allocation2 + $0xf4] sm:$0xf]  ;;  %v10406_v48 = vpack.c.bf16 %v1287_v41, %v1285_v34  ;;  %4048 = vrot.lane.b32.xlu0 %v11230_v37, %s11761_s2  ;;  %2260 = vst [vmem:[#allocation2 + $0x154] sm:$0xff] %v10405_v46 }
 0x248   :  { %v3479_v3 = vld [vmem:[#allocation2 + $0x10c] sm:$0xf]  ;;  %v3849_v28 = vld [vmem:[#allocation2 + $0x110] sm:$0xf]  ;;  %v4103_v53 = vld [vmem:[#allocation2 + $0x114] sm:$0xf]  ;;  %v2915_v57 = vpop.permute.xlu0 %2914 }
 0x249   :  { %v3593_v49 = vld [vmem:[#allocation2 + $0x10c] sm:$0xf]  ;;  %v9668_v50 = vcombine.low %v3478_v38, %v3479_v3  ;;  %v9707_v52 = vcombine.low %v3848_v39, %v3849_v28  ;;  %v4357_v54 = vld [vmem:[#allocation2 + $0x118] sm:$0xf]  ;;  %2261 = vst [vmem:[#allocation2 + $0x15c] sm:$0xff] %v10406_v48  ;;  %v9733_v58 = vcombine.low %v4102_v43, %v4103_v53  ;;  %2952 = vst.msk [vmem:[#allocation3 + $0x140] sm:$0xff] %vm684_vm5, %v2915_v57 }
 0x24a   :  { %v9681_v51 = vcombine.low %v3592_v55, %v3593_v49  ;;  %v9759_v5 = vcombine.low %v4356_v45, %v4357_v54  ;;  %v11231_v59 = vld [vmem:[#allocation2 + $0xec] ss:$36 sps:$4 sm:$0xff]   ;;  %v1130_v60 = vpop.f32.mrb[72].mxu1  ;;  %v1291_v61 = vpop.f32.mrb[124].mxu0 }
 0x24b   :  { %3576 = vst.msk [vmem:[#allocation3 + $0x358] sm:$0xff] %vm684_vm5, %v9668_v50  ;;  %v11232_v44 = vld [vmem:[#allocation2 + $0xf0] ss:$36 sps:$4 sm:$0xff]   ;;  %v1132_v62 = vpop.f32.mrb[73].mxu1  ;;  %v1293_v20 = vpop.f32.mrb[125].mxu0  ;;  %3796 = vrot.lane.b32.xlu1 %v11231_v59, %s11761_s2 }
 0x24c   :  { %3691 = vst.msk [vmem:[#allocation3 + $0x18] sm:$0xff] %vm3687_vm3, %v9681_v51  ;;  %3946 = vst.msk [vmem:[#allocation3 + $0xe8] sm:$0xff] %vm3687_vm3, %v9707_v52  ;;  %v10410_v6 = vpack.c.bf16 %v1132_v62, %v1130_v60  ;;  %v10411_v63 = vpack.c.bf16 %v1293_v20, %v1291_v61  ;;  %v1134_v1 = vpop.f32.mrb[74].mxu1  ;;  %v1295_v2 = vpop.f32.mrb[126].mxu0  ;;  %4050 = vrot.lane.b32.xlu0 %v11232_v44, %s11761_s2  ;;  %v3480_v7 = vld [vmem:[#allocation2 + $0x130] sm:$0xf] }
 0x24d   :  { %4200 = vst.msk [vmem:[#allocation3 + $0x1b8] sm:$0xff] %vm3687_vm3, %v9733_v58  ;;  %4454 = vst.msk [vmem:[#allocation3 + $0x288] sm:$0xff] %vm3687_vm3, %v9759_v5  ;;  %v2663_v4 = vpop.permute.xlu0 %2662  ;;  %v3594_v8 = vld [vmem:[#allocation2 + $0x130] sm:$0xf]  ;;  %v3850_v9 = vld [vmem:[#allocation2 + $0x134] sm:$0xf] }
 0x24e   :  { %2265 = vst [vmem:[#allocation2 + $0x178] sm:$0xff] %v10410_v6  ;;  %2266 = vst [vmem:[#allocation2 + $0x180] sm:$0xff] %v10411_v63  ;;  %v1136_v10 = vpop.f32.mrb[75].mxu1  ;;  %v1297_v11 = vpop.f32.mrb[127].mxu0  ;;  %v4104_v12 = vld [vmem:[#allocation2 + $0x138] sm:$0xf] }
 0x24f   :  { %2699 = vst.msk [vmem:[#allocation3 + $0x78] sm:$0xff] %vm684_vm5, %v2663_v4  ;;  %v4358_v13 = vld [vmem:[#allocation2 + $0x13c] sm:$0xf]  ;;  %v10415_v42 = vpack.c.bf16 %v1136_v10, %v1134_v1  ;;  %v10416_v36 = vpack.c.bf16 %v1297_v11, %v1295_v2  ;;  %v3481_v17 = vld [vmem:[#allocation2 + $0x154] sm:$0xf] }
 0x250   :  { %v3595_v18 = vld [vmem:[#allocation2 + $0x154] sm:$0xf]  ;;  %v3851_v19 = vld [vmem:[#allocation2 + $0x158] sm:$0xf]  ;;  %v9669_v21 = vcombine.low %v3480_v7, %v3481_v17  ;;  %v4105_v23 = vld [vmem:[#allocation2 + $0x15c] sm:$0xf] }
 0x251   :  { %v9682_v22 = vcombine.low %v3594_v8, %v3595_v18  ;;  %v9708_v16 = vcombine.low %v3850_v9, %v3851_v19  ;;  %v4359_v33 = vld [vmem:[#allocation2 + $0x160] sm:$0xf]  ;;  %2270 = vst [vmem:[#allocation2 + $0x19c] sm:$0xff] %v10415_v42  ;;  %2271 = vst [vmem:[#allocation2 + $0x1a4] sm:$0xff] %v10416_v36  ;;  %v2917_v24 = vpop.permute.xlu0 %2916  ;;  %v9734_v25 = vcombine.low %v4104_v12, %v4105_v23  ;;  %v11233_v14 = vld [vmem:[#allocation2 + $0x134] ss:$36 sps:$4 sm:$0xff]  }
 0x252   :  { %v9760_v26 = vcombine.low %v4358_v13, %v4359_v33  ;;  %2953 = vst.msk [vmem:[#allocation3 + $0x148] sm:$0xff] %vm684_vm5, %v2917_v24  ;;  %v1140_v56 = vpop.f32.mrb[76].mxu1  ;;  %v1301_v27 = vpop.f32.mrb[128].mxu0  ;;  %3577 = vst.msk [vmem:[#allocation3 + $0x360] sm:$0xff] %vm684_vm5, %v9669_v21  ;;  %v11234_v29 = vld [vmem:[#allocation2 + $0x138] ss:$36 sps:$4 sm:$0xff]   ;;  %3798 = vrot.lane.b32.xlu1 %v11233_v14, %s11761_s2 }
 0x253   :  { %v1142_v30 = vpop.f32.mrb[77].mxu1  ;;  %v1303_v31 = vpop.f32.mrb[129].mxu0  ;;  %3692 = vst.msk [vmem:[#allocation3 + $0x20] sm:$0xff] %vm3687_vm3, %v9682_v22  ;;  %3947 = vst.msk [vmem:[#allocation3 + $0xf0] sm:$0xff] %vm3687_vm3, %v9708_v16  ;;  %4052 = vrot.lane.b32.xlu0 %v11234_v29, %s11761_s2 }
 0x254   :  { %v10420_v32 = vpack.c.bf16 %v1142_v30, %v1140_v56  ;;  %v10421_v47 = vpack.c.bf16 %v1303_v31, %v1301_v27  ;;  %v1144_v34 = vpop.f32.mrb[78].mxu1  ;;  %v1305_v35 = vpop.f32.mrb[130].mxu0  ;;  %4201 = vst.msk [vmem:[#allocation3 + $0x1c0] sm:$0xff] %vm3687_vm3, %v9734_v25  ;;  %4455 = vst.msk [vmem:[#allocation3 + $0x290] sm:$0xff] %vm3687_vm3, %v9760_v26 }
 0x255   :  { %v2665_v37 = vpop.permute.xlu0 %2664  ;;  %v3482_v38 = vld [vmem:[#allocation2 + $0x178] sm:$0xf]  ;;  %v3852_v39 = vld [vmem:[#allocation2 + $0x17c] sm:$0xf]  ;;  %v1146_v40 = vpop.f32.mrb[79].mxu1 }
 0x256   :  { %v3596_v55 = vld [vmem:[#allocation2 + $0x178] sm:$0xf]  ;;  %2275 = vst [vmem:[#allocation2 + $0x1c0] sm:$0xff] %v10420_v32  ;;  %2276 = vst [vmem:[#allocation2 + $0x1c8] sm:$0xff] %v10421_v47  ;;  %v1307_v41 = vpop.f32.mrb[131].mxu0  ;;  %v10425_v46 = vpack.c.bf16 %v1146_v40, %v1144_v34 }
 0x257   :  { %2700 = vst.msk [vmem:[#allocation3 + $0x80] sm:$0xff] %vm684_vm5, %v2665_v37  ;;  %v4106_v43 = vld [vmem:[#allocation2 + $0x180] sm:$0xf]  ;;  %v4360_v45 = vld [vmem:[#allocation2 + $0x184] sm:$0xf]  ;;  %v10426_v48 = vpack.c.bf16 %v1307_v41, %v1305_v35 }
 0x258   :  { %v3483_v3 = vld [vmem:[#allocation2 + $0x19c] sm:$0xf]  ;;  %v3853_v28 = vld [vmem:[#allocation2 + $0x1a0] sm:$0xf]  ;;  %v4107_v53 = vld [vmem:[#allocation2 + $0x1a4] sm:$0xf] }
 0x259   :  { %v3597_v49 = vld [vmem:[#allocation2 + $0x19c] sm:$0xf]  ;;  %v9670_v50 = vcombine.low %v3482_v38, %v3483_v3  ;;  %v9709_v52 = vcombine.low %v3852_v39, %v3853_v28  ;;  %v4361_v54 = vld [vmem:[#allocation2 + $0x1a8] sm:$0xf]  ;;  %2280 = vst [vmem:[#allocation2 + $0x1e4] sm:$0xff] %v10425_v46  ;;  %2281 = vst [vmem:[#allocation2 + $0x1ec] sm:$0xff] %v10426_v48  ;;  %v2919_v57 = vpop.permute.xlu0 %2918  ;;  %v9735_v58 = vcombine.low %v4106_v43, %v4107_v53 }
 0x25a   :  { %v9683_v51 = vcombine.low %v3596_v55, %v3597_v49  ;;  %v9761_v5 = vcombine.low %v4360_v45, %v4361_v54  ;;  %2954 = vst.msk [vmem:[#allocation3 + $0x150] sm:$0xff] %vm684_vm5, %v2919_v57  ;;  %v11235_v59 = vld [vmem:[#allocation2 + $0x17c] ss:$36 sps:$4 sm:$0xff]   ;;  %v1150_v60 = vpop.f32.mrb[80].mxu1  ;;  %v1311_v61 = vpop.f32.mrb[132].mxu0 }
 0x25b   :  { %3578 = vst.msk [vmem:[#allocation3 + $0x368] sm:$0xff] %vm684_vm5, %v9670_v50  ;;  %v11236_v44 = vld [vmem:[#allocation2 + $0x180] ss:$36 sps:$4 sm:$0xff]   ;;  %v1152_v62 = vpop.f32.mrb[81].mxu1  ;;  %v1313_v20 = vpop.f32.mrb[133].mxu0  ;;  %3800 = vrot.lane.b32.xlu1 %v11235_v59, %s11761_s2 }
 0x25c   :  { %3693 = vst.msk [vmem:[#allocation3 + $0x28] sm:$0xff] %vm3687_vm3, %v9683_v51  ;;  %3948 = vst.msk [vmem:[#allocation3 + $0xf8] sm:$0xff] %vm3687_vm3, %v9709_v52  ;;  %v10430_v6 = vpack.c.bf16 %v1152_v62, %v1150_v60  ;;  %v10431_v63 = vpack.c.bf16 %v1313_v20, %v1311_v61  ;;  %v1154_v1 = vpop.f32.mrb[82].mxu1  ;;  %v1315_v2 = vpop.f32.mrb[134].mxu0  ;;  %4054 = vrot.lane.b32.xlu0 %v11236_v44, %s11761_s2 }
 0x25d   :  { %4202 = vst.msk [vmem:[#allocation3 + $0x1c8] sm:$0xff] %vm3687_vm3, %v9735_v58  ;;  %4456 = vst.msk [vmem:[#allocation3 + $0x298] sm:$0xff] %vm3687_vm3, %v9761_v5  ;;  %v2921_v4 = vpop.permute.xlu0 %2920  ;;  %v3484_v7 = vld [vmem:[#allocation2 + $0x1c0] sm:$0xf]  ;;  %v3854_v9 = vld [vmem:[#allocation2 + $0x1c4] sm:$0xf]  ;;  %v2667_v10 = vpop.permute.xlu1 %2666 }
 0x25e   :  { %v3598_v8 = vld [vmem:[#allocation2 + $0x1c0] sm:$0xf]  ;;  %2285 = vst [vmem:[#allocation2 + $0x208] sm:$0xff] %v10430_v6  ;;  %2286 = vst [vmem:[#allocation2 + $0x210] sm:$0xff] %v10431_v63  ;;  %v1156_v11 = vpop.f32.mrb[83].mxu1  ;;  %v1317_v36 = vpop.f32.mrb[135].mxu0 }
 0x25f   :  { %2955 = vst.msk [vmem:[#allocation3 + $0x158] sm:$0xff] %vm684_vm5, %v2921_v4  ;;  %v4108_v12 = vld [vmem:[#allocation2 + $0x1c8] sm:$0xf]  ;;  %v4362_v13 = vld [vmem:[#allocation2 + $0x1cc] sm:$0xf]  ;;  %2701 = vst.msk [vmem:[#allocation3 + $0x88] sm:$0xff] %vm684_vm5, %v2667_v10  ;;  %v10435_v42 = vpack.c.bf16 %v1156_v11, %v1154_v1  ;;  %v10436_v19 = vpack.c.bf16 %v1317_v36, %v1315_v2 }
 0x260   :  { %v3485_v15 = vld [vmem:[#allocation2 + $0x1e4] sm:$0xf]  ;;  %v3855_v18 = vld [vmem:[#allocation2 + $0x1e8] sm:$0xf]  ;;  %v4109_v23 = vld [vmem:[#allocation2 + $0x1ec] sm:$0xf] }
 0x261   :  { %v3599_v17 = vld [vmem:[#allocation2 + $0x1e4] sm:$0xf]  ;;  %v9671_v21 = vcombine.low %v3484_v7, %v3485_v15  ;;  %v9710_v16 = vcombine.low %v3854_v9, %v3855_v18  ;;  %v4363_v33 = vld [vmem:[#allocation2 + $0x1f0] sm:$0xf]  ;;  %2290 = vst [vmem:[#allocation2 + $0x22c] sm:$0xff] %v10435_v42  ;;  %v9736_v24 = vcombine.low %v4108_v12, %v4109_v23  ;;  %2291 = vst [vmem:[#allocation2 + $0x234] sm:$0xff] %v10436_v19 }
 0x262   :  { %v9684_v22 = vcombine.low %v3598_v8, %v3599_v17  ;;  %v9762_v25 = vcombine.low %v4362_v13, %v4363_v33  ;;  %v11237_v26 = vld [vmem:[#allocation2 + $0x1c4] ss:$36 sps:$4 sm:$0xff]   ;;  %v1160_v14 = vpop.f32.mrb[84].mxu1  ;;  %v1321_v56 = vpop.f32.mrb[136].mxu0 }
 0x263   :  { %3579 = vst.msk [vmem:[#allocation3 + $0x370] sm:$0xff] %vm684_vm5, %v9671_v21  ;;  %v1162_v27 = vpop.f32.mrb[85].mxu1  ;;  %v1323_v29 = vpop.f32.mrb[137].mxu0  ;;  %3802 = vrot.lane.b32.xlu1 %v11237_v26, %s11761_s2  ;;  %v11238_v35 = vld [vmem:[#allocation2 + $0x1c8] ss:$36 sps:$4 sm:$0xff]  }
 0x264   :  { %3694 = vst.msk [vmem:[#allocation3 + $0x30] sm:$0xff] %vm3687_vm3, %v9684_v22  ;;  %3949 = vst.msk [vmem:[#allocation3 + $0x100] sm:$0xff] %vm3687_vm3, %v9710_v16  ;;  %v10440_v30 = vpack.c.bf16 %v1162_v27, %v1160_v14  ;;  %v10441_v31 = vpack.c.bf16 %v1323_v29, %v1321_v56  ;;  %v1164_v32 = vpop.f32.mrb[86].mxu1  ;;  %v1325_v47 = vpop.f32.mrb[138].mxu0 }
 0x265   :  { %4203 = vst.msk [vmem:[#allocation3 + $0x1d0] sm:$0xff] %vm3687_vm3, %v9736_v24  ;;  %4457 = vst.msk [vmem:[#allocation3 + $0x2a0] sm:$0xff] %vm3687_vm3, %v9762_v25  ;;  %v2669_v34 = vpop.permute.xlu0 %2668  ;;  %v3486_v37 = vld [vmem:[#allocation2 + $0x208] sm:$0xf]  ;;  %v3856_v55 = vld [vmem:[#allocation2 + $0x20c] sm:$0xf] }
 0x266   :  { %v3600_v38 = vld [vmem:[#allocation2 + $0x208] sm:$0xf]  ;;  %2295 = vst [vmem:[#allocation2 + $0x250] sm:$0xff] %v10440_v30  ;;  %2296 = vst [vmem:[#allocation2 + $0x258] sm:$0xff] %v10441_v31  ;;  %v1166_v39 = vpop.f32.mrb[87].mxu1  ;;  %v1327_v40 = vpop.f32.mrb[139].mxu0 }
 0x267   :  { %2702 = vst.msk [vmem:[#allocation3 + $0x90] sm:$0xff] %vm684_vm5, %v2669_v34  ;;  %v4110_v41 = vld [vmem:[#allocation2 + $0x210] sm:$0xf]  ;;  %v4364_v43 = vld [vmem:[#allocation2 + $0x214] sm:$0xf]  ;;  %v10445_v45 = vpack.c.bf16 %v1166_v39, %v1164_v32  ;;  %v10446_v46 = vpack.c.bf16 %v1327_v40, %v1325_v47  ;;  %4056 = vrot.lane.b32.xlu1 %v11238_v35, %s11761_s2 }
 0x268   :  { %v3487_v48 = vld [vmem:[#allocation2 + $0x22c] sm:$0xf]  ;;  %v3857_v49 = vld [vmem:[#allocation2 + $0x230] sm:$0xf]  ;;  %v4111_v52 = vld [vmem:[#allocation2 + $0x234] sm:$0xf] }
 0x269   :  { %v3601_v3 = vld [vmem:[#allocation2 + $0x22c] sm:$0xf]  ;;  %v9672_v28 = vcombine.low %v3486_v37, %v3487_v48  ;;  %v9711_v51 = vcombine.low %v3856_v55, %v3857_v49  ;;  %v4365_v53 = vld [vmem:[#allocation2 + $0x238] sm:$0xf]  ;;  %2300 = vst [vmem:[#allocation2 + $0x274] sm:$0xff] %v10445_v45  ;;  %2301 = vst [vmem:[#allocation2 + $0x27c] sm:$0xff] %v10446_v46  ;;  %v2923_v54 = vpop.permute.xlu0 %2922  ;;  %v9737_v57 = vcombine.low %v4110_v41, %v4111_v52 }
 0x26a   :  { %v9685_v50 = vcombine.low %v3600_v38, %v3601_v3  ;;  %v9763_v58 = vcombine.low %v4364_v43, %v4365_v53  ;;  %2956 = vst.msk [vmem:[#allocation3 + $0x160] sm:$0xff] %vm684_vm5, %v2923_v54  ;;  %v1170_v5 = vpop.f32.mrb[88].mxu1  ;;  %v11239_v59 = vld [vmem:[#allocation2 + $0x20c] ss:$36 sps:$4 sm:$0xff]   ;;  %v1331_v60 = vpop.f32.mrb[140].mxu0 }
 0x26b   :  { %3580 = vst.msk [vmem:[#allocation3 + $0x378] sm:$0xff] %vm684_vm5, %v9672_v28  ;;  %v1172_v61 = vpop.f32.mrb[89].mxu1  ;;  %v1333_v44 = vpop.f32.mrb[141].mxu0  ;;  %3804 = vrot.lane.b32.xlu1 %v11239_v59, %s11761_s2 }
 0x26c   :  { %3695 = vst.msk [vmem:[#allocation3 + $0x38] sm:$0xff] %vm3687_vm3, %v9685_v50  ;;  %3950 = vst.msk [vmem:[#allocation3 + $0x108] sm:$0xff] %vm3687_vm3, %v9711_v51  ;;  %v10450_v62 = vpack.c.bf16 %v1172_v61, %v1170_v5  ;;  %v10451_v20 = vpack.c.bf16 %v1333_v44, %v1331_v60  ;;  %v1174_v6 = vpop.f32.mrb[90].mxu1  ;;  %v1335_v63 = vpop.f32.mrb[142].mxu0  ;;  %v4718_v60 = vld [vmem:[#allocation3] sm:$0xff] }
 0x26d   :  { %4204 = vst.msk [vmem:[#allocation3 + $0x1d8] sm:$0xff] %vm3687_vm3, %v9737_v57  ;;  %4458 = vst.msk [vmem:[#allocation3 + $0x2a8] sm:$0xff] %vm3687_vm3, %v9763_v58  ;;  %v2671_v1 = vpop.permute.xlu0 %2670  ;;  %v3488_v2 = vld [vmem:[#allocation2 + $0x250] sm:$0xf]  ;;  %v3858_v7 = vld [vmem:[#allocation2 + $0x254] sm:$0xf] }
 0x26e   :  { %v3602_v4 = vld [vmem:[#allocation2 + $0x250] sm:$0xf]  ;;  %2305 = vst [vmem:[#allocation2 + $0x298] sm:$0xff] %v10450_v62  ;;  %2306 = vst [vmem:[#allocation2 + $0x2a0] sm:$0xff] %v10451_v20  ;;  %v1176_v8 = vpop.f32.mrb[91].mxu1  ;;  %v1337_v9 = vpop.f32.mrb[143].mxu0 }
 0x26f   :  { %2703 = vst.msk [vmem:[#allocation3 + $0x98] sm:$0xff] %vm684_vm5, %v2671_v1  ;;  %v4112_v10 = vld [vmem:[#allocation2 + $0x258] sm:$0xf]  ;;  %v4366_v11 = vld [vmem:[#allocation2 + $0x25c] sm:$0xf]  ;;  %v10455_v12 = vpack.c.bf16 %v1176_v8, %v1174_v6  ;;  %v10456_v13 = vpack.c.bf16 %v1337_v9, %v1335_v63 }
 0x270   :  { %v3489_v42 = vld [vmem:[#allocation2 + $0x274] sm:$0xf]  ;;  %v3859_v15 = vld [vmem:[#allocation2 + $0x278] sm:$0xf]  ;;  %v4113_v21 = vld [vmem:[#allocation2 + $0x27c] sm:$0xf] }
 0x271   :  { %v3603_v36 = vld [vmem:[#allocation2 + $0x274] sm:$0xf]  ;;  %v9673_v17 = vcombine.low %v3488_v2, %v3489_v42  ;;  %v9712_v19 = vcombine.low %v3858_v7, %v3859_v15  ;;  %v4367_v22 = vld [vmem:[#allocation2 + $0x280] sm:$0xf]  ;;  %2310 = vst [vmem:[#allocation2 + $0x2bc] sm:$0xff] %v10455_v12  ;;  %2311 = vst [vmem:[#allocation2 + $0x2c4] sm:$0xff] %v10456_v13  ;;  %v2925_v16 = vpop.permute.xlu0 %2924  ;;  %v9738_v23 = vcombine.low %v4112_v10, %v4113_v21 }
 0x272   :  { %v9686_v18 = vcombine.low %v3602_v4, %v3603_v36  ;;  %v9764_v33 = vcombine.low %v4366_v11, %v4367_v22  ;;  %2957 = vst.msk [vmem:[#allocation3 + $0x168] sm:$0xff] %vm684_vm5, %v2925_v16  ;;  %v1180_v24 = vpop.f32.mrb[92].mxu1  ;;  %v11240_v25 = vld [vmem:[#allocation2 + $0x254] ss:$36 sps:$4 sm:$0xff]   ;;  %v1341_v26 = vpop.f32.mrb[144].mxu0 }
 0x273   :  { %3581 = vst.msk [vmem:[#allocation3 + $0x380] sm:$0xff] %vm684_vm5, %v9673_v17  ;;  %v1182_v14 = vpop.f32.mrb[93].mxu1  ;;  %v1343_v56 = vpop.f32.mrb[145].mxu0  ;;  %3806 = vrot.lane.b32.xlu1 %v11240_v25, %s11761_s2 }
 0x274   :  { %3696 = vst.msk [vmem:[#allocation3 + $0x40] sm:$0xff] %vm3687_vm3, %v9686_v18  ;;  %3951 = vst.msk [vmem:[#allocation3 + $0x110] sm:$0xff] %vm3687_vm3, %v9712_v19  ;;  %v10460_v27 = vpack.c.bf16 %v1182_v14, %v1180_v24  ;;  %v10461_v29 = vpack.c.bf16 %v1343_v56, %v1341_v26  ;;  %v1184_v30 = vpop.f32.mrb[94].mxu1  ;;  %v1345_v31 = vpop.f32.mrb[146].mxu0  ;;  %v4719_v56 = vld [vmem:[#allocation3 + $0x8] sm:$0xff] }
 0x275   :  { %4205 = vst.msk [vmem:[#allocation3 + $0x1e0] sm:$0xff] %vm3687_vm3, %v9738_v23  ;;  %4459 = vst.msk [vmem:[#allocation3 + $0x2b0] sm:$0xff] %vm3687_vm3, %v9764_v33  ;;  %v2673_v32 = vpop.permute.xlu1 %2672  ;;  %v3490_v47 = vld [vmem:[#allocation2 + $0x298] sm:$0xf]  ;;  %v3860_v35 = vld [vmem:[#allocation2 + $0x29c] sm:$0xf] }
 0x276   :  { %v3604_v34 = vld [vmem:[#allocation2 + $0x298] sm:$0xf]  ;;  %2315 = vst [vmem:[#allocation2 + $0x2e0] sm:$0xff] %v10460_v27  ;;  %2316 = vst [vmem:[#allocation2 + $0x2e8] sm:$0xff] %v10461_v29  ;;  %v1186_v37 = vpop.f32.mrb[95].mxu1  ;;  %v1347_v38 = vpop.f32.mrb[147].mxu0 }
 0x277   :  { %2704 = vst.msk [vmem:[#allocation3 + $0xa0] sm:$0xff] %vm684_vm5, %v2673_v32  ;;  %v4114_v55 = vld [vmem:[#allocation2 + $0x2a0] sm:$0xf]  ;;  %v4368_v39 = vld [vmem:[#allocation2 + $0x2a4] sm:$0xf]  ;;  %v10465_v40 = vpack.c.bf16 %v1186_v37, %v1184_v30  ;;  %v10466_v41 = vpack.c.bf16 %v1347_v38, %v1345_v31 }
 0x278   :  { %v3491_v43 = vld [vmem:[#allocation2 + $0x2bc] sm:$0xf]  ;;  %v3861_v46 = vld [vmem:[#allocation2 + $0x2c0] sm:$0xf]  ;;  %v4115_v28 = vld [vmem:[#allocation2 + $0x2c4] sm:$0xf] }
 0x279   :  { %v3605_v45 = vld [vmem:[#allocation2 + $0x2bc] sm:$0xf]  ;;  %v9674_v48 = vcombine.low %v3490_v47, %v3491_v43  ;;  %v9713_v49 = vcombine.low %v3860_v35, %v3861_v46  ;;  %v4369_v50 = vld [vmem:[#allocation2 + $0x2c8] sm:$0xf]  ;;  %2320 = vst [vmem:[#allocation2 + $0x304] sm:$0xff] %v10465_v40  ;;  %2321 = vst [vmem:[#allocation2 + $0x30c] sm:$0xff] %v10466_v41  ;;  %v9739_v51 = vcombine.low %v4114_v55, %v4115_v28 }
 0x27a   :  { %v9687_v3 = vcombine.low %v3604_v34, %v3605_v45  ;;  %v9765_v52 = vcombine.low %v4368_v39, %v4369_v50  ;;  %v1190_v53 = vpop.f32.mrb[96].mxu1  ;;  %v11241_v57 = vld [vmem:[#allocation2 + $0x29c] ss:$36 sps:$4 sm:$0xff]   ;;  %v1351_v58 = vpop.f32.mrb[148].mxu0 }
 0x27b   :  { %v4726_v54 = vld [vmem:[#allocation3 + $0x40] sm:$0xff]  ;;  %3582 = vst.msk [vmem:[#allocation3 + $0x388] sm:$0xff] %vm684_vm5, %v9674_v48  ;;  %v1192_v5 = vpop.f32.mrb[97].mxu1  ;;  %v1353_v59 = vpop.f32.mrb[149].mxu0  ;;  %3808 = vrot.lane.b32.xlu1 %v11241_v57, %s11761_s2 }
 0x27c   :  { %10550 = vmatprep.subr.bf16.mxu0 %v4726_v54  ;;  %3697 = vst.msk [vmem:[#allocation3 + $0x48] sm:$0xff] %vm3687_vm3, %v9687_v3  ;;  %3952 = vst.msk [vmem:[#allocation3 + $0x118] sm:$0xff] %vm3687_vm3, %v9713_v49  ;;  %v10470_v61 = vpack.c.bf16 %v1192_v5, %v1190_v53  ;;  %v10471_v44 = vpack.c.bf16 %v1353_v59, %v1351_v58  ;;  %v1194_v62 = vpop.f32.mrb[98].mxu1  ;;  %v1355_v20 = vpop.f32.mrb[150].mxu0  ;;  %v11242_v63 = vld [vmem:[#allocation2 + $0x2a0] ss:$36 sps:$4 sm:$0xff]  }
 0x27d   :  { %4206 = vst.msk [vmem:[#allocation3 + $0x1e8] sm:$0xff] %vm3687_vm3, %v9739_v51  ;;  %4460 = vst.msk [vmem:[#allocation3 + $0x2b8] sm:$0xff] %vm3687_vm3, %v9765_v52  ;;  %10551 = vmatpush3.bf16.msra.mxu0 %v4718_v60  ;;  %v2675_v6 = vpop.permute.xlu1 %2674  ;;  %v3492_v1 = vld [vmem:[#allocation2 + $0x2e0] sm:$0xf]  ;;  %v3862_v4 = vld [vmem:[#allocation2 + $0x2e4] sm:$0xf] }
 0x27e   :  { %v3606_v2 = vld [vmem:[#allocation2 + $0x2e0] sm:$0xf]  ;;  %2325 = vst [vmem:[#allocation2 + $0x328] sm:$0xff] %v10470_v61  ;;  %2326 = vst [vmem:[#allocation2 + $0x330] sm:$0xff] %v10471_v44  ;;  %v1196_v7 = vpop.f32.mrb[99].mxu1  ;;  %v1357_v8 = vpop.f32.mrb[151].mxu0 }
 0x27f   :  { %2705 = vst.msk [vmem:[#allocation3 + $0xa8] sm:$0xff] %vm684_vm5, %v2675_v6  ;;  %v4116_v9 = vld [vmem:[#allocation2 + $0x2e8] sm:$0xf]  ;;  %v4370_v10 = vld [vmem:[#allocation2 + $0x2ec] sm:$0xf]  ;;  %v10475_v11 = vpack.c.bf16 %v1196_v7, %v1194_v62  ;;  %v10476_v12 = vpack.c.bf16 %v1357_v8, %v1355_v20  ;;  %4062 = vrot.lane.b32.xlu1 %v11242_v63, %s11761_s2  ;;  %v4720_v59 = vld [vmem:[#allocation3 + $0x10] sm:$0xff] }
 0x280   :  { %v3493_v13 = vld [vmem:[#allocation2 + $0x304] sm:$0xf]  ;;  %v3863_v36 = vld [vmem:[#allocation2 + $0x308] sm:$0xf]  ;;  %v4117_v19 = vld [vmem:[#allocation2 + $0x30c] sm:$0xf] }
 0x281   :  { %v3607_v42 = vld [vmem:[#allocation2 + $0x304] sm:$0xf]  ;;  %v9675_v15 = vcombine.low %v3492_v1, %v3493_v13  ;;  %v9714_v18 = vcombine.low %v3862_v4, %v3863_v36  ;;  %v4371_v21 = vld [vmem:[#allocation2 + $0x310] sm:$0xf]  ;;  %2330 = vst [vmem:[#allocation2 + $0x34c] sm:$0xff] %v10475_v11  ;;  %2331 = vst [vmem:[#allocation2 + $0x354] sm:$0xff] %v10476_v12  ;;  %v9740_v22 = vcombine.low %v4116_v9, %v4117_v19 }
 0x282   :  { %v9688_v17 = vcombine.low %v3606_v2, %v3607_v42  ;;  %v9766_v16 = vcombine.low %v4370_v10, %v4371_v21  ;;  %v1200_v23 = vpop.f32.mrb[100].mxu1  ;;  %v11243_v24 = vld [vmem:[#allocation2 + $0x2e4] ss:$36 sps:$4 sm:$0xff]   ;;  %v1361_v25 = vpop.f32.mrb[152].mxu0  ;;  %v11253_v12 = vld [vmem:[#allocation2 + $0x210] ss:$36 sps:$4 sm:$0xff]  }
 0x283   :  { %v4727_v33 = vld [vmem:[#allocation3 + $0x48] sm:$0xff]  ;;  %3583 = vst.msk [vmem:[#allocation3 + $0x390] sm:$0xff] %vm684_vm5, %v9675_v15  ;;  %v1202_v26 = vpop.f32.mrb[101].mxu1  ;;  %v1363_v14 = vpop.f32.mrb[153].mxu0  ;;  %3810 = vrot.lane.b32.xlu1 %v11243_v24, %s11761_s2  ;;  %v4721_v42 = vld [vmem:[#allocation3 + $0x18] sm:$0xff] }
 0x284   :  { %3698 = vst.msk [vmem:[#allocation3 + $0x50] sm:$0xff] %vm3687_vm3, %v9688_v17  ;;  %3953 = vst.msk [vmem:[#allocation3 + $0x120] sm:$0xff] %vm3687_vm3, %v9714_v18  ;;  %10552 = vmatprep.subr.bf16.mxu0 %v4727_v33  ;;  %v10480_v27 = vpack.c.bf16 %v1202_v26, %v1200_v23  ;;  %v10481_v29 = vpack.c.bf16 %v1363_v14, %v1361_v25  ;;  %v1204_v30 = vpop.f32.mrb[102].mxu1  ;;  %v1365_v31 = vpop.f32.mrb[154].mxu0  ;;  %v11249_v47 = vld [vmem:[#allocation2 + $0x2e8] ss:$36 sps:$4 sm:$0xff]  }
 0x285   :  { %4207 = vst.msk [vmem:[#allocation3 + $0x1f0] sm:$0xff] %vm3687_vm3, %v9740_v22  ;;  %4461 = vst.msk [vmem:[#allocation3 + $0x2c0] sm:$0xff] %vm3687_vm3, %v9766_v16  ;;  %10553 = vmatpush3.bf16.msra.mxu0 %v4719_v56  ;;  %v2677_v32 = vpop.permute.xlu1 %2676  ;;  %v3494_v34 = vld [vmem:[#allocation2 + $0x328] sm:$0xf]  ;;  %v3864_v37 = vld [vmem:[#allocation2 + $0x32c] sm:$0xf] }
 0x286   :  { %v3608_v35 = vld [vmem:[#allocation2 + $0x328] sm:$0xf]  ;;  %2335 = vst [vmem:[#allocation2 + $0x370] sm:$0x33] %v10480_v27  ;;  %2336 = vst [vmem:[#allocation2 + $0x378] sm:$0x33] %v10481_v29 }
 0x287   :  { %2706 = vst.msk [vmem:[#allocation3 + $0xb0] sm:$0xff] %vm684_vm5, %v2677_v32  ;;  %v1205_v38 = vpop.f32.mrb[103].mxu1  ;;  %v1366_v55 = vpop.f32.mrb[155].mxu0  ;;  %v4118_v39 = vld [vmem:[#allocation2 + $0x330] sm:$0xf]  ;;  %4064 = vrot.lane.b32.xlu1 %v11249_v47, %s11761_s2  ;;  %v4722_v25 = vld [vmem:[#allocation3 + $0x20] sm:$0xff] }
 0x288   :  { %v4372_v40 = vld [vmem:[#allocation2 + $0x334] sm:$0xf]  ;;  %v3495_v41 = vld [vmem:[#allocation2 + $0x34c] sm:$0xf]  ;;  %v3865_v45 = vld [vmem:[#allocation2 + $0x350] sm:$0xf] }
 0x289   :  { %v3609_v43 = vld [vmem:[#allocation2 + $0x34c] sm:$0xf]  ;;  %v9676_v46 = vcombine.low %v3494_v34, %v3495_v41  ;;  %v9715_v3 = vcombine.low %v3864_v37, %v3865_v45  ;;  %v4119_v49 = vld [vmem:[#allocation2 + $0x354] sm:$0xf]  ;;  %v4373_v28 = vld [vmem:[#allocation2 + $0x358] sm:$0xf]  ;;  %v2931_v50 = vpop.permute.xlu1 %2930 }
 0x28a   :  { %v9689_v48 = vcombine.low %v3608_v35, %v3609_v43  ;;  %v9741_v51 = vcombine.low %v4118_v39, %v4119_v49  ;;  %v9767_v52 = vcombine.low %v4372_v40, %v4373_v28  ;;  %2960 = vst.msk [vmem:[#allocation3 + $0x180] sm:$0xff] %vm684_vm5, %v2931_v50  ;;  %v1402_v53 = vpop.f32.mrb[104].mxu1  ;;  %v11250_v57 = vld [vmem:[#allocation2 + $0x32c] ss:$36 sps:$4 sm:$0xff]   ;;  %v11254_v15 = vld [vmem:[#allocation2 + $0x1fc] ss:$36 sps:$4 sm:$0xff]  }
 0x28b   :  { %v4728_v54 = vld [vmem:[#allocation3 + $0x50] sm:$0xff]  ;;  %3584 = vst.msk [vmem:[#allocation3 + $0x398] sm:$0xff] %vm684_vm5, %v9676_v46  ;;  %v10362_v58 = vpack.c.bf16 %v1402_v53, %v1402_v53  ;;  %v10984_v5 = vpop.f32.mrb[105].mxu1  ;;  %3812 = vrot.lane.b32.xlu1 %v11250_v57, %s11761_s2  ;;  %v11255_v33 = vld [vmem:[#allocation2 + $0x4] ss:$36 sps:$4 sm:$0xff]  }
 0x28c   :  { %3699 = vst.msk [vmem:[#allocation3 + $0x58] sm:$0xff] %vm3687_vm3, %v9689_v48  ;;  %3954 = vst.msk [vmem:[#allocation3 + $0x128] sm:$0xff] %vm3687_vm3, %v9715_v3  ;;  %10554 = vmatprep.subr.bf16.mxu0 %v4728_v54  ;;  %v1405_v60 = vpop.f32.mrb[106].mxu1  ;;  %v11251_v61 = vld [vmem:[#allocation2 + $0x330] ss:$36 sps:$4 sm:$0xff]  }
 0x28d   :  { %4208 = vst.msk [vmem:[#allocation3 + $0x1f8] sm:$0xff] %vm3687_vm3, %v9741_v51  ;;  %4462 = vst.msk [vmem:[#allocation3 + $0x2c8] sm:$0xff] %vm3687_vm3, %v9767_v52  ;;  %10555 = vmatpush3.bf16.msra.mxu0 %v4720_v59  ;;  %v11244_v44 = vld [vmem:[#allocation2 + $0x370] ss:$0 sps:$4 sm:$0x33]   ;;  %v2679_v62 = vpop.permute.xlu1 %2678  ;;  %v10367_v20 = vpack.c.bf16 %v1405_v60, %v1405_v60  ;;  %v10985_v6 = vpop.f32.mrb[107].mxu1 }
 0x28e   :  { %2217 = vst [vmem:[#allocation2 + $0x20] sm:$0xf] %v10362_v58  ;;  %v11245_v63 = vld [vmem:[#allocation2 + $0x370] ss:$0 sps:$4 sm:$0x33]   ;;  %2707 = vst.msk [vmem:[#allocation3 + $0xb8] sm:$0xff] %vm684_vm5, %v2679_v62 }
 0x28f   :  { %v11246_v1 = vld [vmem:[#allocation2 + $0x374] ss:$0 sps:$4 sm:$0x33]   ;;  %2222 = vst [vmem:[#allocation2 + $0x44] sm:$0xf] %v10367_v20  ;;  %4066 = vrot.lane.b32.xlu1 %v11251_v61, %s11761_s2 }
 0x290   :  { %3585 = vst.msk [vmem:[#allocation3 + $0x3a0] sm:$0x3] %vm2568_vm2, %v11244_v44  ;;  %v11247_v2 = vld [vmem:[#allocation2 + $0x378] ss:$0 sps:$4 sm:$0x33]  }
 0x291   :  { %3701 = vst.msk [vmem:[#allocation3 + $0x60] sm:$0x3] %vm3700_vm4, %v11245_v63  ;;  %v11248_v4 = vld [vmem:[#allocation2 + $0x37c] ss:$0 sps:$4 sm:$0x33]   ;;  %v2933_v7 = vpop.permute.xlu1 %2932  ;;  %v1410_v9 = vpop.f32.mrb[108].mxu1 }
 0x292   :  { %3955 = vst.msk [vmem:[#allocation3 + $0x130] sm:$0x3] %vm3700_vm4, %v11246_v1  ;;  %v11252_v8 = vld [vmem:[#allocation2 + $0x374] ss:$0 sps:$4 sm:$0x33]   ;;  %v10372_v10 = vpack.c.bf16 %v1410_v9, %v1410_v9  ;;  %v10988_v13 = vpop.f32.mrb[109].mxu1 }
 0x293   :  { %2961 = vst.msk [vmem:[#allocation3 + $0x188] sm:$0xff] %vm684_vm5, %v2933_v7  ;;  %v4729_v11 = vld [vmem:[#allocation3 + $0x58] sm:$0xff]  ;;  %3814 = vrot.lane.b32.xlu0 %v11252_v8, %s11761_s2  ;;  %v1413_v36 = vpop.f32.mrb[110].mxu1  ;;  %4058 = vrot.lane.b32.xlu1 %v11253_v12, %s11761_s2  ;;  %v11256_v26 = vld [vmem:[#allocation2 + $0x244] ss:$36 sps:$4 sm:$0xff]  }
 0x294   :  { %4209 = vst.msk [vmem:[#allocation3 + $0x200] sm:$0x3] %vm3700_vm4, %v11247_v2  ;;  %4463 = vst.msk [vmem:[#allocation3 + $0x2d0] sm:$0x3] %vm3700_vm4, %v11248_v4  ;;  %10556 = vmatprep.subr.bf16.mxu0 %v4729_v11  ;;  %v10377_v18 = vpack.c.bf16 %v1413_v36, %v1413_v36  ;;  %v10989_v19 = vpop.f32.mrb[111].mxu1  ;;  %v2681_v16 = vpop.permute.xlu0 %2680  ;;  %v4723_v2 = vld [vmem:[#allocation3 + $0x28] sm:$0xff] }
 0x295   :  { %2227 = vst [vmem:[#allocation2 + $0x68] sm:$0xf] %v10372_v10  ;;  %10557 = vmatpush3.bf16.msra.mxu0 %v4721_v42  ;;  %v2935_v17 = vpop.permute.xlu1 %2934  ;;  %v4604_v21 = vld [vmem:[#allocation2 + $0x20] sm:$0xf]  ;;  %2708 = vst.msk [vmem:[#allocation3 + $0xc0] sm:$0xff] %vm684_vm5, %v2681_v16 }
 0x296   :  { %v4605_v22 = vld [vmem:[#allocation2 + $0x44] sm:$0xf]  ;;  %2962 = vst.msk [vmem:[#allocation3 + $0x190] sm:$0xff] %vm684_vm5, %v2935_v17  ;;  %2232 = vst [vmem:[#allocation2 + $0x8c] sm:$0xf] %v10377_v18  ;;  %v4724_v18 = vld [vmem:[#allocation3 + $0x30] sm:$0xff] }
 0x297   :  { %v9782_v23 = vcombine.low %v4604_v21, %v4605_v22  ;;  %2926 = vrot.lane.b32.xlu0 %v11254_v15, %s11761_s2  ;;  %2912 = vrot.lane.b32.xlu1 %v11255_v33, %s11761_s2  ;;  %v11257_v27 = vld [vmem:[#allocation2 + $0x18] ss:$36 sps:$4 sm:$0xff]   ;;  %v11260_v40 = vld [vmem:[#allocation2 + $0x200] ss:$36 sps:$4 sm:$0xff]   ;;  %v11261_v45 = vld [vmem:[#allocation2 + $0x8] ss:$36 sps:$4 sm:$0xff]  }
 0x298   :  { %v4730_v24 = vld [vmem:[#allocation3 + $0x60] sm:$0xff]  ;;  %v11258_v47 = vld [vmem:[#allocation2 + $0x258] ss:$36 sps:$4 sm:$0xff]   ;;  %v11265_v59 = vld [vmem:[#allocation2 + $0x50] ss:$36 sps:$4 sm:$0xff]  }
 0x299   :  { %10558 = vmatprep.subr.bf16.mxu0 %v4730_v24  ;;  %4705 = vst.msk [vmem:[#allocation3 + $0x340] sm:$0xff] %vm3687_vm3, %v9782_v23  ;;  %v1418_v14 = vpop.f32.mrb[112].mxu1  ;;  %v11259_v39 = vld [vmem:[#allocation2 + $0x214] ss:$36 sps:$4 sm:$0xff]   ;;  %v11262_v28 = vld [vmem:[#allocation2 + $0x248] ss:$36 sps:$4 sm:$0xff]  }
 0x29a   :  { %10559 = vmatpush3.bf16.msra.mxu0 %v4722_v25  ;;  %v10382_v56 = vpack.c.bf16 %v1418_v14, %v1418_v14  ;;  %v10992_v29 = vpop.f32.mrb[113].mxu1  ;;  %v11263_v54 = vld [vmem:[#allocation2 + $0x1c] ss:$36 sps:$4 sm:$0xff]   ;;  %v11327_v61 = vld [vmem:[%s13984_s5 + $0xc] ss:$60 sps:$4 sm:$0xff]  }
 0x29b   :  { %2928 = vrot.lane.b32.xlu0 %v11256_v26, %s11761_s2  ;;  %v1421_v30 = vpop.f32.mrb[114].mxu1  ;;  %v2937_v31 = vpop.permute.xlu1 %2936  ;;  %4044 = vrot.lane.b32.xlu1 %v11257_v27, %s11761_s2  ;;  %v11264_v57 = vld [vmem:[#allocation2 + $0x25c] ss:$36 sps:$4 sm:$0xff]   ;;  %v11266_v6 = vld [vmem:[#allocation2 + $0x290] ss:$36 sps:$4 sm:$0xff]  }
 0x29c   :  { %2237 = vst [vmem:[#allocation2 + $0xb0] sm:$0xf] %v10382_v56  ;;  %v10387_v32 = vpack.c.bf16 %v1421_v30, %v1421_v30  ;;  %v10993_v34 = vpop.f32.mrb[115].mxu1  ;;  %v4606_v35 = vld [vmem:[#allocation2 + $0x68] sm:$0xf]  ;;  %v2683_v38 = vpop.permute.xlu0 %2682  ;;  %5225 = vmatprep.mubr.bf16.mxu1 %v11327_v61 }
 0x29d   :  { %v4607_v37 = vld [vmem:[#allocation2 + $0x8c] sm:$0xf]  ;;  %2963 = vst.msk [vmem:[#allocation3 + $0x198] sm:$0x3] %vm2568_vm2, %v2937_v31  ;;  %2709 = vst.msk [vmem:[#allocation3 + $0xc8] sm:$0x3] %vm2568_vm2, %v2683_v38 }
 0x29e   :  { %v9783_v55 = vcombine.low %v4606_v35, %v4607_v37  ;;  %2242 = vst [vmem:[#allocation2 + $0xd4] sm:$0xf] %v10387_v32  ;;  %v11267_v9 = vld [vmem:[#allocation2 + $0x64] ss:$36 sps:$4 sm:$0xff]   ;;  %v11269_v42 = vld [vmem:[#allocation2 + $0x98] ss:$36 sps:$4 sm:$0xff]  }
 0x29f   :  { %4060 = vrot.lane.b32.xlu0 %v11258_v47, %s11761_s2  ;;  %4312 = vrot.lane.b32.xlu1 %v11259_v39, %s11761_s2  ;;  %v11268_v11 = vld [vmem:[#allocation2 + $0x2a4] ss:$36 sps:$4 sm:$0xff]   ;;  %v11270_v17 = vld [vmem:[#allocation2 + $0x2d8] ss:$36 sps:$4 sm:$0xff]   ;;  %v11271_v16 = vld [vmem:[#allocation2 + $0xac] ss:$36 sps:$4 sm:$0xff]  }
 0x2a0   :  { %4706 = vst.msk [vmem:[#allocation3 + $0x348] sm:$0xff] %vm3687_vm3, %v9783_v55  ;;  %v11272_v26 = vld [vmem:[#allocation2 + $0x2ec] ss:$36 sps:$4 sm:$0xff]   ;;  %v11273_v29 = vld [vmem:[#allocation2 + $0x378] ss:$0 sps:$4 sm:$0x33]  }
 0x2a1   :  { %v1426_v41 = vpop.f32.mrb[116].mxu1  ;;  %v11274_v47 = vld [vmem:[#allocation2 + $0x320] ss:$36 sps:$4 sm:$0xff]  }
 0x2a2   :  { %v10392_v43 = vpack.c.bf16 %v1426_v41, %v1426_v41  ;;  %v10996_v46 = vpop.f32.mrb[117].mxu1  ;;  %v4725_v41 = vld [vmem:[#allocation3 + $0x38] sm:$0xff] }
 0x2a3   :  { %3180 = vrot.lane.b32.xlu0 %v11260_v40, %s11761_s2  ;;  %v1429_v48 = vpop.f32.mrb[118].mxu1  ;;  %3166 = vrot.lane.b32.xlu1 %v11261_v45, %s11761_s2  ;;  %v3791_v3 = vpop.permute.xlu0 %3790  ;;  %v4608_v51 = vld [vmem:[#allocation2 + $0xb0] sm:$0xf]  ;;  %v11277_v45 = vld [vmem:[%s13984_s5] ss:$60 sps:$4 sm:$0xff]  }
 0x2a4   :  { %2247 = vst [vmem:[#allocation2 + $0xf8] sm:$0xf] %v10392_v43  ;;  %v10397_v49 = vpack.c.bf16 %v1429_v48, %v1429_v48  ;;  %v10997_v50 = vpop.f32.mrb[119].mxu1  ;;  %3829 = vst.msk [vmem:[#allocation3 + $0x68] sm:$0xff] %vm3687_vm3, %v3791_v3  ;;  %v11275_v43 = vld [vmem:[#allocation2 + $0xc] ss:$36 sps:$4 sm:$0xff]  }
 0x2a5   :  { %v4609_v52 = vld [vmem:[#allocation2 + $0xd4] sm:$0xf]  ;;  %v11276_v48 = vld [vmem:[#allocation2 + $0xe0] ss:$36 sps:$4 sm:$0xff]  }
 0x2a6   :  { %v9784_v53 = vcombine.low %v4608_v51, %v4609_v52  ;;  %2252 = vst [vmem:[#allocation2 + $0x11c] sm:$0xf] %v10397_v49  ;;  %v11314_v49 = vld [vmem:[%s13984_s5 + $0x7c] ss:$60 sps:$4 sm:$0xff]   ;;  %v4750_v50 = vld [vmem:[#allocation3 + $0x100] sm:$0xff] }
 0x2a7   :  { %3182 = vrot.lane.b32.xlu0 %v11262_v28, %s11761_s2  ;;  %4298 = vrot.lane.b32.xlu1 %v11263_v54, %s11761_s2  ;;  %v11280_v51 = vld [vmem:[#allocation2 + $0x334] ss:$36 sps:$4 sm:$0xff]  }
 0x2a8   :  { %4707 = vst.msk [vmem:[#allocation3 + $0x350] sm:$0xff] %vm3687_vm3, %v9784_v53 }
 0x2a9   :  { %v1434_v58 = vpop.f32.mrb[120].mxu1 }
 0x2aa   :  { %v10402_v5 = vpack.c.bf16 %v1434_v58, %v1434_v58  ;;  %v11000_v60 = vpop.f32.mrb[121].mxu1  ;;  %v11281_v58 = vld [vmem:[#allocation2 + $0x368] ss:$0 sps:$4 sm:$0x33]  }
 0x2ab   :  { %4314 = vrot.lane.b32.xlu0 %v11264_v57, %s11761_s2  ;;  %v1437_v44 = vpop.f32.mrb[122].mxu1  ;;  %3168 = vrot.lane.b32.xlu1 %v11265_v59, %s11761_s2  ;;  %v4731_v1 = vld [vmem:[#allocation3 + $0x68] sm:$0xff]  ;;  %v4610_v4 = vld [vmem:[#allocation2 + $0xf8] sm:$0xf] }
 0x2ac   :  { %2257 = vst [vmem:[#allocation2 + $0x140] sm:$0xf] %v10402_v5  ;;  %v10407_v20 = vpack.c.bf16 %v1437_v44, %v1437_v44  ;;  %v11001_v63 = vpop.f32.mrb[123].mxu1  ;;  %10560 = vmatprep.subr.bf16.mxu0 %v4731_v1 }
 0x2ad   :  { %v3793_v62 = vpop.permute.xlu0 %3792  ;;  %v4611_v7 = vld [vmem:[#allocation2 + $0x11c] sm:$0xf]  ;;  %10561 = vmatpush3.bf16.msra.mxu0 %v4723_v2  ;;  %v11317_v63 = vld [vmem:[%s13984_s5 + $0x78] ss:$60 sps:$4 sm:$0xff]  }
 0x2ae   :  { %3830 = vst.msk [vmem:[#allocation3 + $0x70] sm:$0xff] %vm3687_vm3, %v3793_v62  ;;  %v9785_v8 = vcombine.low %v4610_v4, %v4611_v7  ;;  %2262 = vst [vmem:[#allocation2 + $0x164] sm:$0xf] %v10407_v20  ;;  %v4751_v20 = vld [vmem:[#allocation3 + $0x108] sm:$0xff] }
 0x2af   :  { %3184 = vrot.lane.b32.xlu0 %v11266_v6, %s11761_s2  ;;  %4300 = vrot.lane.b32.xlu1 %v11267_v9, %s11761_s2  ;;  %v11282_v6 = vld [vmem:[#allocation2 + $0xf4] ss:$36 sps:$4 sm:$0xff]   ;;  %v11283_v4 = vld [vmem:[#allocation2 + $0x128] ss:$36 sps:$4 sm:$0xff]  }
 0x2b0   :  { %4708 = vst.msk [vmem:[#allocation3 + $0x358] sm:$0xff] %vm3687_vm3, %v9785_v8  ;;  %v11319_v2 = vld [vmem:[%s13984_s5 + $0xf4] ss:$60 sps:$4 sm:$0xff]  }
 0x2b1   :  { %v4047_v10 = vpop.permute.xlu0 %4046  ;;  %v1442_v12 = vpop.f32.mrb[124].mxu1  ;;  %v4752_v9 = vld [vmem:[#allocation3 + $0x110] sm:$0xff] }
 0x2b2   :  { %4084 = vst.msk [vmem:[#allocation3 + $0x140] sm:$0xff] %vm3687_vm3, %v4047_v10  ;;  %v10412_v13 = vpack.c.bf16 %v1442_v12, %v1442_v12  ;;  %v11004_v36 = vpop.f32.mrb[125].mxu1  ;;  %v11284_v10 = vld [vmem:[#allocation2 + $0x54] ss:$36 sps:$4 sm:$0xff]  }
 0x2b3   :  { %4316 = vrot.lane.b32.xlu0 %v11268_v11, %s11761_s2  ;;  %v1445_v15 = vpop.f32.mrb[126].mxu1  ;;  %3170 = vrot.lane.b32.xlu1 %v11269_v42, %s11761_s2  ;;  %v4612_v23 = vld [vmem:[#allocation2 + $0x140] sm:$0xf]  ;;  %v470_v42 = vld [vmem:[%s13984_s5 + $0x12c] sm:$0xff] }
 0x2b4   :  { %2267 = vst [vmem:[#allocation2 + $0x188] sm:$0xf] %v10412_v13  ;;  %v10417_v19 = vpack.c.bf16 %v1445_v15, %v1445_v15  ;;  %v11005_v21 = vpop.f32.mrb[127].mxu1  ;;  %v462_v13 = vld [vmem:[%s13984_s5 + $0xf0] sm:$0xff]  ;;  %v11285_v15 = vld [vmem:[#allocation2 + $0x9c] ss:$36 sps:$4 sm:$0xff]  }
 0x2b5   :  { %v4732_v22 = vld [vmem:[#allocation3 + $0x70] sm:$0xff]  ;;  %v4613_v33 = vld [vmem:[#allocation2 + $0x164] sm:$0xf]  ;;  %v3795_v24 = vpop.permute.xlu0 %3794 }
 0x2b6   :  { %10562 = vmatprep.subr.bf16.mxu0 %v4732_v22  ;;  %v9786_v25 = vcombine.low %v4612_v23, %v4613_v33  ;;  %2272 = vst [vmem:[#allocation2 + $0x1ac] sm:$0xf] %v10417_v19  ;;  %3831 = vst.msk [vmem:[#allocation3 + $0x78] sm:$0xff] %vm3687_vm3, %v3795_v24  ;;  %v11286_v24 = vld [vmem:[#allocation2 + $0x13c] ss:$36 sps:$4 sm:$0xff]  }
 0x2b7   :  { %10563 = vmatpush3.bf16.msra.mxu0 %v4724_v18  ;;  %3186 = vrot.lane.b32.xlu0 %v11270_v17, %s11761_s2  ;;  %v478_v18 = vld [vmem:[%s13984_s5 + $0x168] sm:$0x11] }
 0x2b8   :  { %4709 = vst.msk [vmem:[#allocation3 + $0x360] sm:$0xff] %vm3687_vm3, %v9786_v25  ;;  %4302 = vrot.lane.b32.xlu1 %v11271_v16, %s11761_s2  ;;  %v9826_v25 = vcombine.low %v462_v13, %v470_v42  ;;  %v11298_v42 = vld [vmem:[#allocation2 + $0x174] ss:$36 sps:$4 sm:$0xff]  }
 0x2b9   :  { %v4049_v14 = vpop.permute.xlu0 %4048  ;;  %v1450_v56 = vpop.f32.mrb[128].mxu1  ;;  %v4758_v46 = vld [vmem:[#allocation3 + $0x140] sm:$0xff] }
 0x2ba   :  { %4085 = vst.msk [vmem:[#allocation3 + $0x148] sm:$0xff] %vm3687_vm3, %v4049_v14  ;;  %v10422_v27 = vpack.c.bf16 %v1450_v56, %v1450_v56  ;;  %v11008_v30 = vpop.f32.mrb[129].mxu1  ;;  %v9842_v14 = vcombine.high %v478_v18, %v478_v18  ;;  %v11287_v56 = vld [vmem:[#allocation2 + $0xe4] ss:$36 sps:$4 sm:$0xff]  }
 0x2bb   :  { %v4614_v31 = vld [vmem:[#allocation2 + $0x188] sm:$0xf]  ;;  %4318 = vrot.lane.b32.xlu0 %v11272_v26, %s11761_s2  ;;  %v1453_v32 = vpop.f32.mrb[130].mxu1  ;;  %v4753_v26 = vld [vmem:[#allocation3 + $0x118] sm:$0xff]  ;;  %v11288_v30 = vld [vmem:[#allocation2 + $0x170] ss:$36 sps:$4 sm:$0xff]  }
 0x2bc   :  { %2277 = vst [vmem:[#allocation2 + $0x1d0] sm:$0xf] %v10422_v27  ;;  %4068 = vrot.lane.b32.xlu1 %v11273_v29, %s11761_s2  ;;  %v10427_v34 = vpack.c.bf16 %v1453_v32, %v1453_v32  ;;  %v11009_v35 = vpop.f32.mrb[131].mxu1 }
 0x2bd   :  { %v4615_v37 = vld [vmem:[#allocation2 + $0x1ac] sm:$0xf]  ;;  %v3797_v38 = vpop.permute.xlu1 %3796  ;;  %v4733_v55 = vld [vmem:[#allocation3 + $0x78] sm:$0xff] }
 0x2be   :  { %v9787_v39 = vcombine.low %v4614_v31, %v4615_v37  ;;  %3832 = vst.msk [vmem:[#allocation3 + $0x80] sm:$0xff] %vm3687_vm3, %v3797_v38  ;;  %2282 = vst [vmem:[#allocation2 + $0x1f4] sm:$0xf] %v10427_v34  ;;  %v4051_v40 = vpop.permute.xlu0 %4050  ;;  %10564 = vmatprep.subr.bf16.mxu0 %v4733_v55  ;;  %v11289_v34 = vld [vmem:[#allocation2 + $0x12c] ss:$36 sps:$4 sm:$0xff]  }
 0x2bf   :  { %4086 = vst.msk [vmem:[#allocation3 + $0x150] sm:$0xff] %vm3687_vm3, %v4051_v40  ;;  %3188 = vrot.lane.b32.xlu0 %v11274_v47, %s11761_s2  ;;  %10565 = vmatpush3.bf16.msra.mxu0 %v4725_v41  ;;  %v11290_v41 = vld [vmem:[#allocation2 + $0x184] ss:$36 sps:$4 sm:$0xff]  }
 0x2c0   :  { %4710 = vst.msk [vmem:[#allocation3 + $0x368] sm:$0xff] %vm3687_vm3, %v9787_v39  ;;  %3420 = vrot.lane.b32.xlu1 %v11275_v43, %s11761_s2  ;;  %10630 = vmatprep.subr.bf16.mxu0 %v4758_v46  ;;  %v9841_v43 = vcombine.low %v478_v18, %v478_v18  ;;  %v11324_v46 = vld [vmem:[%s13984_s5 + $0x14] ss:$60 sps:$4 sm:$0xff]   ;;  %v11301_v18 = vld [vmem:[#allocation2 + $0x188] ss:$36 sps:$4 sm:$0xff]  }
 0x2c1   :  { %v1458_v3 = vpop.f32.mrb[132].mxu1  ;;  %v4759_v53 = vld [vmem:[#allocation3 + $0x148] sm:$0xff] }
 0x2c2   :  { %v10432_v28 = vpack.c.bf16 %v1458_v3, %v1458_v3  ;;  %5162 = vmatmul.mubr.bf16.vlgmr.msra.gmra.mrb[156].mxu0 %v11277_v45  ;;  %v11012_v52 = vpop.f32.mrb[133].mxu1  ;;  %v4754_v45 = vld [vmem:[#allocation3 + $0x120] sm:$0xff] }
 0x2c3   :  { %3172 = vrot.lane.b32.xlu0 %v11276_v48, %s11761_s2  ;;  %10631 = vmatpush3.bf16.msra.mxu0 %v4750_v50  ;;  %v1461_v54 = vpop.f32.mrb[134].mxu1  ;;  %v4616_v59 = vld [vmem:[#allocation2 + $0x1d0] sm:$0xf]  ;;  %v11291_v3 = vld [vmem:[#allocation2 + $0x20] ss:$36 sps:$4 sm:$0xff]  }
 0x2c4   :  { %2287 = vst [vmem:[#allocation2 + $0x218] sm:$0xf] %v10432_v28  ;;  %4320 = vrot.lane.b32.xlu1 %v11280_v51, %s11761_s2  ;;  %10632 = vmatprep.subr.bf16.mxu0 %v4759_v53  ;;  %v10437_v57 = vpack.c.bf16 %v1461_v54, %v1461_v54  ;;  %v11013_v5 = vpop.f32.mrb[135].mxu1  ;;  %v3799_v61 = vpop.permute.xlu1 %3798  ;;  %v11292_v50 = vld [vmem:[#allocation2 + $0x37c] ss:$0 sps:$4 sm:$0x33]  }
 0x2c5   :  { %v4617_v60 = vld [vmem:[#allocation2 + $0x1f4] sm:$0xf]  ;;  %5169 = vmatprep.mubr.bf16.mxu0 %v11314_v49  ;;  %3833 = vst.msk [vmem:[#allocation3 + $0x88] sm:$0xff] %vm3687_vm3, %v3799_v61  ;;  %v4053_v62 = vpop.permute.xlu0 %4052  ;;  %v11293_v54 = vld [vmem:[#allocation2 + $0x68] ss:$36 sps:$4 sm:$0xff]  }
 0x2c6   :  { %v9788_v44 = vcombine.low %v4616_v59, %v4617_v60  ;;  %2292 = vst [vmem:[#allocation2 + $0x23c] sm:$0xf] %v10437_v57  ;;  %4087 = vst.msk [vmem:[#allocation3 + $0x158] sm:$0xff] %vm3687_vm3, %v4053_v62  ;;  %v4760_v1 = vld [vmem:[#allocation3 + $0x150] sm:$0xff] }
 0x2c7   :  { %3190 = vrot.lane.b32.xlu0 %v11281_v58, %s11761_s2  ;;  %10633 = vmatpush3.bf16.msra.mxu0 %v4751_v20  ;;  %v11294_v61 = vld [vmem:[#allocation2 + $0x1b8] ss:$36 sps:$4 sm:$0xff]  }
 0x2c8   :  { %4711 = vst.msk [vmem:[#allocation3 + $0x370] sm:$0xff] %vm3687_vm3, %v9788_v44  ;;  %4304 = vrot.lane.b32.xlu1 %v11282_v6, %s11761_s2  ;;  %10634 = vmatprep.subr.bf16.mxu0 %v4760_v1  ;;  %v11295_v44 = vld [vmem:[#allocation2 + $0xb0] ss:$36 sps:$4 sm:$0xff]  }
 0x2c9   :  { %v1466_v7 = vpop.f32.mrb[136].mxu1  ;;  %v11296_v1 = vld [vmem:[#allocation2 + $0x1cc] ss:$36 sps:$4 sm:$0xff]  }
 0x2ca   :  { %v10442_v8 = vpack.c.bf16 %v1466_v7, %v1466_v7  ;;  %v11016_v11 = vpop.f32.mrb[137].mxu1  ;;  %5170 = vmatmul.mubr.bf16.gmra.mrb[160].mxu0 %v11317_v63  ;;  %v4755_v63 = vld [vmem:[#allocation3 + $0x128] sm:$0xff] }
 0x2cb   :  { %3174 = vrot.lane.b32.xlu0 %v11283_v4, %s11761_s2  ;;  %10635 = vmatpush3.bf16.msra.mxu0 %v4752_v9  ;;  %v1469_v12 = vpop.f32.mrb[138].mxu1  ;;  %v4618_v19 = vld [vmem:[#allocation2 + $0x218] sm:$0xf] }
 0x2cc   :  { %2297 = vst [vmem:[#allocation2 + $0x260] sm:$0xf] %v10442_v8  ;;  %3422 = vrot.lane.b32.xlu1 %v11284_v10, %s11761_s2  ;;  %v10447_v36 = vpack.c.bf16 %v1469_v12, %v1469_v12  ;;  %v11017_v17 = vpop.f32.mrb[139].mxu1  ;;  %5177 = vmatprep.mubr.bf16.mxu0 %v11319_v2  ;;  %v11297_v8 = vld [vmem:[#allocation2 + $0xf8] ss:$36 sps:$4 sm:$0xff]  }
 0x2cd   :  { %v4619_v21 = vld [vmem:[#allocation2 + $0x23c] sm:$0xf]  ;;  %v3801_v22 = vpop.permute.xlu1 %3800 }
 0x2ce   :  { %v9789_v16 = vcombine.low %v4618_v19, %v4619_v21  ;;  %3834 = vst.msk [vmem:[#allocation3 + $0x90] sm:$0xff] %vm3687_vm3, %v3801_v22  ;;  %2302 = vst [vmem:[#allocation2 + $0x284] sm:$0xf] %v10447_v36  ;;  %v4055_v23 = vpop.permute.xlu0 %4054  ;;  %v4761_v33 = vld [vmem:[#allocation3 + $0x158] sm:$0xff] }
 0x2cf   :  { %4088 = vst.msk [vmem:[#allocation3 + $0x160] sm:$0xff] %vm3687_vm3, %v4055_v23  ;;  %3424 = vrot.lane.b32.xlu0 %v11285_v15, %s11761_s2  ;;  %10636 = vmatprep.subr.bf16.mxu0 %v4761_v33  ;;  %v11299_v36 = vld [vmem:[#allocation2 + $0x140] ss:$36 sps:$4 sm:$0xff]  }
 0x2d0   :  { %4712 = vst.msk [vmem:[#allocation3 + $0x378] sm:$0xff] %vm3687_vm3, %v9789_v16  ;;  %10637 = vmatpush3.bf16.msra.mxu0 %v4753_v26  ;;  %4306 = vrot.lane.b32.xlu1 %v11286_v24, %s11761_s2  ;;  %v11302_v22 = vld [vmem:[#allocation2 + $0x1bc] ss:$36 sps:$4 sm:$0xff]   ;;  %v11303_v26 = vld [vmem:[#allocation2 + $0x1d0] ss:$36 sps:$4 sm:$0xff]  }
 0x2d1   :  { %v1474_v27 = vpop.f32.mrb[140].mxu1 }
 0x2d2   :  { %v10452_v29 = vpack.c.bf16 %v1474_v27, %v1474_v27  ;;  %v11020_v31 = vpop.f32.mrb[141].mxu1  ;;  %5178 = vmatmul.mubr.bf16.gmra.mrb[164].mxu0 %v9826_v25  ;;  %v11305_v27 = vld [vmem:[#allocation2 + $0x218] ss:$36 sps:$4 sm:$0xff]  }
 0x2d3   :  { %3426 = vrot.lane.b32.xlu0 %v11287_v56, %s11761_s2  ;;  %v1477_v32 = vpop.f32.mrb[142].mxu1  ;;  %5185 = vmatprep.mubr.bf16.mxu0 %v9842_v14  ;;  %v4620_v37 = vld [vmem:[#allocation2 + $0x260] sm:$0xf]  ;;  %v11304_v56 = vld [vmem:[#allocation2 + $0x204] ss:$36 sps:$4 sm:$0xff]  }
 0x2d4   :  { %2307 = vst [vmem:[#allocation2 + $0x2a8] sm:$0xf] %v10452_v29  ;;  %3176 = vrot.lane.b32.xlu1 %v11288_v30, %s11761_s2  ;;  %v10457_v47 = vpack.c.bf16 %v1477_v32, %v1477_v32  ;;  %v11021_v35 = vpop.f32.mrb[143].mxu1  ;;  %v11306_v31 = vld [vmem:[#allocation2 + $0x24c] ss:$36 sps:$4 sm:$0xff]  }
 0x2d5   :  { %v4621_v38 = vld [vmem:[#allocation2 + $0x284] sm:$0xf]  ;;  %v3803_v55 = vpop.permute.xlu1 %3802 }
 0x2d6   :  { %v9790_v39 = vcombine.low %v4620_v37, %v4621_v38  ;;  %3835 = vst.msk [vmem:[#allocation3 + $0x98] sm:$0xff] %vm3687_vm3, %v3803_v55  ;;  %2312 = vst [vmem:[#allocation2 + $0x2cc] sm:$0xf] %v10457_v47  ;;  %v4762_v40 = vld [vmem:[#allocation3 + $0x160] sm:$0xff]  ;;  %v11308_v47 = vld [vmem:[#allocation2 + $0x294] ss:$36 sps:$4 sm:$0xff]  }
 0x2d7   :  { %3428 = vrot.lane.b32.xlu0 %v11289_v34, %s11761_s2  ;;  %10638 = vmatprep.subr.bf16.mxu0 %v4762_v40  ;;  %v11307_v32 = vld [vmem:[#allocation2 + $0x260] ss:$36 sps:$4 sm:$0xff]  }
 0x2d8   :  { %4713 = vst.msk [vmem:[#allocation3 + $0x380] sm:$0xff] %vm3687_vm3, %v9790_v39  ;;  %10639 = vmatpush3.bf16.msra.mxu0 %v4754_v45  ;;  %4308 = vrot.lane.b32.xlu1 %v11290_v41, %s11761_s2  ;;  %v11310_v37 = vld [vmem:[#allocation2 + $0x2dc] ss:$36 sps:$4 sm:$0xff]   ;;  %v11312_v39 = vld [vmem:[#allocation2 + $0x324] ss:$36 sps:$4 sm:$0xff]  }
 0x2d9   :  { %v4057_v48 = vpop.permute.xlu1 %4056  ;;  %v1482_v49 = vpop.f32.mrb[144].mxu1  ;;  %v11316_v45 = vld [vmem:[#allocation2 + $0x36c] ss:$0 sps:$4 sm:$0x33]  }
 0x2da   :  { %4089 = vst.msk [vmem:[#allocation3 + $0x168] sm:$0xff] %vm3687_vm3, %v4057_v48  ;;  %v10462_v28 = vpack.c.bf16 %v1482_v49, %v1482_v49  ;;  %v11024_v51 = vpop.f32.mrb[145].mxu1  ;;  %5186 = vmatmul.mubr.bf16.gmra.mrb[168].mxu0 %v9841_v43 }
 0x2db   :  { %4552 = vrot.lane.b32.xlu0 %v11291_v3, %s11761_s2  ;;  %v1485_v52 = vpop.f32.mrb[146].mxu1  ;;  %5289 = vmatprep.mubr.bf16.mxu0 %v11324_v46  ;;  %v4622_v58 = vld [vmem:[#allocation2 + $0x2a8] sm:$0xf] }
 0x2dc   :  { %2317 = vst [vmem:[#allocation2 + $0x2f0] sm:$0xf] %v10462_v28  ;;  %4322 = vrot.lane.b32.xlu1 %v11292_v50, %s11761_s2  ;;  %v10467_v53 = vpack.c.bf16 %v1485_v52, %v1485_v52  ;;  %v11025_v57 = vpop.f32.mrb[147].mxu1  ;;  %v4734_v3 = vld [vmem:[#allocation3 + $0x80] sm:$0xff] }
 0x2dd   :  { %v4623_v5 = vld [vmem:[#allocation2 + $0x2cc] sm:$0xf]  ;;  %v3805_v59 = vpop.permute.xlu1 %3804  ;;  %v4744_v57 = vld [vmem:[#allocation3 + $0xd0] sm:$0xff] }
 0x2de   :  { %v9791_v60 = vcombine.low %v4622_v58, %v4623_v5  ;;  %2322 = vst [vmem:[#allocation2 + $0x314] sm:$0xf] %v10467_v53  ;;  %3836 = vst.msk [vmem:[#allocation3 + $0xa0] sm:$0xff] %vm3687_vm3, %v3805_v59  ;;  %v11309_v35 = vld [vmem:[#allocation2 + $0x2a8] ss:$36 sps:$4 sm:$0xff]   ;;  %v4736_v5 = vld [vmem:[#allocation3 + $0x90] sm:$0xff] }
 0x2df   :  { %4554 = vrot.lane.b32.xlu0 %v11293_v54, %s11761_s2  ;;  %v4735_v53 = vld [vmem:[#allocation3 + $0x88] sm:$0xff] }
 0x2e0   :  { %4714 = vst.msk [vmem:[#allocation3 + $0x388] sm:$0xff] %vm3687_vm3, %v9791_v60  ;;  %3178 = vrot.lane.b32.xlu1 %v11294_v61, %s11761_s2  ;;  %v4745_v61 = vld [vmem:[#allocation3 + $0xd8] sm:$0xff] }
 0x2e1   :  { %v4763_v62 = vld [vmem:[#allocation3 + $0x168] sm:$0xff]  ;;  %v1490_v20 = vpop.f32.mrb[148].mxu1 }
 0x2e2   :  { %10640 = vmatprep.subr.bf16.mxu0 %v4763_v62  ;;  %v10472_v6 = vpack.c.bf16 %v1490_v20, %v1490_v20  ;;  %v11028_v2 = vpop.f32.mrb[149].mxu1  ;;  %v4737_v20 = vld [vmem:[#allocation3 + $0x98] sm:$0xff] }
 0x2e3   :  { %4556 = vrot.lane.b32.xlu0 %v11295_v44, %s11761_s2  ;;  %10641 = vmatpush3.bf16.msra.mxu0 %v4755_v63  ;;  %v1493_v4 = vpop.f32.mrb[150].mxu1  ;;  %v4624_v10 = vld [vmem:[#allocation2 + $0x2f0] sm:$0xf]  ;;  %v4756_v44 = vld [vmem:[#allocation3 + $0x130] sm:$0xff]  ;;  %v4746_v63 = vld [vmem:[#allocation3 + $0xe0] sm:$0xff] }
 0x2e4   :  { %2327 = vst [vmem:[#allocation2 + $0x338] sm:$0xf] %v10472_v6  ;;  %4310 = vrot.lane.b32.xlu1 %v11296_v1, %s11761_s2  ;;  %v10477_v7 = vpack.c.bf16 %v1493_v4, %v1493_v4  ;;  %v11029_v9 = vpop.f32.mrb[151].mxu1 }
 0x2e5   :  { %v4625_v11 = vld [vmem:[#allocation2 + $0x314] sm:$0xf]  ;;  %v3807_v12 = vpop.permute.xlu1 %3806  ;;  %v4738_v4 = vld [vmem:[#allocation3 + $0xa0] sm:$0xff]  ;;  %v11322_v9 = vld [vmem:[%s13984_s5 + $0x10] ss:$60 sps:$4 sm:$0xff]  }
 0x2e6   :  { %v9792_v13 = vcombine.low %v4624_v10, %v4625_v11  ;;  %2332 = vst [vmem:[#allocation2 + $0x35c] sm:$0xf] %v10477_v7  ;;  %3837 = vst.msk [vmem:[#allocation3 + $0xa8] sm:$0xff] %vm3687_vm3, %v3807_v12  ;;  %v11311_v55 = vld [vmem:[#allocation2 + $0x2f0] ss:$36 sps:$4 sm:$0xff]  }
 0x2e7   :  { %4558 = vrot.lane.b32.xlu0 %v11297_v8, %s11761_s2  ;;  %v4747_v10 = vld [vmem:[#allocation3 + $0xe8] sm:$0xff] }
 0x2e8   :  { %4715 = vst.msk [vmem:[#allocation3 + $0x390] sm:$0xff] %vm3687_vm3, %v9792_v13  ;;  %3430 = vrot.lane.b32.xlu1 %v11298_v42, %s11761_s2  ;;  %v11339_v12 = vld [vmem:[%s13984_s5 + $0x8c] ss:$60 sps:$4 sm:$0xff]  }
 0x2e9   :  { %v1498_v15 = vpop.f32.mrb[152].mxu1 }
 0x2ea   :  { %v10482_v17 = vpack.c.bf16 %v1498_v15, %v1498_v15  ;;  %v11032_v19 = vpop.f32.mrb[153].mxu1  ;;  %v4748_v15 = vld [vmem:[#allocation3 + $0xf0] sm:$0xff] }
 0x2eb   :  { %4560 = vrot.lane.b32.xlu0 %v11299_v36, %s11761_s2  ;;  %v1501_v21 = vpop.f32.mrb[154].mxu1  ;;  %v4626_v23 = vld [vmem:[#allocation2 + $0x338] sm:$0xf] }
 0x2ec   :  { %2337 = vst [vmem:[#allocation2 + $0x380] sm:$0x3] %v10482_v17  ;;  %4562 = vrot.lane.b32.xlu1 %v11301_v18, %s11761_s2  ;;  %v11033_v16 = vpop.f32.mrb[155].mxu1  ;;  %v4782_v17 = vld [vmem:[#allocation3 + $0x200] sm:$0xff] }
 0x2ed   :  { %v4627_v33 = vld [vmem:[#allocation2 + $0x35c] sm:$0xf]  ;;  %v3809_v24 = vpop.permute.xlu1 %3808  ;;  %v4739_v13 = vld [vmem:[#allocation3 + $0xa8] sm:$0xff] }
 0x2ee   :  { %v9793_v25 = vcombine.low %v4626_v23, %v4627_v33  ;;  %3838 = vst.msk [vmem:[#allocation3 + $0xb0] sm:$0xff] %vm3687_vm3, %v3809_v24  ;;  %v11313_v41 = vld [vmem:[#allocation2 + $0x338] ss:$36 sps:$4 sm:$0xff]   ;;  %v11345_v23 = vld [vmem:[%s13984_s5 + $0x104] ss:$60 sps:$4 sm:$0xff]  }
 0x2ef   :  { %3432 = vrot.lane.b32.xlu0 %v11302_v22, %s11761_s2  ;;  %v11341_v22 = vld [vmem:[%s13984_s5 + $0x88] ss:$60 sps:$4 sm:$0xff]   ;;  %v4749_v16 = vld [vmem:[#allocation3 + $0xf8] sm:$0xff] }
 0x2f0   :  { %4716 = vst.msk [vmem:[#allocation3 + $0x398] sm:$0xff] %vm3687_vm3, %v9793_v25  ;;  %4564 = vrot.lane.b32.xlu1 %v11303_v26, %s11761_s2 }
 0x2f1   :  { %v4063_v14 = vpop.permute.xlu1 %4062 }
 0x2f2   :  { %4092 = vst.msk [vmem:[#allocation3 + $0x180] sm:$0xff] %vm3687_vm3, %v4063_v14 }
 0x2f3   :  { %v11300_v29 = vld [vmem:[#allocation2 + $0x380] ss:$0 sps:$4 sm:$0x33]   ;;  %3434 = vrot.lane.b32.xlu0 %v11304_v56, %s11761_s2  ;;  %v11325_v56 = vld [vmem:[%s13984_s5 + $0x8] ss:$60 sps:$4 sm:$0xff]  }
 0x2f4   :  { %4566 = vrot.lane.b32.xlu1 %v11305_v27, %s11761_s2  ;;  %4717 = vst.msk [vmem:[#allocation3 + $0x3a0] sm:$0x3] %vm3700_vm4, %v11300_v29  ;;  %v11318_v49 = vld [vmem:[#allocation2 + $0x380] ss:$0 sps:$4 sm:$0x33]   ;;  %v4774_v27 = vld [vmem:[#allocation3 + $0x1c0] sm:$0xff] }
 0x2f5   :  { %v3811_v30 = vpop.permute.xlu1 %3810  ;;  %v4740_v19 = vld [vmem:[#allocation3 + $0xb0] sm:$0xff]  ;;  %v11328_v29 = vld [vmem:[%s13984_s5 + $0x84] ss:$60 sps:$4 sm:$0xff]  }
 0x2f6   :  { %3839 = vst.msk [vmem:[#allocation3 + $0xb8] sm:$0xff] %vm3687_vm3, %v3811_v30 }
 0x2f7   :  { %3436 = vrot.lane.b32.xlu0 %v11306_v31, %s11761_s2  ;;  %v480_v31 = vld [vmem:[%s13984_s5 + $0x178] sm:$0x11] }
 0x2f8   :  { %4568 = vrot.lane.b32.xlu1 %v11307_v32, %s11761_s2 }
 0x2f9   :  { %v4065_v34 = vpop.permute.xlu1 %4064  ;;  %v4766_v32 = vld [vmem:[#allocation3 + $0x180] sm:$0xff] }
 0x2fa   :  { %4093 = vst.msk [vmem:[#allocation3 + $0x188] sm:$0xff] %vm3687_vm3, %v4065_v34  ;;  %v11347_v34 = vld [vmem:[%s13984_s5 + $0x100] ss:$60 sps:$4 sm:$0xff]  }
 0x2fb   :  { %3438 = vrot.lane.b32.xlu0 %v11308_v47, %s11761_s2 }
 0x2fc   :  { %4570 = vrot.lane.b32.xlu1 %v11309_v35, %s11761_s2  ;;  %v4775_v35 = vld [vmem:[#allocation3 + $0x1c8] sm:$0xff] }
 0x2fd   :  { %v3813_v38 = vpop.permute.xlu1 %3812  ;;  %v4741_v25 = vld [vmem:[#allocation3 + $0xb8] sm:$0xff] }
 0x2fe   :  { %3840 = vst.msk [vmem:[#allocation3 + $0xc0] sm:$0xff] %vm3687_vm3, %v3813_v38 }
 0x2ff   :  { %3440 = vrot.lane.b32.xlu0 %v11310_v37, %s11761_s2  ;;  %v9846_v37 = vcombine.high %v480_v31, %v480_v31 }
 0x300   :  { %4572 = vrot.lane.b32.xlu1 %v11311_v55, %s11761_s2 }
 0x301   :  { %v4067_v40 = vpop.permute.xlu1 %4066 }
 0x302   :  { %4094 = vst.msk [vmem:[#allocation3 + $0x190] sm:$0xff] %vm3687_vm3, %v4067_v40 }
 0x303   :  { %3442 = vrot.lane.b32.xlu0 %v11312_v39, %s11761_s2  ;;  %v4767_v39 = vld [vmem:[#allocation3 + $0x188] sm:$0xff] }
 0x304   :  { %4574 = vrot.lane.b32.xlu1 %v11313_v41, %s11761_s2 }
 0x305   :  { %v3815_v43 = vpop.permute.xlu0 %3814  ;;  %v4742_v46 = vld [vmem:[#allocation3 + $0xc0] sm:$0xff]  ;;  %v4059_v48 = vpop.permute.xlu1 %4058 }
 0x306   :  { %3841 = vst.msk [vmem:[#allocation3 + $0xc8] sm:$0x3] %vm3700_vm4, %v3815_v43  ;;  %10590 = vmatprep.subr.bf16.mxu1 %v4742_v46  ;;  %v11330_v43 = vld [vmem:[%s13984_s5 + $0x80] ss:$60 sps:$4 sm:$0xff]  }
 0x307   :  { %3444 = vrot.lane.b32.xlu0 %v11316_v45, %s11761_s2  ;;  %10591 = vmatpush3.bf16.msra.mxu1 %v4734_v3  ;;  %v4776_v45 = vld [vmem:[#allocation3 + $0x1d0] sm:$0xff] }
 0x308   :  { %4576 = vrot.lane.b32.xlu1 %v11318_v49, %s11761_s2  ;;  %v11331_v46 = vld [vmem:[%s13984_s5 + $0xfc] ss:$60 sps:$4 sm:$0xff]  }
 0x309   :  { %v2927_v28 = vpop.permute.xlu0 %2926  ;;  %v2913_v50 = vpop.permute.xlu1 %2912  ;;  %v4768_v3 = vld [vmem:[#allocation3 + $0x190] sm:$0xff] }
 0x30a   :  { %2958 = vst.msk [vmem:[#allocation3 + $0x170] sm:$0xff] %vm684_vm5, %v2927_v28  ;;  %2951 = vst.msk [vmem:[#allocation3 + $0x138] sm:$0xff] %vm684_vm5, %v2913_v50  ;;  %v9845_v28 = vcombine.low %v480_v31, %v480_v31  ;;  %v4777_v50 = vld [vmem:[#allocation3 + $0x1d8] sm:$0xff]  ;;  %v4800_v31 = vld [vmem:[#allocation3 + $0x290] sm:$0xff] }
 0x30b   :  { %4090 = vst.msk [vmem:[#allocation3 + $0x170] sm:$0xff] %vm3687_vm3, %v4059_v48 }
 0x30d   :  { %v2929_v51 = vpop.permute.xlu0 %2928  ;;  %v4743_v52 = vld [vmem:[#allocation3 + $0xc8] sm:$0xff]  ;;  %v4045_v54 = vpop.permute.xlu1 %4044 }
 0x30e   :  { %2959 = vst.msk [vmem:[#allocation3 + $0x178] sm:$0xff] %vm684_vm5, %v2929_v51  ;;  %10592 = vmatprep.subr.bf16.mxu1 %v4743_v52  ;;  %v479_v51 = vld [vmem:[%s13984_s5 + $0x170] sm:$0x11]  ;;  %v11357_v52 = vld [vmem:[%s13984_s5 + $0x24] ss:$60 sps:$4 sm:$0xff]  }
 0x30f   :  { %10593 = vmatpush3.bf16.msra.mxu1 %v4735_v53  ;;  %4083 = vst.msk [vmem:[#allocation3 + $0x138] sm:$0xff] %vm3687_vm3, %v4045_v54 }
 0x310   :  { %10594 = vmatprep.subr.bf16.mxu1 %v4744_v57 }
 0x311   :  { %v4061_v58 = vpop.permute.xlu0 %4060  ;;  %v4313_v60 = vpop.permute.xlu1 %4312 }
 0x312   :  { %4091 = vst.msk [vmem:[#allocation3 + $0x178] sm:$0xff] %vm3687_vm3, %v4061_v58  ;;  %v4764_v59 = vld [vmem:[#allocation3 + $0x170] sm:$0xff] }
 0x313   :  { %10595 = vmatpush3.bf16.msra.mxu1 %v4736_v5  ;;  %10642 = vmatprep.subr.bf16.mxu0 %v4764_v59  ;;  %v11333_v59 = vld [vmem:[%s13984_s5 + $0xf8] ss:$60 sps:$4 sm:$0xff]  }
 0x314   :  { %10596 = vmatprep.subr.bf16.mxu1 %v4745_v61  ;;  %10643 = vmatpush3.bf16.msra.mxu0 %v4756_v44  ;;  %v9844_v61 = vcombine.high %v479_v51, %v479_v51 }
 0x315   :  { %v3181_v62 = vpop.permute.xlu0 %3180  ;;  %v3167_v6 = vpop.permute.xlu1 %3166 }
 0x316   :  { %3212 = vst.msk [vmem:[#allocation3 + $0x240] sm:$0xff] %vm684_vm5, %v3181_v62  ;;  %3205 = vst.msk [vmem:[#allocation3 + $0x208] sm:$0xff] %vm684_vm5, %v3167_v6  ;;  %v4757_v7 = vld [vmem:[#allocation3 + $0x138] sm:$0xff]  ;;  %v4779_v6 = vld [vmem:[#allocation3 + $0x1e8] sm:$0xff] }
 0x317   :  { %4344 = vst.msk [vmem:[#allocation3 + $0x240] sm:$0xff] %vm3687_vm3, %v4313_v60  ;;  %10597 = vmatpush3.bf16.msra.mxu1 %v4737_v20  ;;  %v4778_v60 = vld [vmem:[#allocation3 + $0x1e0] sm:$0xff] }
 0x318   :  { %10598 = vmatprep.subr.bf16.mxu1 %v4746_v63  ;;  %v4770_v20 = vld [vmem:[#allocation3 + $0x1a0] sm:$0xff] }
 0x319   :  { %v3183_v1 = vpop.permute.xlu0 %3182  ;;  %v4765_v2 = vld [vmem:[#allocation3 + $0x178] sm:$0xff]  ;;  %v4299_v8 = vpop.permute.xlu1 %4298 }
 0x31a   :  { %3213 = vst.msk [vmem:[#allocation3 + $0x248] sm:$0xff] %vm684_vm5, %v3183_v1  ;;  %10644 = vmatprep.subr.bf16.mxu0 %v4765_v2  ;;  %v4771_v2 = vld [vmem:[#allocation3 + $0x1a8] sm:$0xff] }
 0x31b   :  { %10599 = vmatpush3.bf16.msra.mxu1 %v4738_v4  ;;  %10645 = vmatpush3.bf16.msra.mxu0 %v4757_v7  ;;  %4337 = vst.msk [vmem:[#allocation3 + $0x208] sm:$0xff] %vm3687_vm3, %v4299_v8  ;;  %v9843_v7 = vcombine.low %v479_v51, %v479_v51  ;;  %v4780_v8 = vld [vmem:[#allocation3 + $0x1f0] sm:$0xff] }
 0x31c   :  { %10600 = vmatprep.subr.bf16.mxu1 %v4747_v10 }
 0x31d   :  { %v4315_v11 = vpop.permute.xlu0 %4314  ;;  %v3169_v36 = vpop.permute.xlu1 %3168 }
 0x31e   :  { %4345 = vst.msk [vmem:[#allocation3 + $0x248] sm:$0xff] %vm3687_vm3, %v4315_v11  ;;  %v4790_v42 = vld [vmem:[#allocation3 + $0x240] sm:$0xff]  ;;  %5290 = vmatmul.mubr.bf16.vlgmr.msra.gmra.mrb[172].mxu0 %v11322_v9  ;;  %v11338_v9 = vld [vmem:[%s13984_s5 + $0x1c] ss:$60 sps:$4 sm:$0xff]  }
 0x31f   :  { %10601 = vmatpush3.bf16.msra.mxu1 %v4739_v13  ;;  %10710 = vmatprep.subr.bf16.mxu0 %v4790_v42  ;;  %3206 = vst.msk [vmem:[#allocation3 + $0x210] sm:$0xff] %vm684_vm5, %v3169_v36  ;;  %v4781_v42 = vld [vmem:[#allocation3 + $0x1f8] sm:$0xff] }
 0x320   :  { %10602 = vmatprep.subr.bf16.mxu1 %v4748_v15  ;;  %10711 = vmatpush3.bf16.msra.mxu0 %v4782_v17  ;;  %v4773_v17 = vld [vmem:[#allocation3 + $0x1b8] sm:$0xff] }
 0x321   :  { %v3185_v18 = vpop.permute.xlu0 %3184  ;;  %5297 = vmatprep.mubr.bf16.mxu0 %v11339_v12  ;;  %v4301_v21 = vpop.permute.xlu1 %4300  ;;  %v4772_v12 = vld [vmem:[#allocation3 + $0x1b0] sm:$0xff] }
 0x322   :  { %3214 = vst.msk [vmem:[#allocation3 + $0x250] sm:$0xff] %vm684_vm5, %v3185_v18  ;;  %v4783_v14 = vld [vmem:[#allocation3 + $0x208] sm:$0xff]  ;;  %v11336_v18 = vld [vmem:[%s13984_s5 + $0x18] ss:$60 sps:$4 sm:$0xff]  }
 0x323   :  { %10603 = vmatpush3.bf16.msra.mxu1 %v4740_v19  ;;  %4338 = vst.msk [vmem:[#allocation3 + $0x210] sm:$0xff] %vm3687_vm3, %v4301_v21  ;;  %v4806_v19 = vld [vmem:[#allocation3 + $0x2c0] sm:$0xff]  ;;  %v11342_v21 = vld [vmem:[%s13984_s5 + $0x94] ss:$60 sps:$4 sm:$0xff]  }
 0x324   :  { %10604 = vmatprep.subr.bf16.mxu1 %v4749_v16 }
 0x325   :  { %v4317_v33 = vpop.permute.xlu0 %4316  ;;  %v4791_v24 = vld [vmem:[#allocation3 + $0x248] sm:$0xff]  ;;  %v3171_v26 = vpop.permute.xlu1 %3170 }
 0x326   :  { %4346 = vst.msk [vmem:[#allocation3 + $0x250] sm:$0xff] %vm3687_vm3, %v4317_v33  ;;  %10712 = vmatprep.subr.bf16.mxu0 %v4791_v24  ;;  %5298 = vmatmul.mubr.bf16.gmra.mrb[176].mxu0 %v11341_v22  ;;  %v4807_v33 = vld [vmem:[#allocation3 + $0x2c8] sm:$0xff] }
 0x327   :  { %10605 = vmatpush3.bf16.msra.mxu1 %v4741_v25  ;;  %3207 = vst.msk [vmem:[#allocation3 + $0x218] sm:$0xff] %vm684_vm5, %v3171_v26  ;;  %10713 = vmatpush3.bf16.msra.mxu0 %v4783_v14  ;;  %v4799_v26 = vld [vmem:[#allocation3 + $0x288] sm:$0xff] }
 0x328   :  { %10670 = vmatprep.subr.bf16.mxu1 %v4774_v27  ;;  %5305 = vmatprep.mubr.bf16.mxu0 %v11345_v23  ;;  %v4798_v23 = vld [vmem:[#allocation3 + $0x280] sm:$0xff]  ;;  %v11344_v14 = vld [vmem:[%s13984_s5 + $0x90] ss:$60 sps:$4 sm:$0xff]  }
 0x329   :  { %v3187_v30 = vpop.permute.xlu0 %3186  ;;  %v11348_v27 = vld [vmem:[%s13984_s5 + $0x10c] ss:$60 sps:$4 sm:$0xff]  }
 0x32a   :  { %3215 = vst.msk [vmem:[#allocation3 + $0x258] sm:$0xff] %vm684_vm5, %v3187_v30  ;;  %5226 = vmatmul.mubr.bf16.vlgmr.msra.gmra.mrb[156].mxu1 %v11325_v56  ;;  %v4303_v47 = vpop.permute.xlu1 %4302  ;;  %v4784_v40 = vld [vmem:[#allocation3 + $0x210] sm:$0xff] }
 0x32b   :  { %10671 = vmatpush3.bf16.msra.mxu1 %v4766_v32  ;;  %4339 = vst.msk [vmem:[#allocation3 + $0x218] sm:$0xff] %vm3687_vm3, %v4303_v47  ;;  %5233 = vmatprep.mubr.bf16.mxu1 %v11328_v29  ;;  %v4808_v56 = vld [vmem:[#allocation3 + $0x2d0] sm:$0xff]  ;;  %v481_v32 = vld [vmem:[%s13984_s5 + $0x180] sm:$0x11] }
 0x32c   :  { %10672 = vmatprep.subr.bf16.mxu1 %v4775_v35 }
 0x32d   :  { %v4319_v38 = vpop.permute.xlu0 %4318  ;;  %v4792_v55 = vld [vmem:[#allocation3 + $0x250] sm:$0xff] }
 0x32e   :  { %4347 = vst.msk [vmem:[#allocation3 + $0x258] sm:$0xff] %vm3687_vm3, %v4319_v38  ;;  %10714 = vmatprep.subr.bf16.mxu0 %v4792_v55  ;;  %v4069_v41 = vpop.permute.xlu1 %4068  ;;  %5306 = vmatmul.mubr.bf16.gmra.mrb[180].mxu0 %v11347_v34  ;;  %v4801_v38 = vld [vmem:[#allocation3 + $0x298] sm:$0xff]  ;;  %v11350_v55 = vld [vmem:[%s13984_s5 + $0x108] ss:$60 sps:$4 sm:$0xff]  }
 0x32f   :  { %10673 = vmatpush3.bf16.msra.mxu1 %v4767_v39  ;;  %10715 = vmatpush3.bf16.msra.mxu0 %v4784_v40  ;;  %4095 = vst.msk [vmem:[#allocation3 + $0x198] sm:$0x3] %vm3700_vm4, %v4069_v41  ;;  %v9848_v40 = vcombine.high %v481_v32, %v481_v32  ;;  %v4796_v41 = vld [vmem:[#allocation3 + $0x270] sm:$0xff] }
 0x330   :  { %10674 = vmatprep.subr.bf16.mxu1 %v4776_v45  ;;  %5313 = vmatprep.mubr.bf16.mxu0 %v9846_v37 }
 0x331   :  { %v3189_v48 = vpop.permute.xlu0 %3188 }
 0x332   :  { %3216 = vst.msk [vmem:[#allocation3 + $0x260] sm:$0xff] %vm684_vm5, %v3189_v48  ;;  %5234 = vmatmul.mubr.bf16.gmra.mrb[160].mxu1 %v11330_v43  ;;  %v3421_v49 = vpop.permute.xlu1 %3420  ;;  %v4785_v57 = vld [vmem:[#allocation3 + $0x218] sm:$0xff]  ;;  %v4802_v48 = vld [vmem:[#allocation3 + $0x2a0] sm:$0xff] }
 0x333   :  { %10675 = vmatpush3.bf16.msra.mxu1 %v4768_v3  ;;  %3459 = vst.msk [vmem:[#allocation3 + $0x2d8] sm:$0xff] %vm684_vm5, %v3421_v49  ;;  %5241 = vmatprep.mubr.bf16.mxu1 %v11331_v46  ;;  %v4797_v49 = vld [vmem:[#allocation3 + $0x278] sm:$0xff] }
 0x334   :  { %10676 = vmatprep.subr.bf16.mxu1 %v4777_v50 }
 0x335   :  { %v3173_v53 = vpop.permute.xlu0 %3172  ;;  %v4793_v54 = vld [vmem:[#allocation3 + $0x258] sm:$0xff] }
 0x336   :  { %3208 = vst.msk [vmem:[#allocation3 + $0x220] sm:$0xff] %vm684_vm5, %v3173_v53  ;;  %10716 = vmatprep.subr.bf16.mxu0 %v4793_v54  ;;  %v4321_v58 = vpop.permute.xlu1 %4320  ;;  %v4769_v5 = vld [vmem:[#allocation3 + $0x198] sm:$0xff]  ;;  %5314 = vmatmul.mubr.bf16.gmra.mrb[184].mxu0 %v9845_v28  ;;  %v9847_v54 = vcombine.low %v481_v32, %v481_v32 }
 0x337   :  { %10717 = vmatpush3.bf16.msra.mxu0 %v4785_v57  ;;  %4348 = vst.msk [vmem:[#allocation3 + $0x260] sm:$0xff] %vm3687_vm3, %v4321_v58  ;;  %10677 = vmatpush3.bf16.msra.mxu1 %v4769_v5  ;;  %v11355_v57 = vld [vmem:[%s13984_s5 + $0x20] ss:$60 sps:$4 sm:$0xff]   ;;  %v4822_v58 = vld [vmem:[#allocation3 + $0x340] sm:$0xff] }
 0x338   :  { %10678 = vmatprep.subr.bf16.mxu1 %v4778_v60  ;;  %5417 = vmatprep.mubr.bf16.mxu0 %v11357_v52  ;;  %v4803_v52 = vld [vmem:[#allocation3 + $0x2a8] sm:$0xff] }
 0x339   :  { %v3191_v44 = vpop.permute.xlu0 %3190  ;;  %v11360_v5 = vld [vmem:[%s13984_s5 + $0x2c] ss:$60 sps:$4 sm:$0xff]  }
 0x33a   :  { %3217 = vst.msk [vmem:[#allocation3 + $0x268] sm:$0x3] %vm2568_vm2, %v3191_v44  ;;  %5242 = vmatmul.mubr.bf16.gmra.mrb[164].mxu1 %v11333_v59  ;;  %v4305_v62 = vpop.permute.xlu1 %4304  ;;  %v11361_v59 = vld [vmem:[%s13984_s5 + $0x9c] ss:$60 sps:$4 sm:$0xff]  }
 0x33b   :  { %4340 = vst.msk [vmem:[#allocation3 + $0x220] sm:$0xff] %vm3687_vm3, %v4305_v62  ;;  %10679 = vmatpush3.bf16.msra.mxu1 %v4770_v20  ;;  %5249 = vmatprep.mubr.bf16.mxu1 %v9844_v61  ;;  %v4804_v62 = vld [vmem:[#allocation3 + $0x2b0] sm:$0xff] }
 0x33c   :  { %10680 = vmatprep.subr.bf16.mxu1 %v4779_v6 }
 0x33d   :  { %v3175_v63 = vpop.permute.xlu0 %3174 }
 0x33e   :  { %3209 = vst.msk [vmem:[#allocation3 + $0x228] sm:$0xff] %vm684_vm5, %v3175_v63  ;;  %v3423_v1 = vpop.permute.xlu1 %3422  ;;  %v4794_v4 = vld [vmem:[#allocation3 + $0x260] sm:$0xff] }
 0x33f   :  { %3460 = vst.msk [vmem:[#allocation3 + $0x2e0] sm:$0xff] %vm684_vm5, %v3423_v1  ;;  %10681 = vmatpush3.bf16.msra.mxu1 %v4771_v2  ;;  %10718 = vmatprep.subr.bf16.mxu0 %v4794_v4  ;;  %v4805_v1 = vld [vmem:[#allocation3 + $0x2b8] sm:$0xff]  ;;  %v11358_v4 = vld [vmem:[%s13984_s5 + $0x28] ss:$60 sps:$4 sm:$0xff]  }
 0x340   :  { %10682 = vmatprep.subr.bf16.mxu1 %v4780_v8  ;;  %v4830_v8 = vld [vmem:[#allocation3 + $0x380] sm:$0xff] }
 0x341   :  { %v3425_v10 = vpop.permute.xlu0 %3424 }
 0x342   :  { %3461 = vst.msk [vmem:[#allocation3 + $0x2e8] sm:$0xff] %vm684_vm5, %v3425_v10  ;;  %5250 = vmatmul.mubr.bf16.gmra.mrb[168].mxu1 %v9843_v7  ;;  %v4307_v11 = vpop.permute.xlu1 %4306  ;;  %v4786_v13 = vld [vmem:[#allocation3 + $0x220] sm:$0xff]  ;;  %v4823_v7 = vld [vmem:[#allocation3 + $0x348] sm:$0xff]  ;;  %v11363_v10 = vld [vmem:[%s13984_s5 + $0x98] ss:$60 sps:$4 sm:$0xff]  }
 0x343   :  { %4341 = vst.msk [vmem:[#allocation3 + $0x228] sm:$0xff] %vm3687_vm3, %v4307_v11  ;;  %10683 = vmatpush3.bf16.msra.mxu1 %v4772_v12  ;;  %10719 = vmatpush3.bf16.msra.mxu0 %v4786_v13  ;;  %v11364_v11 = vld [vmem:[%s13984_s5 + $0xa4] ss:$60 sps:$4 sm:$0xff]  }
 0x344   :  { %10684 = vmatprep.subr.bf16.mxu1 %v4781_v42  ;;  %5353 = vmatprep.mubr.bf16.mxu1 %v11338_v9  ;;  %v11367_v42 = vld [vmem:[%s13984_s5 + $0x114] ss:$60 sps:$4 sm:$0xff]  }
 0x345   :  { %v3427_v36 = vpop.permute.xlu0 %3426 }
 0x346   :  { %3462 = vst.msk [vmem:[#allocation3 + $0x2f0] sm:$0xff] %vm684_vm5, %v3427_v36  ;;  %v3177_v15 = vpop.permute.xlu1 %3176  ;;  %v4824_v36 = vld [vmem:[#allocation3 + $0x350] sm:$0xff] }
 0x347   :  { %3210 = vst.msk [vmem:[#allocation3 + $0x230] sm:$0xff] %vm684_vm5, %v3177_v15  ;;  %10685 = vmatpush3.bf16.msra.mxu1 %v4773_v17  ;;  %v4831_v15 = vld [vmem:[#allocation3 + $0x388] sm:$0xff] }
 0x348   :  { %10750 = vmatprep.subr.bf16.mxu1 %v4806_v19 }
 0x349   :  { %v3429_v22 = vpop.permute.xlu0 %3428 }
 0x34a   :  { %3463 = vst.msk [vmem:[#allocation3 + $0x2f8] sm:$0xff] %vm684_vm5, %v3429_v22  ;;  %5354 = vmatmul.mubr.bf16.vlgmr.msra.gmra.mrb[172].mxu1 %v11336_v18  ;;  %v4309_v16 = vpop.permute.xlu1 %4308  ;;  %v4787_v39 = vld [vmem:[#allocation3 + $0x228] sm:$0xff]  ;;  %v4825_v22 = vld [vmem:[#allocation3 + $0x358] sm:$0xff] }
 0x34b   :  { %4342 = vst.msk [vmem:[#allocation3 + $0x230] sm:$0xff] %vm3687_vm3, %v4309_v16  ;;  %10751 = vmatpush3.bf16.msra.mxu1 %v4798_v23  ;;  %5361 = vmatprep.mubr.bf16.mxu1 %v11342_v21  ;;  %v11366_v21 = vld [vmem:[%s13984_s5 + $0xa0] ss:$60 sps:$4 sm:$0xff]   ;;  %v4832_v16 = vld [vmem:[#allocation3 + $0x390] sm:$0xff]  ;;  %v482_v23 = vld [vmem:[%s13984_s5 + $0x188] sm:$0x11] }
 0x34c   :  { %10752 = vmatprep.subr.bf16.mxu1 %v4807_v33 }
 0x34d   :  { %v4553_v24 = vpop.permute.xlu0 %4552 }
 0x34e   :  { %4591 = vst.msk [vmem:[#allocation3 + $0x2d8] sm:$0xff] %vm3687_vm3, %v4553_v24  ;;  %v4323_v25 = vpop.permute.xlu1 %4322  ;;  %v11369_v24 = vld [vmem:[%s13984_s5 + $0x110] ss:$60 sps:$4 sm:$0xff]  }
 0x34f   :  { %4349 = vst.msk [vmem:[#allocation3 + $0x268] sm:$0x3] %vm3700_vm4, %v4323_v25  ;;  %10753 = vmatpush3.bf16.msra.mxu1 %v4799_v26  ;;  %v11370_v25 = vld [vmem:[%s13984_s5 + $0x11c] ss:$60 sps:$4 sm:$0xff]  }
 0x350   :  { %10754 = vmatprep.subr.bf16.mxu1 %v4808_v56  ;;  %v9850_v56 = vcombine.high %v482_v23, %v482_v23 }
 0x351   :  { %v4555_v29 = vpop.permute.xlu0 %4554 }
 0x352   :  { %4592 = vst.msk [vmem:[#allocation3 + $0x2e0] sm:$0xff] %vm3687_vm3, %v4555_v29  ;;  %5362 = vmatmul.mubr.bf16.gmra.mrb[176].mxu1 %v11344_v14  ;;  %v3179_v30 = vpop.permute.xlu1 %3178  ;;  %v4788_v3 = vld [vmem:[#allocation3 + $0x230] sm:$0xff]  ;;  %v4833_v29 = vld [vmem:[#allocation3 + $0x398] sm:$0xff] }
 0x353   :  { %3211 = vst.msk [vmem:[#allocation3 + $0x238] sm:$0xff] %vm684_vm5, %v3179_v30  ;;  %10755 = vmatpush3.bf16.msra.mxu1 %v4800_v31  ;;  %5369 = vmatprep.mubr.bf16.mxu1 %v11348_v27  ;;  %v4826_v27 = vld [vmem:[#allocation3 + $0x360] sm:$0xff]  ;;  %v483_v31 = vld [vmem:[%s13984_s5 + $0x190] sm:$0x11] }
 0x355   :  { %v4557_v47 = vpop.permute.xlu0 %4556  ;;  %v4809_v34 = vld [vmem:[#allocation3 + $0x2d8] sm:$0xff] }
 0x356   :  { %4593 = vst.msk [vmem:[#allocation3 + $0x2e8] sm:$0xff] %vm3687_vm3, %v4557_v47  ;;  %10756 = vmatprep.subr.bf16.mxu1 %v4809_v34  ;;  %v4311_v35 = vpop.permute.xlu1 %4310  ;;  %v4795_v37 = vld [vmem:[#allocation3 + $0x268] sm:$0xff]  ;;  %v11372_v34 = vld [vmem:[%s13984_s5 + $0x118] ss:$60 sps:$4 sm:$0xff]  }
 0x357   :  { %4343 = vst.msk [vmem:[#allocation3 + $0x238] sm:$0xff] %vm3687_vm3, %v4311_v35  ;;  %10720 = vmatprep.subr.bf16.mxu0 %v4795_v37  ;;  %10757 = vmatpush3.bf16.msra.mxu1 %v4801_v38  ;;  %v4827_v35 = vld [vmem:[#allocation3 + $0x368] sm:$0xff]  ;;  %v4834_v37 = vld [vmem:[#allocation3 + $0x3a0] sm:$0xff]  ;;  %v9852_v38 = vcombine.high %v483_v31, %v483_v31 }
 0x358   :  { %10721 = vmatpush3.bf16.msra.mxu0 %v4787_v39  ;;  %v9849_v39 = vcombine.low %v482_v23, %v482_v23  ;;  %v11392_v23 = vld [vmem:[%s13985_s3] ss:$36 sps:$4 sm:$0xff]  }
 0x359   :  { %v4559_v43 = vpop.permute.xlu0 %4558  ;;  %10722 = vmatprep.subr.bf16.mxu0 %v4796_v41  ;;  %v4810_v45 = vld [vmem:[#allocation3 + $0x2e0] sm:$0xff] }
 0x35a   :  { %4594 = vst.msk [vmem:[#allocation3 + $0x2f0] sm:$0xff] %vm3687_vm3, %v4559_v43  ;;  %10758 = vmatprep.subr.bf16.mxu1 %v4810_v45  ;;  %5370 = vmatmul.mubr.bf16.gmra.mrb[180].mxu1 %v11350_v55  ;;  %v3431_v46 = vpop.permute.xlu1 %3430  ;;  %v11379_v43 = vld [vmem:[%s13984_s5 + $0x34] ss:$60 sps:$4 sm:$0xff]  }
 0x35b   :  { %3464 = vst.msk [vmem:[#allocation3 + $0x300] sm:$0xff] %vm684_vm5, %v3431_v46  ;;  %10759 = vmatpush3.bf16.msra.mxu1 %v4802_v48  ;;  %5377 = vmatprep.mubr.bf16.mxu1 %v9848_v40  ;;  %v4828_v45 = vld [vmem:[#allocation3 + $0x370] sm:$0xff]  ;;  %v9851_v48 = vcombine.low %v483_v31, %v483_v31 }
 0x35c   :  { %10723 = vmatpush3.bf16.msra.mxu0 %v4788_v3  ;;  %v4829_v3 = vld [vmem:[#allocation3 + $0x378] sm:$0xff] }
 0x35d   :  { %v4561_v28 = vpop.permute.xlu0 %4560  ;;  %10724 = vmatprep.subr.bf16.mxu0 %v4797_v49  ;;  %v4811_v50 = vld [vmem:[#allocation3 + $0x2e8] sm:$0xff]  ;;  %v11380_v49 = vld [vmem:[%s13984_s5 + $0x38] ss:$60 sps:$4 sm:$0xff]  }
 0x35e   :  { %4595 = vst.msk [vmem:[#allocation3 + $0x2f8] sm:$0xff] %vm3687_vm3, %v4561_v28  ;;  %10760 = vmatprep.subr.bf16.mxu1 %v4811_v50  ;;  %v4563_v51 = vpop.permute.xlu1 %4562  ;;  %v4789_v53 = vld [vmem:[#allocation3 + $0x238] sm:$0xff]  ;;  %v11377_v50 = vld [vmem:[%s13984_s5 + $0x30] ss:$60 sps:$4 sm:$0xff]  }
 0x35f   :  { %4596 = vst.msk [vmem:[#allocation3 + $0x300] sm:$0xff] %vm3687_vm3, %v4563_v51  ;;  %10761 = vmatpush3.bf16.msra.mxu1 %v4803_v52  ;;  %v11382_v51 = vld [vmem:[%s13984_s5 + $0xac] ss:$60 sps:$4 sm:$0xff]   ;;  %v11407_v31 = vld [vmem:[%s13985_s3 + $0x98] ss:$36 sps:$4 sm:$0xff]  }
 0x360   :  { %10725 = vmatpush3.bf16.msra.mxu0 %v4789_v53  ;;  %v11381_v52 = vld [vmem:[%s13984_s5 + $0xb0] ss:$60 sps:$4 sm:$0xff]   ;;  %v11388_v53 = vld [vmem:[%s13984_s5 + $0x128] ss:$60 sps:$4 sm:$0xff]  }
 0x361   :  { %v3433_v60 = vpop.permute.xlu0 %3432  ;;  %v4812_v61 = vld [vmem:[#allocation3 + $0x2f0] sm:$0xff]  ;;  %10790 = vmatprep.subr.bf16.mxu0 %v4822_v58  ;;  %v11389_v58 = vld [vmem:[%s13984_s5 + $0x1a0] ss:$0 sps:$4 sm:$0x11]  }
 0x362   :  { %3465 = vst.msk [vmem:[#allocation3 + $0x308] sm:$0xff] %vm684_vm5, %v3433_v60  ;;  %10762 = vmatprep.subr.bf16.mxu1 %v4812_v61  ;;  %5378 = vmatmul.mubr.bf16.gmra.mrb[184].mxu1 %v9847_v54  ;;  %v4565_v44 = vpop.permute.xlu1 %4564  ;;  %v11384_v54 = vld [vmem:[%s13984_s5 + $0xa8] ss:$60 sps:$4 sm:$0xff]  }
 0x363   :  { %4597 = vst.msk [vmem:[#allocation3 + $0x308] sm:$0xff] %vm3687_vm3, %v4565_v44  ;;  %10763 = vmatpush3.bf16.msra.mxu1 %v4804_v62  ;;  %5418 = vmatmul.mubr.bf16.vlgmr.msra.gmra.mrb[188].mxu0 %v11355_v57  ;;  %v11385_v57 = vld [vmem:[%s13984_s5 + $0x124] ss:$60 sps:$4 sm:$0xff]   ;;  %v11756_v61 = vld [vmem:[#allocation5] sm:$0xff] }
 0x364   :  { %5481 = vmatprep.mubr.bf16.mxu1 %v11360_v5  ;;  %5425 = vmatprep.mubr.bf16.mxu0 %v11361_v59  ;;  %v484_v5 = vld [vmem:[%s13984_s5 + $0x198] sm:$0x11] }
 0x365   :  { %v3435_v20 = vpop.permute.xlu0 %3434  ;;  %v4813_v6 = vld [vmem:[#allocation3 + $0x2f8] sm:$0xff]  ;;  %v9854_v60 = vcombine.high %v484_v5, %v484_v5 }
 0x366   :  { %3466 = vst.msk [vmem:[#allocation3 + $0x310] sm:$0xff] %vm684_vm5, %v3435_v20  ;;  %10764 = vmatprep.subr.bf16.mxu1 %v4813_v6  ;;  %v4567_v63 = vpop.permute.xlu1 %4566  ;;  %v4814_v2 = vld [vmem:[#allocation3 + $0x300] sm:$0xff]  ;;  %v11387_v59 = vld [vmem:[%s13984_s5 + $0x120] ss:$60 sps:$4 sm:$0xff]  }
 0x367   :  { %4598 = vst.msk [vmem:[#allocation3 + $0x310] sm:$0xff] %vm3687_vm3, %v4567_v63  ;;  %10765 = vmatpush3.bf16.msra.mxu1 %v4805_v1  ;;  %10791 = vmatpush3.bf16.msra.mxu0 %v4814_v2  ;;  %v9853_v2 = vcombine.low %v484_v5, %v484_v5 }
 0x368   :  { %10792 = vmatprep.subr.bf16.mxu0 %v4823_v7  ;;  %11034 = vmatprep.subr.bf16.mxu1 %v4830_v8 }
 0x369   :  { %v3437_v9 = vpop.permute.xlu0 %3436 }
 0x36a   :  { %3467 = vst.msk [vmem:[#allocation3 + $0x318] sm:$0xff] %vm684_vm5, %v3437_v9  ;;  %5482 = vmatmul.mubr.bf16.vlgmr.msra.gmra.mrb[188].mxu1 %v11358_v4  ;;  %v4569_v12 = vpop.permute.xlu1 %4568  ;;  %v4815_v13 = vld [vmem:[#allocation3 + $0x308] sm:$0xff] }
 0x36b   :  { %4599 = vst.msk [vmem:[#allocation3 + $0x318] sm:$0xff] %vm3687_vm3, %v4569_v12  ;;  %10793 = vmatpush3.bf16.msra.mxu0 %v4815_v13  ;;  %11035 = vmatpush3.bf16.msra.mxu1 %v4830_v8 }
 0x36c   :  { %10794 = vmatprep.subr.bf16.mxu0 %v4824_v36  ;;  %11036 = vmatprep.subr.bf16.mxu1 %v4831_v15 }
 0x36d   :  { %v3439_v17 = vpop.permute.xlu0 %3438  ;;  %5426 = vmatmul.mubr.bf16.gmra.mrb[192].mxu0 %v11363_v10  ;;  %5489 = vmatprep.mubr.bf16.mxu1 %v11364_v11 }
 0x36e   :  { %3468 = vst.msk [vmem:[#allocation3 + $0x320] sm:$0xff] %vm684_vm5, %v3439_v17  ;;  %v4571_v18 = vpop.permute.xlu1 %4570  ;;  %v4816_v19 = vld [vmem:[#allocation3 + $0x310] sm:$0xff]  ;;  %5433 = vmatprep.mubr.bf16.mxu0 %v11367_v42 }
 0x36f   :  { %4600 = vst.msk [vmem:[#allocation3 + $0x320] sm:$0xff] %vm3687_vm3, %v4571_v18  ;;  %10795 = vmatpush3.bf16.msra.mxu0 %v4816_v19  ;;  %11037 = vmatpush3.bf16.msra.mxu1 %v4831_v15 }
 0x370   :  { %10796 = vmatprep.subr.bf16.mxu0 %v4825_v22  ;;  %11038 = vmatprep.subr.bf16.mxu1 %v4832_v16 }
 0x371   :  { %v3441_v33 = vpop.permute.xlu0 %3440 }
 0x372   :  { %3469 = vst.msk [vmem:[#allocation3 + $0x328] sm:$0xff] %vm684_vm5, %v3441_v33  ;;  %5490 = vmatmul.mubr.bf16.gmra.mrb[192].mxu1 %v11366_v21  ;;  %v4573_v26 = vpop.permute.xlu1 %4572  ;;  %v4817_v14 = vld [vmem:[#allocation3 + $0x318] sm:$0xff]  ;;  %v11394_v33 = vld [vmem:[%s13985_s3 + $0x4] ss:$36 sps:$4 sm:$0xff]  }
 0x373   :  { %4601 = vst.msk [vmem:[#allocation3 + $0x328] sm:$0xff] %vm3687_vm3, %v4573_v26  ;;  %10797 = vmatpush3.bf16.msra.mxu0 %v4817_v14  ;;  %11039 = vmatpush3.bf16.msra.mxu1 %v4832_v16  ;;  %v11398_v26 = vld [vmem:[%s13985_s3 + $0x48] ss:$36 sps:$4 sm:$0xff]  }
 0x374   :  { %10798 = vmatprep.subr.bf16.mxu0 %v4826_v27  ;;  %11040 = vmatprep.subr.bf16.mxu1 %v4833_v29  ;;  %v11400_v14 = vld [vmem:[%s13985_s3 + $0x4c] ss:$36 sps:$4 sm:$0xff]   ;;  %v11403_v27 = vld [vmem:[%s13985_s3 + $0x54] ss:$36 sps:$4 sm:$0xff]  }
 0x375   :  { %v3443_v30 = vpop.permute.xlu0 %3442  ;;  %5434 = vmatmul.mubr.bf16.gmra.mrb[196].mxu0 %v11369_v24  ;;  %5497 = vmatprep.mubr.bf16.mxu1 %v11370_v25  ;;  %v11395_v24 = vld [vmem:[%s13985_s3 + $0x8] ss:$36 sps:$4 sm:$0xff]  }
 0x376   :  { %3470 = vst.msk [vmem:[#allocation3 + $0x330] sm:$0xff] %vm684_vm5, %v3443_v30  ;;  %v4575_v32 = vpop.permute.xlu1 %4574  ;;  %v4818_v47 = vld [vmem:[#allocation3 + $0x320] sm:$0xff]  ;;  %5441 = vmatprep.mubr.bf16.mxu0 %v9850_v56  ;;  %v11397_v25 = vld [vmem:[%s13985_s3 + $0xc] ss:$36 sps:$4 sm:$0xff]   ;;  %v11406_v30 = vld [vmem:[%s13985_s3 + $0x94] ss:$36 sps:$4 sm:$0xff]  }
 0x377   :  { %4602 = vst.msk [vmem:[#allocation3 + $0x330] sm:$0xff] %vm3687_vm3, %v4575_v32  ;;  %10799 = vmatpush3.bf16.msra.mxu0 %v4818_v47  ;;  %11041 = vmatpush3.bf16.msra.mxu1 %v4833_v29  ;;  %v11401_v56 = vld [vmem:[%s13985_s3 + $0x50] ss:$36 sps:$4 sm:$0xff]   ;;  %v11409_v32 = vld [vmem:[%s13985_s3 + $0x9c] ss:$36 sps:$4 sm:$0xff]  }
 0x378   :  { %10800 = vmatprep.subr.bf16.mxu0 %v4827_v35  ;;  %11042 = vmatprep.subr.bf16.mxu1 %v4834_v37  ;;  %v11404_v29 = vld [vmem:[%s13985_s3 + $0x90] ss:$36 sps:$4 sm:$0xff]   ;;  %v11410_v47 = vld [vmem:[%s13985_s3 + $0xd8] ss:$36 sps:$4 sm:$0xff]   ;;  %v11413_v35 = vld [vmem:[%s13985_s3 + $0xe0] ss:$36 sps:$4 sm:$0xff]  }
 0x379   :  { %v3445_v55 = vpop.permute.xlu0 %3444 }
 0x37a   :  { %3471 = vst.msk [vmem:[#allocation3 + $0x338] sm:$0x3] %vm2568_vm2, %v3445_v55  ;;  %5498 = vmatmul.mubr.bf16.gmra.mrb[196].mxu1 %v11372_v34  ;;  %v4577_v40 = vpop.permute.xlu1 %4576  ;;  %v4819_v41 = vld [vmem:[#allocation3 + $0x328] sm:$0xff]  ;;  %v11412_v34 = vld [vmem:[%s13985_s3 + $0xdc] ss:$36 sps:$4 sm:$0xff]  }
 0x37b   :  { %4603 = vst.msk [vmem:[#allocation3 + $0x338] sm:$0x3] %vm3700_vm4, %v4577_v40  ;;  %10801 = vmatpush3.bf16.msra.mxu0 %v4819_v41  ;;  %11043 = vmatpush3.bf16.msra.mxu1 %v4834_v37  ;;  %v11415_v37 = vld [vmem:[%s13985_s3 + $0xe4] ss:$36 sps:$4 sm:$0xff]   ;;  %v11421_v40 = vld [vmem:[%s13985_s3 + $0x12c] ss:$36 sps:$4 sm:$0xff]   ;;  %vm13228_vm4 = vmand %vm175_vm0, %vm6705_vm14 }
 0x37c   :  { %10802 = vmatprep.subr.bf16.mxu0 %v4828_v45  ;;  %5505 = vmatprep.mubr.bf16.mxu1 %v9852_v38  ;;  %v11416_v38 = vld [vmem:[%s13985_s3 + $0x120] ss:$36 sps:$4 sm:$0xff]   ;;  %v11422_v41 = vld [vmem:[%s13985_s3 + $0x168] ss:$36 sps:$4 sm:$0xff]   ;;  %v11425_v45 = vld [vmem:[%s13985_s3 + $0x170] ss:$36 sps:$4 sm:$0xff]  }
 0x37d   :  { %5442 = vmatmul.mubr.bf16.gmra.mrb[200].mxu0 %v9849_v39  ;;  %6192 = vmatprep.subr.bf16.mxu1 %v11397_v25  ;;  %v11418_v55 = vld [vmem:[%s13985_s3 + $0x124] ss:$36 sps:$4 sm:$0xff]   ;;  %vm6708_vm2 = vsmask.f32 4352 }
 0x37e   :  { %v4820_v46 = vld [vmem:[#allocation3 + $0x330] sm:$0xff]  ;;  %5545 = vmatprep.mubr.bf16.mxu0 %v11379_v43  ;;  %v11419_v39 = vld [vmem:[%s13985_s3 + $0x128] ss:$36 sps:$4 sm:$0xff]  }
 0x37f   :  { %10803 = vmatpush3.bf16.msra.mxu0 %v4820_v46  ;;  %v11424_v43 = vld [vmem:[%s13985_s3 + $0x16c] ss:$36 sps:$4 sm:$0xff]   ;;  %v11427_v46 = vld [vmem:[%s13985_s3 + $0x174] ss:$36 sps:$4 sm:$0xff]  }
 0x380   :  { %10804 = vmatprep.subr.bf16.mxu0 %v4829_v3  ;;  %v11430_v3 = vld [vmem:[%s13985_s3 + $0x1b4] ss:$36 sps:$4 sm:$0xff]  }
 0x382   :  { %5506 = vmatmul.mubr.bf16.gmra.mrb[200].mxu1 %v9851_v48  ;;  %v4821_v28 = vld [vmem:[#allocation3 + $0x338] sm:$0xff]  ;;  %v11428_v48 = vld [vmem:[%s13985_s3 + $0x1b0] ss:$36 sps:$4 sm:$0xff]  }
 0x383   :  { %10805 = vmatpush3.bf16.msra.mxu0 %v4821_v28  ;;  %11044 = vmatprep.mubr.msk.bf16.mxu1 %vm5116_vm6, %v11380_v49  ;;  %v11431_v49 = vld [vmem:[%s13985_s3 + $0x1b8] ss:$36 sps:$4 sm:$0xff]  }
 0x384   :  { %6121 = vmatprep.subr.bf16.mxu0 %v11394_v33  ;;  %v11433_v28 = vld [vmem:[%s13985_s3 + $0x1bc] ss:$36 sps:$4 sm:$0xff]  }
 0x386   :  { %5546 = vmatmul.mubr.bf16.vlgmr.msra.gmra.mrb[204].mxu0 %v11377_v50  ;;  %v11434_v50 = vld [vmem:[%s13985_s3 + $0x1f8] ss:$36 sps:$4 sm:$0xff]  }
 0x387   :  { %5553 = vmatprep.mubr.bf16.mxu0 %v11382_v51  ;;  %6122 = vmatpush1.bf16.msra.mxu0 %v11392_v23  ;;  %v11436_v51 = vld [vmem:[%s13985_s3 + $0x1fc] ss:$36 sps:$4 sm:$0xff]  }
 0x388   :  { %6123 = vmatprep.subr.bf16.mxu0 %v11400_v14 }
 0x38a   :  { %11045 = vmatmul.mubr.msk.bf16.vlgmr.msra.gmra.mrb[204].mxu1 %vm5116_vm6, %v11381_v52  ;;  %v11437_v52 = vld [vmem:[%s13985_s3 + $0x200] ss:$36 sps:$4 sm:$0xff]  }
 0x38b   :  { %11048 = vmatprep.mubr.msk.bf16.mxu1 %vm5116_vm6, %v11388_v53  ;;  %6193 = vmatpush1.bf16.msra.mxu1 %v11395_v24  ;;  %v11439_v53 = vld [vmem:[%s13985_s3 + $0x204] ss:$36 sps:$4 sm:$0xff]  }
 0x38c   :  { %6194 = vmatprep.subr.bf16.mxu1 %v11403_v27  ;;  %6124 = vmatpush1.bf16.msra.mxu0 %v11398_v26 }
 0x38d   :  { %6125 = vmatprep.subr.bf16.mxu0 %v11406_v30 }
 0x38e   :  { %5554 = vmatmul.mubr.bf16.gmra.mrb[208].mxu0 %v11384_v54  ;;  %v11442_v54 = vld [vmem:[%s13985_s3 + $0x14] ss:$36 sps:$4 sm:$0xff]  }
 0x38f   :  { %5561 = vmatprep.mubr.bf16.mxu0 %v11385_v57  ;;  %6195 = vmatpush1.bf16.msra.mxu1 %v11401_v56  ;;  %v11445_v57 = vld [vmem:[%s13985_s3 + $0x1c] ss:$36 sps:$4 sm:$0xff]  }
 0x390   :  { %6196 = vmatprep.subr.bf16.mxu1 %v11409_v32  ;;  %6126 = vmatpush1.bf16.msra.mxu0 %v11404_v29 }
 0x391   :  { %6127 = vmatprep.subr.bf16.mxu0 %v11412_v34 }
 0x392   :  { %11049 = vmatmul.mubr.msk.bf16.gmra.mrb[208].mxu1 %vm5116_vm6, %v11389_v58  ;;  %vm13233_vm6 = vmand %vm6707_vm15, %vm6708_vm2 }
 0x393   :  { %6224 = vmatprep.mubr.bf16.mxu1 %v11756_v61  ;;  %6197 = vmatpush1.bf16.msra.mxu1 %v11407_v31  ;;  %vm13243_vm0 = vmor %vm13233_vm6, %vm13228_vm4 }
 0x394   :  { %6198 = vmatprep.subr.bf16.mxu1 %v11415_v37  ;;  %6128 = vmatpush1.bf16.msra.mxu0 %v11410_v47 }
 0x395   :  { %v10566_v44 = vpop.f32.mrb[156].mxu0  ;;  %6129 = vmatprep.subr.bf16.mxu0 %v11418_v55 }
 0x396   :  { %5562 = vmatmul.mubr.bf16.gmra.mrb[212].mxu0 %v11387_v59  ;;  %v10567_v62 = vpop.f32.mrb[157].mxu0 }
 0x397   :  { %5569 = vmatprep.mubr.bf16.mxu0 %v9854_v60  ;;  %v12930_v20 = vadd.f32 %v10567_v62, %v10566_v44  ;;  %v10569_v6 = vpop.f32.mrb[158].mxu0  ;;  %6199 = vmatpush1.bf16.msra.mxu1 %v11413_v35 }
 0x398   :  { %v10570_v63 = vpop.f32.mrb[159].mxu0  ;;  %6200 = vmatprep.subr.bf16.mxu1 %v11421_v40  ;;  %6130 = vmatpush1.bf16.msra.mxu0 %v11416_v38 }
 0x399   :  { %v12932_v1 = vadd.f32 %v10570_v63, %v10569_v6  ;;  %6131 = vmatprep.subr.bf16.mxu0 %v11424_v43 }
 0x39b   :  { %6201 = vmatpush1.bf16.msra.mxu1 %v11419_v39 }
 0x39c   :  { %6202 = vmatprep.subr.bf16.mxu1 %v11427_v46  ;;  %6132 = vmatpush1.bf16.msra.mxu0 %v11422_v41 }
 0x39d   :  { %v10572_v4 = vpop.f32.mrb[160].mxu0  ;;  %6133 = vmatprep.subr.bf16.mxu0 %v11430_v3 }
 0x39e   :  { %5570 = vmatmul.mubr.bf16.gmra.mrb[216].mxu0 %v9853_v2  ;;  %v10573_v7 = vpop.f32.mrb[161].mxu0 }
 0x39f   :  { %v12934_v8 = vadd.f32 %v10573_v7, %v10572_v4  ;;  %v10575_v9 = vpop.f32.mrb[162].mxu0  ;;  %6153 = vmatprep.mubr.bf16.mxu0 %v11756_v61  ;;  %6203 = vmatpush1.bf16.msra.mxu1 %v11425_v45  ;;  %v9795_v4 = vld [vmem:[%s13983_s4 + $0x1] ss:$0 sm:$0xff] }
 0x3a0   :  { %v10576_v10 = vpop.f32.mrb[163].mxu0  ;;  %6204 = vmatprep.subr.bf16.mxu1 %v11433_v28  ;;  %6134 = vmatpush1.bf16.msra.mxu0 %v11428_v48 }
 0x3a1   :  { %v12936_v11 = vadd.f32 %v10576_v10, %v10575_v9  ;;  %6135 = vmatprep.subr.bf16.mxu0 %v11436_v51 }
 0x3a3   :  { %6205 = vmatpush1.bf16.msra.mxu1 %v11431_v49 }
 0x3a4   :  { %6206 = vmatprep.subr.bf16.mxu1 %v11439_v53  ;;  %6136 = vmatpush1.bf16.msra.mxu0 %v11434_v50 }
 0x3a5   :  { %v10578_v12 = vpop.f32.mrb[164].mxu0  ;;  %6263 = vmatprep.subr.bf16.mxu0 %v11442_v54 }
 0x3a6   :  { %v10579_v13 = vpop.f32.mrb[165].mxu0 }
 0x3a7   :  { %v12938_v42 = vadd.f32 %v10579_v13, %v10578_v12  ;;  %v10581_v36 = vpop.f32.mrb[166].mxu0  ;;  %6207 = vmatpush1.bf16.msra.mxu1 %v11437_v52  ;;  %v5164_v13 = vadd.f32 %v12930_v20, %v9795_v4  ;;  %v5172_v20 = vadd.f32 %v12934_v8, %v9795_v4 }
 0x3a8   :  { %v10582_v15 = vpop.f32.mrb[167].mxu0  ;;  %6334 = vmatprep.subr.bf16.mxu1 %v11445_v57 }
 0x3a9   :  { %v12940_v17 = vadd.f32 %v10582_v15, %v10581_v36  ;;  %v5180_v49 = vadd.f32 %v12938_v42, %v9795_v4 }
 0x3ab   :  { %v5183_v51 = vadd.f32 %v12940_v17, %v9795_v4 }
 0x3ad   :  { %v10584_v18 = vpop.f32.mrb[168].mxu0 }
 0x3ae   :  { %v10585_v19 = vpop.f32.mrb[169].mxu0 }
 0x3af   :  { %v12942_v21 = vadd.f32 %v10585_v19, %v10584_v18  ;;  %v10587_v22 = vpop.f32.mrb[170].mxu0  ;;  %v5167_v19 = vadd.f32 %v12932_v1, %v9795_v4  ;;  %v5175_v1 = vadd.f32 %v12936_v11, %v9795_v4 }
 0x3b0   :  { %v10588_v16 = vpop.f32.mrb[171].mxu0 }
 0x3f1   :  { %v10646_v58 = vpop.f32.mrb[172].mxu0 }
 0x3f2   :  { %v10647_v5 = vpop.f32.mrb[173].mxu0 }
 0x3f3   :  { %v10648_v59 = vadd.f32 %v10647_v5, %v10646_v58  ;;  %v10649_v60 = vpop.f32.mrb[174].mxu0 }
 0x3f4   :  { %v10650_v61 = vpop.f32.mrb[175].mxu0 }
 0x3f5   :  { %v10651_v44 = vadd.f32 %v10650_v61, %v10649_v60 }
 0x3f9   :  { %v10652_v62 = vpop.f32.mrb[176].mxu0 }
 0x3fa   :  { %v10653_v6 = vpop.f32.mrb[177].mxu0 }
 0x3fb   :  { %v10654_v63 = vadd.f32 %v10653_v6, %v10652_v62  ;;  %v10655_v2 = vpop.f32.mrb[178].mxu0 }
 0x3fc   :  { %v10656_v7 = vpop.f32.mrb[179].mxu0 }
 0x3fd   :  { %v10606_v9 = vpop.f32.mrb[156].mxu1  ;;  %v10657_v10 = vadd.f32 %v10656_v7, %v10655_v2 }
 0x3fe   :  { %v10607_v12 = vpop.f32.mrb[157].mxu1 }
 0x3ff   :  { %v10608_v36 = vadd.f32 %v10607_v12, %v10606_v9  ;;  %v10609_v15 = vpop.f32.mrb[158].mxu1 }
 0x400   :  { %v10610_v18 = vpop.f32.mrb[159].mxu1 }
 0x401   :  { %v5228_v22 = vadd.f32 %v10608_v36, %v5164_v13  ;;  %v10611_v16 = vadd.f32 %v10610_v18, %v10609_v15  ;;  %v10658_v23 = vpop.f32.mrb[180].mxu0 }
 0x402   :  { %v10659_v33 = vpop.f32.mrb[181].mxu0 }
 0x403   :  { %v5231_v24 = vadd.f32 %v10611_v16, %v5167_v19  ;;  %v5292_v25 = vadd.f32 %v10648_v59, %v5228_v22  ;;  %v10660_v26 = vadd.f32 %v10659_v33, %v10658_v23  ;;  %v10661_v14 = vpop.f32.mrb[182].mxu0  ;;  %v5188_v59 = vadd.f32 %v12942_v21, %v9795_v4 }
 0x404   :  { %v10662_v56 = vpop.f32.mrb[183].mxu0 }
 0x405   :  { %v10612_v27 = vpop.f32.mrb[160].mxu1  ;;  %v5295_v29 = vadd.f32 %v10651_v44, %v5231_v24  ;;  %v10663_v30 = vadd.f32 %v10662_v56, %v10661_v14 }
 0x406   :  { %v10613_v31 = vpop.f32.mrb[161].mxu1 }
 0x407   :  { %v10614_v32 = vadd.f32 %v10613_v31, %v10612_v27  ;;  %v10615_v47 = vpop.f32.mrb[162].mxu1 }
 0x408   :  { %v10616_v34 = vpop.f32.mrb[163].mxu1 }
 0x409   :  { %v5236_v35 = vadd.f32 %v10614_v32, %v5172_v20  ;;  %v10617_v37 = vadd.f32 %v10616_v34, %v10615_v47  ;;  %v10664_v38 = vpop.f32.mrb[184].mxu0 }
 0x40a   :  { %v10665_v55 = vpop.f32.mrb[185].mxu0 }
 0x40b   :  { %v5239_v39 = vadd.f32 %v10617_v37, %v5175_v1  ;;  %v5300_v40 = vadd.f32 %v10654_v63, %v5236_v35  ;;  %v10666_v41 = vadd.f32 %v10665_v55, %v10664_v38  ;;  %v10667_v43 = vpop.f32.mrb[186].mxu0 }
 0x40c   :  { %v10668_v45 = vpop.f32.mrb[187].mxu0 }
 0x40d   :  { %v10618_v46 = vpop.f32.mrb[164].mxu1  ;;  %v5303_v48 = vadd.f32 %v10657_v10, %v5239_v39 }
 0x40e   :  { %v10619_v3 = vpop.f32.mrb[165].mxu1 }
 0x40f   :  { %v10620_v8 = vadd.f32 %v10619_v3, %v10618_v46  ;;  %v10621_v28 = vpop.f32.mrb[166].mxu1 }
 0x410   :  { %v10622_v50 = vpop.f32.mrb[167].mxu1 }
 0x411   :  { %v5244_v11 = vadd.f32 %v10620_v8, %v5180_v49  ;;  %v10623_v52 = vadd.f32 %v10622_v50, %v10621_v28 }
 0x413   :  { %v5247_v53 = vadd.f32 %v10623_v52, %v5183_v51  ;;  %v5308_v54 = vadd.f32 %v10660_v26, %v5244_v11 }
 0x415   :  { %v10624_v57 = vpop.f32.mrb[168].mxu1  ;;  %v5311_v58 = vadd.f32 %v10663_v30, %v5247_v53 }
 0x416   :  { %v10625_v5 = vpop.f32.mrb[169].mxu1 }
 0x417   :  { %v10626_v60 = vadd.f32 %v10625_v5, %v10624_v57  ;;  %v10627_v61 = vpop.f32.mrb[170].mxu1 }
 0x418   :  { %v10628_v44 = vpop.f32.mrb[171].mxu1 }
 0x419   :  { %v5252_v62 = vadd.f32 %v10626_v60, %v5188_v59 }
 0x41b   :  { %v5316_v6 = vadd.f32 %v10666_v41, %v5252_v62 }
 0x41d   :  { %v10686_v42 = vpop.f32.mrb[172].mxu1 }
 0x41e   :  { %v10687_v63 = vpop.f32.mrb[173].mxu1 }
 0x41f   :  { %v10688_v2 = vadd.f32 %v10687_v63, %v10686_v42  ;;  %v10689_v7 = vpop.f32.mrb[174].mxu1 }
 0x420   :  { %v10690_v9 = vpop.f32.mrb[175].mxu1 }
 0x421   :  { %v5356_v17 = vadd.f32 %v10688_v2, %v5292_v25  ;;  %v10691_v10 = vadd.f32 %v10690_v9, %v10689_v7 }
 0x423   :  { %v5359_v12 = vadd.f32 %v10691_v10, %v5295_v29 }
 0x425   :  { %v10692_v13 = vpop.f32.mrb[176].mxu1 }
 0x426   :  { %v10693_v36 = vpop.f32.mrb[177].mxu1 }
 0x427   :  { %v10694_v15 = vadd.f32 %v10693_v36, %v10692_v13  ;;  %v10695_v18 = vpop.f32.mrb[178].mxu1 }
 0x428   :  { %v10696_v19 = vpop.f32.mrb[179].mxu1 }
 0x429   :  { %v5364_v22 = vadd.f32 %v10694_v15, %v5300_v40  ;;  %v10697_v21 = vadd.f32 %v10696_v19, %v10695_v18 }
 0x42b   :  { %v5367_v4 = vadd.f32 %v10697_v21, %v5303_v48 }
 0x42d   :  { %v10698_v16 = vpop.f32.mrb[180].mxu1 }
 0x42e   :  { %v10699_v23 = vpop.f32.mrb[181].mxu1 }
 0x42f   :  { %v10700_v33 = vadd.f32 %v10699_v23, %v10698_v16  ;;  %v10701_v24 = vpop.f32.mrb[182].mxu1 }
 0x430   :  { %v10702_v26 = vpop.f32.mrb[183].mxu1 }
 0x431   :  { %v5372_v14 = vadd.f32 %v10700_v33, %v5308_v54  ;;  %v10703_v56 = vadd.f32 %v10702_v26, %v10701_v24 }
 0x433   :  { %v5375_v27 = vadd.f32 %v10703_v56, %v5311_v58 }
 0x435   :  { %v10704_v30 = vpop.f32.mrb[184].mxu1 }
 0x436   :  { %v10705_v25 = vpop.f32.mrb[185].mxu1  ;;  %v10726_v31 = vpop.f32.mrb[188].mxu0 }
 0x437   :  { %v10706_v29 = vadd.f32 %v10705_v25, %v10704_v30  ;;  %v10707_v20 = vpop.f32.mrb[186].mxu1  ;;  %v10727_v32 = vpop.f32.mrb[189].mxu0 }
 0x438   :  { %v10708_v47 = vpop.f32.mrb[187].mxu1  ;;  %v10728_v34 = vadd.f32 %v10727_v32, %v10726_v31  ;;  %v10729_v1 = vpop.f32.mrb[190].mxu0 }
 0x439   :  { %v5380_v35 = vadd.f32 %v10706_v29, %v5316_v6  ;;  %v10730_v37 = vpop.f32.mrb[191].mxu0 }
 0x43a   :  { %v5420_v38 = vadd.f32 %v10728_v34, %v5356_v17  ;;  %v10731_v55 = vadd.f32 %v10730_v37, %v10729_v1 }
 0x43c   :  { %v5423_v39 = vadd.f32 %v10731_v55, %v5359_v12 }
 0x43d   :  { %v10766_v40 = vpop.f32.mrb[188].mxu1 }
 0x43e   :  { %v10767_v41 = vpop.f32.mrb[189].mxu1 }
 0x43f   :  { %v10768_v43 = vadd.f32 %v10767_v41, %v10766_v40  ;;  %v10769_v45 = vpop.f32.mrb[190].mxu1 }
 0x440   :  { %v10770_v46 = vpop.f32.mrb[191].mxu1  ;;  %v10732_v48 = vpop.f32.mrb[192].mxu0 }
 0x441   :  { %v5484_v3 = vadd.f32 %v10768_v43, %v5420_v38  ;;  %v10771_v49 = vadd.f32 %v10770_v46, %v10769_v45  ;;  %v10733_v8 = vpop.f32.mrb[193].mxu0 }
 0x442   :  { %v10734_v28 = vadd.f32 %v10733_v8, %v10732_v48  ;;  %v10735_v50 = vpop.f32.mrb[194].mxu0 }
 0x443   :  { %v5487_v51 = vadd.f32 %v10771_v49, %v5423_v39  ;;  %v10736_v11 = vpop.f32.mrb[195].mxu0 }
 0x444   :  { %v5428_v52 = vadd.f32 %v10734_v28, %v5364_v22  ;;  %v10737_v53 = vadd.f32 %v10736_v11, %v10735_v50 }
 0x445   :  { %v10772_v54 = vpop.f32.mrb[192].mxu1 }
 0x446   :  { %v5431_v57 = vadd.f32 %v10737_v53, %v5367_v4  ;;  %v10773_v58 = vpop.f32.mrb[193].mxu1 }
 0x447   :  { %v10774_v5 = vadd.f32 %v10773_v58, %v10772_v54  ;;  %v10775_v59 = vpop.f32.mrb[194].mxu1 }
 0x448   :  { %v10738_v60 = vpop.f32.mrb[196].mxu0  ;;  %v10776_v61 = vpop.f32.mrb[195].mxu1 }
 0x449   :  { %v5492_v44 = vadd.f32 %v10774_v5, %v5428_v52  ;;  %v10777_v62 = vadd.f32 %v10776_v61, %v10775_v59  ;;  %v10739_v6 = vpop.f32.mrb[197].mxu0  ;;  %v11448_v5 = vld [vmem:[%s13985_s3 + $0x5c] ss:$36 sps:$4 sm:$0xff]   ;;  %v11451_v59 = vld [vmem:[%s13985_s3 + $0x64] ss:$36 sps:$4 sm:$0xff]  }
 0x44a   :  { %v10740_v42 = vadd.f32 %v10739_v6, %v10738_v60  ;;  %v10741_v63 = vpop.f32.mrb[198].mxu0  ;;  %v11446_v6 = vld [vmem:[%s13985_s3 + $0x58] ss:$36 sps:$4 sm:$0xff]  }
 0x44b   :  { %v5495_v2 = vadd.f32 %v10777_v62, %v5431_v57  ;;  %v10742_v7 = vpop.f32.mrb[199].mxu0 }
 0x44c   :  { %v5436_v9 = vadd.f32 %v10740_v42, %v5372_v14  ;;  %v10743_v17 = vadd.f32 %v10742_v7, %v10741_v63 }
 0x44d   :  { %v10778_v10 = vpop.f32.mrb[196].mxu1 }
 0x44e   :  { %v5439_v12 = vadd.f32 %v10743_v17, %v5375_v27  ;;  %v10779_v13 = vpop.f32.mrb[197].mxu1 }
 0x44f   :  { %v10780_v36 = vadd.f32 %v10779_v13, %v10778_v10  ;;  %v10781_v15 = vpop.f32.mrb[198].mxu1  ;;  %v11454_v10 = vld [vmem:[%s13985_s3 + $0xa4] ss:$36 sps:$4 sm:$0xff]  }
 0x450   :  { %v10744_v18 = vpop.f32.mrb[200].mxu0  ;;  %v10782_v19 = vpop.f32.mrb[199].mxu1 }
 0x451   :  { %v10745_v22 = vpop.f32.mrb[201].mxu0  ;;  %v13056_v21 = vadd.f32 %v10780_v36, %v5436_v9  ;;  %v10783_v4 = vadd.f32 %v10782_v19, %v10781_v15 }
 0x452   :  { %v10746_v16 = vadd.f32 %v10745_v22, %v10744_v18  ;;  %v10747_v23 = vpop.f32.mrb[202].mxu0  ;;  %v13092_v18 = vld [vmem:[#allocation5] sm:$0xff] }
 0x453   :  { %v10748_v33 = vpop.f32.mrb[203].mxu0  ;;  %v13058_v24 = vadd.f32 %v10783_v4, %v5439_v12  ;;  %v11457_v12 = vld [vmem:[%s13985_s3 + $0xac] ss:$36 sps:$4 sm:$0xff]  }
 0x454   :  { %v5444_v26 = vadd.f32 %v10746_v16, %v5380_v35  ;;  %v11452_v33 = vld [vmem:[%s13985_s3 + $0xa0] ss:$36 sps:$4 sm:$0xff]  }
 0x455   :  { %v10784_v56 = vpop.f32.mrb[200].mxu1 }
 0x456   :  { %v10785_v14 = vpop.f32.mrb[201].mxu1 }
 0x457   :  { %v10786_v30 = vadd.f32 %v10785_v14, %v10784_v56  ;;  %v10787_v25 = vpop.f32.mrb[202].mxu1  ;;  %v11460_v14 = vld [vmem:[%s13985_s3 + $0xec] ss:$36 sps:$4 sm:$0xff]  }
 0x458   :  { %v10788_v27 = vpop.f32.mrb[203].mxu1 }
 0x459   :  { %v10806_v31 = vpop.f32.mrb[204].mxu0  ;;  %v13060_v29 = vadd.f32 %v10786_v30, %v5444_v26  ;;  %v11455_v26 = vld [vmem:[%s13985_s3 + $0xa8] ss:$36 sps:$4 sm:$0xff]  }
 0x45a   :  { %v10807_v20 = vpop.f32.mrb[205].mxu0  ;;  %v11458_v27 = vld [vmem:[%s13985_s3 + $0xe8] ss:$36 sps:$4 sm:$0xff]  }
 0x45b   :  { %v10808_v32 = vadd.f32 %v10807_v20, %v10806_v31  ;;  %v10809_v47 = vpop.f32.mrb[206].mxu0 }
 0x45c   :  { %v10810_v34 = vpop.f32.mrb[207].mxu0 }
 0x45d   :  { %v10811_v1 = vadd.f32 %v10810_v34, %v10809_v47  ;;  %v11046_v37 = vpop.f32.mrb[204].mxu1  ;;  %v5548_v38 = vadd.f32 %v10808_v32, %v5484_v3  ;;  %v11440_v3 = vld [vmem:[%s13985_s3 + $0x10] ss:$36 sps:$4 sm:$0xff]  }
 0x45e   :  { %v5611_v55 = vpop.f32.mrb[205].mxu1  ;;  %v11461_v47 = vld [vmem:[%s13985_s3 + $0xf0] ss:$36 sps:$4 sm:$0xff]  }
 0x45f   :  { %v5612_v39 = vadd.f32 %v5611_v55, %v5548_v38  ;;  %v11047_v40 = vpop.f32.mrb[206].mxu1  ;;  %v5551_v41 = vadd.f32 %v10811_v1, %v5487_v51  ;;  %v11443_v51 = vld [vmem:[%s13985_s3 + $0x18] ss:$36 sps:$4 sm:$0xff]  }
 0x460   :  { %v5614_v35 = vpop.f32.mrb[207].mxu1  ;;  %v11469_v1 = vld [vmem:[%s13985_s3 + $0x13c] ss:$36 sps:$4 sm:$0xff]  }
 0x461   :  { %v5648_v43 = vmul.f32 0.02, %v5612_v39  ;;  %v5615_v45 = vadd.f32 %v5614_v35, %v5551_v41  ;;  %v10812_v46 = vpop.f32.mrb[208].mxu0  ;;  %vm5641_vm7 = vcmp.gt.f32.partialorder %v5612_v39, 0.0 }
 0x462   :  { %v10813_v48 = vpop.f32.mrb[209].mxu0 }
 0x463   :  { %vm5642_vm8 = vcmp.gt.f32.partialorder %v5615_v45, 0.0  ;;  %v5649_v49 = vmul.f32 0.02, %v5615_v45  ;;  %v10814_v8 = vadd.f32 %v10813_v48, %v10812_v46  ;;  %v10815_v28 = vpop.f32.mrb[210].mxu0  ;;  %v5655_v11 = vsel %vm5641_vm7, %v5612_v39, %v5648_v43  ;;  %v11464_v43 = vld [vmem:[%s13985_s3 + $0x130] ss:$36 sps:$4 sm:$0xff]  }
 0x464   :  { %v10816_v50 = vpop.f32.mrb[211].mxu0  ;;  %v11472_v48 = vld [vmem:[%s13985_s3 + $0x17c] ss:$36 sps:$4 sm:$0xff]   ;;  %vm6794_vm7 = vcmask 516096  }
 0x465   :  { %v5656_v52 = vsel %vm5642_vm8, %v5615_v45, %v5649_v49  ;;  %v5556_v53 = vadd.f32 %v10814_v8, %v5492_v44  ;;  %v10817_v54 = vadd.f32 %v10816_v50, %v10815_v28  ;;  %v13068_v57 = vpop.f32.mrb[208].mxu1  ;;  %v11467_v45 = vld [vmem:[%s13985_s3 + $0x138] ss:$36 sps:$4 sm:$0xff]   ;;  %v11473_v50 = vld [vmem:[%s13985_s3 + $0x180] ss:$36 sps:$4 sm:$0xff]   ;;  %vm13267_vm8 = vmand %vm6794_vm7, %vm6705_vm14 }
 0x466   :  { %v13070_v58 = vpack.c.bf16 %v5656_v52, %v5655_v11  ;;  %v5627_v60 = vpop.f32.mrb[209].mxu1  ;;  %v11470_v8 = vld [vmem:[%s13985_s3 + $0x178] ss:$36 sps:$4 sm:$0xff]   ;;  %v11478_v11 = vld [vmem:[%s13985_s3 + $0x1c4] ss:$36 sps:$4 sm:$0xff]  }
 0x467   :  { %v5620_v61 = vadd.f32 %v11046_v37, %v5556_v53  ;;  %v5559_v44 = vadd.f32 %v10817_v54, %v5495_v2  ;;  %v11051_v62 = vpop.f32.mrb[210].mxu1  ;;  %v11449_v2 = vld [vmem:[%s13985_s3 + $0x60] ss:$36 sps:$4 sm:$0xff]   ;;  %v11481_v52 = vld [vmem:[%s13985_s3 + $0x1cc] ss:$36 sps:$4 sm:$0xff]  }
 0x468   :  { %6154 = vmatmul.mubr.bf16.vlgmr.msra.gmra.mrb[220].mxu0 %v13070_v58  ;;  %6225 = vmatmul.mubr.bf16.vlgmr.msra.gmra.mrb[212].mxu1 %v13070_v58  ;;  %v5630_v42 = vpop.f32.mrb[211].mxu1  ;;  %v11476_v54 = vld [vmem:[%s13985_s3 + $0x1c0] ss:$36 sps:$4 sm:$0xff]   ;;  %v11490_v62 = vld [vmem:[%s13985_s3 + $0xb0] ss:$36 sps:$4 sm:$0xff]  }
 0x469   :  { %vm5643_vm9 = vcmp.gt.f32.partialorder %v5620_v61, 0.0  ;;  %v5650_v63 = vmul.f32 0.02, %v5620_v61  ;;  %v5623_v7 = vadd.f32 %v11047_v40, %v5559_v44  ;;  %v10818_v9 = vpop.f32.mrb[212].mxu0  ;;  %6264 = vmatpush1.bf16.msra.mxu0 %v11440_v3  ;;  %6335 = vmatpush1.bf16.msra.mxu1 %v11443_v51  ;;  %v11479_v3 = vld [vmem:[%s13985_s3 + $0x1c8] ss:$36 sps:$4 sm:$0xff]  }
 0x46a   :  { %v10819_v17 = vpop.f32.mrb[213].mxu0  ;;  %6265 = vmatprep.subr.bf16.mxu0 %v11448_v5  ;;  %6336 = vmatprep.subr.bf16.mxu1 %v11451_v59  ;;  %v11487_v5 = vld [vmem:[%s13985_s3 + $0x214] ss:$36 sps:$4 sm:$0xff]   ;;  %v11482_v59 = vld [vmem:[%s13985_s3 + $0x208] ss:$36 sps:$4 sm:$0xff]  }
 0x46b   :  { %vm5644_vm10 = vcmp.gt.f32.partialorder %v5623_v7, 0.0  ;;  %v5651_v13 = vmul.f32 0.02, %v5623_v7  ;;  %v10820_v36 = vadd.f32 %v10819_v17, %v10818_v9  ;;  %v10821_v15 = vpop.f32.mrb[214].mxu0  ;;  %6163 = vmatprep.mubr.bf16.mxu0 %v13092_v18  ;;  %6234 = vmatprep.mubr.bf16.mxu1 %v13092_v18  ;;  %v5657_v19 = vsel %vm5643_vm9, %v5620_v61, %v5650_v63  ;;  %v11488_v61 = vld [vmem:[%s13985_s3 + $0x20] ss:$36 sps:$4 sm:$0xff]  }
 0x46c   :  { %v10822_v22 = vpop.f32.mrb[215].mxu0  ;;  %v11489_v44 = vld [vmem:[%s13985_s3 + $0x68] ss:$36 sps:$4 sm:$0xff]   ;;  %v11495_v9 = vld [vmem:[%s13985_s3 + $0x218] ss:$36 sps:$4 sm:$0xff]   ;;  %vm7143_vm9 = vcmask 1040896  }
 0x46d   :  { %v5658_v4 = vsel %vm5644_vm10, %v5623_v7, %v5651_v13  ;;  %v10823_v16 = vadd.f32 %v10822_v22, %v10821_v15  ;;  %6266 = vmatpush1.bf16.msra.mxu0 %v11446_v6  ;;  %6337 = vmatpush1.bf16.msra.mxu1 %v11449_v2  ;;  %v5564_v23 = vadd.f32 %v10820_v36, %v13056_v21  ;;  %v11463_v21 = vld [vmem:[%s13985_s3 + $0xf4] ss:$36 sps:$4 sm:$0xff]   ;;  %v11493_v63 = vld [vmem:[%s13985_s3 + $0x188] ss:$36 sps:$4 sm:$0xff]   ;;  %vm13312_vm10 = vmand %vm7143_vm9, %vm6705_vm14 }
 0x46e   :  { %v13104_v56 = vpack.c.bf16 %v5658_v4, %v5657_v19  ;;  %6267 = vmatprep.subr.bf16.mxu0 %v11454_v10  ;;  %6338 = vmatprep.subr.bf16.mxu1 %v11457_v12  ;;  %v11491_v6 = vld [vmem:[%s13985_s3 + $0xf8] ss:$36 sps:$4 sm:$0xff]   ;;  %v11494_v7 = vld [vmem:[%s13985_s3 + $0x1d0] ss:$36 sps:$4 sm:$0xff]  }
 0x46f   :  { %v5628_v30 = vadd.f32 %v5627_v60, %v5564_v23  ;;  %v5567_v25 = vadd.f32 %v10823_v16, %v13058_v24  ;;  %v11466_v24 = vld [vmem:[%s13985_s3 + $0x134] ss:$36 sps:$4 sm:$0xff]  }
 0x470   :  { %6164 = vmatmul.mubr.bf16.gmra.mrb[224].mxu0 %v13104_v56  ;;  %6235 = vmatmul.mubr.bf16.gmra.mrb[216].mxu1 %v13104_v56  ;;  %v11485_v60 = vld [vmem:[%s13985_s3 + $0x210] ss:$36 sps:$4 sm:$0xff]  }
 0x471   :  { %v5652_v31 = vmul.f32 0.02, %v5628_v30  ;;  %v5631_v20 = vadd.f32 %v5630_v42, %v5567_v25  ;;  %v10824_v32 = vpop.f32.mrb[216].mxu0  ;;  %6268 = vmatpush1.bf16.msra.mxu0 %v11452_v33  ;;  %6339 = vmatpush1.bf16.msra.mxu1 %v11455_v26  ;;  %vm5645_vm11 = vcmp.gt.f32.partialorder %v5628_v30, 0.0  ;;  %v11492_v42 = vld [vmem:[%s13985_s3 + $0x140] ss:$36 sps:$4 sm:$0xff]  }
 0x472   :  { %v10825_v34 = vpop.f32.mrb[217].mxu0  ;;  %6269 = vmatprep.subr.bf16.mxu0 %v11460_v14  ;;  %6340 = vmatprep.subr.bf16.mxu1 %v11463_v21 }
 0x473   :  { %vm5646_vm12 = vcmp.gt.f32.partialorder %v5631_v20, 0.0  ;;  %v5653_v37 = vmul.f32 0.02, %v5631_v20  ;;  %v10826_v38 = vadd.f32 %v10825_v34, %v10824_v32  ;;  %6173 = vmatprep.mubr.bf16.mxu0 %v13092_v18  ;;  %6244 = vmatprep.mubr.bf16.mxu1 %v13092_v18  ;;  %v10827_v55 = vpop.f32.mrb[218].mxu0  ;;  %v5659_v40 = vsel %vm5645_vm11, %v5628_v30, %v5652_v31 }
 0x474   :  { %v10828_v39 = vpop.f32.mrb[219].mxu0 }
 0x475   :  { %v5660_v41 = vsel %vm5646_vm12, %v5631_v20, %v5653_v37  ;;  %v5572_v35 = vadd.f32 %v10826_v38, %v13060_v29  ;;  %6270 = vmatpush1.bf16.msra.mxu0 %v11458_v27  ;;  %6341 = vmatpush1.bf16.msra.mxu1 %v11461_v47  ;;  %v11475_v29 = vld [vmem:[%s13985_s3 + $0x184] ss:$36 sps:$4 sm:$0xff]  }
 0x476   :  { %v13136_v46 = vpack.c.bf16 %v5660_v41, %v5659_v40  ;;  %6271 = vmatprep.subr.bf16.mxu0 %v11466_v24  ;;  %6342 = vmatprep.subr.bf16.mxu1 %v11469_v1 }
 0x477   :  { %v5636_v49 = vadd.f32 %v13068_v57, %v5572_v35  ;;  %v11484_v57 = vld [vmem:[%s13985_s3 + $0x20c] ss:$36 sps:$4 sm:$0xff]  }
 0x478   :  { %6174 = vmatmul.mubr.bf16.gmra.mrb[228].mxu0 %v13136_v46  ;;  %6245 = vmatmul.mubr.bf16.gmra.mrb[220].mxu1 %v13136_v46 }
 0x479   :  { %vm5647_vm13 = vcmp.gt.f32.partialorder %v5636_v49, 0.0  ;;  %v5654_v28 = vmul.f32 0.02, %v5636_v49  ;;  %6272 = vmatpush1.bf16.msra.mxu0 %v11464_v43  ;;  %6343 = vmatpush1.bf16.msra.mxu1 %v11467_v45 }
 0x47a   :  { %6273 = vmatprep.subr.bf16.mxu0 %v11472_v48  ;;  %6344 = vmatprep.subr.bf16.mxu1 %v11475_v29 }
 0x47b   :  { %v5661_v53 = vsel %vm5647_vm13, %v5636_v49, %v5654_v28  ;;  %6183 = vmatprep.mubr.bf16.mxu0 %v13092_v18  ;;  %6254 = vmatprep.mubr.bf16.mxu1 %v13092_v18  ;;  %vm8431_vm13 = vcmask 130048  }
 0x47c   :  { %v5752_v51 = vpack.c.bf16 %v5661_v53, %v5661_v53 }
 0x47d   :  { %6274 = vmatpush1.bf16.msra.mxu0 %v11470_v8  ;;  %6345 = vmatpush1.bf16.msra.mxu1 %v11473_v50 }
 0x47e   :  { %6275 = vmatprep.subr.bf16.mxu0 %v11478_v11  ;;  %6346 = vmatprep.subr.bf16.mxu1 %v11481_v52 }
 0x480   :  { %6184 = vmatmul.mubr.bf16.gmra.mrb[232].mxu0 %v5752_v51  ;;  %6255 = vmatmul.mubr.bf16.gmra.mrb[224].mxu1 %v5752_v51 }
 0x481   :  { %6276 = vmatpush1.bf16.msra.mxu0 %v11476_v54  ;;  %6347 = vmatpush1.bf16.msra.mxu1 %v11479_v3 }
 0x482   :  { %6277 = vmatprep.subr.bf16.mxu0 %v11484_v57  ;;  %6348 = vmatprep.subr.bf16.mxu1 %v11487_v5 }
 0x483   :  { %6295 = vmatprep.mubr.bf16.mxu0 %v13092_v18  ;;  %6366 = vmatprep.mubr.bf16.mxu1 %v13092_v18 }
 0x485   :  { %6278 = vmatpush1.bf16.msra.mxu0 %v11482_v59  ;;  %6349 = vmatpush1.bf16.msra.mxu1 %v11485_v60 }
 0x486   :  { %11052 = vmatprep.subr.bf16.mxu0 %v11488_v61 }
 0x488   :  { %6296 = vmatmul.mubr.bf16.vlgmr.msra.gmra.mrb[236].mxu0 %v13070_v58  ;;  %6367 = vmatmul.mubr.bf16.vlgmr.msra.gmra.mrb[228].mxu1 %v13070_v58 }
 0x489   :  { %11053 = vmatpush3.bf16.msra.mxu0 %v11488_v61  ;;  %6305 = vmatprep.mubr.bf16.mxu0 %v13092_v18 }
 0x48a   :  { %11054 = vmatprep.subr.bf16.mxu0 %v11489_v44  ;;  %6376 = vmatprep.mubr.bf16.mxu1 %v13092_v18 }
 0x48d   :  { %11055 = vmatpush3.bf16.msra.mxu0 %v11489_v44 }
 0x48e   :  { %11056 = vmatprep.subr.bf16.mxu0 %v11490_v62 }
 0x490   :  { %6306 = vmatmul.mubr.bf16.gmra.mrb[240].mxu0 %v13104_v56  ;;  %6377 = vmatmul.mubr.bf16.gmra.mrb[232].mxu1 %v13104_v56 }
 0x491   :  { %11057 = vmatpush3.bf16.msra.mxu0 %v11490_v62  ;;  %6315 = vmatprep.mubr.bf16.mxu0 %v13092_v18 }
 0x492   :  { %11058 = vmatprep.subr.bf16.mxu0 %v11491_v6  ;;  %6386 = vmatprep.mubr.bf16.mxu1 %v13092_v18 }
 0x495   :  { %11059 = vmatpush3.bf16.msra.mxu0 %v11491_v6 }
 0x496   :  { %11060 = vmatprep.subr.bf16.mxu0 %v11492_v42 }
 0x498   :  { %6316 = vmatmul.mubr.bf16.gmra.mrb[244].mxu0 %v13136_v46  ;;  %6387 = vmatmul.mubr.bf16.gmra.mrb[236].mxu1 %v13136_v46 }
 0x499   :  { %11061 = vmatpush3.bf16.msra.mxu0 %v11492_v42  ;;  %6325 = vmatprep.mubr.bf16.mxu0 %v13092_v18 }
 0x49a   :  { %11062 = vmatprep.subr.bf16.mxu0 %v11493_v63  ;;  %6396 = vmatprep.mubr.bf16.mxu1 %v13092_v18 }
 0x49d   :  { %11063 = vmatpush3.bf16.msra.mxu0 %v11493_v63 }
 0x49e   :  { %11064 = vmatprep.subr.bf16.mxu0 %v11494_v7 }
 0x4a0   :  { %6326 = vmatmul.mubr.bf16.gmra.mrb[248].mxu0 %v5752_v51  ;;  %6397 = vmatmul.mubr.bf16.gmra.mrb[240].mxu1 %v5752_v51 }
 0x4a1   :  { %11065 = vmatpush3.bf16.msra.mxu0 %v11494_v7  ;;  %11068 = vmatprep.mubr.bf16.mxu0 %v13070_v58 }
 0x4a2   :  { %11066 = vmatprep.subr.bf16.mxu0 %v11495_v9 }
 0x4a5   :  { %11067 = vmatpush3.bf16.msra.mxu0 %v11495_v9 }
 0x4a8   :  { %11069 = vmatmul.mubr.bf16.vlgmr.msra.gmra.mrb[252].mxu0 %v13104_v56 }
 0x4a9   :  { %11072 = vmatprep.mubr.bf16.mxu0 %v13136_v46 }
 0x4b0   :  { %11073 = vmatmul.mubr.bf16.gmra.mrb[0].mxu0 %v5752_v51 }
 0x53b   :  { %v6155_v2 = vpop.f32.mrb[220].mxu0  ;;  %v6226_v17 = vpop.f32.mrb[212].mxu1 }
 0x53c   :  { %v6157_v10 = vpop.f32.mrb[221].mxu0  ;;  %v6228_v12 = vpop.f32.mrb[213].mxu1 }
 0x53d   :  { %v10483_v13 = vpack.c.bf16 %v6157_v10, %v6155_v2  ;;  %v10484_v36 = vpack.c.bf16 %v6228_v12, %v6226_v17  ;;  %v6159_v15 = vpop.f32.mrb[222].mxu0  ;;  %v6230_v19 = vpop.f32.mrb[214].mxu1 }
 0x53e   :  { %v6161_v22 = vpop.f32.mrb[223].mxu0  ;;  %v6232_v4 = vpop.f32.mrb[215].mxu1 }
 0x53f   :  { %6674 = vst [vmem:[#allocation4] sm:$0xff] %v10483_v13  ;;  %6675 = vst [vmem:[#allocation4 + $0x8] sm:$0xff] %v10484_v36  ;;  %v10488_v58 = vpack.c.bf16 %v6161_v22, %v6159_v15  ;;  %v10489_v16 = vpack.c.bf16 %v6232_v4, %v6230_v19  ;;  %v6711_v13 = vld [vmem:[#allocation4 + $0xd8] sm:$0x11] }
 0x541   :  { %6679 = vst [vmem:[#allocation4 + $0x24] sm:$0xff] %v10488_v58  ;;  %6680 = vst [vmem:[#allocation4 + $0x2c] sm:$0xff] %v10489_v16 }
 0x543   :  { %v6165_v23 = vpop.f32.mrb[224].mxu0  ;;  %v6236_v33 = vpop.f32.mrb[216].mxu1 }
 0x544   :  { %v6167_v26 = vpop.f32.mrb[225].mxu0  ;;  %v6238_v56 = vpop.f32.mrb[217].mxu1 }
 0x545   :  { %v10493_v14 = vpack.c.bf16 %v6167_v26, %v6165_v23  ;;  %v10494_v21 = vpack.c.bf16 %v6238_v56, %v6236_v33  ;;  %v6169_v30 = vpop.f32.mrb[226].mxu0  ;;  %v6240_v25 = vpop.f32.mrb[218].mxu1  ;;  %v6714_v23 = vld [vmem:[#allocation4 + $0xe0] sm:$0x11] }
 0x546   :  { %v6762_v27 = vld [vmem:[#allocation4] sm:$0xf]  ;;  %v6842_v31 = vld [vmem:[#allocation4 + $0x4] sm:$0xf]  ;;  %v6920_v20 = vld [vmem:[#allocation4 + $0x8] sm:$0xf] }
 0x547   :  { %v6998_v32 = vld [vmem:[#allocation4 + $0xc] sm:$0xf]  ;;  %6684 = vst [vmem:[#allocation4 + $0x48] sm:$0xff] %v10493_v14  ;;  %6685 = vst [vmem:[#allocation4 + $0x50] sm:$0xff] %v10494_v21  ;;  %v6171_v47 = vpop.f32.mrb[227].mxu0  ;;  %v6242_v34 = vpop.f32.mrb[219].mxu1 }
 0x548   :  { %v6763_v24 = vld [vmem:[#allocation4 + $0x24] sm:$0xf]  ;;  %v6843_v1 = vld [vmem:[#allocation4 + $0x28] sm:$0xf]  ;;  %v6921_v37 = vld [vmem:[#allocation4 + $0x2c] sm:$0xf]  ;;  %v10498_v38 = vpack.c.bf16 %v6171_v47, %v6169_v30  ;;  %v10499_v55 = vpack.c.bf16 %v6242_v34, %v6240_v25 }
 0x549   :  { %v9967_v39 = vcombine.low %v6762_v27, %v6763_v24  ;;  %v9975_v40 = vcombine.low %v6842_v31, %v6843_v1  ;;  %v9983_v41 = vcombine.low %v6920_v20, %v6921_v37  ;;  %v6999_v35 = vld [vmem:[#allocation4 + $0x30] sm:$0xf]  ;;  %v11496_v43 = vld [vmem:[#allocation4 + $0x4] ss:$36 sps:$4 sm:$0xff]  }
 0x54a   :  { %v9991_v45 = vcombine.low %v6998_v32, %v6999_v35  ;;  %6689 = vst [vmem:[#allocation4 + $0x6c] sm:$0xff] %v10498_v38  ;;  %6690 = vst [vmem:[#allocation4 + $0x74] sm:$0xff] %v10499_v55  ;;  %v11497_v46 = vld [vmem:[#allocation4] ss:$36 sps:$4 sm:$0xff]   ;;  %6902 = vrot.lane.b32.xlu0 %v11496_v43, %s11761_s2  ;;  %v11498_v53 = vld [vmem:[#allocation4 + $0xc] ss:$36 sps:$4 sm:$0xff]  }
 0x54b   :  { %6791 = vst.msk [vmem:[#allocation5] sm:$0xff] %vm684_vm5, %v9967_v39  ;;  %6871 = vst.msk [vmem:[#allocation5 + $0x40] sm:$0xff] %vm684_vm5, %v9975_v40  ;;  %v6246_v48 = vpop.f32.mrb[220].mxu1  ;;  %v6175_v29 = vpop.f32.mrb[228].mxu0  ;;  %6824 = vrot.lane.b32.xlu1 %v11497_v46, %s11761_s2  ;;  %v11499_v3 = vld [vmem:[#allocation4 + $0x8] ss:$36 sps:$4 sm:$0xff]  }
 0x54c   :  { %6949 = vst.msk [vmem:[#allocation5 + $0x80] sm:$0xff] %vm684_vm5, %v9983_v41  ;;  %7027 = vst.msk [vmem:[#allocation5 + $0xc0] sm:$0xff] %vm684_vm5, %v9991_v45  ;;  %v6177_v49 = vpop.f32.mrb[229].mxu0  ;;  %v6248_v8 = vpop.f32.mrb[221].mxu1 }
 0x54d   :  { %v10503_v28 = vpack.c.bf16 %v6177_v49, %v6175_v29  ;;  %v10504_v50 = vpack.c.bf16 %v6248_v8, %v6246_v48  ;;  %v6179_v11 = vpop.f32.mrb[230].mxu0  ;;  %v6250_v52 = vpop.f32.mrb[222].mxu1 }
 0x54e   :  { %v6764_v57 = vld [vmem:[#allocation4 + $0x48] sm:$0xf]  ;;  %v6844_v5 = vld [vmem:[#allocation4 + $0x4c] sm:$0xf]  ;;  %v6922_v59 = vld [vmem:[#allocation4 + $0x50] sm:$0xf]  ;;  %7058 = vrot.lane.b32.xlu0 %v11498_v53, %s11761_s2 }
 0x54f   :  { %6694 = vst [vmem:[#allocation4 + $0x90] sm:$0xff] %v10503_v28  ;;  %6695 = vst [vmem:[#allocation4 + $0x98] sm:$0xff] %v10504_v50  ;;  %v6181_v60 = vpop.f32.mrb[231].mxu0  ;;  %v6252_v61 = vpop.f32.mrb[223].mxu1  ;;  %v7000_v44 = vld [vmem:[#allocation4 + $0x54] sm:$0xf]  ;;  %6980 = vrot.lane.b32.xlu1 %v11499_v3, %s11761_s2 }
 0x550   :  { %v10508_v62 = vpack.c.bf16 %v6181_v60, %v6179_v11  ;;  %v10509_v6 = vpack.c.bf16 %v6252_v61, %v6250_v52  ;;  %v6874_v52 = vld [vmem:[#allocation5 + $0x58] sm:$0x1] }
 0x551   :  { %v6765_v42 = vld [vmem:[#allocation4 + $0x6c] sm:$0xf]  ;;  %v6845_v63 = vld [vmem:[#allocation4 + $0x70] sm:$0xf]  ;;  %v6923_v7 = vld [vmem:[#allocation4 + $0x74] sm:$0xf] }
 0x552   :  { %v9968_v9 = vcombine.low %v6764_v57, %v6765_v42  ;;  %v9976_v2 = vcombine.low %v6844_v5, %v6845_v63  ;;  %v9984_v17 = vcombine.low %v6922_v59, %v6923_v7  ;;  %v7001_v10 = vld [vmem:[#allocation4 + $0x78] sm:$0xf]  ;;  %6699 = vst [vmem:[#allocation4 + $0xb4] sm:$0xff] %v10508_v62  ;;  %6700 = vst [vmem:[#allocation4 + $0xbc] sm:$0xff] %v10509_v6  ;;  %v11500_v12 = vld [vmem:[#allocation4 + $0x4c] ss:$36 sps:$4 sm:$0xff]  }
 0x553   :  { %v9992_v36 = vcombine.low %v7000_v44, %v7001_v10  ;;  %v6256_v15 = vpop.f32.mrb[224].mxu1  ;;  %v11501_v19 = vld [vmem:[#allocation4 + $0x48] ss:$36 sps:$4 sm:$0xff]   ;;  %v6185_v22 = vpop.f32.mrb[232].mxu0  ;;  %6904 = vrot.lane.b32.xlu0 %v11500_v12, %s11761_s2  ;;  %v11506_v21 = vld [vmem:[#allocation4 + $0x54] ss:$36 sps:$4 sm:$0xff]  }
 0x554   :  { %6792 = vst.msk [vmem:[#allocation5 + $0x8] sm:$0xff] %vm684_vm5, %v9968_v9  ;;  %6872 = vst.msk [vmem:[#allocation5 + $0x48] sm:$0xff] %vm684_vm5, %v9976_v2  ;;  %v6187_v58 = vpop.f32.mrb[233].mxu0  ;;  %v6258_v16 = vpop.f32.mrb[225].mxu1  ;;  %6826 = vrot.lane.b32.xlu1 %v11501_v19, %s11761_s2  ;;  %v11507_v30 = vld [vmem:[#allocation4 + $0x50] ss:$36 sps:$4 sm:$0xff]  }
 0x555   :  { %6950 = vst.msk [vmem:[#allocation5 + $0x88] sm:$0xff] %vm684_vm5, %v9984_v17  ;;  %7028 = vst.msk [vmem:[#allocation5 + $0xc8] sm:$0xff] %vm684_vm5, %v9992_v36  ;;  %v10513_v33 = vpack.c.bf16 %v6187_v58, %v6185_v22  ;;  %v10514_v26 = vpack.c.bf16 %v6258_v16, %v6256_v15  ;;  %v6189_v56 = vpop.f32.mrb[234].mxu0  ;;  %v6260_v14 = vpop.f32.mrb[226].mxu1  ;;  %v6796_v53 = vld [vmem:[#allocation5 + $0x18] sm:$0x1] }
 0x556   :  { %v6766_v25 = vld [vmem:[#allocation4 + $0x90] sm:$0xf]  ;;  %v6846_v27 = vld [vmem:[#allocation4 + $0x94] sm:$0xf]  ;;  %v6924_v31 = vld [vmem:[#allocation4 + $0x98] sm:$0xf] }
 0x557   :  { %v6712_v20 = vsel %vm13243_vm0, %v10513_v33, %v6711_v13  ;;  %v6715_v32 = vsel %vm13243_vm0, %v10514_v26, %v6714_v23  ;;  %v6190_v47 = vpop.f32.mrb[235].mxu0  ;;  %v6261_v34 = vpop.f32.mrb[227].mxu1  ;;  %v7002_v24 = vld [vmem:[#allocation4 + $0x9c] sm:$0xf]  ;;  %7060 = vrot.lane.b32.xlu0 %v11506_v21, %s11761_s2  ;;  %v6952_v59 = vld [vmem:[#allocation5 + $0x98] sm:$0x1] }
 0x558   :  { %6713 = vst [vmem:[#allocation4 + $0xd8] sm:$0x11] %v6712_v20  ;;  %6716 = vst [vmem:[#allocation4 + $0xe0] sm:$0x11] %v6715_v32  ;;  %6982 = vrot.lane.b32.xlu1 %v11507_v30, %s11761_s2  ;;  %v7030_v62 = vld [vmem:[#allocation5 + $0xd8] sm:$0x1] }
 0x559   :  { %v6767_v1 = vld [vmem:[#allocation4 + $0xb4] sm:$0xf]  ;;  %v6847_v37 = vld [vmem:[#allocation4 + $0xb8] sm:$0xf]  ;;  %v6925_v38 = vld [vmem:[#allocation4 + $0xbc] sm:$0xf] }
 0x55a   :  { %v9969_v55 = vcombine.low %v6766_v25, %v6767_v1  ;;  %v9977_v39 = vcombine.low %v6846_v27, %v6847_v37  ;;  %v9985_v40 = vcombine.low %v6924_v31, %v6925_v38  ;;  %v7003_v41 = vld [vmem:[#allocation4 + $0xc0] sm:$0xf]  ;;  %v11508_v35 = vld [vmem:[#allocation4 + $0x94] ss:$36 sps:$4 sm:$0xff]  }
 0x55b   :  { %v9993_v43 = vcombine.low %v7002_v24, %v7003_v41  ;;  %v6368_v45 = vpop.f32.mrb[228].mxu1  ;;  %v11509_v46 = vld [vmem:[#allocation4 + $0x90] ss:$36 sps:$4 sm:$0xff]   ;;  %v6297_v48 = vpop.f32.mrb[236].mxu0  ;;  %6906 = vrot.lane.b32.xlu0 %v11508_v35, %s11761_s2  ;;  %v11510_v5 = vld [vmem:[#allocation4 + $0x9c] ss:$36 sps:$4 sm:$0xff]  }
 0x55c   :  { %6793 = vst.msk [vmem:[#allocation5 + $0x10] sm:$0xff] %vm684_vm5, %v9969_v55  ;;  %6873 = vst.msk [vmem:[#allocation5 + $0x50] sm:$0xff] %vm684_vm5, %v9977_v39  ;;  %v6299_v29 = vpop.f32.mrb[237].mxu0  ;;  %v6370_v49 = vpop.f32.mrb[229].mxu1  ;;  %6828 = vrot.lane.b32.xlu1 %v11509_v46, %s11761_s2 }
 0x55d   :  { %6951 = vst.msk [vmem:[#allocation5 + $0x90] sm:$0xff] %vm684_vm5, %v9985_v40  ;;  %7029 = vst.msk [vmem:[#allocation5 + $0xd0] sm:$0xff] %vm684_vm5, %v9993_v43  ;;  %v10485_v8 = vpack.c.bf16 %v6299_v29, %v6297_v48  ;;  %v10486_v28 = vpack.c.bf16 %v6370_v49, %v6368_v45  ;;  %v6301_v50 = vpop.f32.mrb[238].mxu0  ;;  %v6372_v11 = vpop.f32.mrb[230].mxu1 }
 0x55e   :  { %v6303_v51 = vpop.f32.mrb[239].mxu0  ;;  %v6374_v57 = vpop.f32.mrb[231].mxu1 }
 0x55f   :  { %v11502_v60 = vld [vmem:[#allocation4 + $0xd8] ss:$0 sps:$4 sm:$0x11]   ;;  %6676 = vst [vmem:[#allocation4 + $0x10] sm:$0xff] %v10485_v8  ;;  %6677 = vst [vmem:[#allocation4 + $0x18] sm:$0xff] %v10486_v28  ;;  %v10490_v61 = vpack.c.bf16 %v6303_v51, %v6301_v50  ;;  %v10491_v44 = vpack.c.bf16 %v6374_v57, %v6372_v11  ;;  %7062 = vrot.lane.b32.xlu0 %v11510_v5, %s11761_s2 }
 0x560   :  { %v11503_v6 = vld [vmem:[#allocation4 + $0xdc] ss:$0 sps:$4 sm:$0x11]   ;;  %v11504_v42 = vld [vmem:[#allocation4 + $0xe0] ss:$0 sps:$4 sm:$0x11]   ;;  %v6797_v63 = vsel %vm13267_vm8, %v11502_v60, %v6796_v53 }
 0x561   :  { %6681 = vst [vmem:[#allocation4 + $0x34] sm:$0xff] %v10490_v61  ;;  %6682 = vst [vmem:[#allocation4 + $0x3c] sm:$0xff] %v10491_v44  ;;  %v11505_v7 = vld [vmem:[#allocation4 + $0xe4] ss:$0 sps:$4 sm:$0x11]   ;;  %v6875_v9 = vsel %vm13267_vm8, %v11503_v6, %v6874_v52  ;;  %v6953_v10 = vsel %vm13267_vm8, %v11504_v42, %v6952_v59 }
 0x562   :  { %6798 = vst [vmem:[#allocation5 + $0x18] sm:$0x1] %v6797_v63  ;;  %v11511_v2 = vld [vmem:[#allocation4 + $0xd8] ss:$0 sps:$4 sm:$0x11]   ;;  %v7031_v36 = vsel %vm13267_vm8, %v11505_v7, %v7030_v62 }
 0x563   :  { %v6378_v17 = vpop.f32.mrb[232].mxu1  ;;  %6876 = vst [vmem:[#allocation5 + $0x58] sm:$0x1] %v6875_v9  ;;  %v11512_v12 = vld [vmem:[#allocation4 + $0xdc] ss:$0 sps:$4 sm:$0x11]   ;;  %6830 = vrot.lane.b32.xlu1 %v11511_v2, %s11761_s2 }
 0x564   :  { %v6307_v13 = vpop.f32.mrb[240].mxu0  ;;  %6954 = vst [vmem:[#allocation5 + $0x98] sm:$0x1] %v6953_v10  ;;  %v6380_v19 = vpop.f32.mrb[233].mxu1  ;;  %7032 = vst [vmem:[#allocation5 + $0xd8] sm:$0x1] %v7031_v36  ;;  %6908 = vrot.lane.b32.xlu0 %v11512_v12, %s11761_s2 }
 0x565   :  { %v6309_v15 = vpop.f32.mrb[241].mxu0  ;;  %v10496_v33 = vpack.c.bf16 %v6380_v19, %v6378_v17  ;;  %v6382_v21 = vpop.f32.mrb[234].mxu1  ;;  %v11513_v39 = vld [vmem:[#allocation4 + $0xe0] ss:$0 sps:$4 sm:$0x11]  }
 0x566   :  { %v7076_v22 = vld [vmem:[#allocation4 + $0x10] sm:$0xf]  ;;  %v7191_v16 = vld [vmem:[#allocation4 + $0x14] sm:$0xf]  ;;  %v10495_v23 = vpack.c.bf16 %v6309_v15, %v6307_v13  ;;  %v7269_v26 = vld [vmem:[#allocation4 + $0x18] sm:$0xf] }
 0x567   :  { %v7111_v58 = vld [vmem:[#allocation4 + $0x10] sm:$0xf]  ;;  %v7347_v56 = vld [vmem:[#allocation4 + $0x1c] sm:$0xf]  ;;  %v6311_v14 = vpop.f32.mrb[242].mxu0  ;;  %6687 = vst [vmem:[#allocation4 + $0x60] sm:$0xff] %v10496_v33  ;;  %6986 = vrot.lane.b32.xlu1 %v11513_v39, %s11761_s2 }
 0x568   :  { %v7077_v30 = vld [vmem:[#allocation4 + $0x34] sm:$0xf]  ;;  %v7192_v27 = vld [vmem:[#allocation4 + $0x38] sm:$0xf]  ;;  %6686 = vst [vmem:[#allocation4 + $0x58] sm:$0xff] %v10495_v23  ;;  %v6384_v24 = vpop.f32.mrb[235].mxu1 }
 0x569   :  { %v7112_v25 = vld [vmem:[#allocation4 + $0x34] sm:$0xf]  ;;  %v9999_v31 = vcombine.low %v7076_v22, %v7077_v30  ;;  %v10011_v32 = vcombine.low %v7191_v16, %v7192_v27  ;;  %v7270_v47 = vld [vmem:[#allocation4 + $0x3c] sm:$0xf]  ;;  %v7348_v34 = vld [vmem:[#allocation4 + $0x40] sm:$0xf]  ;;  %v10501_v55 = vpack.c.bf16 %v6384_v24, %v6382_v21 }
 0x56a   :  { %v10003_v20 = vcombine.low %v7111_v58, %v7112_v25  ;;  %v6313_v1 = vpop.f32.mrb[243].mxu0  ;;  %v10019_v37 = vcombine.low %v7269_v26, %v7270_v47  ;;  %v10027_v38 = vcombine.low %v7347_v56, %v7348_v34  ;;  %v11514_v41 = vld [vmem:[#allocation4 + $0xe4] ss:$0 sps:$4 sm:$0x11]   ;;  %v11515_v45 = vld [vmem:[#allocation4 + $0x18] ss:$36 sps:$4 sm:$0xff]  }
 0x56b   :  { %v10500_v40 = vpack.c.bf16 %v6313_v1, %v6311_v14  ;;  %7105 = vst.msk [vmem:[#allocation5 + $0x100] sm:$0xff] %vm684_vm5, %v9999_v31  ;;  %v6388_v35 = vpop.f32.mrb[236].mxu1  ;;  %v6317_v43 = vpop.f32.mrb[244].mxu0  ;;  %6692 = vst [vmem:[#allocation4 + $0x84] sm:$0xff] %v10501_v55  ;;  %7064 = vrot.lane.b32.xlu0 %v11514_v41, %s11761_s2  ;;  %v11516_v46 = vld [vmem:[#allocation4 + $0x14] ss:$36 sps:$4 sm:$0xff]  }
 0x56c   :  { %7140 = vst.msk [vmem:[#allocation5] sm:$0xff] %vm3687_vm3, %v10003_v20  ;;  %7220 = vst.msk [vmem:[#allocation5 + $0x40] sm:$0xff] %vm3687_vm3, %v10011_v32  ;;  %v6319_v48 = vpop.f32.mrb[245].mxu0  ;;  %v6390_v29 = vpop.f32.mrb[237].mxu1  ;;  %7173 = vrot.lane.b32.xlu1 %v11516_v46, %s11761_s2  ;;  %v11517_v53 = vld [vmem:[#allocation4 + $0x1c] ss:$36 sps:$4 sm:$0xff]  }
 0x56d   :  { %7298 = vst.msk [vmem:[#allocation5 + $0x80] sm:$0xff] %vm3687_vm3, %v10019_v37  ;;  %7376 = vst.msk [vmem:[#allocation5 + $0xc0] sm:$0xff] %vm3687_vm3, %v10027_v38  ;;  %v10505_v49 = vpack.c.bf16 %v6319_v48, %v6317_v43  ;;  %v10506_v8 = vpack.c.bf16 %v6390_v29, %v6388_v35  ;;  %v6321_v28 = vpop.f32.mrb[246].mxu0  ;;  %v6392_v50 = vpop.f32.mrb[238].mxu1  ;;  %v6720_v15 = vld [vmem:[#allocation4 + $0xf0] sm:$0x11] }
 0x56e   :  { %6691 = vst [vmem:[#allocation4 + $0x7c] sm:$0xff] %v10500_v40  ;;  %v6323_v11 = vpop.f32.mrb[247].mxu0  ;;  %v6394_v52 = vpop.f32.mrb[239].mxu1  ;;  %v7271_v57 = vld [vmem:[#allocation4 + $0x60] sm:$0xf] }
 0x56f   :  { %7251 = vrot.lane.b32.xlu0 %v11515_v45, %s11761_s2  ;;  %6696 = vst [vmem:[#allocation4 + $0xa0] sm:$0xff] %v10505_v49  ;;  %6697 = vst [vmem:[#allocation4 + $0xa8] sm:$0xff] %v10506_v8  ;;  %v7078_v51 = vld [vmem:[#allocation4 + $0x58] sm:$0xf]  ;;  %v10510_v5 = vpack.c.bf16 %v6323_v11, %v6321_v28  ;;  %v10511_v59 = vpack.c.bf16 %v6394_v52, %v6392_v50  ;;  %v7193_v61 = vld [vmem:[#allocation4 + $0x5c] sm:$0xf] }
 0x570   :  { %v7113_v60 = vld [vmem:[#allocation4 + $0x58] sm:$0xf]  ;;  %v7349_v44 = vld [vmem:[#allocation4 + $0x64] sm:$0xf]  ;;  %7329 = vrot.lane.b32.xlu1 %v11517_v53, %s11761_s2  ;;  %v6717_v56 = vld [vmem:[#allocation4 + $0xe8] sm:$0x11] }
 0x571   :  { %6701 = vst [vmem:[#allocation4 + $0xc4] sm:$0xff] %v10510_v5  ;;  %6702 = vst [vmem:[#allocation4 + $0xcc] sm:$0xff] %v10511_v59 }
 0x572   :  { %v7272_v42 = vld [vmem:[#allocation4 + $0x84] sm:$0xf]  ;;  %v7350_v63 = vld [vmem:[#allocation4 + $0x88] sm:$0xf] }
 0x573   :  { %v7468_v62 = vld [vmem:[#allocation5 + $0x40] sm:$0xff]  ;;  %v10020_v9 = vcombine.low %v7271_v57, %v7272_v42  ;;  %v10028_v2 = vcombine.low %v7349_v44, %v7350_v63  ;;  %v6398_v13 = vpop.f32.mrb[240].mxu1  ;;  %v6327_v23 = vpop.f32.mrb[248].mxu0  ;;  %v11525_v37 = vld [vmem:[#allocation4 + $0x64] ss:$36 sps:$4 sm:$0xff]  }
 0x574   :  { %v7460_v6 = vld [vmem:[#allocation5] sm:$0xff]  ;;  %10851 = vmatprep.subr.bf16.mxu1 %v7468_v62  ;;  %v6400_v33 = vpop.f32.mrb[241].mxu1  ;;  %v6329_v27 = vpop.f32.mrb[249].mxu0  ;;  %v7301_v62 = vld [vmem:[#allocation5 + $0x98] sm:$0x1] }
 0x575   :  { %v7079_v7 = vld [vmem:[#allocation4 + $0x7c] sm:$0xf]  ;;  %v7194_v12 = vld [vmem:[#allocation4 + $0x80] sm:$0xf]  ;;  %10852 = vmatpush3.bf16.msra.mxu1 %v7460_v6  ;;  %7299 = vst.msk [vmem:[#allocation5 + $0x88] sm:$0xff] %vm3687_vm3, %v10020_v9  ;;  %7377 = vst.msk [vmem:[#allocation5 + $0xc8] sm:$0xff] %vm3687_vm3, %v10028_v2  ;;  %v10516_v14 = vpack.c.bf16 %v6400_v33, %v6398_v13  ;;  %v10515_v47 = vpack.c.bf16 %v6329_v27, %v6327_v23 }
 0x576   :  { %v10000_v17 = vcombine.low %v7078_v51, %v7079_v7  ;;  %v7114_v10 = vld [vmem:[#allocation4 + $0x7c] sm:$0xf]  ;;  %v10012_v22 = vcombine.low %v7193_v61, %v7194_v12  ;;  %v11518_v58 = vld [vmem:[#allocation4 + $0x60] ss:$36 sps:$4 sm:$0xff]   ;;  %v6402_v31 = vpop.f32.mrb[242].mxu1  ;;  %v6331_v24 = vpop.f32.mrb[250].mxu0 }
 0x577   :  { %v7484_v36 = vld [vmem:[#allocation5 + $0xc0] sm:$0xff]  ;;  %v10004_v19 = vcombine.low %v7113_v60, %v7114_v10  ;;  %7253 = vrot.lane.b32.xlu0 %v11518_v58, %s11761_s2  ;;  %v7195_v25 = vld [vmem:[#allocation4 + $0xa4] sm:$0xf]  ;;  %v7273_v20 = vld [vmem:[#allocation4 + $0xa8] sm:$0xf]  ;;  %v6721_v34 = vsel %vm13243_vm0, %v10516_v14, %v6720_v15  ;;  %v6403_v1 = vpop.f32.mrb[243].mxu1  ;;  %v6718_v46 = vsel %vm13243_vm0, %v10515_v47, %v6717_v56 }
 0x578   :  { %10873 = vmatprep.subr.bf16.mxu0 %v7484_v36  ;;  %7106 = vst.msk [vmem:[#allocation5 + $0x108] sm:$0xff] %vm684_vm5, %v10000_v17  ;;  %v11519_v16 = vld [vmem:[#allocation4 + $0x5c] ss:$36 sps:$4 sm:$0xff]   ;;  %v7351_v32 = vld [vmem:[#allocation4 + $0xac] sm:$0xf]  ;;  %v6332_v48 = vpop.f32.mrb[251].mxu0 }
 0x579   :  { %v7476_v26 = vld [vmem:[#allocation5 + $0x80] sm:$0xff]  ;;  %7141 = vst.msk [vmem:[#allocation5 + $0x8] sm:$0xff] %vm3687_vm3, %v10004_v19  ;;  %7221 = vst.msk [vmem:[#allocation5 + $0x48] sm:$0xff] %vm3687_vm3, %v10012_v22  ;;  %7175 = vrot.lane.b32.xlu1 %v11519_v16, %s11761_s2  ;;  %v7081_v38 = vld [vmem:[#allocation4 + $0xc4] sm:$0xf] }
 0x57a   :  { %10874 = vmatpush3.bf16.msra.mxu0 %v7476_v26  ;;  %v7080_v21 = vld [vmem:[#allocation4 + $0xa0] sm:$0xf]  ;;  %v7116_v55 = vld [vmem:[#allocation4 + $0xc4] sm:$0xf]  ;;  %v7196_v39 = vld [vmem:[#allocation4 + $0xc8] sm:$0xf] }
 0x57b   :  { %v7115_v30 = vld [vmem:[#allocation4 + $0xa0] sm:$0xf]  ;;  %6722 = vst [vmem:[#allocation4 + $0xf0] sm:$0x11] %v6721_v34  ;;  %v10001_v40 = vcombine.low %v7080_v21, %v7081_v38  ;;  %v10013_v35 = vcombine.low %v7195_v25, %v7196_v39  ;;  %v7274_v43 = vld [vmem:[#allocation4 + $0xcc] sm:$0xf] }
 0x57c   :  { %v10005_v41 = vcombine.low %v7115_v30, %v7116_v55  ;;  %v7352_v45 = vld [vmem:[#allocation4 + $0xd0] sm:$0xf]  ;;  %v10021_v29 = vcombine.low %v7273_v20, %v7274_v43  ;;  %6719 = vst [vmem:[#allocation4 + $0xe8] sm:$0x11] %v6718_v46  ;;  %v11526_v8 = vld [vmem:[#allocation4 + $0xa8] ss:$36 sps:$4 sm:$0xff]  }
 0x57d   :  { %v10029_v49 = vcombine.low %v7351_v32, %v7352_v45  ;;  %7331 = vrot.lane.b32.xlu1 %v11525_v37, %s11761_s2  ;;  %7107 = vst.msk [vmem:[#allocation5 + $0x110] sm:$0xff] %vm684_vm5, %v10001_v40  ;;  %v7485_v28 = vld [vmem:[#allocation5 + $0xc8] sm:$0xff]  ;;  %v11070_v50 = vpop.f32.mrb[252].mxu0  ;;  %7255 = vrot.lane.b32.xlu0 %v11526_v8, %s11761_s2  ;;  %v6723_v63 = vld [vmem:[#allocation4 + $0xf8] sm:$0x1] }
 0x57e   :  { %7142 = vst.msk [vmem:[#allocation5 + $0x10] sm:$0xff] %vm3687_vm3, %v10005_v41  ;;  %7222 = vst.msk [vmem:[#allocation5 + $0x50] sm:$0xff] %vm3687_vm3, %v10013_v35  ;;  %10875 = vmatprep.subr.bf16.mxu0 %v7485_v28  ;;  %v11527_v11 = vld [vmem:[#allocation4 + $0xa4] ss:$36 sps:$4 sm:$0xff]   ;;  %v10497_v52 = vpack.c.bf16 %v11070_v50, %v11070_v50  ;;  %v6439_v53 = vpop.f32.mrb[253].mxu0 }
 0x57f   :  { %7300 = vst.msk [vmem:[#allocation5 + $0x90] sm:$0xff] %vm3687_vm3, %v10021_v29  ;;  %7378 = vst.msk [vmem:[#allocation5 + $0xd0] sm:$0xff] %vm3687_vm3, %v10029_v49  ;;  %v10487_v57 = vpack.c.bf16 %v6439_v53, %v6439_v53  ;;  %v7477_v5 = vld [vmem:[#allocation5 + $0x88] sm:$0xff]  ;;  %v11071_v59 = vpop.f32.mrb[254].mxu0  ;;  %v7379_v7 = vld [vmem:[#allocation5 + $0xd8] sm:$0x1] }
 0x580   :  { %v7469_v4 = vld [vmem:[#allocation5 + $0x48] sm:$0xff]  ;;  %6688 = vst [vmem:[#allocation4 + $0x68] sm:$0xf] %v10497_v52  ;;  %v10502_v61 = vpack.c.bf16 %v11071_v59, %v11071_v59  ;;  %v6442_v44 = vpop.f32.mrb[255].mxu0  ;;  %10876 = vmatpush3.bf16.msra.mxu0 %v7477_v5  ;;  %v7145_v17 = vld [vmem:[#allocation5 + $0x18] sm:$0x1] }
 0x581   :  { %v7461_v51 = vld [vmem:[#allocation5 + $0x8] sm:$0xff]  ;;  %10853 = vmatprep.subr.bf16.mxu1 %v7469_v4  ;;  %7177 = vrot.lane.b32.xlu1 %v11527_v11, %s11761_s2  ;;  %6678 = vst [vmem:[#allocation4 + $0x20] sm:$0xf] %v10487_v57  ;;  %v10492_v42 = vpack.c.bf16 %v6442_v44, %v6442_v44  ;;  %v7223_v15 = vld [vmem:[#allocation5 + $0x58] sm:$0x1] }
 0x582   :  { %10854 = vmatpush3.bf16.msra.mxu1 %v7461_v51  ;;  %v11523_v6 = vld [vmem:[#allocation4 + $0xf0] ss:$0 sps:$4 sm:$0x11]   ;;  %v11524_v9 = vld [vmem:[#allocation4 + $0xf4] ss:$0 sps:$4 sm:$0x11]  }
 0x583   :  { %6693 = vst [vmem:[#allocation4 + $0x8c] sm:$0xf] %v10502_v61  ;;  %6683 = vst [vmem:[#allocation4 + $0x44] sm:$0xf] %v10492_v42  ;;  %v11074_v2 = vpop.f32.mrb[0].mxu0  ;;  %v7302_v10 = vsel %vm13312_vm10, %v11523_v6, %v7301_v62  ;;  %v7380_v19 = vsel %vm13312_vm10, %v11524_v9, %v7379_v7 }
 0x584   :  { %v11521_v12 = vld [vmem:[#allocation4 + $0xe8] ss:$0 sps:$4 sm:$0x11]   ;;  %v10517_v13 = vpack.c.bf16 %v11074_v2, %v11074_v2  ;;  %7303 = vst [vmem:[#allocation5 + $0x98] sm:$0x1] %v7302_v10  ;;  %v6455_v33 = vpop.f32.mrb[1].mxu0 }
 0x585   :  { %v7470_v36 = vld [vmem:[#allocation5 + $0x50] sm:$0xff]  ;;  %7381 = vst [vmem:[#allocation5 + $0xd8] sm:$0x1] %v7380_v19  ;;  %v7146_v26 = vsel %vm13312_vm10, %v11521_v12, %v7145_v17  ;;  %v10507_v14 = vpack.c.bf16 %v6455_v33, %v6455_v33  ;;  %v11075_v25 = vpop.f32.mrb[2].mxu0  ;;  %v11533_v35 = vld [vmem:[#allocation4 + $0x98] ss:$36 sps:$4 sm:$0xff]  }
 0x586   :  { %v11522_v22 = vld [vmem:[#allocation4 + $0xec] ss:$0 sps:$4 sm:$0x11]   ;;  %10855 = vmatprep.subr.bf16.mxu1 %v7470_v36  ;;  %v11528_v16 = vld [vmem:[#allocation4 + $0xf0] ss:$0 sps:$4 sm:$0x11]   ;;  %v6724_v23 = vsel %vm13228_vm4, %v10517_v13, %v6723_v63 }
 0x587   :  { %v7486_v58 = vld [vmem:[#allocation5 + $0xd0] sm:$0xff]  ;;  %v7427_v56 = vld [vmem:[#allocation4 + $0x68] sm:$0xf]  ;;  %6725 = vst [vmem:[#allocation4 + $0xf8] sm:$0x1] %v6724_v23  ;;  %v7224_v27 = vsel %vm13312_vm10, %v11522_v22, %v7223_v15  ;;  %7257 = vrot.lane.b32.xlu0 %v11528_v16, %s11761_s2  ;;  %v6458_v54 = vpop.f32.mrb[3].mxu0 }
 0x588   :  { %10877 = vmatprep.subr.bf16.mxu0 %v7486_v58  ;;  %v7462_v21 = vld [vmem:[#allocation5 + $0x10] sm:$0xff]  ;;  %7147 = vst [vmem:[#allocation5 + $0x18] sm:$0x1] %v7146_v26  ;;  %v7425_v31 = vld [vmem:[#allocation4 + $0x20] sm:$0xf]  ;;  %v10512_v47 = vpack.c.bf16 %v6458_v54, %v6458_v54 }
 0x589   :  { %v7478_v30 = vld [vmem:[#allocation5 + $0x90] sm:$0xff]  ;;  %10856 = vmatpush3.bf16.msra.mxu1 %v7462_v21  ;;  %7225 = vst [vmem:[#allocation5 + $0x58] sm:$0x1] %v7224_v27  ;;  %6698 = vst [vmem:[#allocation4 + $0xb0] sm:$0xf] %v10507_v14 }
 0x58a   :  { %v7428_v20 = vld [vmem:[#allocation4 + $0x8c] sm:$0xf]  ;;  %10878 = vmatpush3.bf16.msra.mxu0 %v7478_v30  ;;  %v7426_v24 = vld [vmem:[#allocation4 + $0x44] sm:$0xf]  ;;  %6703 = vst [vmem:[#allocation4 + $0xd4] sm:$0xf] %v10512_v47 }
 0x58b   :  { %v11530_v32 = vld [vmem:[#allocation4 + $0xec] ss:$0 sps:$4 sm:$0x11]   ;;  %v10036_v34 = vcombine.low %v7427_v56, %v7428_v20  ;;  %v10035_v1 = vcombine.low %v7425_v31, %v7426_v24  ;;  %v11532_v55 = vld [vmem:[#allocation4 + $0x20] ss:$36 sps:$4 sm:$0xff]   ;;  %v7479_v39 = vld [vmem:[#allocation5 + $0x98] sm:$0xff] }
 0x58c   :  { %v11531_v37 = vld [vmem:[#allocation4 + $0x68] ss:$36 sps:$4 sm:$0xff]   ;;  %7179 = vrot.lane.b32.xlu0 %v11530_v32, %s11761_s2  ;;  %v7487_v38 = vld [vmem:[#allocation5 + $0xd8] sm:$0xff]  ;;  %7407 = vrot.lane.b32.xlu1 %v11532_v55, %s11761_s2 }
 0x58d   :  { %7455 = vst.msk [vmem:[#allocation5 + $0x108] sm:$0xff] %vm3687_vm3, %v10036_v34  ;;  %7454 = vst.msk [vmem:[#allocation5 + $0x100] sm:$0xff] %vm3687_vm3, %v10035_v1  ;;  %10879 = vmatprep.subr.bf16.mxu0 %v7487_v38  ;;  %v11520_v43 = vld [vmem:[#allocation4 + $0xe8] ss:$0 sps:$4 sm:$0x11]  }
 0x58e   :  { %10880 = vmatpush3.bf16.msra.mxu0 %v7479_v39  ;;  %v11540_v49 = vld [vmem:[%s13986_s6 + $0x4] ss:$20 sps:$4 sm:$0xff]   ;;  %v7108_v28 = vld [vmem:[#allocation5 + $0x118] sm:$0x1] }
 0x58f   :  { %v7463_v40 = vld [vmem:[#allocation5 + $0x18] sm:$0xff]  ;;  %v11534_v8 = vld [vmem:[#allocation4 + $0xac] ss:$36 sps:$4 sm:$0xff]   ;;  %7560 = vmatprep.mubr.bf16.mxu1 %v11540_v49  ;;  %v7109_v50 = vsel %vm13267_vm8, %v11520_v43, %v7108_v28 }
 0x590   :  { %v7471_v41 = vld [vmem:[#allocation5 + $0x58] sm:$0xff]  ;;  %7409 = vrot.lane.b32.xlu0 %v11531_v37, %s11761_s2  ;;  %v7429_v45 = vld [vmem:[#allocation4 + $0xb0] sm:$0xf]  ;;  %6984 = vrot.lane.b32.xlu1 %v11533_v35, %s11761_s2  ;;  %7110 = vst [vmem:[#allocation5 + $0x118] sm:$0x1] %v7109_v50 }
 0x591   :  { %10857 = vmatprep.subr.bf16.mxu1 %v7471_v41  ;;  %v7430_v46 = vld [vmem:[#allocation4 + $0xd4] sm:$0xf]  ;;  %v11537_v4 = vld [vmem:[#allocation4 + $0xf8] ss:$0 sps:$4 sm:$0x11]  }
 0x592   :  { %10858 = vmatpush3.bf16.msra.mxu1 %v7463_v40  ;;  %v11535_v48 = vld [vmem:[#allocation4 + $0xb0] ss:$36 sps:$4 sm:$0xff]   ;;  %v10037_v29 = vcombine.low %v7429_v45, %v7430_v46  ;;  %v11529_v53 = vld [vmem:[#allocation4 + $0xf8] ss:$0 sps:$4 sm:$0x11]  }
 0x593   :  { %v11536_v11 = vld [vmem:[#allocation4 + $0xf4] ss:$0 sps:$4 sm:$0x11]  }
 0x594   :  { %7411 = vrot.lane.b32.xlu0 %v11535_v48, %s11761_s2  ;;  %7456 = vst.msk [vmem:[#allocation5 + $0x110] sm:$0xff] %vm3687_vm3, %v10037_v29  ;;  %7333 = vrot.lane.b32.xlu1 %v11534_v8, %s11761_s2  ;;  %v11543_v52 = vld [vmem:[%s13986_s6 + $0xc] ss:$20 sps:$4 sm:$0xff]  }
 0x595   :  { %7601 = vmatprep.mubr.bf16.mxu0 %v11543_v52  ;;  %v6839_v17 = vld [vmem:[#allocation5 + $0x38] sm:$0x1] }
 0x596   :  { %v6917_v10 = vld [vmem:[#allocation5 + $0x78] sm:$0x1] }
 0x597   :  { %v7457_v51 = vld [vmem:[#allocation5 + $0x118] sm:$0x1] }
 0x598   :  { %7413 = vrot.lane.b32.xlu0 %v11537_v4, %s11761_s2  ;;  %7335 = vrot.lane.b32.xlu1 %v11536_v11, %s11761_s2  ;;  %v7458_v57 = vsel %vm13312_vm10, %v11529_v53, %v7457_v51  ;;  %v6995_v19 = vld [vmem:[#allocation5 + $0xb8] sm:$0x1]  ;;  %v7492_v11 = vld [vmem:[#allocation5 + $0x100] sm:$0xff] }
 0x599   :  { %7459 = vst [vmem:[#allocation5 + $0x118] sm:$0x1] %v7458_v57  ;;  %v7073_v22 = vld [vmem:[#allocation5 + $0xf8] sm:$0x1] }
 0x59a   :  { %v11538_v48 = vld [vmem:[%s13986_s6] ss:$20 sps:$4 sm:$0xff]  }
 0x5bc   :  { %v6903_v5 = vpop.permute.xlu0 %6902 }
 0x5bd   :  { %6914 = vst.msk [vmem:[#allocation5 + $0x60] sm:$0xff] %vm684_vm5, %v6903_v5  ;;  %v6825_v59 = vpop.permute.xlu1 %6824 }
 0x5be   :  { %6836 = vst.msk [vmem:[#allocation5 + $0x20] sm:$0xff] %vm684_vm5, %v6825_v59 }
 0x5c0   :  { %v7059_v61 = vpop.permute.xlu0 %7058 }
 0x5c1   :  { %7070 = vst.msk [vmem:[#allocation5 + $0xe0] sm:$0xff] %vm684_vm5, %v7059_v61  ;;  %v6981_v44 = vpop.permute.xlu1 %6980  ;;  %v7493_v61 = vld [vmem:[#allocation5 + $0x108] sm:$0xff] }
 0x5c2   :  { %6992 = vst.msk [vmem:[#allocation5 + $0xa0] sm:$0xff] %vm684_vm5, %v6981_v44 }
 0x5c5   :  { %v6905_v62 = vpop.permute.xlu0 %6904 }
 0x5c6   :  { %6915 = vst.msk [vmem:[#allocation5 + $0x68] sm:$0xff] %vm684_vm5, %v6905_v62  ;;  %v6827_v6 = vpop.permute.xlu1 %6826  ;;  %v7494_v62 = vld [vmem:[#allocation5 + $0x110] sm:$0xff] }
 0x5c7   :  { %6837 = vst.msk [vmem:[#allocation5 + $0x28] sm:$0xff] %vm684_vm5, %v6827_v6 }
 0x5c9   :  { %v7061_v42 = vpop.permute.xlu0 %7060 }
 0x5ca   :  { %7071 = vst.msk [vmem:[#allocation5 + $0xe8] sm:$0xff] %vm684_vm5, %v7061_v42  ;;  %v6983_v63 = vpop.permute.xlu1 %6982  ;;  %v11556_v42 = vld [vmem:[%s13985_s3 + $0x24c] ss:$36 sps:$4 sm:$0xff]  }
 0x5cb   :  { %6993 = vst.msk [vmem:[#allocation5 + $0xa8] sm:$0xff] %vm684_vm5, %v6983_v63  ;;  %v11541_v63 = vld [vmem:[%s13986_s6 + $0x8] ss:$20 sps:$4 sm:$0xff]  }
 0x5cd   :  { %v6907_v7 = vpop.permute.xlu0 %6906 }
 0x5ce   :  { %6916 = vst.msk [vmem:[#allocation5 + $0x70] sm:$0xff] %vm684_vm5, %v6907_v7  ;;  %v6829_v9 = vpop.permute.xlu1 %6828  ;;  %v11547_v7 = vld [vmem:[%s13985_s3 + $0x244] ss:$36 sps:$4 sm:$0xff]  }
 0x5cf   :  { %6838 = vst.msk [vmem:[#allocation5 + $0x30] sm:$0xff] %vm684_vm5, %v6829_v9  ;;  %v11554_v9 = vld [vmem:[%s13985_s3 + $0x248] ss:$36 sps:$4 sm:$0xff]  }
 0x5d1   :  { %v7063_v2 = vpop.permute.xlu0 %7062 }
 0x5d2   :  { %7072 = vst.msk [vmem:[#allocation5 + $0xf0] sm:$0xff] %vm684_vm5, %v7063_v2  ;;  %v7495_v2 = vld [vmem:[#allocation5 + $0x118] sm:$0xff] }
 0x5d5   :  { %v6831_v12 = vpop.permute.xlu1 %6830 }
 0x5d6   :  { %v6840_v13 = vsel %vm13267_vm8, %v6831_v12, %v6839_v17  ;;  %v6909_v36 = vpop.permute.xlu0 %6908  ;;  %v11544_v17 = vld [vmem:[%s13986_s6 + $0x10] ss:$20 sps:$4 sm:$0xff]  }
 0x5d7   :  { %6841 = vst [vmem:[#allocation5 + $0x38] sm:$0x1] %v6840_v13  ;;  %v6918_v15 = vsel %vm13267_vm8, %v6909_v36, %v6917_v10  ;;  %v11562_v10 = vld [vmem:[%s13985_s3 + $0x294] ss:$36 sps:$4 sm:$0xff]   ;;  %v11545_v12 = vld [vmem:[%s13985_s3 + $0x240] ss:$36 sps:$4 sm:$0xff]  }
 0x5d8   :  { %6919 = vst [vmem:[#allocation5 + $0x78] sm:$0x1] %v6918_v15  ;;  %v11550_v13 = vld [vmem:[%s13985_s3 + $0x28c] ss:$36 sps:$4 sm:$0xff]  }
 0x5d9   :  { %v6987_v58 = vpop.permute.xlu1 %6986  ;;  %v11560_v36 = vld [vmem:[%s13985_s3 + $0x290] ss:$36 sps:$4 sm:$0xff]   ;;  %v11548_v15 = vld [vmem:[%s13985_s3 + $0x288] ss:$36 sps:$4 sm:$0xff]  }
 0x5da   :  { %v6996_v23 = vsel %vm13267_vm8, %v6987_v58, %v6995_v19  ;;  %v11553_v19 = vld [vmem:[%s13985_s3 + $0x2d4] ss:$36 sps:$4 sm:$0xff]   ;;  %v11559_v58 = vld [vmem:[%s13985_s3 + $0x31c] ss:$36 sps:$4 sm:$0xff]  }
 0x5db   :  { %6997 = vst [vmem:[#allocation5 + $0xb8] sm:$0x1] %v6996_v23  ;;  %v11563_v23 = vld [vmem:[%s13985_s3 + $0x360] ss:$36 sps:$4 sm:$0xff]  }
 0x5dd   :  { %v7065_v16 = vpop.permute.xlu0 %7064 }
 0x5de   :  { %v7074_v33 = vsel %vm13267_vm8, %v7065_v16, %v7073_v22  ;;  %v7174_v56 = vpop.permute.xlu1 %7173  ;;  %v7188_v38 = vld [vmem:[#allocation5 + $0x38] sm:$0x1]  ;;  %v11551_v22 = vld [vmem:[%s13985_s3 + $0x2d0] ss:$36 sps:$4 sm:$0xff]   ;;  %v11557_v16 = vld [vmem:[%s13985_s3 + $0x318] ss:$36 sps:$4 sm:$0xff]  }
 0x5df   :  { %7075 = vst [vmem:[#allocation5 + $0xf8] sm:$0x1] %v7074_v33  ;;  %7185 = vst.msk [vmem:[#allocation5 + $0x20] sm:$0xff] %vm3687_vm3, %v7174_v56  ;;  %v7266_v34 = vld [vmem:[#allocation5 + $0x78] sm:$0x1] }
 0x5e0   :  { %v11565_v33 = vld [vmem:[%s13985_s3 + $0x364] ss:$36 sps:$4 sm:$0xff]   ;;  %v11568_v56 = vld [vmem:[%s13985_s3 + $0x2dc] ss:$36 sps:$4 sm:$0xff]  }
 0x5e1   :  { %v7252_v26 = vpop.permute.xlu0 %7251 }
 0x5e2   :  { %7263 = vst.msk [vmem:[#allocation5 + $0x60] sm:$0xff] %vm3687_vm3, %v7252_v26  ;;  %v7330_v14 = vpop.permute.xlu1 %7329  ;;  %v7344_v53 = vld [vmem:[#allocation5 + $0xb8] sm:$0x1]  ;;  %v11566_v26 = vld [vmem:[%s13985_s3 + $0x2d8] ss:$36 sps:$4 sm:$0xff]  }
 0x5e3   :  { %7341 = vst.msk [vmem:[#allocation5 + $0xa0] sm:$0xff] %vm3687_vm3, %v7330_v14  ;;  %v11569_v14 = vld [vmem:[%s13985_s3 + $0x3a8] ss:$36 sps:$4 sm:$0xff]  }
 0x5e6   :  { %v7464_v27 = vld [vmem:[#allocation5 + $0x20] sm:$0xff]  ;;  %v7422_v50 = vld [vmem:[#allocation5 + $0xf8] sm:$0x1] }
 0x5e9   :  { %v7254_v21 = vpop.permute.xlu0 %7253  ;;  %v7472_v25 = vld [vmem:[#allocation5 + $0x60] sm:$0xff] }
 0x5ea   :  { %7264 = vst.msk [vmem:[#allocation5 + $0x68] sm:$0xff] %vm3687_vm3, %v7254_v21  ;;  %10859 = vmatprep.subr.bf16.mxu1 %v7472_v25  ;;  %v7480_v8 = vld [vmem:[#allocation5 + $0xa0] sm:$0xff] }
 0x5eb   :  { %v7176_v30 = vpop.permute.xlu1 %7175  ;;  %10860 = vmatpush3.bf16.msra.mxu1 %v7464_v27  ;;  %v11571_v21 = vld [vmem:[%s13985_s3 + $0x3ac] ss:$36 sps:$4 sm:$0xff]   ;;  %v11574_v25 = vld [vmem:[%s13985_s3 + $0x324] ss:$36 sps:$4 sm:$0xff]  }
 0x5ec   :  { %7186 = vst.msk [vmem:[#allocation5 + $0x28] sm:$0xff] %vm3687_vm3, %v7176_v30  ;;  %v11572_v30 = vld [vmem:[%s13985_s3 + $0x320] ss:$36 sps:$4 sm:$0xff]   ;;  %v11575_v27 = vld [vmem:[%s13985_s3 + $0x3f0] ss:$36 sps:$4 sm:$0xff]  }
 0x5ef   :  { %v7332_v3 = vpop.permute.xlu1 %7331  ;;  %v7256_v31 = vpop.permute.xlu0 %7255 }
 0x5f0   :  { %7342 = vst.msk [vmem:[#allocation5 + $0xa8] sm:$0xff] %vm3687_vm3, %v7332_v3  ;;  %7265 = vst.msk [vmem:[#allocation5 + $0x70] sm:$0xff] %vm3687_vm3, %v7256_v31  ;;  %v11577_v3 = vld [vmem:[%s13985_s3 + $0x3f4] ss:$36 sps:$4 sm:$0xff]   ;;  %v11578_v31 = vld [vmem:[%s13985_s3 + $0x368] ss:$36 sps:$4 sm:$0xff]  }
 0x5f1   :  { %v7473_v54 = vld [vmem:[#allocation5 + $0x68] sm:$0xff] }
 0x5f2   :  { %10861 = vmatprep.subr.bf16.mxu1 %v7473_v54  ;;  %v11580_v54 = vld [vmem:[%s13985_s3 + $0x36c] ss:$36 sps:$4 sm:$0xff]  }
 0x5f3   :  { %v7178_v20 = vpop.permute.xlu1 %7177  ;;  %v7465_v32 = vld [vmem:[#allocation5 + $0x28] sm:$0xff] }
 0x5f4   :  { %7187 = vst.msk [vmem:[#allocation5 + $0x30] sm:$0xff] %vm3687_vm3, %v7178_v20  ;;  %10862 = vmatpush3.bf16.msra.mxu1 %v7465_v32  ;;  %v11581_v20 = vld [vmem:[%s13985_s3 + $0x438] ss:$36 sps:$4 sm:$0xff]  }
 0x5f5   :  { %v11583_v32 = vld [vmem:[%s13985_s3 + $0x43c] ss:$36 sps:$4 sm:$0xff]  }
 0x5f7   :  { %v7474_v47 = vld [vmem:[#allocation5 + $0x70] sm:$0xff]  ;;  %v7481_v5 = vld [vmem:[#allocation5 + $0xa8] sm:$0xff] }
 0x5f8   :  { %10863 = vmatprep.subr.bf16.mxu1 %v7474_v47  ;;  %v11586_v47 = vld [vmem:[%s13985_s3 + $0x3b4] ss:$36 sps:$4 sm:$0xff]  }
 0x5f9   :  { %v7258_v24 = vpop.permute.xlu0 %7257 }
 0x5fa   :  { %v7267_v37 = vsel %vm13312_vm10, %v7258_v24, %v7266_v34  ;;  %v11589_v34 = vld [vmem:[%s13985_s3 + $0x254] ss:$36 sps:$4 sm:$0xff]  }
 0x5fb   :  { %v7466_v1 = vld [vmem:[#allocation5 + $0x30] sm:$0xff]  ;;  %7268 = vst [vmem:[#allocation5 + $0x78] sm:$0x1] %v7267_v37  ;;  %v11584_v24 = vld [vmem:[%s13985_s3 + $0x3b0] ss:$36 sps:$4 sm:$0xff]  }
 0x5fc   :  { %10864 = vmatpush3.bf16.msra.mxu1 %v7466_v1  ;;  %v11592_v1 = vld [vmem:[%s13985_s3 + $0x3fc] ss:$36 sps:$4 sm:$0xff]  }
 0x5fd   :  { %v11590_v37 = vld [vmem:[%s13985_s3 + $0x3f8] ss:$36 sps:$4 sm:$0xff]  }
 0x5fe   :  { %v7180_v55 = vpop.permute.xlu0 %7179  ;;  %v7408_v40 = vpop.permute.xlu1 %7407 }
 0x5ff   :  { %v7189_v39 = vsel %vm13312_vm10, %v7180_v55, %v7188_v38  ;;  %7419 = vst.msk [vmem:[#allocation5 + $0xe0] sm:$0xff] %vm3687_vm3, %v7408_v40  ;;  %v11598_v38 = vld [vmem:[%s13985_s3 + $0x444] ss:$36 sps:$4 sm:$0xff]  }
 0x600   :  { %7190 = vst [vmem:[#allocation5 + $0x38] sm:$0x1] %v7189_v39  ;;  %v11596_v55 = vld [vmem:[%s13985_s3 + $0x440] ss:$36 sps:$4 sm:$0xff]  }
 0x601   :  { %v11604_v39 = vld [vmem:[%s13985_s3 + $0x25c] ss:$36 sps:$4 sm:$0xff]  }
 0x602   :  { %v7410_v41 = vpop.permute.xlu0 %7409  ;;  %v7475_v35 = vld [vmem:[#allocation5 + $0x78] sm:$0xff]  ;;  %v6985_v43 = vpop.permute.xlu1 %6984 }
 0x603   :  { %7420 = vst.msk [vmem:[#allocation5 + $0xe8] sm:$0xff] %vm3687_vm3, %v7410_v41  ;;  %10865 = vmatprep.subr.bf16.mxu1 %v7475_v35 }
 0x604   :  { %6994 = vst.msk [vmem:[#allocation5 + $0xb0] sm:$0xff] %vm684_vm5, %v6985_v43 }
 0x606   :  { %v7412_v45 = vpop.permute.xlu0 %7411  ;;  %v7334_v29 = vpop.permute.xlu1 %7333  ;;  %v7488_v49 = vld [vmem:[#allocation5 + $0xe0] sm:$0xff] }
 0x607   :  { %v7467_v46 = vld [vmem:[#allocation5 + $0x38] sm:$0xff]  ;;  %7421 = vst.msk [vmem:[#allocation5 + $0xf0] sm:$0xff] %vm3687_vm3, %v7412_v45  ;;  %7343 = vst.msk [vmem:[#allocation5 + $0xb0] sm:$0xff] %vm3687_vm3, %v7334_v29  ;;  %10881 = vmatprep.subr.bf16.mxu0 %v7488_v49 }
 0x608   :  { %10866 = vmatpush3.bf16.msra.mxu1 %v7467_v46  ;;  %10882 = vmatpush3.bf16.msra.mxu0 %v7480_v8 }
 0x609   :  { %11076 = vmatprep.subr.bf16.mxu1 %v11758_v0 }
 0x60a   :  { %v7489_v28 = vld [vmem:[#allocation5 + $0xe8] sm:$0xff]  ;;  %v7414_v4 = vpop.permute.xlu0 %7413  ;;  %v7336_v51 = vpop.permute.xlu1 %7335 }
 0x60b   :  { %7561 = vmatmul.mubr.bf16.vlgmr.msra.gmra.mrb[244].mxu1 %v11538_v48  ;;  %10883 = vmatprep.subr.bf16.mxu0 %v7489_v28  ;;  %v7423_v52 = vsel %vm13312_vm10, %v7414_v4, %v7422_v50  ;;  %v7345_v57 = vsel %vm13312_vm10, %v7336_v51, %v7344_v53  ;;  %v10039_v48 = vld [vmem:[%s13983_s4 + $0x2] ss:$0 sm:$0xff] }
 0x60c   :  { %11077 = vmatpush3.bf16.msra.mxu1 %v7492_v11  ;;  %7424 = vst [vmem:[#allocation5 + $0xf8] sm:$0x1] %v7423_v52  ;;  %11084 = vmatprep.mubr.msk.bf16.mxu1 %vm11759_vm1, %v11758_v0  ;;  %7346 = vst [vmem:[#allocation5 + $0xb8] sm:$0x1] %v7345_v57 }
 0x60d   :  { %11078 = vmatprep.subr.bf16.mxu1 %v11758_v0  ;;  %10884 = vmatpush3.bf16.msra.mxu0 %v7481_v5 }
 0x60e   :  { %v7490_v59 = vld [vmem:[#allocation5 + $0xf0] sm:$0xff] }
 0x60f   :  { %10885 = vmatprep.subr.bf16.mxu0 %v7490_v59  ;;  %v7482_v44 = vld [vmem:[#allocation5 + $0xb0] sm:$0xff] }
 0x610   :  { %11079 = vmatpush3.bf16.msra.mxu1 %v7493_v61 }
 0x611   :  { %11080 = vmatprep.subr.bf16.mxu1 %v11758_v0  ;;  %10886 = vmatpush3.bf16.msra.mxu0 %v7482_v44 }
 0x613   :  { %v7491_v6 = vld [vmem:[#allocation5 + $0xf8] sm:$0xff] }
 0x614   :  { %11081 = vmatpush3.bf16.msra.mxu1 %v7494_v62  ;;  %10887 = vmatprep.subr.bf16.mxu0 %v7491_v6  ;;  %v7483_v60 = vld [vmem:[#allocation5 + $0xb8] sm:$0xff] }
 0x615   :  { %11082 = vmatprep.subr.bf16.mxu1 %v11758_v0  ;;  %10888 = vmatpush3.bf16.msra.mxu0 %v7483_v60 }
 0x616   :  { %8153 = vmatprep.subr.bf16.mxu0 %v11556_v42 }
 0x618   :  { %11083 = vmatpush3.bf16.msra.mxu1 %v7495_v2  ;;  %7602 = vmatmul.mubr.bf16.vlgmr.msra.gmra.mrb[4].mxu0 %v11541_v63 }
 0x619   :  { %8110 = vmatprep.subr.bf16.mxu1 %v11547_v7  ;;  %8154 = vmatpush1.bf16.msra.mxu0 %v11554_v9  ;;  %v11587_v7 = vld [vmem:[%s13985_s3 + $0x250] ss:$36 sps:$4 sm:$0xff]   ;;  %v11602_v9 = vld [vmem:[%s13985_s3 + $0x258] ss:$36 sps:$4 sm:$0xff]  }
 0x61a   :  { %8185 = vmatprep.mubr.bf16.mxu0 %v13092_v18  ;;  %8155 = vmatprep.subr.bf16.mxu0 %v11562_v10  ;;  %v11610_v10 = vld [vmem:[%s13985_s3 + $0x2a4] ss:$36 sps:$4 sm:$0xff]  }
 0x61b   :  { %11085 = vmatmul.mubr.msk.bf16.vlgmr.msra.gmra.mrb[248].mxu1 %vm684_vm5, %v11544_v17  ;;  %v11595_v17 = vld [vmem:[%s13985_s3 + $0x29c] ss:$36 sps:$4 sm:$0xff]  }
 0x61c   :  { %8111 = vmatpush1.bf16.msra.mxu1 %v11545_v12  ;;  %8142 = vmatprep.mubr.bf16.mxu1 %v13092_v18  ;;  %v11593_v12 = vld [vmem:[%s13985_s3 + $0x298] ss:$36 sps:$4 sm:$0xff]  }
 0x61d   :  { %8112 = vmatprep.subr.bf16.mxu1 %v11550_v13  ;;  %8156 = vmatpush1.bf16.msra.mxu0 %v11560_v36  ;;  %v11608_v13 = vld [vmem:[%s13985_s3 + $0x2a0] ss:$36 sps:$4 sm:$0xff]  }
 0x61e   :  { %8157 = vmatprep.subr.bf16.mxu0 %v11568_v56  ;;  %v11601_v36 = vld [vmem:[%s13985_s3 + $0x2e4] ss:$36 sps:$4 sm:$0xff]   ;;  %v11628_v56 = vld [vmem:[%s13985_s3 + $0x37c] ss:$36 sps:$4 sm:$0xff]  }
 0x620   :  { %8113 = vmatpush1.bf16.msra.mxu1 %v11548_v15  ;;  %v11616_v15 = vld [vmem:[%s13985_s3 + $0x2ec] ss:$36 sps:$4 sm:$0xff]  }
 0x621   :  { %8114 = vmatprep.subr.bf16.mxu1 %v11553_v19  ;;  %8158 = vmatpush1.bf16.msra.mxu0 %v11566_v26  ;;  %v11599_v19 = vld [vmem:[%s13985_s3 + $0x2e0] ss:$36 sps:$4 sm:$0xff]   ;;  %v11613_v26 = vld [vmem:[%s13985_s3 + $0x374] ss:$36 sps:$4 sm:$0xff]  }
 0x622   :  { %8159 = vmatprep.subr.bf16.mxu0 %v11574_v25  ;;  %v11634_v25 = vld [vmem:[%s13985_s3 + $0x3c4] ss:$36 sps:$4 sm:$0xff]  }
 0x624   :  { %8115 = vmatpush1.bf16.msra.mxu1 %v11551_v22  ;;  %v11614_v22 = vld [vmem:[%s13985_s3 + $0x2e8] ss:$36 sps:$4 sm:$0xff]  }
 0x625   :  { %8116 = vmatprep.subr.bf16.mxu1 %v11559_v58  ;;  %8160 = vmatpush1.bf16.msra.mxu0 %v11572_v30  ;;  %v11607_v58 = vld [vmem:[%s13985_s3 + $0x32c] ss:$36 sps:$4 sm:$0xff]   ;;  %v11619_v30 = vld [vmem:[%s13985_s3 + $0x3bc] ss:$36 sps:$4 sm:$0xff]  }
 0x626   :  { %8161 = vmatprep.subr.bf16.mxu0 %v11580_v54  ;;  %v11637_v54 = vld [vmem:[%s13985_s3 + $0x40c] ss:$36 sps:$4 sm:$0xff]  }
 0x628   :  { %8117 = vmatpush1.bf16.msra.mxu1 %v11557_v16  ;;  %v11622_v16 = vld [vmem:[%s13985_s3 + $0x334] ss:$36 sps:$4 sm:$0xff]  }
 0x629   :  { %8118 = vmatprep.subr.bf16.mxu1 %v11565_v33  ;;  %8162 = vmatpush1.bf16.msra.mxu0 %v11578_v31  ;;  %v11620_v33 = vld [vmem:[%s13985_s3 + $0x330] ss:$36 sps:$4 sm:$0xff]   ;;  %v11625_v31 = vld [vmem:[%s13985_s3 + $0x404] ss:$36 sps:$4 sm:$0xff]  }
 0x62a   :  { %8163 = vmatprep.subr.bf16.mxu0 %v11586_v47  ;;  %v11631_v47 = vld [vmem:[%s13985_s3 + $0x44c] ss:$36 sps:$4 sm:$0xff]  }
 0x62c   :  { %8119 = vmatpush1.bf16.msra.mxu1 %v11563_v23  ;;  %v11605_v23 = vld [vmem:[%s13985_s3 + $0x328] ss:$36 sps:$4 sm:$0xff]  }
 0x62d   :  { %8120 = vmatprep.subr.bf16.mxu1 %v11571_v21  ;;  %8164 = vmatpush1.bf16.msra.mxu0 %v11584_v24  ;;  %v11626_v21 = vld [vmem:[%s13985_s3 + $0x378] ss:$36 sps:$4 sm:$0xff]   ;;  %v11629_v24 = vld [vmem:[%s13985_s3 + $0x448] ss:$36 sps:$4 sm:$0xff]  }
 0x62e   :  { %8165 = vmatprep.subr.bf16.mxu0 %v11592_v1  ;;  %v11639_v1 = vld [vmem:[%s13985_s3 + $0x450] ss:$36 sps:$4 sm:$0xff]  }
 0x630   :  { %8121 = vmatpush1.bf16.msra.mxu1 %v11569_v14  ;;  %v11611_v14 = vld [vmem:[%s13985_s3 + $0x370] ss:$36 sps:$4 sm:$0xff]  }
 0x631   :  { %8122 = vmatprep.subr.bf16.mxu1 %v11577_v3  ;;  %8166 = vmatpush1.bf16.msra.mxu0 %v11590_v37  ;;  %v11632_v3 = vld [vmem:[%s13985_s3 + $0x3c0] ss:$36 sps:$4 sm:$0xff]  }
 0x632   :  { %8167 = vmatprep.subr.bf16.mxu0 %v11598_v38  ;;  %v11638_v37 = vld [vmem:[%s13985_s3 + $0x260] ss:$36 sps:$4 sm:$0xff]   ;;  %v11642_v38 = vld [vmem:[%s13985_s3 + $0x2a8] ss:$36 sps:$4 sm:$0xff]  }
 0x634   :  { %8123 = vmatpush1.bf16.msra.mxu1 %v11575_v27  ;;  %v11617_v27 = vld [vmem:[%s13985_s3 + $0x3b8] ss:$36 sps:$4 sm:$0xff]  }
 0x635   :  { %8124 = vmatprep.subr.bf16.mxu1 %v11583_v32  ;;  %8168 = vmatpush1.bf16.msra.mxu0 %v11596_v55  ;;  %v11635_v32 = vld [vmem:[%s13985_s3 + $0x408] ss:$36 sps:$4 sm:$0xff]   ;;  %v11643_v55 = vld [vmem:[%s13985_s3 + $0x2f0] ss:$36 sps:$4 sm:$0xff]  }
 0x636   :  { %8239 = vmatprep.subr.bf16.mxu0 %v11604_v39  ;;  %v11644_v39 = vld [vmem:[%s13985_s3 + $0x338] ss:$36 sps:$4 sm:$0xff]  }
 0x638   :  { %8125 = vmatpush1.bf16.msra.mxu1 %v11581_v20  ;;  %v11623_v20 = vld [vmem:[%s13985_s3 + $0x400] ss:$36 sps:$4 sm:$0xff]  }
 0x639   :  { %8196 = vmatprep.subr.bf16.mxu1 %v11589_v34  ;;  %v11641_v34 = vld [vmem:[%s13985_s3 + $0x454] ss:$36 sps:$4 sm:$0xff]  }
 0x6de   :  { %v10867_v40 = vpop.f32.mrb[244].mxu1 }
 0x6df   :  { %v10868_v41 = vpop.f32.mrb[245].mxu1 }
 0x6e0   :  { %v10869_v35 = vadd.f32 %v10868_v41, %v10867_v40  ;;  %v10870_v43 = vpop.f32.mrb[246].mxu1  ;;  %v11645_v40 = vld [vmem:[%s13985_s3 + $0x380] ss:$36 sps:$4 sm:$0xff]   ;;  %v11646_v41 = vld [vmem:[%s13985_s3 + $0x3c8] ss:$36 sps:$4 sm:$0xff]  }
 0x6e1   :  { %v10871_v45 = vpop.f32.mrb[247].mxu1 }
 0x6e2   :  { %v10872_v46 = vadd.f32 %v10871_v45, %v10870_v43  ;;  %v7563_v8 = vadd.f32 %v10869_v35, %v10039_v48  ;;  %v11647_v35 = vld [vmem:[%s13985_s3 + $0x410] ss:$36 sps:$4 sm:$0xff]   ;;  %v11648_v43 = vld [vmem:[%s13985_s3 + $0x458] ss:$36 sps:$4 sm:$0xff]  }
 0x6e4   :  { %v7566_v53 = vadd.f32 %v10872_v46, %v10039_v48 }
 0x6eb   :  { %v10889_v29 = vpop.f32.mrb[4].mxu0 }
 0x6ec   :  { %v10890_v49 = vpop.f32.mrb[5].mxu0 }
 0x6ed   :  { %v10891_v28 = vadd.f32 %v10890_v49, %v10889_v29  ;;  %v10892_v50 = vpop.f32.mrb[6].mxu0 }
 0x6ee   :  { %v7644_v4 = vpop.f32.mrb[248].mxu1  ;;  %v10893_v11 = vpop.f32.mrb[7].mxu0 }
 0x6ef   :  { %v11086_v52 = vpop.f32.mrb[249].mxu1  ;;  %v10894_v51 = vadd.f32 %v10893_v11, %v10892_v50  ;;  %v7604_v57 = vadd.f32 %v10891_v28, %v7563_v8 }
 0x6f0   :  { %v7647_v5 = vpop.f32.mrb[250].mxu1 }
 0x6f1   :  { %v11087_v59 = vpop.f32.mrb[251].mxu1  ;;  %v7645_v61 = vadd.f32 %v7644_v4, %v7604_v57  ;;  %v7607_v44 = vadd.f32 %v10894_v51, %v7566_v53 }
 0x6f3   :  { %v7653_v62 = vmul.f32 0.02, %v7645_v61  ;;  %v7648_v6 = vadd.f32 %v7647_v5, %v7607_v44  ;;  %vm7651_vm11 = vcmp.gt.f32.partialorder %v7645_v61, 0.0 }
 0x6f5   :  { %vm7652_vm12 = vcmp.gt.f32.partialorder %v7648_v6, 0.0  ;;  %v7654_v42 = vmul.f32 0.02, %v7648_v6  ;;  %v7655_v60 = vsel %vm7651_vm11, %v7645_v61, %v7653_v62 }
 0x6f7   :  { %v7656_v63 = vsel %vm7652_vm12, %v7648_v6, %v7654_v42 }
 0x6f8   :  { %v13518_v2 = vpack.c.bf16 %v7656_v63, %v7655_v60 }
 0x6fa   :  { %8143 = vmatmul.mubr.bf16.vlgmr.msra.gmra.mrb[252].mxu1 %v13518_v2  ;;  %8186 = vmatmul.mubr.bf16.vlgmr.msra.gmra.mrb[8].mxu0 %v13518_v2 }
 0x6fb   :  { %8197 = vmatpush1.bf16.msra.mxu1 %v11587_v7  ;;  %8240 = vmatpush1.bf16.msra.mxu0 %v11602_v9 }
 0x6fc   :  { %8198 = vmatprep.subr.bf16.mxu1 %v11595_v17  ;;  %8241 = vmatprep.subr.bf16.mxu0 %v11610_v10 }
 0x6fd   :  { %8228 = vmatprep.mubr.bf16.mxu1 %v13092_v18  ;;  %8271 = vmatprep.mubr.bf16.mxu0 %v13092_v18 }
 0x6ff   :  { %8199 = vmatpush1.bf16.msra.mxu1 %v11593_v12  ;;  %8242 = vmatpush1.bf16.msra.mxu0 %v11608_v13 }
 0x700   :  { %8200 = vmatprep.subr.bf16.mxu1 %v11601_v36  ;;  %8243 = vmatprep.subr.bf16.mxu0 %v11616_v15  ;;  %v13669_v36 = vld [vmem:[%s13987_s7 + $0x4] ss:$8 sps:$4 sm:$0xff]  }
 0x701   :  { %v11652_v15 = vld [vmem:[%s13985_s3 + $0x480] ss:$36 sps:$4 sm:$0xff]  }
 0x703   :  { %8201 = vmatpush1.bf16.msra.mxu1 %v11599_v19  ;;  %8244 = vmatpush1.bf16.msra.mxu0 %v11614_v22  ;;  %v11654_v19 = vld [vmem:[%s13985_s3 + $0x484] ss:$36 sps:$4 sm:$0xff]   ;;  %v11657_v22 = vld [vmem:[%s13985_s3 + $0x4cc] ss:$36 sps:$4 sm:$0xff]  }
 0x704   :  { %8202 = vmatprep.subr.bf16.mxu1 %v11607_v58  ;;  %8245 = vmatprep.subr.bf16.mxu0 %v11622_v16  ;;  %v11655_v58 = vld [vmem:[%s13985_s3 + $0x4c8] ss:$36 sps:$4 sm:$0xff]   ;;  %v11660_v16 = vld [vmem:[%s13985_s3 + $0x514] ss:$36 sps:$4 sm:$0xff]  }
 0x707   :  { %8203 = vmatpush1.bf16.msra.mxu1 %v11605_v23  ;;  %8246 = vmatpush1.bf16.msra.mxu0 %v11620_v33  ;;  %v11658_v23 = vld [vmem:[%s13985_s3 + $0x510] ss:$36 sps:$4 sm:$0xff]   ;;  %v11666_v33 = vld [vmem:[%s13985_s3 + $0x55c] ss:$36 sps:$4 sm:$0xff]  }
 0x708   :  { %8204 = vmatprep.subr.bf16.mxu1 %v11613_v26  ;;  %8247 = vmatprep.subr.bf16.mxu0 %v11628_v56  ;;  %v11664_v26 = vld [vmem:[%s13985_s3 + $0x558] ss:$36 sps:$4 sm:$0xff]   ;;  %v11672_v56 = vld [vmem:[%s13985_s3 + $0x5a4] ss:$36 sps:$4 sm:$0xff]  }
 0x70b   :  { %8205 = vmatpush1.bf16.msra.mxu1 %v11611_v14  ;;  %8248 = vmatpush1.bf16.msra.mxu0 %v11626_v21  ;;  %v11670_v14 = vld [vmem:[%s13985_s3 + $0x5a0] ss:$36 sps:$4 sm:$0xff]   ;;  %v11678_v21 = vld [vmem:[%s13985_s3 + $0x5ec] ss:$36 sps:$4 sm:$0xff]  }
 0x70c   :  { %8206 = vmatprep.subr.bf16.mxu1 %v11619_v30  ;;  %8249 = vmatprep.subr.bf16.mxu0 %v11634_v25  ;;  %v11676_v30 = vld [vmem:[%s13985_s3 + $0x5e8] ss:$36 sps:$4 sm:$0xff]  }
 0x70f   :  { %8207 = vmatpush1.bf16.msra.mxu1 %v11617_v27  ;;  %8250 = vmatpush1.bf16.msra.mxu0 %v11632_v3 }
 0x710   :  { %8208 = vmatprep.subr.bf16.mxu1 %v11625_v31  ;;  %8251 = vmatprep.subr.bf16.mxu0 %v11637_v54 }
 0x713   :  { %8209 = vmatpush1.bf16.msra.mxu1 %v11623_v20  ;;  %8252 = vmatpush1.bf16.msra.mxu0 %v11635_v32 }
 0x714   :  { %8210 = vmatprep.subr.bf16.mxu1 %v11631_v47  ;;  %8253 = vmatprep.subr.bf16.mxu0 %v11641_v34 }
 0x717   :  { %8211 = vmatpush1.bf16.msra.mxu1 %v11629_v24  ;;  %8254 = vmatpush1.bf16.msra.mxu0 %v11639_v1 }
 0x718   :  { %11088 = vmatprep.subr.bf16.mxu1 %v11758_v0  ;;  %8435 = vmatprep.subr.bf16.mxu0 %v13092_v18 }
 0x71a   :  { %8229 = vmatmul.mubr.bf16.vlgmr.msra.gmra.mrb[0].mxu1 %v13518_v2  ;;  %8272 = vmatmul.mubr.bf16.vlgmr.msra.gmra.mrb[12].mxu0 %v13518_v2 }
 0x71b   :  { %11089 = vmatpush3.bf16.msra.mxu1 %v11638_v37  ;;  %11104 = vmatprep.mubr.msk.bf16.mxu1 %vm11759_vm1, %v11758_v0 }
 0x71c   :  { %11090 = vmatprep.subr.bf16.mxu1 %v11758_v0  ;;  %10201 = vmatprep.mubr.msk.bf16.mxu0 %vm8431_vm13, %v13669_v36 }
 0x71f   :  { %11091 = vmatpush3.bf16.msra.mxu1 %v11642_v38 }
 0x720   :  { %11092 = vmatprep.subr.bf16.mxu1 %v11758_v0 }
 0x723   :  { %11093 = vmatpush3.bf16.msra.mxu1 %v11643_v55 }
 0x724   :  { %11094 = vmatprep.subr.bf16.mxu1 %v11758_v0 }
 0x727   :  { %11095 = vmatpush3.bf16.msra.mxu1 %v11644_v39 }
 0x728   :  { %11096 = vmatprep.subr.bf16.mxu1 %v11758_v0 }
 0x72b   :  { %11097 = vmatpush3.bf16.msra.mxu1 %v11645_v40  ;;  %v11663_v40 = vld [vmem:[%s13985_s3 + $0x48c] ss:$36 sps:$4 sm:$0xff]  }
 0x72c   :  { %11098 = vmatprep.subr.bf16.mxu1 %v11758_v0 }
 0x72f   :  { %11099 = vmatpush3.bf16.msra.mxu1 %v11646_v41 }
 0x730   :  { %11100 = vmatprep.subr.bf16.mxu1 %v11758_v0 }
 0x733   :  { %11101 = vmatpush3.bf16.msra.mxu1 %v11647_v35  ;;  %v13730_v35 = vld [vmem:[%s13987_s7] ss:$8 sps:$4 sm:$0xff]  }
 0x734   :  { %11102 = vmatprep.subr.bf16.mxu1 %v11758_v0 }
 0x737   :  { %11103 = vmatpush3.bf16.msra.mxu1 %v11648_v43  ;;  %v11661_v43 = vld [vmem:[%s13985_s3 + $0x488] ss:$36 sps:$4 sm:$0xff]  }
 0x738   :  { %8935 = vmatprep.subr.bf16.mxu1 %v11654_v19  ;;  %v11694_v19 = vld [vmem:[%s13985_s3 + $0x490] ss:$36 sps:$4 sm:$0xff]  }
 0x73a   :  { %11105 = vmatmul.mubr.bf16.vlgmr.msra.gmra.mrb[4].mxu1 %v13518_v2 }
 0x73b   :  { %8967 = vmatprep.mubr.bf16.mxu1 %v13092_v18  ;;  %8936 = vmatpush1.bf16.msra.mxu1 %v11652_v15 }
 0x73c   :  { %8937 = vmatprep.subr.bf16.mxu1 %v11657_v22  ;;  %v11709_v22 = vld [vmem:[%s13985_s3 + $0x498] ss:$36 sps:$4 sm:$0xff]  }
 0x73f   :  { %8938 = vmatpush1.bf16.msra.mxu1 %v11655_v58 }
 0x740   :  { %8939 = vmatprep.subr.bf16.mxu1 %v11660_v16  ;;  %v11702_v16 = vld [vmem:[%s13985_s3 + $0x4dc] ss:$36 sps:$4 sm:$0xff]  }
 0x743   :  { %8940 = vmatpush1.bf16.msra.mxu1 %v11658_v23  ;;  %v11717_v23 = vld [vmem:[%s13985_s3 + $0x4e4] ss:$36 sps:$4 sm:$0xff]  }
 0x744   :  { %8941 = vmatprep.subr.bf16.mxu1 %v11666_v33  ;;  %v11700_v33 = vld [vmem:[%s13985_s3 + $0x4d8] ss:$36 sps:$4 sm:$0xff]  }
 0x747   :  { %8942 = vmatpush1.bf16.msra.mxu1 %v11664_v26  ;;  %v11715_v26 = vld [vmem:[%s13985_s3 + $0x4e0] ss:$36 sps:$4 sm:$0xff]  }
 0x748   :  { %8943 = vmatprep.subr.bf16.mxu1 %v11672_v56  ;;  %v11708_v56 = vld [vmem:[%s13985_s3 + $0x524] ss:$36 sps:$4 sm:$0xff]  }
 0x74b   :  { %8944 = vmatpush1.bf16.msra.mxu1 %v11670_v14  ;;  %v11723_v14 = vld [vmem:[%s13985_s3 + $0x52c] ss:$36 sps:$4 sm:$0xff]  }
 0x74c   :  { %8945 = vmatprep.subr.bf16.mxu1 %v11678_v21  ;;  %v11706_v21 = vld [vmem:[%s13985_s3 + $0x520] ss:$36 sps:$4 sm:$0xff]  }
 0x74f   :  { %8946 = vmatpush1.bf16.msra.mxu1 %v11676_v30  ;;  %v11721_v30 = vld [vmem:[%s13985_s3 + $0x528] ss:$36 sps:$4 sm:$0xff]  }
 0x7cd   :  { %v8144_v45 = vpop.f32.mrb[252].mxu1  ;;  %v8187_v46 = vpop.f32.mrb[8].mxu0 }
 0x7ce   :  { %v8146_v48 = vpop.f32.mrb[253].mxu1  ;;  %v8189_v29 = vpop.f32.mrb[9].mxu0 }
 0x7cf   :  { %v8148_v49 = vpop.f32.mrb[254].mxu1  ;;  %v8191_v8 = vpop.f32.mrb[10].mxu0 }
 0x7d0   :  { %v8323_v28 = vpack.c.bf16 %v8148_v49, %v8144_v45  ;;  %v8150_v50 = vpop.f32.mrb[255].mxu1  ;;  %v8325_v4 = vpack.c.bf16 %v8191_v8, %v8187_v46  ;;  %v8193_v11 = vpop.f32.mrb[11].mxu0  ;;  %v11669_v45 = vld [vmem:[%s13985_s3 + $0x4d4] ss:$36 sps:$4 sm:$0xff]   ;;  %v11681_v49 = vld [vmem:[%s13985_s3 + $0x564] ss:$36 sps:$4 sm:$0xff]  }
 0x7d1   :  { %v8324_v52 = vpack.c.bf16 %v8150_v50, %v8146_v48  ;;  %v8326_v53 = vpack.c.bf16 %v8193_v11, %v8189_v29  ;;  %v11667_v46 = vld [vmem:[%s13985_s3 + $0x4d0] ss:$36 sps:$4 sm:$0xff]   ;;  %v11675_v48 = vld [vmem:[%s13985_s3 + $0x51c] ss:$36 sps:$4 sm:$0xff]  }
 0x7d2   :  { %8342 = vst.msk [vmem:[#allocation7] sm:$0xff] %vm684_vm5, %v8323_v28  ;;  %8345 = vrot.lane.b32.xlu0 %v8323_v28, %s11761_s2  ;;  %8358 = vst.msk [vmem:[#allocation7 + $0x20] sm:$0xff] %vm684_vm5, %v8325_v4  ;;  %v11673_v29 = vld [vmem:[%s13985_s3 + $0x518] ss:$36 sps:$4 sm:$0xff]   ;;  %v11679_v8 = vld [vmem:[%s13985_s3 + $0x560] ss:$36 sps:$4 sm:$0xff]  }
 0x7d3   :  { %8350 = vst.msk [vmem:[#allocation7 + $0x10] sm:$0xff] %vm684_vm5, %v8324_v52  ;;  %8366 = vst.msk [vmem:[#allocation7 + $0x30] sm:$0xff] %vm684_vm5, %v8326_v53  ;;  %v11682_v28 = vld [vmem:[%s13985_s3 + $0x630] ss:$36 sps:$4 sm:$0xff]  }
 0x7d4   :  { %v11684_v50 = vld [vmem:[%s13985_s3 + $0x634] ss:$36 sps:$4 sm:$0xff]   ;;  %v11687_v11 = vld [vmem:[%s13985_s3 + $0x5ac] ss:$36 sps:$4 sm:$0xff]  }
 0x7d5   :  { %8947 = vmatprep.subr.bf16.mxu1 %v11684_v50  ;;  %v11754_v50 = vld [vmem:[%s13985_s3 + $0x650] ss:$36 sps:$4 sm:$0xff]  }
 0x7d6   :  { %8353 = vrot.lane.b32.xlu0 %v8324_v52, %s11761_s2  ;;  %8948 = vmatpush1.bf16.msra.mxu1 %v11682_v28  ;;  %v11688_v52 = vld [vmem:[%s13985_s3 + $0x678] ss:$36 sps:$4 sm:$0xff]   ;;  %v11752_v28 = vld [vmem:[%s13985_s3 + $0x5c0] ss:$36 sps:$4 sm:$0xff]  }
 0x7da   :  { %8361 = vrot.lane.b32.xlu0 %v8325_v4, %s11761_s2  ;;  %v11685_v4 = vld [vmem:[%s13985_s3 + $0x5a8] ss:$36 sps:$4 sm:$0xff]  }
 0x7de   :  { %8369 = vrot.lane.b32.xlu0 %v8326_v53, %s11761_s2  ;;  %v11690_v53 = vld [vmem:[%s13985_s3 + $0x67c] ss:$36 sps:$4 sm:$0xff]  }
 0x7df   :  { %8949 = vmatprep.subr.bf16.mxu1 %v11690_v53 }
 0x7e0   :  { %8950 = vmatpush1.bf16.msra.mxu1 %v11688_v52 }
 0x7ed   :  { %v8230_v51 = vpop.f32.mrb[0].mxu1  ;;  %v8273_v57 = vpop.f32.mrb[12].mxu0 }
 0x7ee   :  { %v8232_v5 = vpop.f32.mrb[1].mxu1  ;;  %v8275_v59 = vpop.f32.mrb[13].mxu0 }
 0x7ef   :  { %v8234_v61 = vpop.f32.mrb[2].mxu1  ;;  %v8277_v44 = vpop.f32.mrb[14].mxu0 }
 0x7f0   :  { %v8327_v62 = vpack.c.bf16 %v8234_v61, %v8230_v51  ;;  %v8236_v6 = vpop.f32.mrb[3].mxu1  ;;  %v8329_v42 = vpack.c.bf16 %v8277_v44, %v8273_v57  ;;  %v8279_v60 = vpop.f32.mrb[15].mxu0  ;;  %v11693_v51 = vld [vmem:[%s13985_s3 + $0x5f4] ss:$36 sps:$4 sm:$0xff]   ;;  %v11705_v44 = vld [vmem:[%s13985_s3 + $0x684] ss:$36 sps:$4 sm:$0xff]  }
 0x7f1   :  { %v8328_v63 = vpack.c.bf16 %v8236_v6, %v8232_v5  ;;  %v8330_v7 = vpack.c.bf16 %v8279_v60, %v8275_v59  ;;  %v11696_v57 = vld [vmem:[%s13985_s3 + $0x494] ss:$36 sps:$4 sm:$0xff]   ;;  %v11699_v59 = vld [vmem:[%s13985_s3 + $0x63c] ss:$36 sps:$4 sm:$0xff]  }
 0x7f2   :  { %8374 = vst.msk [vmem:[#allocation7 + $0x40] sm:$0xff] %vm684_vm5, %v8327_v62  ;;  %v11691_v5 = vld [vmem:[%s13985_s3 + $0x5f0] ss:$36 sps:$4 sm:$0xff]   ;;  %9021 = vmatprep.subr.bf16.mxu1 %v11696_v57  ;;  %v11697_v61 = vld [vmem:[%s13985_s3 + $0x638] ss:$36 sps:$4 sm:$0xff]  }
 0x7f3   :  { %8376 = vst.msk [vmem:[#allocation7] sm:$0xff] %vm3687_vm3, %v8327_v62  ;;  %8392 = vst.msk [vmem:[#allocation7 + $0x20] sm:$0xff] %vm3687_vm3, %v8329_v42  ;;  %8379 = vrot.lane.b32.xlu1 %v8328_v63, %s11761_s2  ;;  %v11703_v62 = vld [vmem:[%s13985_s3 + $0x680] ss:$36 sps:$4 sm:$0xff]  }
 0x7f4   :  { %8384 = vst.msk [vmem:[#allocation7 + $0x10] sm:$0xff] %vm3687_vm3, %v8328_v63  ;;  %8400 = vst.msk [vmem:[#allocation7 + $0x30] sm:$0xff] %vm3687_vm3, %v8330_v7  ;;  %v11711_v6 = vld [vmem:[%s13985_s3 + $0x49c] ss:$36 sps:$4 sm:$0xff]  }
 0x7f7   :  { %8387 = vrot.lane.b32.xlu1 %v8329_v42, %s11761_s2  ;;  %v10198_v42 = vld [vmem:[%s13983_s4 + $0x3] ss:$0 sm:$0xff] }
 0x7fa   :  { %v8409_v9 = vld [vmem:[#allocation7] sm:$0xff] }
 0x7fb   :  { %8436 = vmatpush1.bf16.msra.mxu0 %v8409_v9  ;;  %8395 = vrot.lane.b32.xlu1 %v8330_v7, %s11761_s2  ;;  %v8411_v34 = vld [vmem:[#allocation7 + $0x10] sm:$0xff]  ;;  %v8413_v1 = vld [vmem:[#allocation7 + $0x20] sm:$0xff] }
 0x7fc   :  { %8437 = vmatprep.subr.bf16.mxu0 %v13092_v18  ;;  %v8415_v38 = vld [vmem:[#allocation7 + $0x30] sm:$0xff] }
 0x80d   :  { %v8316_v2 = vpop.f32.mrb[4].mxu1 }
 0x80e   :  { %v11106_v17 = vpop.f32.mrb[5].mxu1 }
 0x80f   :  { %v8319_v10 = vpop.f32.mrb[6].mxu1 }
 0x810   :  { %v8331_v12 = vpack.c.bf16 %v8319_v10, %v8316_v2  ;;  %v11107_v13 = vpop.f32.mrb[7].mxu1 }
 0x812   :  { %8408 = vst.msk [vmem:[#allocation7 + $0x40] sm:$0xff] %vm3687_vm3, %v8331_v12  ;;  %8403 = vrot.lane.b32.xlu1 %v8331_v12, %s11761_s2 }
 0x819   :  { %v8417_v41 = vld [vmem:[#allocation7 + $0x40] sm:$0xff] }
 0x844   :  { %v8346_v25 = vpop.permute.xlu0 %8345 }
 0x845   :  { %8348 = vst.msk [vmem:[#allocation7 + $0x8] sm:$0xff] %vm684_vm5, %v8346_v25  ;;  %v11714_v25 = vld [vmem:[%s13985_s3 + $0x56c] ss:$36 sps:$4 sm:$0xff]  }
 0x848   :  { %v8354_v27 = vpop.permute.xlu0 %8353 }
 0x849   :  { %8356 = vst.msk [vmem:[#allocation7 + $0x18] sm:$0xff] %vm684_vm5, %v8354_v27  ;;  %v11729_v27 = vld [vmem:[%s13985_s3 + $0x574] ss:$36 sps:$4 sm:$0xff]  }
 0x84c   :  { %v8362_v3 = vpop.permute.xlu0 %8361 }
 0x84d   :  { %8364 = vst.msk [vmem:[#allocation7 + $0x28] sm:$0xff] %vm684_vm5, %v8362_v3  ;;  %v11712_v3 = vld [vmem:[%s13985_s3 + $0x568] ss:$36 sps:$4 sm:$0xff]  }
 0x850   :  { %v8370_v31 = vpop.permute.xlu0 %8369 }
 0x851   :  { %8372 = vst.msk [vmem:[#allocation7 + $0x38] sm:$0xff] %vm684_vm5, %v8370_v31  ;;  %v11727_v31 = vld [vmem:[%s13985_s3 + $0x570] ss:$36 sps:$4 sm:$0xff]  }
 0x865   :  { %v8380_v54 = vpop.permute.xlu1 %8379 }
 0x866   :  { %8382 = vst.msk [vmem:[#allocation7 + $0x8] sm:$0xff] %vm3687_vm3, %v8380_v54  ;;  %v11720_v54 = vld [vmem:[%s13985_s3 + $0x5b4] ss:$36 sps:$4 sm:$0xff]  }
 0x869   :  { %v8388_v20 = vpop.permute.xlu1 %8387 }
 0x86a   :  { %8390 = vst.msk [vmem:[#allocation7 + $0x18] sm:$0xff] %vm3687_vm3, %v8388_v20  ;;  %v11735_v20 = vld [vmem:[%s13985_s3 + $0x5bc] ss:$36 sps:$4 sm:$0xff]  }
 0x86d   :  { %v8410_v32 = vld [vmem:[#allocation7 + $0x8] sm:$0xff]  ;;  %v8396_v47 = vpop.permute.xlu1 %8395 }
 0x86e   :  { %8438 = vmatpush1.bf16.msra.mxu0 %v8410_v32  ;;  %8398 = vst.msk [vmem:[#allocation7 + $0x28] sm:$0xff] %vm3687_vm3, %v8396_v47  ;;  %v11718_v32 = vld [vmem:[%s13985_s3 + $0x5b0] ss:$36 sps:$4 sm:$0xff]   ;;  %v11733_v47 = vld [vmem:[%s13985_s3 + $0x5b8] ss:$36 sps:$4 sm:$0xff]  }
 0x86f   :  { %8439 = vmatprep.subr.bf16.mxu0 %v13092_v18 }
 0x871   :  { %v8412_v24 = vld [vmem:[#allocation7 + $0x18] sm:$0xff] }
 0x872   :  { %8440 = vmatpush1.bf16.msra.mxu0 %v8411_v34  ;;  %v11726_v34 = vld [vmem:[%s13985_s3 + $0x5fc] ss:$36 sps:$4 sm:$0xff]  }
 0x873   :  { %8441 = vmatprep.subr.bf16.mxu0 %v13092_v18 }
 0x875   :  { %v8414_v37 = vld [vmem:[#allocation7 + $0x28] sm:$0xff] }
 0x876   :  { %8442 = vmatpush1.bf16.msra.mxu0 %v8412_v24  ;;  %v11741_v24 = vld [vmem:[%s13985_s3 + $0x604] ss:$36 sps:$4 sm:$0xff]  }
 0x877   :  { %8443 = vmatprep.subr.bf16.mxu0 %v13092_v18 }
 0x87a   :  { %8444 = vmatpush1.bf16.msra.mxu0 %v8413_v1  ;;  %v11724_v1 = vld [vmem:[%s13985_s3 + $0x5f8] ss:$36 sps:$4 sm:$0xff]  }
 0x87b   :  { %8445 = vmatprep.subr.bf16.mxu0 %v13092_v18 }
 0x87e   :  { %8446 = vmatpush1.bf16.msra.mxu0 %v8414_v37  ;;  %v11739_v37 = vld [vmem:[%s13985_s3 + $0x600] ss:$36 sps:$4 sm:$0xff]  }
 0x87f   :  { %8447 = vmatprep.subr.bf16.mxu0 %v13092_v18 }
 0x882   :  { %8448 = vmatpush1.bf16.msra.mxu0 %v8415_v38  ;;  %v11732_v38 = vld [vmem:[%s13985_s3 + $0x644] ss:$36 sps:$4 sm:$0xff]  }
 0x883   :  { %8449 = vmatprep.subr.bf16.mxu0 %v13092_v18 }
 0x884   :  { %v8404_v55 = vpop.permute.xlu1 %8403 }
 0x885   :  { %8406 = vst.msk [vmem:[#allocation7 + $0x38] sm:$0xff] %vm3687_vm3, %v8404_v55  ;;  %v11744_v55 = vld [vmem:[%s13985_s3 + $0x64c] ss:$36 sps:$4 sm:$0xff]  }
 0x88c   :  { %v8416_v39 = vld [vmem:[#allocation7 + $0x38] sm:$0xff] }
 0x88d   :  { %8450 = vmatpush1.bf16.msra.mxu0 %v8416_v39  ;;  %v11730_v39 = vld [vmem:[%s13985_s3 + $0x640] ss:$36 sps:$4 sm:$0xff]  }
 0x88e   :  { %8451 = vmatprep.subr.bf16.mxu0 %v13092_v18 }
 0x891   :  { %8452 = vmatpush1.bf16.msra.mxu0 %v8417_v41  ;;  %v11738_v41 = vld [vmem:[%s13985_s3 + $0x68c] ss:$36 sps:$4 sm:$0xff]  }
 0x892   :  { %8978 = vmatprep.subr.bf16.mxu0 %v11663_v40  ;;  %v11742_v40 = vld [vmem:[%s13985_s3 + $0x648] ss:$36 sps:$4 sm:$0xff]  }
 0x894   :  { %8468 = vmatmul.mubr.bf16.vlgmr.msra.gmra.mrb[16].mxu0 %v13730_v35 }
 0x895   :  { %8979 = vmatpush1.bf16.msra.mxu0 %v11661_v43  ;;  %9010 = vmatprep.mubr.bf16.mxu0 %v13092_v18  ;;  %v11748_v43 = vld [vmem:[%s13985_s3 + $0x694] ss:$36 sps:$4 sm:$0xff]  }
 0x896   :  { %8980 = vmatprep.subr.bf16.mxu0 %v11669_v45  ;;  %v11736_v45 = vld [vmem:[%s13985_s3 + $0x688] ss:$36 sps:$4 sm:$0xff]  }
 0x899   :  { %8981 = vmatpush1.bf16.msra.mxu0 %v11667_v46  ;;  %v11746_v46 = vld [vmem:[%s13985_s3 + $0x690] ss:$36 sps:$4 sm:$0xff]  }
 0x89a   :  { %8982 = vmatprep.subr.bf16.mxu0 %v11675_v48  ;;  %v11745_v48 = vld [vmem:[%s13985_s3 + $0x4a0] ss:$36 sps:$4 sm:$0xff]  }
 0x89d   :  { %8983 = vmatpush1.bf16.msra.mxu0 %v11673_v29  ;;  %v11749_v29 = vld [vmem:[%s13985_s3 + $0x4e8] ss:$36 sps:$4 sm:$0xff]  }
 0x89e   :  { %8984 = vmatprep.subr.bf16.mxu0 %v11681_v49  ;;  %v11750_v49 = vld [vmem:[%s13985_s3 + $0x530] ss:$36 sps:$4 sm:$0xff]  }
 0x8a1   :  { %8985 = vmatpush1.bf16.msra.mxu0 %v11679_v8  ;;  %v11751_v8 = vld [vmem:[%s13985_s3 + $0x578] ss:$36 sps:$4 sm:$0xff]  }
 0x8a2   :  { %8986 = vmatprep.subr.bf16.mxu0 %v11687_v11 }
 0x8a5   :  { %8987 = vmatpush1.bf16.msra.mxu0 %v11685_v4  ;;  %v11755_v4 = vld [vmem:[%s13985_s3 + $0x698] ss:$36 sps:$4 sm:$0xff]  }
 0x8a6   :  { %8988 = vmatprep.subr.bf16.mxu0 %v11693_v51 }
 0x8a9   :  { %8989 = vmatpush1.bf16.msra.mxu0 %v11691_v5 }
 0x8aa   :  { %8990 = vmatprep.subr.bf16.mxu0 %v11699_v59 }
 0x8ad   :  { %8991 = vmatpush1.bf16.msra.mxu0 %v11697_v61 }
 0x8ae   :  { %8992 = vmatprep.subr.bf16.mxu0 %v11705_v44 }
 0x8b1   :  { %8993 = vmatpush1.bf16.msra.mxu0 %v11703_v62 }
 0x8b2   :  { %9064 = vmatprep.subr.bf16.mxu0 %v11711_v6 }
 0x967   :  { %v8469_v60 = vpop.f32.mrb[16].mxu0 }
 0x968   :  { %v8470_v63 = vadd.f32 %v10198_v42, %v8469_v60  ;;  %v8471_v7 = vpop.f32.mrb[17].mxu0 }
 0x969   :  { %v8472_v9 = vpop.f32.mrb[18].mxu0 }
 0x96a   :  { %v8478_v2 = vmul.f32 0.02, %v8470_v63  ;;  %v8473_v17 = vadd.f32 %v10198_v42, %v8472_v9  ;;  %v8474_v10 = vpop.f32.mrb[19].mxu0  ;;  %vm8476_vm14 = vcmp.gt.f32.partialorder %v8470_v63, 0.0 }
 0x96c   :  { %vm8477_vm15 = vcmp.gt.f32.partialorder %v8473_v17, 0.0  ;;  %v8479_v12 = vmul.f32 0.02, %v8473_v17  ;;  %v8480_v13 = vsel %vm8476_vm14, %v8470_v63, %v8478_v2 }
 0x96e   :  { %v8481_v15 = vsel %vm8477_vm15, %v8473_v17, %v8479_v12 }
 0x96f   :  { %v13806_v58 = vpack.c.bf16 %v8481_v15, %v8480_v13 }
 0x971   :  { %8968 = vmatmul.mubr.bf16.vlgmr.msra.gmra.mrb[8].mxu1 %v13806_v58  ;;  %9011 = vmatmul.mubr.bf16.vlgmr.msra.gmra.mrb[20].mxu0 %v13806_v58 }
 0x972   :  { %9022 = vmatpush1.bf16.msra.mxu1 %v11694_v19  ;;  %9065 = vmatpush1.bf16.msra.mxu0 %v11709_v22 }
 0x973   :  { %9023 = vmatprep.subr.bf16.mxu1 %v11702_v16  ;;  %9066 = vmatprep.subr.bf16.mxu0 %v11717_v23 }
 0x974   :  { %9053 = vmatprep.mubr.bf16.mxu1 %v13092_v18  ;;  %9096 = vmatprep.mubr.bf16.mxu0 %v13092_v18 }
 0x976   :  { %9024 = vmatpush1.bf16.msra.mxu1 %v11700_v33  ;;  %9067 = vmatpush1.bf16.msra.mxu0 %v11715_v26 }
 0x977   :  { %9025 = vmatprep.subr.bf16.mxu1 %v11708_v56  ;;  %9068 = vmatprep.subr.bf16.mxu0 %v11723_v14 }
 0x97a   :  { %9026 = vmatpush1.bf16.msra.mxu1 %v11706_v21  ;;  %9069 = vmatpush1.bf16.msra.mxu0 %v11721_v30 }
 0x97b   :  { %9027 = vmatprep.subr.bf16.mxu1 %v11714_v25  ;;  %9070 = vmatprep.subr.bf16.mxu0 %v11729_v27 }
 0x97e   :  { %9028 = vmatpush1.bf16.msra.mxu1 %v11712_v3  ;;  %9071 = vmatpush1.bf16.msra.mxu0 %v11727_v31 }
 0x97f   :  { %9029 = vmatprep.subr.bf16.mxu1 %v11720_v54  ;;  %9072 = vmatprep.subr.bf16.mxu0 %v11735_v20 }
 0x982   :  { %9030 = vmatpush1.bf16.msra.mxu1 %v11718_v32  ;;  %9073 = vmatpush1.bf16.msra.mxu0 %v11733_v47 }
 0x983   :  { %9031 = vmatprep.subr.bf16.mxu1 %v11726_v34  ;;  %9074 = vmatprep.subr.bf16.mxu0 %v11741_v24 }
 0x986   :  { %9032 = vmatpush1.bf16.msra.mxu1 %v11724_v1  ;;  %9075 = vmatpush1.bf16.msra.mxu0 %v11739_v37 }
 0x987   :  { %9033 = vmatprep.subr.bf16.mxu1 %v11732_v38  ;;  %9076 = vmatprep.subr.bf16.mxu0 %v11744_v55  ;;  %v10354_v38 = vld [vmem:[%s13983_s4 + $0x4] ss:$0 sm:$0xff] }
 0x98a   :  { %9034 = vmatpush1.bf16.msra.mxu1 %v11730_v39  ;;  %9077 = vmatpush1.bf16.msra.mxu0 %v11742_v40 }
 0x98b   :  { %9035 = vmatprep.subr.bf16.mxu1 %v11738_v41  ;;  %9078 = vmatprep.subr.bf16.mxu0 %v11748_v43 }
 0x98e   :  { %9036 = vmatpush1.bf16.msra.mxu1 %v11736_v45  ;;  %9079 = vmatpush1.bf16.msra.mxu0 %v11746_v46 }
 0x98f   :  { %11108 = vmatprep.subr.bf16.mxu1 %v11758_v0  ;;  %9259 = vmatprep.subr.bf16.mxu0 %v13092_v18 }
 0x991   :  { %9054 = vmatmul.mubr.bf16.vlgmr.msra.gmra.mrb[12].mxu1 %v13806_v58  ;;  %9097 = vmatmul.mubr.bf16.vlgmr.msra.gmra.mrb[24].mxu0 %v13806_v58 }
 0x992   :  { %11109 = vmatpush3.bf16.msra.mxu1 %v11745_v48  ;;  %11124 = vmatprep.mubr.msk.bf16.mxu1 %vm11759_vm1, %v11758_v0 }
 0x993   :  { %11110 = vmatprep.subr.bf16.mxu1 %v11758_v0  ;;  %10357 = vmatprep.mubr.msk.bf16.mxu0 %vm8431_vm13, %v13669_v36  ;;  %v11753_v36 = vld [vmem:[%s13985_s3 + $0x608] ss:$36 sps:$4 sm:$0xff]  }
 0x996   :  { %11111 = vmatpush3.bf16.msra.mxu1 %v11749_v29 }
 0x997   :  { %11112 = vmatprep.subr.bf16.mxu1 %v11758_v0 }
 0x99a   :  { %11113 = vmatpush3.bf16.msra.mxu1 %v11750_v49 }
 0x99b   :  { %11114 = vmatprep.subr.bf16.mxu1 %v11758_v0 }
 0x99e   :  { %11115 = vmatpush3.bf16.msra.mxu1 %v11751_v8 }
 0x99f   :  { %11116 = vmatprep.subr.bf16.mxu1 %v11758_v0 }
 0x9a2   :  { %11117 = vmatpush3.bf16.msra.mxu1 %v11752_v28 }
 0x9a3   :  { %11118 = vmatprep.subr.bf16.mxu1 %v11758_v0 }
 0x9a6   :  { %11119 = vmatpush3.bf16.msra.mxu1 %v11753_v36 }
 0x9a7   :  { %11120 = vmatprep.subr.bf16.mxu1 %v11758_v0 }
 0x9aa   :  { %11121 = vmatpush3.bf16.msra.mxu1 %v11754_v50 }
 0x9ab   :  { %11122 = vmatprep.subr.bf16.mxu1 %v11758_v0 }
 0x9ae   :  { %11123 = vmatpush3.bf16.msra.mxu1 %v11755_v4 }
 0x9b1   :  { %11125 = vmatmul.mubr.bf16.vlgmr.msra.gmra.mrb[16].mxu1 %v13806_v58 }
 0xa44   :  { %v8969_v11 = vpop.f32.mrb[8].mxu1  ;;  %v9012_v52 = vpop.f32.mrb[20].mxu0 }
 0xa45   :  { %v8971_v53 = vpop.f32.mrb[9].mxu1  ;;  %v9014_v51 = vpop.f32.mrb[21].mxu0 }
 0xa46   :  { %v8973_v57 = vpop.f32.mrb[10].mxu1  ;;  %v9016_v5 = vpop.f32.mrb[22].mxu0 }
 0xa47   :  { %v9148_v59 = vpack.c.bf16 %v8973_v57, %v8969_v11  ;;  %v8975_v61 = vpop.f32.mrb[11].mxu1  ;;  %v9150_v44 = vpack.c.bf16 %v9016_v5, %v9012_v52  ;;  %v9018_v62 = vpop.f32.mrb[23].mxu0 }
 0xa48   :  { %v9149_v6 = vpack.c.bf16 %v8975_v61, %v8971_v53  ;;  %v9151_v42 = vpack.c.bf16 %v9018_v62, %v9014_v51 }
 0xa49   :  { %9167 = vst.msk [vmem:[#allocation7] sm:$0xff] %vm684_vm5, %v9148_v59  ;;  %9170 = vrot.lane.b32.xlu0 %v9148_v59, %s11761_s2  ;;  %9183 = vst.msk [vmem:[#allocation7 + $0x20] sm:$0xff] %vm684_vm5, %v9150_v44 }
 0xa4a   :  { %9175 = vst.msk [vmem:[#allocation7 + $0x10] sm:$0xff] %vm684_vm5, %v9149_v6  ;;  %9191 = vst.msk [vmem:[#allocation7 + $0x30] sm:$0xff] %vm684_vm5, %v9151_v42 }
 0xa4d   :  { %9178 = vrot.lane.b32.xlu0 %v9149_v6, %s11761_s2 }
 0xa51   :  { %9186 = vrot.lane.b32.xlu0 %v9150_v44, %s11761_s2 }
 0xa55   :  { %9194 = vrot.lane.b32.xlu0 %v9151_v42, %s11761_s2 }
 0xa64   :  { %v9055_v0 = vpop.f32.mrb[12].mxu1  ;;  %v9098_v60 = vpop.f32.mrb[24].mxu0 }
 0xa65   :  { %v9057_v63 = vpop.f32.mrb[13].mxu1  ;;  %v9100_v7 = vpop.f32.mrb[25].mxu0 }
 0xa66   :  { %v9059_v9 = vpop.f32.mrb[14].mxu1  ;;  %v9102_v2 = vpop.f32.mrb[26].mxu0 }
 0xa67   :  { %v9152_v17 = vpack.c.bf16 %v9059_v9, %v9055_v0  ;;  %v9061_v10 = vpop.f32.mrb[15].mxu1  ;;  %v9154_v12 = vpack.c.bf16 %v9102_v2, %v9098_v60  ;;  %v9104_v13 = vpop.f32.mrb[27].mxu0 }
 0xa68   :  { %v9153_v15 = vpack.c.bf16 %v9061_v10, %v9057_v63  ;;  %v9155_v19 = vpack.c.bf16 %v9104_v13, %v9100_v7 }
 0xa69   :  { %9201 = vst.msk [vmem:[#allocation7] sm:$0xff] %vm3687_vm3, %v9152_v17  ;;  %9217 = vst.msk [vmem:[#allocation7 + $0x20] sm:$0xff] %vm3687_vm3, %v9154_v12 }
 0xa6a   :  { %9199 = vst.msk [vmem:[#allocation7 + $0x40] sm:$0xff] %vm684_vm5, %v9152_v17  ;;  %9204 = vrot.lane.b32.xlu1 %v9153_v15, %s11761_s2 }
 0xa6b   :  { %9209 = vst.msk [vmem:[#allocation7 + $0x10] sm:$0xff] %vm3687_vm3, %v9153_v15  ;;  %9225 = vst.msk [vmem:[#allocation7 + $0x30] sm:$0xff] %vm3687_vm3, %v9155_v19 }
 0xa6e   :  { %9212 = vrot.lane.b32.xlu1 %v9154_v12, %s11761_s2 }
 0xa70   :  { %v9234_v22 = vld [vmem:[#allocation7] sm:$0xff] }
 0xa71   :  { %9260 = vmatpush1.bf16.msra.mxu0 %v9234_v22  ;;  %v9238_v32 = vld [vmem:[#allocation7 + $0x20] sm:$0xff] }
 0xa72   :  { %9220 = vrot.lane.b32.xlu1 %v9155_v19, %s11761_s2  ;;  %9261 = vmatprep.subr.bf16.mxu0 %v13092_v18  ;;  %v9236_v54 = vld [vmem:[#allocation7 + $0x10] sm:$0xff] }
 0xa73   :  { %v9240_v34 = vld [vmem:[#allocation7 + $0x30] sm:$0xff] }
 0xa84   :  { %v9141_v58 = vpop.f32.mrb[16].mxu1 }
 0xa85   :  { %v11126_v16 = vpop.f32.mrb[17].mxu1 }
 0xa86   :  { %v9144_v23 = vpop.f32.mrb[18].mxu1 }
 0xa87   :  { %v9156_v33 = vpack.c.bf16 %v9144_v23, %v9141_v58  ;;  %v11127_v26 = vpop.f32.mrb[19].mxu1 }
 0xa89   :  { %9233 = vst.msk [vmem:[#allocation7 + $0x40] sm:$0xff] %vm3687_vm3, %v9156_v33  ;;  %9228 = vrot.lane.b32.xlu1 %v9156_v33, %s11761_s2 }
 0xa90   :  { %v9242_v37 = vld [vmem:[#allocation7 + $0x40] sm:$0xff] }
 0xabb   :  { %v9171_v56 = vpop.permute.xlu0 %9170 }
 0xabc   :  { %9173 = vst.msk [vmem:[#allocation7 + $0x8] sm:$0xff] %vm684_vm5, %v9171_v56 }
 0xabf   :  { %v9179_v14 = vpop.permute.xlu0 %9178 }
 0xac0   :  { %9181 = vst.msk [vmem:[#allocation7 + $0x18] sm:$0xff] %vm684_vm5, %v9179_v14 }
 0xac3   :  { %v9187_v21 = vpop.permute.xlu0 %9186 }
 0xac4   :  { %9189 = vst.msk [vmem:[#allocation7 + $0x28] sm:$0xff] %vm684_vm5, %v9187_v21 }
 0xac7   :  { %v9195_v30 = vpop.permute.xlu0 %9194 }
 0xac8   :  { %9197 = vst.msk [vmem:[#allocation7 + $0x38] sm:$0xff] %vm684_vm5, %v9195_v30 }
 0xadc   :  { %v9205_v25 = vpop.permute.xlu1 %9204 }
 0xadd   :  { %9207 = vst.msk [vmem:[#allocation7 + $0x8] sm:$0xff] %vm3687_vm3, %v9205_v25 }
 0xae0   :  { %v9213_v27 = vpop.permute.xlu1 %9212 }
 0xae1   :  { %9215 = vst.msk [vmem:[#allocation7 + $0x18] sm:$0xff] %vm3687_vm3, %v9213_v27 }
 0xae4   :  { %v9235_v3 = vld [vmem:[#allocation7 + $0x8] sm:$0xff]  ;;  %v9221_v31 = vpop.permute.xlu1 %9220 }
 0xae5   :  { %9262 = vmatpush1.bf16.msra.mxu0 %v9235_v3  ;;  %9223 = vst.msk [vmem:[#allocation7 + $0x28] sm:$0xff] %vm3687_vm3, %v9221_v31 }
 0xae6   :  { %9263 = vmatprep.subr.bf16.mxu0 %v13092_v18 }
 0xae8   :  { %v9237_v20 = vld [vmem:[#allocation7 + $0x18] sm:$0xff] }
 0xae9   :  { %9264 = vmatpush1.bf16.msra.mxu0 %v9236_v54 }
 0xaea   :  { %9265 = vmatprep.subr.bf16.mxu0 %v13092_v18 }
 0xaec   :  { %v9239_v47 = vld [vmem:[#allocation7 + $0x28] sm:$0xff] }
 0xaed   :  { %9266 = vmatpush1.bf16.msra.mxu0 %v9237_v20 }
 0xaee   :  { %9267 = vmatprep.subr.bf16.mxu0 %v13092_v18 }
 0xaf1   :  { %9268 = vmatpush1.bf16.msra.mxu0 %v9238_v32 }
 0xaf2   :  { %9269 = vmatprep.subr.bf16.mxu0 %v13092_v18 }
 0xaf5   :  { %9270 = vmatpush1.bf16.msra.mxu0 %v9239_v47 }
 0xaf6   :  { %9271 = vmatprep.subr.bf16.mxu0 %v13092_v18 }
 0xaf9   :  { %9272 = vmatpush1.bf16.msra.mxu0 %v9240_v34 }
 0xafa   :  { %9273 = vmatprep.subr.bf16.mxu0 %v13092_v18 }
 0xafb   :  { %v9229_v24 = vpop.permute.xlu1 %9228 }
 0xafc   :  { %9231 = vst.msk [vmem:[#allocation7 + $0x38] sm:$0xff] %vm3687_vm3, %v9229_v24 }
 0xb03   :  { %v9241_v1 = vld [vmem:[#allocation7 + $0x38] sm:$0xff] }
 0xb04   :  { %9274 = vmatpush1.bf16.msra.mxu0 %v9241_v1 }
 0xb05   :  { %9275 = vmatprep.subr.bf16.mxu0 %v13092_v18 }
 0xb08   :  { %9276 = vmatpush1.bf16.msra.mxu0 %v9242_v37 }
 0xb0b   :  { %9292 = vmatmul.mubr.bf16.vlgmr.msra.gmra.mrb[28].mxu0 %v13730_v35 }
 0xbde   :  { %v9293_v55 = vpop.f32.mrb[28].mxu0 }
 0xbdf   :  { %v9294_v39 = vadd.f32 %v10354_v38, %v9293_v55  ;;  %v9295_v40 = vpop.f32.mrb[29].mxu0 }
 0xbe0   :  { %v9296_v41 = vpop.f32.mrb[30].mxu0 }
 0xbe1   :  { %9300 = vst [vmem:[%s13988_s8] sm:$0xff] %v9294_v39  ;;  %v9297_v43 = vadd.f32 %v10354_v38, %v9296_v41  ;;  %v9298_v45 = vpop.f32.mrb[31].mxu0 }
 0xbe3   :  { %9301 = vst [vmem:[%s13988_s8 + $0x8] sm:$0xff] %v9297_v43 }

</bundles_post_ra>
